<compile_context>
chip_gen: v6e
topology: v6e:2x2x1
jax: 0.10.0
libtpu: 0.0.40
codegen_flags: <defaults>
</compile_context>

<pallas_src>
import math

import jax
import jax.numpy as jnp
from jax.experimental import pallas as pl
from jax.experimental.pallas import tpu as pltpu


# ----------------------------------------------------------------------------
# Kernels
# ----------------------------------------------------------------------------
def _ffn_compute(x_ref, w1_ref, b1_ref, w2_ref, b2_ref):
    # fc1 on the MXU (bf16 operands, f32 accumulation), bias + ReLU in f32.
    h = jnp.dot(x_ref[...], w1_ref[...], preferred_element_type=jnp.float32)
    h = jnp.maximum(h + b1_ref[...], 0.0)
    # fc2 on the MXU.
    out = jnp.dot(h.astype(w2_ref.dtype), w2_ref[...],
                  preferred_element_type=jnp.float32)
    return out + b2_ref[...]


def _ffn_kernel(x_ref, w1_ref, b1_ref, w2_ref, b2_ref, id_ref, o_ref):
    out = _ffn_compute(x_ref, w1_ref, b1_ref, w2_ref, b2_ref)
    o_ref[...] = (out + id_ref[...].astype(jnp.float32)).astype(o_ref.dtype)


def _ffn_kernel_noid(x_ref, w1_ref, b1_ref, w2_ref, b2_ref, o_ref):
    out = _ffn_compute(x_ref, w1_ref, b1_ref, w2_ref, b2_ref)
    o_ref[...] = out.astype(o_ref.dtype)


# ----------------------------------------------------------------------------
# Helpers
# ----------------------------------------------------------------------------
def _round_up(n, m):
    return (n + m - 1) // m * m


def _pad2(a, rows, cols):
    pr, pc = rows - a.shape[0], cols - a.shape[1]
    if pr == 0 and pc == 0:
        return a
    return jnp.pad(a, ((0, pr), (0, pc)))


def _weight_spec(shape, single_buffered):
    # Grid-invariant operand: same block every step.  Buffered(1) => do not
    # double-buffer it (halves the resident weight footprint).
    if single_buffered:
        return pl.BlockSpec(shape, lambda i: (0, 0), pipeline_mode=pl.Buffered(1))
    return pl.BlockSpec(shape, lambda i: (0, 0))


# ----------------------------------------------------------------------------
# Wrapper
# ----------------------------------------------------------------------------
def ffn_forward(x, w1, b1, w2, b2, identity=None, *, add_identity=True,
                tm=256, matmul_dtype=jnp.bfloat16):
    """identity + Linear2(ReLU(Linear1(x))).  x: (..., D) float32."""
    assert tm % 8 == 0, "tm must be a multiple of 8 (ideally of 128)"
    D = x.shape[-1]
    F = w1.shape[-1]
    Do = w2.shape[-1]
    assert w1.shape[0] == D and w2.shape[0] == F and b1.shape[-1] == F \
        and b2.shape[-1] == Do
    lead = x.shape[:-1]
    M = math.prod(lead)
    out_dtype = x.dtype

    if add_identity:
        if identity is None:
            identity = x
        if identity.shape[-1] != Do or identity.shape[:-1] != lead:
            raise ValueError(
                f"identity shape {identity.shape} incompatible with output "
                f"shape {lead + (Do,)}")

    # Lane padding: feature dims to multiples of 128 (lane-dense MXU feeds,
    # unmasked full-lane stores).  Zero padding is exact for linear+ReLU.
    Dp, Fp, Dop = _round_up(D, 128), _round_up(F, 128), _round_up(Do, 128)

    # Row tiling: largest tile the problem supports, rows padded to the tile.
    tm_eff = min(tm, _round_up(M, 8))
    Mp = _round_up(M, tm_eff)
    grid = (Mp // tm_eff,)

    mb = jnp.dtype(matmul_dtype).itemsize
    x2 = _pad2(x.reshape(M, D).astype(matmul_dtype), Mp, Dp)
    w1p = _pad2(w1.astype(matmul_dtype), Dp, Fp)
    w2p = _pad2(w2.astype(matmul_dtype), Fp, Dop)
    b1p = _pad2(b1.reshape(1, F).astype(jnp.float32), 1, Fp)
    b2p = _pad2(b2.reshape(1, Do).astype(jnp.float32), 1, Dop)
    if add_identity:
        id2 = _pad2(identity.reshape(M, Do).astype(jnp.float32), Mp, Dop)

    # VMEM budget for the chosen tiling (weights single-buffered, activation
    # tiles double-buffered, plus live intermediates), with headroom.
    vmem_bytes = (
        (Dp * Fp + Fp * Dop) * mb + (Fp + Dop) * 4               # weights/bias
        + 2 * tm_eff * (Dp * mb + Dop * 4                        # x + out tiles
                        + (Dop * 4 if add_identity else 0))      # identity tile
        + tm_eff * Fp * (4 + mb) + tm_eff * Dop * 4              # h, h_bf16, acc
    )
    vmem_limit = int(min(max(vmem_bytes * 3 // 2, 16 * 1024 * 1024),
                         64 * 1024 * 1024))

    cost = pl.CostEstimate(
        flops=int(2 * Mp * (Dp * Fp + Fp * Dop)),
        transcendentals=0,
        bytes_accessed=int(
            x2.size * mb + (w1p.size + w2p.size) * mb
            + (b1p.size + b2p.size) * 4
            + (id2.size * 4 if add_identity else 0)
            + Mp * Dop * jnp.dtype(out_dtype).itemsize),
    )

    def _run(single_buffered_weights):
        in_specs = [
            pl.BlockSpec((tm_eff, Dp), lambda i: (i, 0)),        # x tile
            _weight_spec((Dp, Fp), single_buffered_weights),     # w1
            _weight_spec((1, Fp), single_buffered_weights),      # b1
            _weight_spec((Fp, Dop), single_buffered_weights),    # w2
            _weight_spec((1, Dop), single_buffered_weights),     # b2
        ]
        args = [x2, w1p, b1p, w2p, b2p]
        kernel = _ffn_kernel_noid
        if add_identity:
            in_specs.append(pl.BlockSpec((tm_eff, Dop), lambda i: (i, 0)))
            args.append(id2)
            kernel = _ffn_kernel
        return pl.pallas_call(
            kernel,
            out_shape=jax.ShapeDtypeStruct((Mp, Dop), out_dtype),
            grid_spec=pltpu.PrefetchScalarGridSpec(
                num_scalar_prefetch=0,
                grid=grid,
                in_specs=in_specs,
                out_specs=pl.BlockSpec((tm_eff, Dop), lambda i: (i, 0)),
            ),
            compiler_params=pltpu.CompilerParams(
                dimension_semantics=("parallel",),
                vmem_limit_bytes=vmem_limit,
            ),
            cost_estimate=cost,
        )(*args)

    try:
        out2 = jax.block_until_ready(_run(True))
    except Exception:
        # Fallback if this Pallas build rejects pipeline_mode=Buffered(1);
        # identical semantics, just 2x weight VMEM.
        out2 = _run(False)

    return out2[:M, :Do].reshape(lead + (Do,))


# ----------------------------------------------------------------------------
# Reference (matches the kernel's bf16-operand / f32-accumulate numerics)
# ----------------------------------------------------------------------------
def _ref_ffn(x, w1, b1, w2, b2, identity=None, matmul_dtype=jnp.bfloat16):
    if identity is None:
        identity = x
    md = matmul_dtype
    h = jnp.dot(x.astype(md), w1.astype(md), preferred_element_type=jnp.float32)
    h = jnp.maximum(h + b1, 0.0)
    out = jnp.dot(h.astype(md), w2.astype(md),
                  preferred_element_type=jnp.float32) + b2
    return identity.astype(jnp.float32) + out


if __name__ == "__main__":
    # Module-default feature dims (embed_dim=256, feedforward_dim=1024),
    # small token count: batch=2, seq=256 -> M=512 rows -> 2 grid steps at tm=256.
    B, S, D, F = 2, 256, 256, 1024
    key = jax.random.PRNGKey(0)
    kx, kw1, kb1, kw2, kb2 = jax.random.split(key, 5)

    x = jax.random.normal(kx, (B, S, D), dtype=jnp.float32)
    # Synthetic deterministic parameters (shapes match nn.Linear weights^T).
    w1 = jax.random.normal(kw1, (D, F), dtype=jnp.float32) * (1.0 / jnp.sqrt(D))
    b1 = jax.random.normal(kb1, (F,), dtype=jnp.float32) * 0.02
    w2 = jax.random.normal(kw2, (F, D), dtype=jnp.float32) * (1.0 / jnp.sqrt(F))
    b2 = jax.random.normal(kb2, (D,), dtype=jnp.float32) * 0.02

    out = ffn_forward(x, w1, b1, w2, b2)
    out = jax.block_until_ready(out)
    assert out.shape == (B, S, D)

    # Tight check against a reference using the same bf16-operand matmuls.
    ref_bf16 = _ref_ffn(x, w1, b1, w2, b2, matmul_dtype=jnp.bfloat16)
    assert jnp.allclose(out, ref_bf16, atol=2e-2, rtol=2e-2), (
        "mismatch vs bf16-matched reference: "
        f"{float(jnp.max(jnp.abs(out - ref_bf16)))}")

    # Loose sanity check against the pure-f32 reference.
    ref_f32 = _ref_ffn(x, w1, b1, w2, b2, matmul_dtype=jnp.float32)
    assert jnp.allclose(out, ref_f32, atol=1.5e-1, rtol=1.5e-1), (
        "mismatch vs f32 reference: "
        f"{float(jnp.max(jnp.abs(out - ref_f32)))}")

    print("KERNEL_OK")
</pallas_src>

<mosaic_0001>
module attributes {stable_mosaic.version = 11 : i64} {
  func.func @_ffn_kernel(%arg0: i32, %arg1: memref<256x256xbf16, #tpu.memory_space<vmem>>, %arg2: memref<256x1024xbf16, #tpu.memory_space<vmem>>, %arg3: memref<1x1024xf32, #tpu.memory_space<vmem>>, %arg4: memref<1024x256xbf16, #tpu.memory_space<vmem>>, %arg5: memref<1x256xf32, #tpu.memory_space<vmem>>, %arg6: memref<256x256xf32, #tpu.memory_space<vmem>>, %arg7: memref<256x256xf32, #tpu.memory_space<vmem>>) attributes {dimension_semantics = [#tpu.dimension_semantics<parallel>], iteration_bounds = array<i64: 2>, scalar_prefetch = 0 : i64, scratch_operands = 0 : i64, tpu.core_type = #tpu.core_type<tc>, window_params = [{transform_indices = @transform_0, window_bounds = array<i64: 256, 256>}, {pipeline_mode = #tpu.pipeline_mode<synchronous>, transform_indices = @transform_1, window_bounds = array<i64: 256, 1024>}, {pipeline_mode = #tpu.pipeline_mode<synchronous>, transform_indices = @transform_2, window_bounds = array<i64: 1, 1024>}, {pipeline_mode = #tpu.pipeline_mode<synchronous>, transform_indices = @transform_3, window_bounds = array<i64: 1024, 256>}, {pipeline_mode = #tpu.pipeline_mode<synchronous>, transform_indices = @transform_4, window_bounds = array<i64: 1, 256>}, {transform_indices = @transform_5, window_bounds = array<i64: 256, 256>}, {transform_indices = @transform_6, window_bounds = array<i64: 256, 256>}]} {
    %c0 = arith.constant 0 : index
    %c0_0 = arith.constant 0 : index
    %0 = vector.load %arg1[%c0, %c0_0] : memref<256x256xbf16, #tpu.memory_space<vmem>>, vector<256x256xbf16>
    %c0_1 = arith.constant 0 : index
    %c0_2 = arith.constant 0 : index
    %1 = vector.load %arg2[%c0_1, %c0_2] : memref<256x1024xbf16, #tpu.memory_space<vmem>>, vector<256x1024xbf16>
    %cst = arith.constant dense<0.000000e+00> : vector<256x1024xf32>
    %2 = tpu.matmul %0, %1, %cst {dimension_numbers = #tpu.dot_dimension_numbers<[1], [0], [0], [1], [0, 0, 1, 1], [], []>} : vector<256x256xbf16>, vector<256x1024xbf16>, vector<256x1024xf32> -> vector<256x1024xf32>
    %c0_3 = arith.constant 0 : index
    %c0_4 = arith.constant 0 : index
    %3 = vector.load %arg3[%c0_3, %c0_4] : memref<1x1024xf32, #tpu.memory_space<vmem>>, vector<1x1024xf32>
    %4 = vector.broadcast %3 : vector<1x1024xf32> to vector<256x1024xf32>
    %5 = arith.addf %2, %4 : vector<256x1024xf32>
    %cst_5 = arith.constant 0.000000e+00 : f32
    %6 = vector.broadcast %cst_5 : f32 to vector<256x1024xf32>
    %7 = arith.maximumf %5, %6 : vector<256x1024xf32>
    %8 = arith.truncf %7 : vector<256x1024xf32> to vector<256x1024xbf16>
    %c0_6 = arith.constant 0 : index
    %c0_7 = arith.constant 0 : index
    %9 = vector.load %arg4[%c0_6, %c0_7] : memref<1024x256xbf16, #tpu.memory_space<vmem>>, vector<1024x256xbf16>
    %cst_8 = arith.constant dense<0.000000e+00> : vector<256x256xf32>
    %10 = tpu.matmul %8, %9, %cst_8 {dimension_numbers = #tpu.dot_dimension_numbers<[1], [0], [0], [1], [0, 0, 1, 1], [], []>} : vector<256x1024xbf16>, vector<1024x256xbf16>, vector<256x256xf32> -> vector<256x256xf32>
    %c0_9 = arith.constant 0 : index
    %c0_10 = arith.constant 0 : index
    %11 = vector.load %arg5[%c0_9, %c0_10] : memref<1x256xf32, #tpu.memory_space<vmem>>, vector<1x256xf32>
    %12 = vector.broadcast %11 : vector<1x256xf32> to vector<256x256xf32>
    %13 = arith.addf %10, %12 : vector<256x256xf32>
    %c0_11 = arith.constant 0 : index
    %c0_12 = arith.constant 0 : index
    %14 = vector.load %arg6[%c0_11, %c0_12] : memref<256x256xf32, #tpu.memory_space<vmem>>, vector<256x256xf32>
    %15 = arith.addf %13, %14 : vector<256x256xf32>
    %c0_13 = arith.constant 0 : index
    %c0_14 = arith.constant 0 : index
    %16 = vector.load %arg7[%c0_13, %c0_14] : memref<256x256xf32, #tpu.memory_space<vmem>>, vector<256x256xf32>
    tpu.vector_store %arg7[%c0_13, %c0_14], %15 {strides = array<i32>} : memref<256x256xf32, #tpu.memory_space<vmem>>, vector<256x256xf32>,
    return
  }
  func.func @transform_0(%arg0: i32) -> (i32, i32) {
    %c0_i32 = arith.constant 0 : i32
    %c0_i32_0 = arith.constant 0 : i32
    return %arg0, %c0_i32 : i32, i32
  }
  func.func @transform_1(%arg0: i32) -> (i32, i32) {
    %c0_i32 = arith.constant 0 : i32
    %c0_i32_0 = arith.constant 0 : i32
    %c0_i32_1 = arith.constant 0 : i32
    return %c0_i32, %c0_i32_0 : i32, i32
  }
  func.func @transform_2(%arg0: i32) -> (i32, i32) {
    %c0_i32 = arith.constant 0 : i32
    %c0_i32_0 = arith.constant 0 : i32
    %c0_i32_1 = arith.constant 0 : i32
    return %c0_i32, %c0_i32_0 : i32, i32
  }
  func.func @transform_3(%arg0: i32) -> (i32, i32) {
    %c0_i32 = arith.constant 0 : i32
    %c0_i32_0 = arith.constant 0 : i32
    %c0_i32_1 = arith.constant 0 : i32
    return %c0_i32, %c0_i32_0 : i32, i32
  }
  func.func @transform_4(%arg0: i32) -> (i32, i32) {
    %c0_i32 = arith.constant 0 : i32
    %c0_i32_0 = arith.constant 0 : i32
    %c0_i32_1 = arith.constant 0 : i32
    return %c0_i32, %c0_i32_0 : i32, i32
  }
  func.func @transform_5(%arg0: i32) -> (i32, i32) {
    %c0_i32 = arith.constant 0 : i32
    %c0_i32_0 = arith.constant 0 : i32
    return %arg0, %c0_i32 : i32, i32
  }
  func.func @transform_6(%arg0: i32) -> (i32, i32) {
    %c0_i32 = arith.constant 0 : i32
    %c0_i32_0 = arith.constant 0 : i32
    return %arg0, %c0_i32 : i32, i32
  }
}

module attributes {stable_mosaic.version = 11 : i64} {
  func.func @_ffn_kernel(%arg0: i32, %arg1: memref<256x256xbf16, #tpu.memory_space<vmem>>, %arg2: memref<256x1024xbf16, #tpu.memory_space<vmem>>, %arg3: memref<1x1024xf32, #tpu.memory_space<vmem>>, %arg4: memref<1024x256xbf16, #tpu.memory_space<vmem>>, %arg5: memref<1x256xf32, #tpu.memory_space<vmem>>, %arg6: memref<256x256xf32, #tpu.memory_space<vmem>>, %arg7: memref<256x256xf32, #tpu.memory_space<vmem>>) attributes {dimension_semantics = [#tpu.dimension_semantics<parallel>], iteration_bounds = array<i64: 2>, scalar_prefetch = 0 : i64, scratch_operands = 0 : i64, tpu.core_type = #tpu.core_type<tc>, window_params = [{transform_indices = @transform_0, window_bounds = array<i64: 256, 256>}, {pipeline_mode = #tpu.pipeline_mode<synchronous>, transform_indices = @transform_1, window_bounds = array<i64: 256, 1024>}, {pipeline_mode = #tpu.pipeline_mode<synchronous>, transform_indices = @transform_2, window_bounds = array<i64: 1, 1024>}, {pipeline_mode = #tpu.pipeline_mode<synchronous>, transform_indices = @transform_3, window_bounds = array<i64: 1024, 256>}, {pipeline_mode = #tpu.pipeline_mode<synchronous>, transform_indices = @transform_4, window_bounds = array<i64: 1, 256>}, {transform_indices = @transform_5, window_bounds = array<i64: 256, 256>}, {transform_indices = @transform_6, window_bounds = array<i64: 256, 256>}]} {
    %c0 = arith.constant 0 : index
    %c0_0 = arith.constant 0 : index
    %0 = vector.load %arg1[%c0, %c0_0] : memref<256x256xbf16, #tpu.memory_space<vmem>>, vector<256x256xbf16>
    %c0_1 = arith.constant 0 : index
    %c0_2 = arith.constant 0 : index
    %1 = vector.load %arg2[%c0_1, %c0_2] : memref<256x1024xbf16, #tpu.memory_space<vmem>>, vector<256x1024xbf16>
    %cst = arith.constant dense<0.000000e+00> : vector<256x1024xf32>
    %2 = tpu.matmul %0, %1, %cst {dimension_numbers = #tpu.dot_dimension_numbers<[1], [0], [0], [1], [0, 0, 1, 1], [], []>} : vector<256x256xbf16>, vector<256x1024xbf16>, vector<256x1024xf32> -> vector<256x1024xf32>
    %c0_3 = arith.constant 0 : index
    %c0_4 = arith.constant 0 : index
    %3 = vector.load %arg3[%c0_3, %c0_4] : memref<1x1024xf32, #tpu.memory_space<vmem>>, vector<1x1024xf32>
    %4 = vector.broadcast %3 : vector<1x1024xf32> to vector<256x1024xf32>
    %5 = arith.addf %2, %4 : vector<256x1024xf32>
    %cst_5 = arith.constant 0.000000e+00 : f32
    %6 = vector.broadcast %cst_5 : f32 to vector<256x1024xf32>
    %7 = arith.maximumf %5, %6 : vector<256x1024xf32>
    %8 = arith.truncf %7 : vector<256x1024xf32> to vector<256x1024xbf16>
    %c0_6 = arith.constant 0 : index
    %c0_7 = arith.constant 0 : index
    %9 = vector.load %arg4[%c0_6, %c0_7] : memref<1024x256xbf16, #tpu.memory_space<vmem>>, vector<1024x256xbf16>
    %cst_8 = arith.constant dense<0.000000e+00> : vector<256x256xf32>
    %10 = tpu.matmul %8, %9, %cst_8 {dimension_numbers = #tpu.dot_dimension_numbers<[1], [0], [0], [1], [0, 0, 1, 1], [], []>} : vector<256x1024xbf16>, vector<1024x256xbf16>, vector<256x256xf32> -> vector<256x256xf32>
    %c0_9 = arith.constant 0 : index
    %c0_10 = arith.constant 0 : index
    %11 = vector.load %arg5[%c0_9, %c0_10] : memref<1x256xf32, #tpu.memory_space<vmem>>, vector<1x256xf32>
    %12 = vector.broadcast %11 : vector<1x256xf32> to vector<256x256xf32>
    %13 = arith.addf %10, %12 : vector<256x256xf32>
    %c0_11 = arith.constant 0 : index
    %c0_12 = arith.constant 0 : index
    %14 = vector.load %arg6[%c0_11, %c0_12] : memref<256x256xf32, #tpu.memory_space<vmem>>, vector<256x256xf32>
    %15 = arith.addf %13, %14 : vector<256x256xf32>
    %c0_13 = arith.constant 0 : index
    %c0_14 = arith.constant 0 : index
    %16 = vector.load %arg7[%c0_13, %c0_14] : memref<256x256xf32, #tpu.memory_space<vmem>>, vector<256x256xf32>
    tpu.vector_store %arg7[%c0_13, %c0_14], %15 {strides = array<i32>} : memref<256x256xf32, #tpu.memory_space<vmem>>, vector<256x256xf32>,
    return
  }
  func.func @transform_0(%arg0: i32) -> (i32, i32) {
    %c0_i32 = arith.constant 0 : i32
    %c0_i32_0 = arith.constant 0 : i32
    return %arg0, %c0_i32 : i32, i32
  }
  func.func @transform_1(%arg0: i32) -> (i32, i32) {
    %c0_i32 = arith.constant 0 : i32
    %c0_i32_0 = arith.constant 0 : i32
    %c0_i32_1 = arith.constant 0 : i32
    return %c0_i32, %c0_i32_0 : i32, i32
  }
  func.func @transform_2(%arg0: i32) -> (i32, i32) {
    %c0_i32 = arith.constant 0 : i32
    %c0_i32_0 = arith.constant 0 : i32
    %c0_i32_1 = arith.constant 0 : i32
    return %c0_i32, %c0_i32_0 : i32, i32
  }
  func.func @transform_3(%arg0: i32) -> (i32, i32) {
    %c0_i32 = arith.constant 0 : i32
    %c0_i32_0 = arith.constant 0 : i32
    %c0_i32_1 = arith.constant 0 : i32
    return %c0_i32, %c0_i32_0 : i32, i32
  }
  func.func @transform_4(%arg0: i32) -> (i32, i32) {
    %c0_i32 = arith.constant 0 : i32
    %c0_i32_0 = arith.constant 0 : i32
    %c0_i32_1 = arith.constant 0 : i32
    return %c0_i32, %c0_i32_0 : i32, i32
  }
  func.func @transform_5(%arg0: i32) -> (i32, i32) {
    %c0_i32 = arith.constant 0 : i32
    %c0_i32_0 = arith.constant 0 : i32
    return %arg0, %c0_i32 : i32, i32
  }
  func.func @transform_6(%arg0: i32) -> (i32, i32) {
    %c0_i32 = arith.constant 0 : i32
    %c0_i32_0 = arith.constant 0 : i32
    return %arg0, %c0_i32 : i32, i32
  }
}

</mosaic_0001>

<bundles_post_ra>
// kernel: tpu_custom_call.1
= control target key start
LH: loop header
LB: loop body
LE: loop exit
PB: predicated region body
PF: predicated region fallthrough
CT: control target
= control target key end

     0   :  { %11 = vsyncpa [#allocation3], 0  ;;  %s7241_s0 = inlined_call_operand.hbm [shape: bf16[512,256], index: 0, kind: input, shape index: {}]   ;;  %s7242_s1 = inlined_call_operand.hbm [shape: bf16[256,1024], index: 1, kind: input, shape index: {}]   ;;  %s7243_s2 = inlined_call_operand.hbm [shape: f32[1,1024], index: 2, kind: input, shape index: {}]   ;;  %s7244_s3 = inlined_call_operand.hbm [shape: bf16[1024,256], index: 3, kind: input, shape index: {}]   ;;  %s7245_s4 = inlined_call_operand.vmem [shape: f32[1,256], index: 4, kind: input, shape index: {}]   ;;  %s7246_s5 = inlined_call_operand.hbm [shape: f32[512,256], index: 5, kind: input, shape index: {}]   ;;  %s7247_s6 = inlined_call_operand.hbm [shape: f32[512,256], index: 6, kind: output, shape index: {}]  }
   0x1   :  { %13 = vsyncpa [#allocation3 + $0x1], 0 }
   0x2   :  { %14 = vsyncpa [#allocation6], 0 }
   0x3   :  { %15 = vsyncpa [#allocation9], 0 }
   0x4   :  { %16 = vsyncpa [#allocation4], 0 }
   0x5   :  { %18 = vsyncpa [#allocation4 + $0x1], 0  ;;  %s5307_s21 = smov 0   ;;  %s5309_s22 = smov 0  }
   0x6   :  { %s5311_s23 = smov 0   ;;  %s5313_s24 = smov 0  }
   0x7 LB: > { %s5328_s25 = sadd.s32 4294967295, %s5256_s24   ;;  %s4393_s26 = sadd.s32 4294967294, %s5256_s24   ;;  %s5256_s24 = sphi %s5313_s24, %s7415_s24   ;;  %s5252_s23 = sphi %s5311_s23, %s7418_s23   ;;  %s5248_s22 = sphi %s5309_s22, %s7417_s22   ;;  %s5244_s21 = sphi %s5307_s21, %s7416_s21  }
   0x8   : > { %p44_p0 = scmp.ne.s32.totalorder %s5248_s22, %s5244_s21  ;;  %p7250_p1 = scmp.eq.s32.totalorder %s5328_s25, 0 }
   0x9   : > { %p178_p2 = scmp.eq.s32.totalorder %s5328_s25, 1  ;;  %p184_p3 = scmp.eq.s32.totalorder %s4393_s26, 1 }
   0xa   : > { %p5337_p4 = por %p7250_p1, %p44_p0  ;;  %p4394_p5 = scmp.ge.s32.totalorder %s5256_s24, 1 }
   0xb   : > { %p5342_p6 = por %p184_p3, %p44_p0  ;;  %p191_p7 = scmp.lt.s32.totalorder %s5256_s24, 3 }
   0xc   : > { %s7262_s27 = scalar_select %p5337_p4, 1, 0 }
   0xd   : > { %s7263_s28 = scalar_select %p5342_p6, 1, 0 }
   0xe   : > { %p5347_p8 = pnand %p4394_p5, %p191_p7  ;;  %s5258_s30 = smov [#allocation5]  }
   0xf   : > { %s203_s7 = sshll.u32 %s5258_s30, 4  ;;  %s5361_s9 = sadd.s32 1, %s5256_s24   ;;  %s204_s7 = int_to_ptr.vmem [resolvable:$true] %s203_s7 }
  0x10   : > { %s7264_s29 = scalar_select %p5347_p8, 1, 0 }
  0x11   : > { %p4732_p9 = pneg %p5347_p8  ;;  %7266 = sst [smem:[#allocation17_spill]] %s5361_s9 }
  0x12   : > { %s31_s10 = sadd.s32 1, %s5252_s23  ;;  %s28_s11 = ssub.s32 %s5256_s24, %s5361_s9 }
  0x13   : > { %p5356_p11 = pnand %p4732_p9, %p7250_p1  ;;  %s5057_s12 = scalar_lea.vmem %s204_s7, 16384 }
  0x14   : > { %p5058_p13 = scmp.ne.s32.totalorder %s204_s7, %s5057_s12  ;;  %p5065_p5 = scmp.lt.s32.totalorder %s204_s7, %s204_s7 }
  0x15   : > { %p7251_p12 = pneg %p5356_p11  ;;  %p5066_p7 = scmp.lt.s32.totalorder %s5057_s12, %s5057_s12 }
  0x17   : > { %p5060_p0 = pnand %p5058_p13, %p7251_p12  ;;  %p5067_p9 = por %p5066_p7, %p5065_p5 }
  0x19   : > { %p5061_p3 = pneg %p5060_p0 }
  0x1b   : > { %p5068_p10 = pnand %p5067_p9, %p5061_p3 }
  0x1d   : > { %5071 = shalt.err (!%p5068_p10)
}
  0x1e   : > { %s5259_s13 = smov 512   ;;  %s5260_s14 = smov 32  }
  0x1f   : > { %4735 = dma.hbm_to_vmem [thread:$0]  (!%p5356_p11), %s7242_s1, 16384, %s204_s7, [#allocation6], %s5259_s13, %s5259_s13, %s5260_s14  }
  0x20   : > { %p29_p13 = scmp.eq.s32.totalorder %s28_s11, 0  ;;  %p38_p0 = scmp.ne.s32.totalorder %s5252_s23, %s5248_s22 }
  0x21   : > { %p39_p10 = scmp.eq.s32.totalorder %s5256_s24, 0  ;;  %p4756_p7 = scmp.lt.s32.totalorder %s5256_s24, 2 }
  0x22   : > { %s5380_s17 = scalar_select %p29_p13, %s5252_s23, %s31_s10  }
  0x23   : > { %p40_p3 = por %p39_p10, %p38_p0  ;;  %p5384_p5 = por %p178_p2, %p38_p0 }
  0x24   : > { %s244_s19 = sand.u32 1, %s5256_s24   ;;  %s246_s20 = sand.u32 1, %s5252_s23  }
  0x25   : > { %s7267_s18 = scalar_select %p5384_p5, 1, 0 }
  0x26   : > { %s4399_s26 = sshll.u32 %s246_s20, 8  ;;  %s4709_s30 = sshll.u32 %s5256_s24, 12 }
  0x27   : > { %s5395_s7 = scalar_lea.hbm %s7241_s0, %s4709_s30  ;;  %s248_s10 = scalar_lea.vmem [#allocation2], %s4399_s26 }
  0x28   : > { %s256_s11 = sshll.u32 %s248_s10, 4  ;;  %p5399_p2 = pnand %p4756_p7, %p40_p3  ;;  %s5397_s11 = int_to_ptr.vmem [resolvable:$true] %s256_s11 }
  0x29   : > { %s5403_s14 = sshll.u32 %s246_s20, 9  ;;  %s5405_s15 = scalar_lea.sflag [#allocation3], %s244_s19 }
  0x2a   : > { %s5072_s9 = scalar_lea.hbm %s5395_s7, 4096  ;;  %p5074_p13 = pneg %p5399_p2 }
  0x2b   : > { %p5073_p9 = scmp.ne.s32.totalorder %s5395_s7, %s5072_s9  ;;  %s5077_s30 = scalar_lea.hbm %s7241_s0, 8192 }
  0x2c   : > { %p5078_p3 = scmp.lt.s32.totalorder %s5395_s7, %s7241_s0  ;;  %p5079_p7 = scmp.lt.s32.totalorder %s5077_s30, %s5072_s9 }
  0x2d   : > { %p5075_p0 = pnand %p5074_p13, %p5073_p9 }
  0x2e   : > { %p5080_p1 = por %p5079_p7, %p5078_p3 }
  0x2f   : > { %p5076_p10 = pneg %p5075_p0 }
  0x31   : > { %p5081_p12 = pnand %p5080_p1, %p5076_p10 }
  0x33   : > { %5084 = shalt.err (!%p5081_p12)
}
  0x34   : > { %s5085_s19 = scalar_lea.vmem %s5397_s11, 4096  ;;  %s5261_s20 = smov [#allocation2]  }
  0x35   : > { %p5086_p6 = scmp.ne.s32.totalorder %s5397_s11, %s5085_s19  ;;  %s5090_s16 = sshll.u32 %s5261_s20, 4  ;;  %s5091_s16 = int_to_ptr.vmem [resolvable:$false] %s5090_s16 }
  0x36   : > { %s5092_s26 = scalar_lea.vmem %s5091_s16, 8192  ;;  %p5093_p5 = scmp.lt.s32.totalorder %s5397_s11, %s5091_s16 }
  0x37   : > { %p5088_p9 = pnand %p5086_p6, %p5074_p13  ;;  %p5094_p4 = scmp.lt.s32.totalorder %s5092_s26, %s5085_s19 }
  0x39   : > { %p5089_p0 = pneg %p5088_p9  ;;  %p5095_p8 = por %p5094_p4, %p5093_p5 }
  0x3b   : > { %p5096_p3 = pnand %p5095_p8, %p5089_p0 }
  0x3d   : > { %5099 = shalt.err (!%p5096_p3)
}
  0x3e   : > { %s7255_s9 = smov 128   ;;  %s7256_s30 = smov 8  }
  0x3f   : > { %4745 = dma.hbm_to_vmem [thread:$0]  (!%p5399_p2), %s5395_s7, 4096, %s5397_s11, %s5405_s15, %s7255_s9, %s7255_s9, %s7256_s30  }
  0x40   : > { %s270_s12 = scalar_lea.vmem [#allocation10], %s5403_s14  ;;  %s5264_s19 = smov [#allocation7]  }
  0x41   : > { %s5436_s10 = sshll.u32 %s270_s12, 4  ;;  %s217_s20 = sshll.u32 %s5264_s19, 4  ;;  %s218_s20 = int_to_ptr.vmem [resolvable:$true] %s217_s20  ;;  %s5464_s10 = int_to_ptr.vmem [resolvable:$true] %s5436_s10 }
  0x42   : > { %s5111_s16 = scalar_lea.vmem %s218_s20, 128  ;;  %p7269_p4 = pneg %p5356_p11 }
  0x43   : > { %p5112_p1 = scmp.ne.s32.totalorder %s218_s20, %s5111_s16  ;;  %p5119_p12 = scmp.lt.s32.totalorder %s218_s20, %s218_s20 }
  0x44   : > { %p5120_p5 = scmp.lt.s32.totalorder %s5111_s16, %s5111_s16 }
  0x45   : > { %p5114_p6 = pnand %p5112_p1, %p7269_p4 }
  0x46   : > { %p5121_p10 = por %p5120_p5, %p5119_p12 }
  0x47   : > { %p5115_p8 = pneg %p5114_p6 }
  0x49   : > { %p5122_p7 = pnand %p5121_p10, %p5115_p8 }
  0x4b   : > { %5125 = shalt.err (!%p5122_p7)
}
  0x4c   : > { %4738 = dma.hbm_to_vmem [thread:$0]  (!%p5356_p11), %s7243_s2, 128, %s218_s20, [#allocation6]  }
  0x4d   : > { %s5265_s14 = smov [#allocation8]   ;;  %s4711_s12 = sshll.u32 %s5256_s24, 13 }
  0x4e   : > { %s227_s26 = sshll.u32 %s5265_s14, 4  ;;  %s5450_s30 = scalar_lea.hbm %s7246_s5, %s4711_s12  ;;  %s228_s26 = int_to_ptr.vmem [resolvable:$true] %s227_s26 }
  0x4f   : > { %s5137_s16 = scalar_lea.vmem %s228_s26, 16384  ;;  %p7270_p0 = pmov %p7269_p4 }
  0x50   : > { %p5138_p9 = scmp.ne.s32.totalorder %s228_s26, %s5137_s16  ;;  %p5145_p4 = scmp.lt.s32.totalorder %s228_s26, %s228_s26 }
  0x51   : > { %p5146_p6 = scmp.lt.s32.totalorder %s5137_s16, %s5137_s16 }
  0x52   : > { %p5140_p3 = pnand %p5138_p9, %p7270_p0 }
  0x53   : > { %p5147_p8 = por %p5146_p6, %p5145_p4 }
  0x54   : > { %p5141_p1 = pneg %p5140_p3 }
  0x56   : > { %p5148_p12 = pnand %p5147_p8, %p5141_p1 }
  0x58   : > { %5151 = shalt.err (!%p5148_p12)
}
  0x59   : > { %s7271_s20 = smov 8   ;;  %s7272_s7 = smov 128  }
  0x5a   : > { %4741 = dma.hbm_to_vmem [thread:$0]  (!%p5356_p11), %s7244_s3, 16384, %s228_s26, [#allocation9], %s7272_s7, %s7272_s7, %s7271_s20  }
  0x5b   : > { %s5152_s14 = scalar_lea.hbm %s5450_s30, 8192  ;;  %s5157_s19 = scalar_lea.hbm %s7246_s5, 16384 }
  0x5c   : > { %p5153_p5 = scmp.ne.s32.totalorder %s5450_s30, %s5152_s14  ;;  %p5158_p9 = scmp.lt.s32.totalorder %s5450_s30, %s7246_s5 }
  0x5d   : > { %p5159_p0 = scmp.lt.s32.totalorder %s5157_s19, %s5152_s14 }
  0x5e   : > { %p5155_p10 = pnand %p5153_p5, %p5074_p13 }
  0x5f   : > { %p5160_p3 = por %p5159_p0, %p5158_p9 }
  0x60   : > { %p5156_p7 = pneg %p5155_p10 }
  0x62   : > { %p5161_p1 = pnand %p5160_p3, %p5156_p7 }
  0x64   : > { %5164 = shalt.err (!%p5161_p1)
}
  0x65   : > { %s5165_s26 = scalar_lea.vmem %s5464_s10, 8192  ;;  %s5266_s20 = smov [#allocation10]  }
  0x66   : > { %p5166_p11 = scmp.ne.s32.totalorder %s5464_s10, %s5165_s26  ;;  %s5170_s7 = sshll.u32 %s5266_s20, 4  ;;  %s5171_s7 = int_to_ptr.vmem [resolvable:$false] %s5170_s7 }
  0x67   : > { %s5172_s9 = scalar_lea.vmem %s5171_s7, 16384  ;;  %p5173_p8 = scmp.lt.s32.totalorder %s5464_s10, %s5171_s7 }
  0x68   : > { %p5168_p4 = pnand %p5166_p11, %p5074_p13  ;;  %p5174_p12 = scmp.lt.s32.totalorder %s5172_s9, %s5165_s26 }
  0x6a   : > { %p5169_p6 = pneg %p5168_p4  ;;  %p5175_p5 = por %p5174_p12, %p5173_p8 }
  0x6c   : > { %p5176_p10 = pnand %p5175_p5, %p5169_p6 }
  0x6e   : > { %5179 = shalt.err (!%p5176_p10)
}
  0x6f   : > { %s5267_s14 = smov 256   ;;  %s5268_s8 = smov 16  }
  0x70   : > { %4748 = dma.hbm_to_vmem [thread:$0]  (!%p5399_p2), %s5450_s30, 8192, %s5464_s10, %s5405_s15, %s5267_s14, %s5267_s14, %s5268_s8  }
  0x71   : > { %p7273_p13 = scmp.ne.s32.totalorder %s7264_s29, 0 }
  0x73   : > { %290 = sbr.rel (%p7273_p13) target bundleno = 925 (0x39d), region = 44 }
  0x78   : > { %s292_s12 = sand.u32 1, %s5328_s25   ;;  %s5493_s19 = sand.u32 1, %s5248_s22  }
  0x79   : > { %s4408_s16 = sshll.u32 %s5493_s19, 8  ;;  %s293_s11 = scalar_lea.sflag [#allocation3], %s292_s12 }
  0x7a   : > { %s5496_s26 = scalar_lea.vmem [#allocation2], %s4408_s16  ;;  %p7274_p7 = scmp.ne.s32.totalorder %s7262_s27, 0 }
  0x7c   : > { %5223 = dma.done.wait (%p7274_p7), %s293_s11, 4096  }
  0x7d   : > { %5225 = vsyncadd (%p7274_p7), %s293_s11, 4294963200  ;;  %p7275_p2 = scmp.eq.s32.totalorder %s5328_s25, 0 }
  0x7f   : > { %5227 = dma.done.wait (%p7275_p2), [#allocation6], 16512   ;;  %p7276_p9 = pmov %p7275_p2 }
  0x80   : > { %p7277_p0 = pmov %p7275_p2 }
  0x81   : > { %5229 = vsyncadd (%p7276_p9), [#allocation6], 4294950784 }
  0x82   : > { %5231 = dma.done.wait (%p7277_p0), [#allocation9], 16384   ;;  %p7278_p3 = pmov %p7277_p0 }
  0x83   : > { %s4412_s29 = sshll.u32 %s5493_s19, 9 }
  0x84   : > { %5233 = vsyncadd (%p7278_p3), [#allocation9], 4294950912  ;;  %s5513_s13 = scalar_lea.vmem [#allocation10], %s4412_s29 }
  0x85   : > { %5235 = dma.done.wait (%p7274_p7), %s293_s11, 8192  }
  0x86   : > { %5237 = vsyncadd (%p7274_p7), %s293_s11, 4294959104  ;;  %v442_v0 = vld [vmem:[#allocation5 + $0x1c0] sm:$0xff]  ;;  %v443_v2 = vld [vmem:[#allocation5 + $0x1c8] sm:$0xff]  ;;  %s7003_s30 = scalar_lea.vmem [#allocation11], %s4412_s29  ;;  %s4713_s10 = sshll.u32 %s5328_s25, 13 }
  0x87   : > { %v446_v1 = vld [vmem:[#allocation5 + $0x1e0] sm:$0xff]  ;;  %v447_v4 = vld [vmem:[#allocation5 + $0x1e8] sm:$0xff]  ;;  %s4271_s20 = sshll.u32 %s7003_s30, 4  ;;  %s7194_s14 = scalar_lea.hbm %s7247_s6, %s4713_s10  ;;  %s7196_s20 = int_to_ptr.vmem [resolvable:$true] %s4271_s20 }
  0x88   : > { %v4503_v3 = vcombine.high %v442_v0, %v446_v1  ;;  %v4502_v5 = vcombine.low %v442_v0, %v446_v1  ;;  %v434_v6 = vld [vmem:[#allocation5 + $0x180] sm:$0xff]  ;;  %v4505_v8 = vcombine.high %v443_v2, %v447_v4  ;;  %v4504_v9 = vcombine.low %v443_v2, %v447_v4  ;;  %v435_v11 = vld [vmem:[#allocation5 + $0x188] sm:$0xff]  ;;  %s4257_s25 = scalar_lea.sflag [#allocation4], %s5493_s19  ;;  %s5180_s8 = scalar_lea.vmem %s7196_s20, 8192 }
  0x89   : > { %v438_v7 = vld [vmem:[#allocation5 + $0x1a0] sm:$0xff]  ;;  %v439_v12 = vld [vmem:[#allocation5 + $0x1a8] sm:$0xff]  ;;  %p5181_p1 = scmp.ne.s32.totalorder %s7196_s20, %s5180_s8  ;;  %p7412_p11 = scmp.ne.s32.totalorder %s7267_s18, 0 }
  0x8a   : > { %v4495_v10 = vcombine.high %v434_v6, %v438_v7  ;;  %v426_v13 = vld [vmem:[#allocation5 + $0x140] sm:$0xff]  ;;  %1356 = vmatprep.subr.bf16.mxu0 %v4503_v3  ;;  %v4497_v14 = vcombine.high %v435_v11, %v439_v12  ;;  %v427_v16 = vld [vmem:[#allocation5 + $0x148] sm:$0xff]  ;;  %1549 = vmatprep.subr.bf16.mxu1 %v4505_v8  ;;  %v4494_v18 = vcombine.low %v434_v6, %v438_v7  ;;  %s5269_s12 = smov [#allocation11]  }
  0x8b   : > { %v430_v15 = vld [vmem:[#allocation5 + $0x160] sm:$0xff]  ;;  %v431_v17 = vld [vmem:[#allocation5 + $0x168] sm:$0xff]  ;;  %1357 = vmatpush1.bf16.msra.mxu0 %v4502_v5  ;;  %1550 = vmatpush1.bf16.msra.mxu1 %v4504_v9  ;;  %v4496_v19 = vcombine.low %v435_v11, %v439_v12  ;;  %p5182_p4 = pnand %p5181_p1, %p7412_p11  ;;  %s5184_s16 = sshll.u32 %s5269_s12, 4  ;;  %s5185_s16 = int_to_ptr.vmem [resolvable:$false] %s5184_s16 }
  0x8c   : > { %1358 = vmatprep.subr.bf16.mxu0 %v4495_v10  ;;  %v4487_v20 = vcombine.high %v426_v13, %v430_v15  ;;  %1551 = vmatprep.subr.bf16.mxu1 %v4497_v14  ;;  %v4489_v21 = vcombine.high %v427_v16, %v431_v17  ;;  %v418_v22 = vld [vmem:[#allocation5 + $0x100] sm:$0xff]  ;;  %v419_v24 = vld [vmem:[#allocation5 + $0x108] sm:$0xff]  ;;  %v4486_v26 = vcombine.low %v426_v13, %v430_v15  ;;  %s5186_s11 = scalar_lea.vmem %s5185_s16, 16384  ;;  %p5187_p8 = scmp.lt.s32.totalorder %s7196_s20, %s5185_s16 }
  0x8d   : > { %v422_v23 = vld [vmem:[#allocation5 + $0x120] sm:$0xff]  ;;  %v423_v25 = vld [vmem:[#allocation5 + $0x128] sm:$0xff]  ;;  %v4488_v27 = vcombine.low %v427_v16, %v431_v17  ;;  %p5183_p6 = pneg %p5182_p4  ;;  %p5188_p12 = scmp.lt.s32.totalorder %s5186_s11, %s5180_s8 }
  0x8e   : > { %v4479_v28 = vcombine.high %v418_v22, %v422_v23  ;;  %v4481_v29 = vcombine.high %v419_v24, %v423_v25  ;;  %v410_v30 = vld [vmem:[#allocation5 + $0xc0] sm:$0xff]  ;;  %v411_v32 = vld [vmem:[#allocation5 + $0xc8] sm:$0xff]  ;;  %v4478_v34 = vcombine.low %v418_v22, %v422_v23  ;;  %v4480_v35 = vcombine.low %v419_v24, %v423_v25 }
  0x8f   : > { %1359 = vmatpush1.bf16.msra.mxu0 %v4494_v18  ;;  %1552 = vmatpush1.bf16.msra.mxu1 %v4496_v19  ;;  %v414_v31 = vld [vmem:[#allocation5 + $0xe0] sm:$0xff]  ;;  %v415_v33 = vld [vmem:[#allocation5 + $0xe8] sm:$0xff]  ;;  %p5189_p5 = por %p5188_p12, %p5187_p8 }
  0x90   : > { %1360 = vmatprep.subr.bf16.mxu0 %v4487_v20  ;;  %1553 = vmatprep.subr.bf16.mxu1 %v4489_v21  ;;  %v4471_v36 = vcombine.high %v410_v30, %v414_v31  ;;  %v4473_v37 = vcombine.high %v411_v32, %v415_v33  ;;  %v402_v38 = vld [vmem:[#allocation5 + $0x80] sm:$0xff]  ;;  %v403_v40 = vld [vmem:[#allocation5 + $0x88] sm:$0xff]  ;;  %v4470_v42 = vcombine.low %v410_v30, %v414_v31 }
  0x91   : > { %v406_v39 = vld [vmem:[#allocation5 + $0xa0] sm:$0xff]  ;;  %v407_v41 = vld [vmem:[#allocation5 + $0xa8] sm:$0xff]  ;;  %v4472_v43 = vcombine.low %v411_v32, %v415_v33  ;;  %p5190_p10 = pnand %p5189_p5, %p5183_p6 }
  0x92   : > { %v4463_v44 = vcombine.high %v402_v38, %v406_v39  ;;  %v4465_v45 = vcombine.high %v403_v40, %v407_v41  ;;  %v394_v46 = vld [vmem:[#allocation5 + $0x40] sm:$0xff]  ;;  %v395_v48 = vld [vmem:[#allocation5 + $0x48] sm:$0xff]  ;;  %v4462_v50 = vcombine.low %v402_v38, %v406_v39  ;;  %v4464_v51 = vcombine.low %v403_v40, %v407_v41 }
  0x93   : > { %1361 = vmatpush1.bf16.msra.mxu0 %v4486_v26  ;;  %1554 = vmatpush1.bf16.msra.mxu1 %v4488_v27  ;;  %v398_v47 = vld [vmem:[#allocation5 + $0x60] sm:$0xff]  ;;  %v399_v49 = vld [vmem:[#allocation5 + $0x68] sm:$0xff] }
  0x94   : > { %1362 = vmatprep.subr.bf16.mxu0 %v4479_v28  ;;  %1555 = vmatprep.subr.bf16.mxu1 %v4481_v29  ;;  %v4455_v52 = vcombine.high %v394_v46, %v398_v47  ;;  %v4457_v53 = vcombine.high %v395_v48, %v399_v49  ;;  %v386_v54 = vld [vmem:[#allocation5] sm:$0xff]  ;;  %v387_v57 = vld [vmem:[#allocation5 + $0x8] sm:$0xff]  ;;  %v4454_v59 = vcombine.low %v394_v46, %v398_v47 }
  0x95   : > { %v390_v55 = vld [vmem:[#allocation5 + $0x20] sm:$0xff]  ;;  %v391_v58 = vld [vmem:[#allocation5 + $0x28] sm:$0xff]  ;;  %v4456_v60 = vcombine.low %v395_v48, %v399_v49 }
  0x96   : > { %v4804_v56 = vld [vmem:[%s5496_s26 + $0x4] ss:$8 sps:$4 sm:$0xff]   ;;  %v4447_v61 = vcombine.high %v386_v54, %v390_v55  ;;  %v4449_v62 = vcombine.high %v387_v57, %v391_v58  ;;  %v4446_v3 = vcombine.low %v386_v54, %v390_v55  ;;  %v4448_v4 = vcombine.low %v387_v57, %v391_v58 }
  0x97   : > { %1363 = vmatpush1.bf16.msra.mxu0 %v4478_v34  ;;  %1556 = vmatpush1.bf16.msra.mxu1 %v4480_v35  ;;  %v506_v63 = vld [vmem:[#allocation5 + $0x3c0] sm:$0xff]  ;;  %v507_v1 = vld [vmem:[#allocation5 + $0x3c8] sm:$0xff] }
  0x98   : > { %1364 = vmatprep.subr.bf16.mxu0 %v4471_v36  ;;  %1557 = vmatprep.subr.bf16.mxu1 %v4473_v37  ;;  %v510_v0 = vld [vmem:[#allocation5 + $0x3e0] sm:$0xff]  ;;  %v511_v2 = vld [vmem:[#allocation5 + $0x3e8] sm:$0xff] }
  0x99   : > { %1388 = vmatprep.mubr.bf16.mxu0 %v4804_v56  ;;  %1581 = vmatprep.mubr.bf16.mxu1 %v4804_v56  ;;  %v4567_v5 = vcombine.high %v506_v63, %v510_v0  ;;  %v4569_v6 = vcombine.high %v507_v1, %v511_v2  ;;  %v498_v7 = vld [vmem:[#allocation5 + $0x380] sm:$0xff]  ;;  %v499_v9 = vld [vmem:[#allocation5 + $0x388] sm:$0xff]  ;;  %v4566_v11 = vcombine.low %v506_v63, %v510_v0  ;;  %v444_v63 = vld [vmem:[#allocation5 + $0x1d0] sm:$0xff] }
  0x9a   : > { %v502_v8 = vld [vmem:[#allocation5 + $0x3a0] sm:$0xff]  ;;  %v503_v10 = vld [vmem:[#allocation5 + $0x3a8] sm:$0xff]  ;;  %v4568_v12 = vcombine.low %v507_v1, %v511_v2  ;;  %v448_v0 = vld [vmem:[#allocation5 + $0x1f0] sm:$0xff] }
  0x9b   : > { %1365 = vmatpush1.bf16.msra.mxu0 %v4470_v42  ;;  %1558 = vmatpush1.bf16.msra.mxu1 %v4472_v43  ;;  %v4559_v13 = vcombine.high %v498_v7, %v502_v8  ;;  %v4561_v14 = vcombine.high %v499_v9, %v503_v10  ;;  %v490_v15 = vld [vmem:[#allocation5 + $0x340] sm:$0xff]  ;;  %v491_v17 = vld [vmem:[#allocation5 + $0x348] sm:$0xff]  ;;  %v4558_v19 = vcombine.low %v498_v7, %v502_v8  ;;  %v445_v1 = vld [vmem:[#allocation5 + $0x1d8] sm:$0xff] }
  0x9c   : > { %1366 = vmatprep.subr.bf16.mxu0 %v4463_v44  ;;  %1559 = vmatprep.subr.bf16.mxu1 %v4465_v45  ;;  %v494_v16 = vld [vmem:[#allocation5 + $0x360] sm:$0xff]  ;;  %v495_v18 = vld [vmem:[#allocation5 + $0x368] sm:$0xff]  ;;  %v4560_v20 = vcombine.low %v499_v9, %v503_v10  ;;  %v449_v2 = vld [vmem:[#allocation5 + $0x1f8] sm:$0xff] }
  0x9d   : > { %v4551_v21 = vcombine.high %v490_v15, %v494_v16  ;;  %v4553_v22 = vcombine.high %v491_v17, %v495_v18  ;;  %v482_v23 = vld [vmem:[#allocation5 + $0x300] sm:$0xff]  ;;  %v483_v25 = vld [vmem:[#allocation5 + $0x308] sm:$0xff]  ;;  %v4550_v27 = vcombine.low %v490_v15, %v494_v16  ;;  %v4552_v28 = vcombine.low %v491_v17, %v495_v18  ;;  %v436_v8 = vld [vmem:[#allocation5 + $0x190] sm:$0xff] }
  0x9e   : > { %v486_v24 = vld [vmem:[#allocation5 + $0x320] sm:$0xff]  ;;  %v487_v26 = vld [vmem:[#allocation5 + $0x328] sm:$0xff]  ;;  %v4509_v7 = vcombine.high %v445_v1, %v449_v2  ;;  %v5524_v9 = vld [vmem:[%s5496_s26 + $0x14] ss:$8 sps:$4 sm:$0xff]   ;;  %v4508_v16 = vcombine.low %v445_v1, %v449_v2 }
  0x9f   : > { %1367 = vmatpush1.bf16.msra.mxu0 %v4462_v50  ;;  %1560 = vmatpush1.bf16.msra.mxu1 %v4464_v51  ;;  %v4543_v29 = vcombine.high %v482_v23, %v486_v24  ;;  %v4545_v30 = vcombine.high %v483_v25, %v487_v26  ;;  %v474_v31 = vld [vmem:[#allocation5 + $0x2c0] sm:$0xff]  ;;  %v475_v33 = vld [vmem:[#allocation5 + $0x2c8] sm:$0xff]  ;;  %v4542_v35 = vcombine.low %v482_v23, %v486_v24  ;;  %v440_v10 = vld [vmem:[#allocation5 + $0x1b0] sm:$0xff] }
  0xa0   : > { %1368 = vmatprep.subr.bf16.mxu0 %v4455_v52  ;;  %1561 = vmatprep.subr.bf16.mxu1 %v4457_v53  ;;  %v478_v32 = vld [vmem:[#allocation5 + $0x2e0] sm:$0xff]  ;;  %v479_v34 = vld [vmem:[#allocation5 + $0x2e8] sm:$0xff]  ;;  %v4544_v36 = vcombine.low %v483_v25, %v487_v26  ;;  %v432_v15 = vld [vmem:[#allocation5 + $0x170] sm:$0xff] }
  0xa1   : > { %v4535_v37 = vcombine.high %v474_v31, %v478_v32  ;;  %v4537_v38 = vcombine.high %v475_v33, %v479_v34  ;;  %v466_v39 = vld [vmem:[#allocation5 + $0x280] sm:$0xff]  ;;  %v467_v41 = vld [vmem:[#allocation5 + $0x288] sm:$0xff]  ;;  %v4534_v43 = vcombine.low %v474_v31, %v478_v32  ;;  %v4536_v44 = vcombine.low %v475_v33, %v479_v34  ;;  %v429_v17 = vld [vmem:[#allocation5 + $0x158] sm:$0xff] }
  0xa2   : > { %v470_v40 = vld [vmem:[#allocation5 + $0x2a0] sm:$0xff]  ;;  %v471_v42 = vld [vmem:[#allocation5 + $0x2a8] sm:$0xff]  ;;  %v433_v18 = vld [vmem:[#allocation5 + $0x178] sm:$0xff] }
  0xa3   : > { %1369 = vmatpush1.bf16.msra.mxu0 %v4454_v59  ;;  %1562 = vmatpush1.bf16.msra.mxu1 %v4456_v60  ;;  %v4527_v45 = vcombine.high %v466_v39, %v470_v40  ;;  %v4529_v46 = vcombine.high %v467_v41, %v471_v42  ;;  %v458_v47 = vld [vmem:[#allocation5 + $0x240] sm:$0xff]  ;;  %v459_v49 = vld [vmem:[#allocation5 + $0x248] sm:$0xff]  ;;  %v4526_v51 = vcombine.low %v466_v39, %v470_v40  ;;  %v420_v25 = vld [vmem:[#allocation5 + $0x110] sm:$0xff] }
  0xa4   : > { %1370 = vmatprep.subr.bf16.mxu0 %v4447_v61  ;;  %1563 = vmatprep.subr.bf16.mxu1 %v4449_v62  ;;  %v462_v48 = vld [vmem:[#allocation5 + $0x260] sm:$0xff]  ;;  %v463_v50 = vld [vmem:[#allocation5 + $0x268] sm:$0xff]  ;;  %v4528_v52 = vcombine.low %v467_v41, %v471_v42  ;;  %v424_v26 = vld [vmem:[#allocation5 + $0x130] sm:$0xff]  ;;  %v4492_v34 = vcombine.low %v429_v17, %v433_v18 }
  0xa5   : > { %v4519_v53 = vcombine.high %v458_v47, %v462_v48  ;;  %v4521_v54 = vcombine.high %v459_v49, %v463_v50  ;;  %v450_v55 = vld [vmem:[#allocation5 + $0x200] sm:$0xff]  ;;  %v451_v57 = vld [vmem:[#allocation5 + $0x208] sm:$0xff]  ;;  %v4518_v59 = vcombine.low %v458_v47, %v462_v48  ;;  %v4520_v60 = vcombine.low %v459_v49, %v463_v50  ;;  %v412_v32 = vld [vmem:[#allocation5 + $0xd0] sm:$0xff] }
  0xa6   : > { %v454_v56 = vld [vmem:[#allocation5 + $0x220] sm:$0xff]  ;;  %v455_v58 = vld [vmem:[#allocation5 + $0x228] sm:$0xff]  ;;  %v416_v33 = vld [vmem:[#allocation5 + $0xf0] sm:$0xff]  ;;  %v4482_v40 = vcombine.low %v420_v25, %v424_v26 }
  0xa7   : > { %1371 = vmatpush1.bf16.msra.mxu0 %v4446_v3  ;;  %1564 = vmatpush1.bf16.msra.mxu1 %v4448_v4  ;;  %v4511_v61 = vcombine.high %v450_v55, %v454_v56  ;;  %v4513_v62 = vcombine.high %v451_v57, %v455_v58  ;;  %v4510_v3 = vcombine.low %v450_v55, %v454_v56  ;;  %v5541_v39 = vld [vmem:[%s5496_s26 + $0x20] ss:$8 sps:$4 sm:$0xff]   ;;  %v404_v41 = vld [vmem:[#allocation5 + $0x90] sm:$0xff]  ;;  %v409_v47 = vld [vmem:[#allocation5 + $0xb8] sm:$0xff] }
  0xa8   : > { %1372 = vmatprep.subr.bf16.mxu0 %v4567_v5  ;;  %1565 = vmatprep.subr.bf16.mxu1 %v4569_v6  ;;  %v4512_v4 = vcombine.low %v451_v57, %v455_v58  ;;  %v4507_v5 = vcombine.high %v444_v63, %v448_v0  ;;  %v5521_v6 = vld [vmem:[%s5496_s26] ss:$8 sps:$4 sm:$0xff]   ;;  %v408_v42 = vld [vmem:[#allocation5 + $0xb0] sm:$0xff]  ;;  %v4474_v49 = vcombine.low %v412_v32, %v416_v33  ;;  %v397_v55 = vld [vmem:[#allocation5 + $0x58] sm:$0xff] }
  0xa9   : > { %v396_v50 = vld [vmem:[#allocation5 + $0x50] sm:$0xff]  ;;  %v401_v56 = vld [vmem:[#allocation5 + $0x78] sm:$0xff]  ;;  %v4466_v58 = vcombine.low %v404_v41, %v408_v42 }
  0xaa   : > { %v5551_v57 = vld [vmem:[%s5496_s26 + $0x30] ss:$8 sps:$4 sm:$0xff]   ;;  %v4461_v2 = vcombine.high %v397_v55, %v401_v56 }
  0xab   : > { %1373 = vmatpush2.bf16.msra.mxu0 %v4566_v11  ;;  %1566 = vmatpush2.bf16.msra.mxu1 %v4568_v12  ;;  %v437_v11 = vld [vmem:[#allocation5 + $0x198] sm:$0xff] }
  0xac   : > { %1374 = vmatprep.subr.bf16.mxu0 %v4559_v13  ;;  %1567 = vmatprep.subr.bf16.mxu1 %v4561_v14  ;;  %v441_v12 = vld [vmem:[#allocation5 + $0x1b8] sm:$0xff]  ;;  %v4506_v13 = vcombine.low %v444_v63, %v448_v0  ;;  %v428_v14 = vld [vmem:[#allocation5 + $0x150] sm:$0xff] }
  0xad   : > { %v4500_v23 = vcombine.low %v437_v11, %v441_v12  ;;  %v4491_v24 = vcombine.high %v428_v14, %v432_v15  ;;  %v4490_v31 = vcombine.low %v428_v14, %v432_v15  ;;  %v389_v0 = vld [vmem:[#allocation5 + $0x18] sm:$0xff]  ;;  %v500_v15 = vld [vmem:[#allocation5 + $0x390] sm:$0xff] }
  0xae   : > { %v393_v1 = vld [vmem:[#allocation5 + $0x38] sm:$0xff] }
  0xaf   : > { %1375 = vmatpush2.bf16.msra.mxu0 %v4558_v19  ;;  %1568 = vmatpush2.bf16.msra.mxu1 %v4560_v20  ;;  %v4499_v19 = vcombine.high %v436_v8, %v440_v10  ;;  %v4501_v20 = vcombine.high %v437_v11, %v441_v12  ;;  %v509_v11 = vld [vmem:[#allocation5 + $0x3d8] sm:$0xff] }
  0xb0   : > { %1376 = vmatprep.subr.bf16.mxu0 %v4551_v21  ;;  %1569 = vmatprep.subr.bf16.mxu1 %v4553_v22  ;;  %v4498_v21 = vcombine.low %v436_v8, %v440_v10  ;;  %v5530_v22 = vld [vmem:[%s5496_s26 + $0x10] ss:$8 sps:$4 sm:$0xff]   ;;  %v4453_v10 = vcombine.high %v389_v0, %v393_v1 }
  0xb1   : > { %v513_v12 = vld [vmem:[#allocation5 + $0x3f8] sm:$0xff] }
  0xb3   : > { %1377 = vmatpush2.bf16.msra.mxu0 %v4550_v27  ;;  %1570 = vmatpush2.bf16.msra.mxu1 %v4552_v28  ;;  %v5534_v27 = vld [vmem:[%s5496_s26 + $0x24] ss:$8 sps:$4 sm:$0xff]   ;;  %v4493_v28 = vcombine.high %v429_v17, %v433_v18  ;;  %v5564_v17 = vld [vmem:[%s5496_s26 + $0x54] ss:$8 sps:$4 sm:$0xff]   ;;  %v4452_v18 = vcombine.low %v389_v0, %v393_v1 }
  0xb4   : > { %1378 = vmatprep.subr.bf16.mxu0 %v4543_v29  ;;  %1571 = vmatprep.subr.bf16.mxu1 %v4545_v30  ;;  %v421_v29 = vld [vmem:[#allocation5 + $0x118] sm:$0xff] }
  0xb5   : > { %v425_v30 = vld [vmem:[#allocation5 + $0x138] sm:$0xff] }
  0xb7   : > { %1379 = vmatpush2.bf16.msra.mxu0 %v4542_v35  ;;  %1572 = vmatpush2.bf16.msra.mxu1 %v4544_v36  ;;  %v4483_v35 = vcombine.high %v420_v25, %v424_v26  ;;  %v4485_v36 = vcombine.high %v421_v29, %v425_v30  ;;  %v492_v25 = vld [vmem:[#allocation5 + $0x350] sm:$0xff] }
  0xb8   : > { %1380 = vmatprep.subr.bf16.mxu0 %v4535_v37  ;;  %1573 = vmatprep.subr.bf16.mxu1 %v4537_v38  ;;  %v413_v37 = vld [vmem:[#allocation5 + $0xd8] sm:$0xff]  ;;  %v496_v26 = vld [vmem:[#allocation5 + $0x370] sm:$0xff] }
  0xb9   : > { %v417_v38 = vld [vmem:[#allocation5 + $0xf8] sm:$0xff] }
  0xba   : > { %v4477_v48 = vcombine.high %v413_v37, %v417_v38 }
  0xbb   : > { %1381 = vmatpush2.bf16.msra.mxu0 %v4534_v43  ;;  %1574 = vmatpush2.bf16.msra.mxu1 %v4536_v44  ;;  %v5544_v43 = vld [vmem:[%s5496_s26 + $0x34] ss:$8 sps:$4 sm:$0xff]   ;;  %v4484_v44 = vcombine.low %v421_v29, %v425_v30 }
  0xbc   : > { %1382 = vmatprep.subr.bf16.mxu0 %v4527_v45  ;;  %1575 = vmatprep.subr.bf16.mxu1 %v4529_v46  ;;  %v4475_v45 = vcombine.high %v412_v32, %v416_v33  ;;  %v405_v46 = vld [vmem:[#allocation5 + $0x98] sm:$0xff] }
  0xbd   : > { %v497_v32 = vld [vmem:[#allocation5 + $0x378] sm:$0xff] }
  0xbe   : > { %v5571_v33 = vld [vmem:[%s5496_s26 + $0x50] ss:$8 sps:$4 sm:$0xff]  }
  0xbf   : > { %1383 = vmatpush2.bf16.msra.mxu0 %v4526_v51  ;;  %1576 = vmatpush2.bf16.msra.mxu1 %v4528_v52  ;;  %v400_v51 = vld [vmem:[#allocation5 + $0x70] sm:$0xff]  ;;  %v4476_v52 = vcombine.low %v413_v37, %v417_v38  ;;  %v5574_v37 = vld [vmem:[%s5496_s26 + $0x64] ss:$8 sps:$4 sm:$0xff]  }
  0xc0   : > { %1384 = vmatprep.subr.bf16.mxu0 %v4519_v53  ;;  %1577 = vmatprep.subr.bf16.mxu1 %v4521_v54  ;;  %v4467_v53 = vcombine.high %v404_v41, %v408_v42  ;;  %v4469_v54 = vcombine.high %v405_v46, %v409_v47  ;;  %v4459_v63 = vcombine.high %v396_v50, %v400_v51  ;;  %v485_v41 = vld [vmem:[#allocation5 + $0x318] sm:$0xff] }
  0xc1   : > { %v489_v42 = vld [vmem:[#allocation5 + $0x338] sm:$0xff] }
  0xc3   : > { %1385 = vmatpush2.bf16.msra.mxu0 %v4518_v59  ;;  %1578 = vmatpush2.bf16.msra.mxu1 %v4520_v60  ;;  %v388_v59 = vld [vmem:[#allocation5 + $0x10] sm:$0xff] }
  0xc4   : > { %1386 = vmatprep.subr.bf16.mxu0 %v4511_v61  ;;  %1579 = vmatprep.subr.bf16.mxu1 %v4513_v62  ;;  %v392_v60 = vld [vmem:[#allocation5 + $0x30] sm:$0xff]  ;;  %v5554_v61 = vld [vmem:[%s5496_s26 + $0x44] ss:$8 sps:$4 sm:$0xff]   ;;  %v4468_v62 = vcombine.low %v405_v46, %v409_v47 }
  0xc5   : > { %v4451_v8 = vcombine.high %v388_v59, %v392_v60  ;;  %v4450_v14 = vcombine.low %v388_v59, %v392_v60  ;;  %v476_v46 = vld [vmem:[#allocation5 + $0x2d0] sm:$0xff]  ;;  %v4548_v59 = vcombine.low %v485_v41, %v489_v42 }
  0xc6   : > { %v480_v47 = vld [vmem:[#allocation5 + $0x2f0] sm:$0xff] }
  0xc7   : > { %1387 = vmatpush2.bf16.msra.mxu0 %v4510_v3  ;;  %1580 = vmatpush2.bf16.msra.mxu1 %v4512_v4  ;;  %v4458_v3 = vcombine.low %v396_v50, %v400_v51  ;;  %v508_v4 = vld [vmem:[#allocation5 + $0x3d0] sm:$0xff]  ;;  %v4549_v50 = vcombine.high %v485_v41, %v489_v42  ;;  %v477_v51 = vld [vmem:[#allocation5 + $0x2d8] sm:$0xff]  ;;  %v4539_v60 = vcombine.high %v476_v46, %v480_v47 }
  0xc8   : > { %1742 = vmatprep.subr.bf16.mxu0 %v4507_v5  ;;  %1935 = vmatprep.subr.bf16.mxu1 %v4509_v7  ;;  %v512_v5 = vld [vmem:[#allocation5 + $0x3f0] sm:$0xff]  ;;  %v4460_v7 = vcombine.low %v397_v55, %v401_v56  ;;  %v4538_v1 = vcombine.low %v476_v46, %v480_v47 }
  0xc9   : > { %v468_v55 = vld [vmem:[#allocation5 + $0x290] sm:$0xff] }
  0xca   : > { %1389 = vmatmul.mubr.bf16.vlgmr.msra.gmra.mxu0 %v5521_v6  ;;  %1582 = vmatmul.mubr.bf16.vlgmr.msra.gmra.mxu1 %v5521_v6  ;;  %v472_v56 = vld [vmem:[#allocation5 + $0x2b0] sm:$0xff] }
  0xcb   : > { %1743 = vmatpush1.bf16.msra.mxu0 %v4506_v13  ;;  %1936 = vmatpush1.bf16.msra.mxu1 %v4508_v16  ;;  %v5561_v13 = vld [vmem:[%s5496_s26 + $0x40] ss:$8 sps:$4 sm:$0xff]   ;;  %v504_v16 = vld [vmem:[#allocation5 + $0x3b0] sm:$0xff] }
  0xcc   : > { %1398 = vmatprep.mubr.bf16.mxu0 %v5524_v9  ;;  %1591 = vmatprep.mubr.bf16.mxu1 %v5524_v9  ;;  %v4563_v29 = vcombine.high %v500_v15, %v504_v16  ;;  %v5624_v41 = vld [vmem:[%s5496_s26 + $0xb4] ss:$8 sps:$4 sm:$0xff]   ;;  %v5631_v42 = vld [vmem:[%s5496_s26 + $0xb0] ss:$8 sps:$4 sm:$0xff]  }
  0xcd   : > { %1744 = vmatprep.subr.bf16.mxu0 %v4499_v19  ;;  %1937 = vmatprep.subr.bf16.mxu1 %v4501_v20  ;;  %v4571_v19 = vcombine.high %v508_v4, %v512_v5  ;;  %v501_v20 = vld [vmem:[#allocation5 + $0x398] sm:$0xff] }
  0xce   : > { %v5644_v46 = vld [vmem:[%s5496_s26 + $0xd4] ss:$8 sps:$4 sm:$0xff]   ;;  %v5651_v47 = vld [vmem:[%s5496_s26 + $0xd0] ss:$8 sps:$4 sm:$0xff]  }
  0xcf   : > { %1745 = vmatpush1.bf16.msra.mxu0 %v4498_v21  ;;  %1938 = vmatpush1.bf16.msra.mxu1 %v4500_v23  ;;  %v505_v21 = vld [vmem:[#allocation5 + $0x3b8] sm:$0xff]  ;;  %v4573_v23 = vcombine.high %v509_v11, %v513_v12 }
  0xd0   : > { %1746 = vmatprep.subr.bf16.mxu0 %v4491_v24  ;;  %1939 = vmatprep.subr.bf16.mxu1 %v4493_v28  ;;  %v4570_v24 = vcombine.low %v508_v4, %v512_v5  ;;  %v4572_v28 = vcombine.low %v509_v11, %v513_v12  ;;  %v4565_v30 = vcombine.high %v501_v20, %v505_v21  ;;  %v460_v5 = vld [vmem:[#allocation5 + $0x250] sm:$0xff] }
  0xd1   : > { %v4564_v38 = vcombine.low %v501_v20, %v505_v21  ;;  %v4530_v11 = vcombine.low %v468_v55, %v472_v56  ;;  %v5594_v20 = vld [vmem:[%s5496_s26 + $0x84] ss:$8 sps:$4 sm:$0xff]   ;;  %v453_v21 = vld [vmem:[#allocation5 + $0x218] sm:$0xff] }
  0xd2   : > { %1399 = vmatmul.mubr.bf16.gmra.mxu0 %v5530_v22  ;;  %1592 = vmatmul.mubr.bf16.gmra.mxu1 %v5530_v22 }
  0xd3   : > { %1408 = vmatprep.mubr.bf16.mxu0 %v5534_v27  ;;  %1601 = vmatprep.mubr.bf16.mxu1 %v5534_v27 }
  0xd4   : > { %1747 = vmatpush1.bf16.msra.mxu0 %v4490_v31  ;;  %1940 = vmatpush1.bf16.msra.mxu1 %v4492_v34  ;;  %v493_v31 = vld [vmem:[#allocation5 + $0x358] sm:$0xff]  ;;  %v4562_v34 = vcombine.low %v500_v15, %v504_v16 }
  0xd5   : > { %1748 = vmatprep.subr.bf16.mxu0 %v4483_v35  ;;  %1941 = vmatprep.subr.bf16.mxu1 %v4485_v36  ;;  %v484_v35 = vld [vmem:[#allocation5 + $0x310] sm:$0xff] }
  0xd6   : > { %v488_v36 = vld [vmem:[#allocation5 + $0x330] sm:$0xff] }
  0xd7   : > { %v5591_v15 = vld [vmem:[%s5496_s26 + $0x70] ss:$8 sps:$4 sm:$0xff]  }
  0xd8   : > { %1749 = vmatpush1.bf16.msra.mxu0 %v4482_v40  ;;  %1942 = vmatpush1.bf16.msra.mxu1 %v4484_v44  ;;  %v4555_v40 = vcombine.high %v492_v25, %v496_v26  ;;  %v4557_v44 = vcombine.high %v493_v31, %v497_v32 }
  0xd9   : > { %1750 = vmatprep.subr.bf16.mxu0 %v4475_v45  ;;  %1943 = vmatprep.subr.bf16.mxu1 %v4477_v48  ;;  %v4554_v45 = vcombine.low %v492_v25, %v496_v26  ;;  %v4556_v48 = vcombine.low %v493_v31, %v497_v32  ;;  %v4854_v31 = vld [vmem:[#allocation8 + $0x74] ss:$8 sps:$4 sm:$0xff]   ;;  %v5601_v32 = vld [vmem:[%s5496_s26 + $0x80] ss:$8 sps:$4 sm:$0xff]  }
  0xda   : > { %1409 = vmatmul.mubr.bf16.gmra.mxu0 %v5541_v39  ;;  %1602 = vmatmul.mubr.bf16.gmra.mxu1 %v5541_v39 }
  0xdb   : > { %1418 = vmatprep.mubr.bf16.mxu0 %v5544_v43  ;;  %1611 = vmatprep.mubr.bf16.mxu1 %v5544_v43 }
  0xdc   : > { %1751 = vmatpush1.bf16.msra.mxu0 %v4474_v49  ;;  %1944 = vmatpush1.bf16.msra.mxu1 %v4476_v52  ;;  %v4547_v49 = vcombine.high %v484_v35, %v488_v36  ;;  %v481_v52 = vld [vmem:[#allocation5 + $0x2f8] sm:$0xff] }
  0xdd   : > { %1752 = vmatprep.subr.bf16.mxu0 %v4467_v53  ;;  %1945 = vmatprep.subr.bf16.mxu1 %v4469_v54  ;;  %v5581_v53 = vld [vmem:[%s5496_s26 + $0x60] ss:$8 sps:$4 sm:$0xff]   ;;  %v4546_v54 = vcombine.low %v484_v35, %v488_v36  ;;  %v4541_v0 = vcombine.high %v477_v51, %v481_v52  ;;  %v5604_v35 = vld [vmem:[%s5496_s26 + $0x94] ss:$8 sps:$4 sm:$0xff]   ;;  %v5611_v36 = vld [vmem:[%s5496_s26 + $0x90] ss:$8 sps:$4 sm:$0xff]  }
  0xe0   : > { %1753 = vmatpush1.bf16.msra.mxu0 %v4466_v58  ;;  %1946 = vmatpush1.bf16.msra.mxu1 %v4468_v62  ;;  %v5584_v58 = vld [vmem:[%s5496_s26 + $0x74] ss:$8 sps:$4 sm:$0xff]  }
  0xe1   : > { %1754 = vmatprep.subr.bf16.mxu0 %v4459_v63  ;;  %1947 = vmatprep.subr.bf16.mxu1 %v4461_v2  ;;  %v469_v62 = vld [vmem:[#allocation5 + $0x298] sm:$0xff]  ;;  %v4540_v2 = vcombine.low %v477_v51, %v481_v52  ;;  %v5044_v52 = vld [vmem:[%s5496_s26 + $0x4] ss:$8 sps:$4 sm:$0xff]  }
  0xe2   : > { %1419 = vmatmul.mubr.bf16.gmra.mxu0 %v5551_v57  ;;  %1612 = vmatmul.mubr.bf16.gmra.mxu1 %v5551_v57  ;;  %v473_v63 = vld [vmem:[#allocation5 + $0x2b8] sm:$0xff] }
  0xe3   : > { %1428 = vmatprep.mubr.bf16.mxu0 %v5554_v61  ;;  %1621 = vmatprep.mubr.bf16.mxu1 %v5554_v61  ;;  %v4533_v4 = vcombine.high %v469_v62, %v473_v63  ;;  %v4532_v12 = vcombine.low %v469_v62, %v473_v63  ;;  %v5671_v51 = vld [vmem:[%s5496_s26 + $0xf0] ss:$8 sps:$4 sm:$0xff]   ;;  %v4866_v63 = vld [vmem:[#allocation8 + $0x54] ss:$8 sps:$4 sm:$0xff]  }
  0xe4   : > { %1755 = vmatpush1.bf16.msra.mxu0 %v4458_v3  ;;  %1948 = vmatpush1.bf16.msra.mxu1 %v4460_v7  ;;  %v4531_v3 = vcombine.high %v468_v55, %v472_v56  ;;  %v464_v7 = vld [vmem:[#allocation5 + $0x270] sm:$0xff]  ;;  %v4855_v55 = vld [vmem:[#allocation8 + $0x170] ss:$8 sps:$4 sm:$0xff]  }
  0xe5   : > { %1756 = vmatprep.subr.bf16.mxu0 %v4451_v8  ;;  %1949 = vmatprep.subr.bf16.mxu1 %v4453_v10  ;;  %v461_v8 = vld [vmem:[#allocation5 + $0x258] sm:$0xff]  ;;  %v4860_v56 = vld [vmem:[#allocation8 + $0x64] ss:$8 sps:$4 sm:$0xff]   ;;  %v4861_v62 = vld [vmem:[#allocation8 + $0x160] ss:$8 sps:$4 sm:$0xff]  }
  0xe6   : > { %v465_v10 = vld [vmem:[#allocation5 + $0x278] sm:$0xff] }
  0xe7   : > { %v4525_v16 = vcombine.high %v461_v8, %v465_v10  ;;  %v4524_v25 = vcombine.low %v461_v8, %v465_v10  ;;  %v4876_v8 = vld [vmem:[#allocation8 + $0x30] ss:$8 sps:$4 sm:$0xff]  }
  0xe8   : > { %1757 = vmatpush1.bf16.msra.mxu0 %v4450_v14  ;;  %1950 = vmatpush1.bf16.msra.mxu1 %v4452_v18  ;;  %v4523_v14 = vcombine.high %v460_v5, %v464_v7  ;;  %v452_v18 = vld [vmem:[#allocation5 + $0x210] sm:$0xff]  ;;  %v4879_v10 = vld [vmem:[#allocation8 + $0x130] ss:$8 sps:$4 sm:$0xff]  }
  0xe9   : > { %1758 = vmatprep.subr.bf16.mxu0 %v4571_v19  ;;  %1951 = vmatprep.subr.bf16.mxu1 %v4573_v23  ;;  %v456_v19 = vld [vmem:[#allocation5 + $0x230] sm:$0xff]  ;;  %v457_v23 = vld [vmem:[#allocation5 + $0x238] sm:$0xff] }
  0xea   : > { %1429 = vmatmul.mubr.bf16.gmra.mxu0 %v5561_v13  ;;  %1622 = vmatmul.mubr.bf16.gmra.mxu1 %v5561_v13  ;;  %v4515_v26 = vcombine.high %v452_v18, %v456_v19 }
  0xeb   : > { %1438 = vmatprep.mubr.bf16.mxu0 %v5564_v17  ;;  %1631 = vmatprep.mubr.bf16.mxu1 %v5564_v17 }
  0xec   : > { %1759 = vmatpush2.bf16.msra.mxu0 %v4570_v24  ;;  %1952 = vmatpush2.bf16.msra.mxu1 %v4572_v28  ;;  %v4522_v24 = vcombine.low %v460_v5, %v464_v7  ;;  %v4517_v28 = vcombine.high %v453_v21, %v457_v23  ;;  %v4878_v5 = vld [vmem:[#allocation8 + $0x34] ss:$8 sps:$4 sm:$0xff]  }
  0xed   : > { %1760 = vmatprep.subr.bf16.mxu0 %v4563_v29  ;;  %1953 = vmatprep.subr.bf16.mxu1 %v4565_v30  ;;  %v4514_v29 = vcombine.low %v452_v18, %v456_v19  ;;  %v4516_v30 = vcombine.low %v453_v21, %v457_v23  ;;  %v4881_v7 = vld [vmem:[#allocation8 + $0x134] ss:$8 sps:$4 sm:$0xff]   ;;  %v4888_v18 = vld [vmem:[#allocation8 + $0x10] ss:$8 sps:$4 sm:$0xff]   ;;  %v4896_v21 = vld [vmem:[#allocation8 + $0x4] ss:$8 sps:$4 sm:$0xff]  }
  0xee   : > { %v4891_v19 = vld [vmem:[#allocation8 + $0x110] ss:$8 sps:$4 sm:$0xff]   ;;  %v4897_v23 = vld [vmem:[#allocation8 + $0x100] ss:$8 sps:$4 sm:$0xff]  }
  0xf0   : > { %1761 = vmatpush2.bf16.msra.mxu0 %v4562_v34  ;;  %1954 = vmatpush2.bf16.msra.mxu1 %v4564_v38  ;;  %v4857_v34 = vld [vmem:[#allocation8 + $0x174] ss:$8 sps:$4 sm:$0xff]  }
  0xf1   : > { %1762 = vmatprep.subr.bf16.mxu0 %v4555_v40  ;;  %1955 = vmatprep.subr.bf16.mxu1 %v4557_v44  ;;  %v5614_v38 = vld [vmem:[%s5496_s26 + $0xa4] ss:$8 sps:$4 sm:$0xff]   ;;  %v5621_v40 = vld [vmem:[%s5496_s26 + $0xa0] ss:$8 sps:$4 sm:$0xff]  }
  0xf2   : > { %1439 = vmatmul.mubr.bf16.gmra.mxu0 %v5571_v33  ;;  %1632 = vmatmul.mubr.bf16.gmra.mxu1 %v5571_v33  ;;  %v5634_v44 = vld [vmem:[%s5496_s26 + $0xc4] ss:$8 sps:$4 sm:$0xff]  }
  0xf3   : > { %1448 = vmatprep.mubr.bf16.mxu0 %v5574_v37  ;;  %1641 = vmatprep.mubr.bf16.mxu1 %v5574_v37 }
  0xf4   : > { %1763 = vmatpush2.bf16.msra.mxu0 %v4554_v45  ;;  %1956 = vmatpush2.bf16.msra.mxu1 %v4556_v48  ;;  %v5641_v45 = vld [vmem:[%s5496_s26 + $0xc0] ss:$8 sps:$4 sm:$0xff]   ;;  %v5654_v48 = vld [vmem:[%s5496_s26 + $0xe4] ss:$8 sps:$4 sm:$0xff]  }
  0xf5   : > { %1764 = vmatprep.subr.bf16.mxu0 %v4547_v49  ;;  %1957 = vmatprep.subr.bf16.mxu1 %v4549_v50  ;;  %v5661_v49 = vld [vmem:[%s5496_s26 + $0xe0] ss:$8 sps:$4 sm:$0xff]   ;;  %v5664_v50 = vld [vmem:[%s5496_s26 + $0xf4] ss:$8 sps:$4 sm:$0xff]  }
  0xf8   : > { %1765 = vmatpush2.bf16.msra.mxu0 %v4546_v54  ;;  %1958 = vmatpush2.bf16.msra.mxu1 %v4548_v59  ;;  %v4852_v54 = vld [vmem:[#allocation8 + $0x70] ss:$8 sps:$4 sm:$0xff]   ;;  %v4863_v59 = vld [vmem:[#allocation8 + $0x164] ss:$8 sps:$4 sm:$0xff]  }
  0xf9   : > { %1766 = vmatprep.subr.bf16.mxu0 %v4539_v60  ;;  %1959 = vmatprep.subr.bf16.mxu1 %v4541_v0  ;;  %v4858_v60 = vld [vmem:[#allocation8 + $0x60] ss:$8 sps:$4 sm:$0xff]   ;;  %v4869_v0 = vld [vmem:[#allocation8 + $0x154] ss:$8 sps:$4 sm:$0xff]  }
  0xfa   : > { %1449 = vmatmul.mubr.bf16.gmra.mxu0 %v5581_v53  ;;  %1642 = vmatmul.mubr.bf16.gmra.mxu1 %v5581_v53 }
  0xfb   : > { %1458 = vmatprep.mubr.bf16.mxu0 %v5584_v58  ;;  %1651 = vmatprep.mubr.bf16.mxu1 %v5584_v58 }
  0xfc   : > { %1767 = vmatpush2.bf16.msra.mxu0 %v4538_v1  ;;  %1960 = vmatpush2.bf16.msra.mxu1 %v4540_v2  ;;  %v4864_v1 = vld [vmem:[#allocation8 + $0x50] ss:$8 sps:$4 sm:$0xff]  }
  0xfd   : > { %1768 = vmatprep.subr.bf16.mxu0 %v4531_v3  ;;  %1961 = vmatprep.subr.bf16.mxu1 %v4533_v4  ;;  %v4867_v2 = vld [vmem:[#allocation8 + $0x150] ss:$8 sps:$4 sm:$0xff]   ;;  %v4872_v3 = vld [vmem:[#allocation8 + $0x44] ss:$8 sps:$4 sm:$0xff]   ;;  %v4873_v4 = vld [vmem:[#allocation8 + $0x140] ss:$8 sps:$4 sm:$0xff]  }
 0x100   : > { %1769 = vmatpush2.bf16.msra.mxu0 %v4530_v11  ;;  %1962 = vmatpush2.bf16.msra.mxu1 %v4532_v12  ;;  %v4884_v11 = vld [vmem:[#allocation8 + $0x24] ss:$8 sps:$4 sm:$0xff]   ;;  %v4885_v12 = vld [vmem:[#allocation8 + $0x120] ss:$8 sps:$4 sm:$0xff]  }
 0x101   : > { %1770 = vmatprep.subr.bf16.mxu0 %v4523_v14  ;;  %1963 = vmatprep.subr.bf16.mxu1 %v4525_v16  ;;  %v4890_v14 = vld [vmem:[#allocation8 + $0x14] ss:$8 sps:$4 sm:$0xff]  }
 0x102   : > { %1459 = vmatmul.mubr.bf16.gmra.mxu0 %v5591_v15  ;;  %1652 = vmatmul.mubr.bf16.gmra.mxu1 %v5591_v15  ;;  %v4893_v16 = vld [vmem:[#allocation8 + $0x114] ss:$8 sps:$4 sm:$0xff]  }
 0x103   : > { %1468 = vmatprep.mubr.bf16.mxu0 %v5594_v20  ;;  %1661 = vmatprep.mubr.bf16.mxu1 %v5594_v20 }
 0x104   : > { %1771 = vmatpush2.bf16.msra.mxu0 %v4522_v24  ;;  %1964 = vmatpush2.bf16.msra.mxu1 %v4524_v25  ;;  %v4902_v24 = vld [vmem:[#allocation8 + $0xf4] ss:$8 sps:$4 sm:$0xff]  }
 0x105   : > { %1772 = vmatprep.subr.bf16.mxu0 %v4515_v26  ;;  %1965 = vmatprep.subr.bf16.mxu1 %v4517_v28  ;;  %v4905_v25 = vld [vmem:[#allocation8 + $0x1f4] ss:$8 sps:$4 sm:$0xff]   ;;  %v4900_v26 = vld [vmem:[#allocation8 + $0xf0] ss:$8 sps:$4 sm:$0xff]  }
 0x106   : > { %v4903_v28 = vld [vmem:[#allocation8 + $0x1f0] ss:$8 sps:$4 sm:$0xff]  }
 0x108   : > { %1773 = vmatpush2.bf16.msra.mxu0 %v4514_v29  ;;  %1966 = vmatpush2.bf16.msra.mxu1 %v4516_v30  ;;  %v4908_v29 = vld [vmem:[#allocation8 + $0xe4] ss:$8 sps:$4 sm:$0xff]   ;;  %v4909_v30 = vld [vmem:[#allocation8 + $0x1e0] ss:$8 sps:$4 sm:$0xff]  }
 0x109   : > { %3292 = vmatprep.subr.bf16.mxu0 %v4854_v31  ;;  %3485 = vmatprep.subr.bf16.mxu1 %v4857_v34  ;;  %v4914_v31 = vld [vmem:[#allocation8 + $0xd4] ss:$8 sps:$4 sm:$0xff]  }
 0x10a   : > { %1469 = vmatmul.mubr.bf16.gmra.mxu0 %v5601_v32  ;;  %1662 = vmatmul.mubr.bf16.gmra.mxu1 %v5601_v32  ;;  %v4917_v34 = vld [vmem:[#allocation8 + $0x1d4] ss:$8 sps:$4 sm:$0xff]  }
 0x10b   : > { %1478 = vmatprep.mubr.bf16.mxu0 %v5604_v35  ;;  %1671 = vmatprep.mubr.bf16.mxu1 %v5604_v35 }
 0x112   : > { %1479 = vmatmul.mubr.bf16.gmra.mxu0 %v5611_v36  ;;  %1672 = vmatmul.mubr.bf16.gmra.mxu1 %v5611_v36 }
 0x113   : > { %1488 = vmatprep.mubr.bf16.mxu0 %v5614_v38  ;;  %1681 = vmatprep.mubr.bf16.mxu1 %v5614_v38 }
 0x11a   : > { %1489 = vmatmul.mubr.bf16.gmra.mxu0 %v5621_v40  ;;  %1682 = vmatmul.mubr.bf16.gmra.mxu1 %v5621_v40 }
 0x11b   : > { %1498 = vmatprep.mubr.bf16.mxu0 %v5624_v41  ;;  %1691 = vmatprep.mubr.bf16.mxu1 %v5624_v41 }
 0x122   : > { %1499 = vmatmul.mubr.bf16.gmra.mxu0 %v5631_v42  ;;  %1692 = vmatmul.mubr.bf16.gmra.mxu1 %v5631_v42 }
 0x123   : > { %1508 = vmatprep.mubr.bf16.mxu0 %v5634_v44  ;;  %1701 = vmatprep.mubr.bf16.mxu1 %v5634_v44 }
 0x12a   : > { %1509 = vmatmul.mubr.bf16.gmra.mxu0 %v5641_v45  ;;  %1702 = vmatmul.mubr.bf16.gmra.mxu1 %v5641_v45 }
 0x12b   : > { %1518 = vmatprep.mubr.bf16.mxu0 %v5644_v46  ;;  %1711 = vmatprep.mubr.bf16.mxu1 %v5644_v46 }
 0x132   : > { %1519 = vmatmul.mubr.bf16.gmra.mxu0 %v5651_v47  ;;  %1712 = vmatmul.mubr.bf16.gmra.mxu1 %v5651_v47 }
 0x133   : > { %1528 = vmatprep.mubr.bf16.mxu0 %v5654_v48  ;;  %1721 = vmatprep.mubr.bf16.mxu1 %v5654_v48 }
 0x13a   : > { %1529 = vmatmul.mubr.bf16.gmra.mxu0 %v5661_v49  ;;  %1722 = vmatmul.mubr.bf16.gmra.mxu1 %v5661_v49 }
 0x13b   : > { %1538 = vmatprep.mubr.bf16.mxu0 %v5664_v50  ;;  %1731 = vmatprep.mubr.bf16.mxu1 %v5664_v50 }
 0x142   : > { %1539 = vmatmul.mubr.bf16.gmra.mxu0 %v5671_v51  ;;  %1732 = vmatmul.mubr.bf16.gmra.mxu1 %v5671_v51 }
 0x143   : > { %1774 = vmatprep.mubr.bf16.mxu0 %v5044_v52  ;;  %1967 = vmatprep.mubr.bf16.mxu1 %v5044_v52  ;;  %v4912_v52 = vld [vmem:[#allocation8 + $0xd0] ss:$8 sps:$4 sm:$0xff]  }
 0x14a   : > { %1775 = vmatmul.mubr.bf16.vlgmr.msra.gmra.mxu0 %v5521_v6  ;;  %1968 = vmatmul.mubr.bf16.vlgmr.msra.gmra.mxu1 %v5521_v6  ;;  %v4875_v6 = vld [vmem:[#allocation8 + $0x144] ss:$8 sps:$4 sm:$0xff]  }
 0x14b   : > { %3293 = vmatpush1.bf16.msra.mxu0 %v4852_v54  ;;  %3486 = vmatpush1.bf16.msra.mxu1 %v4855_v55  ;;  %v4915_v54 = vld [vmem:[#allocation8 + $0x1d0] ss:$8 sps:$4 sm:$0xff]   ;;  %v4920_v55 = vld [vmem:[#allocation8 + $0xc4] ss:$8 sps:$4 sm:$0xff]  }
 0x14c   : > { %1784 = vmatprep.mubr.bf16.mxu0 %v5524_v9  ;;  %1977 = vmatprep.mubr.bf16.mxu1 %v5524_v9  ;;  %v4870_v9 = vld [vmem:[#allocation8 + $0x40] ss:$8 sps:$4 sm:$0xff]  }
 0x14d   : > { %3294 = vmatprep.subr.bf16.mxu0 %v4860_v56  ;;  %3487 = vmatprep.subr.bf16.mxu1 %v4863_v59  ;;  %v4921_v56 = vld [vmem:[#allocation8 + $0x1c0] ss:$8 sps:$4 sm:$0xff]   ;;  %v4926_v59 = vld [vmem:[#allocation8 + $0xb4] ss:$8 sps:$4 sm:$0xff]  }
 0x14f   : > { %3295 = vmatpush1.bf16.msra.mxu0 %v4858_v60  ;;  %3488 = vmatpush1.bf16.msra.mxu1 %v4861_v62  ;;  %v4929_v60 = vld [vmem:[#allocation8 + $0x1b4] ss:$8 sps:$4 sm:$0xff]   ;;  %v4924_v62 = vld [vmem:[#allocation8 + $0xb0] ss:$8 sps:$4 sm:$0xff]  }
 0x150   : > { %3296 = vmatprep.subr.bf16.mxu0 %v4866_v63  ;;  %3489 = vmatprep.subr.bf16.mxu1 %v4869_v0  ;;  %v4927_v63 = vld [vmem:[#allocation8 + $0x1b0] ss:$8 sps:$4 sm:$0xff]   ;;  %v4932_v0 = vld [vmem:[#allocation8 + $0xa4] ss:$8 sps:$4 sm:$0xff]  }
 0x152   : > { %1785 = vmatmul.mubr.bf16.gmra.mxu0 %v5530_v22  ;;  %1978 = vmatmul.mubr.bf16.gmra.mxu1 %v5530_v22  ;;  %v4887_v22 = vld [vmem:[#allocation8 + $0x124] ss:$8 sps:$4 sm:$0xff]  }
 0x153   : > { %1794 = vmatprep.mubr.bf16.mxu0 %v5534_v27  ;;  %1987 = vmatprep.mubr.bf16.mxu1 %v5534_v27  ;;  %v4882_v27 = vld [vmem:[#allocation8 + $0x20] ss:$8 sps:$4 sm:$0xff]  }
 0x154   : > { %3297 = vmatpush1.bf16.msra.mxu0 %v4864_v1  ;;  %3490 = vmatpush1.bf16.msra.mxu1 %v4867_v2  ;;  %v4933_v1 = vld [vmem:[#allocation8 + $0x1a0] ss:$8 sps:$4 sm:$0xff]   ;;  %v4938_v2 = vld [vmem:[#allocation8 + $0x94] ss:$8 sps:$4 sm:$0xff]  }
 0x155   : > { %3298 = vmatprep.subr.bf16.mxu0 %v4872_v3  ;;  %3491 = vmatprep.subr.bf16.mxu1 %v4875_v6  ;;  %v4941_v3 = vld [vmem:[#allocation8 + $0x194] ss:$8 sps:$4 sm:$0xff]   ;;  %v4936_v6 = vld [vmem:[#allocation8 + $0x90] ss:$8 sps:$4 sm:$0xff]  }
 0x158   : > { %3299 = vmatpush1.bf16.msra.mxu0 %v4870_v9  ;;  %3492 = vmatpush1.bf16.msra.mxu1 %v4873_v4  ;;  %v4939_v9 = vld [vmem:[#allocation8 + $0x190] ss:$8 sps:$4 sm:$0xff]   ;;  %v4944_v4 = vld [vmem:[#allocation8 + $0x84] ss:$8 sps:$4 sm:$0xff]  }
 0x159   : > { %3300 = vmatprep.subr.bf16.mxu0 %v4878_v5  ;;  %3493 = vmatprep.subr.bf16.mxu1 %v4881_v7  ;;  %v4945_v5 = vld [vmem:[#allocation8 + $0x180] ss:$8 sps:$4 sm:$0xff]   ;;  %v4950_v7 = vld [vmem:[#allocation8 + $0x274] ss:$8 sps:$4 sm:$0xff]  }
 0x15a   : > { %1795 = vmatmul.mubr.bf16.gmra.mxu0 %v5541_v39  ;;  %1988 = vmatmul.mubr.bf16.gmra.mxu1 %v5541_v39  ;;  %v4899_v39 = vld [vmem:[#allocation8 + $0x104] ss:$8 sps:$4 sm:$0xff]  }
 0x15b   : > { %1804 = vmatprep.mubr.bf16.mxu0 %v5544_v43  ;;  %1997 = vmatprep.mubr.bf16.mxu1 %v5544_v43  ;;  %v4894_v43 = vld [vmem:[#allocation8] ss:$8 sps:$4 sm:$0xff]  }
 0x15c   : > { %3301 = vmatpush1.bf16.msra.mxu0 %v4876_v8  ;;  %3494 = vmatpush1.bf16.msra.mxu1 %v4879_v10  ;;  %v4953_v8 = vld [vmem:[#allocation8 + $0x374] ss:$8 sps:$4 sm:$0xff]  }
 0x15d   : > { %3302 = vmatprep.subr.bf16.mxu0 %v4884_v11  ;;  %3495 = vmatprep.subr.bf16.mxu1 %v4887_v22 }
 0x160   : > { %3303 = vmatpush1.bf16.msra.mxu0 %v4882_v27  ;;  %3496 = vmatpush1.bf16.msra.mxu1 %v4885_v12 }
 0x161   : > { %3304 = vmatprep.subr.bf16.mxu0 %v4890_v14  ;;  %3497 = vmatprep.subr.bf16.mxu1 %v4893_v16 }
 0x162   : > { %1805 = vmatmul.mubr.bf16.gmra.mxu0 %v5551_v57  ;;  %1998 = vmatmul.mubr.bf16.gmra.mxu1 %v5551_v57  ;;  %v4911_v57 = vld [vmem:[#allocation8 + $0x1e4] ss:$8 sps:$4 sm:$0xff]  }
 0x163   : > { %1814 = vmatprep.mubr.bf16.mxu0 %v5554_v61  ;;  %2007 = vmatprep.mubr.bf16.mxu1 %v5554_v61  ;;  %v4906_v61 = vld [vmem:[#allocation8 + $0xe0] ss:$8 sps:$4 sm:$0xff]  }
 0x164   : > { %3305 = vmatpush1.bf16.msra.mxu0 %v4888_v18  ;;  %3498 = vmatpush1.bf16.msra.mxu1 %v4891_v19 }
 0x165   : > { %3306 = vmatprep.subr.bf16.mxu0 %v4896_v21  ;;  %3499 = vmatprep.subr.bf16.mxu1 %v4899_v39 }
 0x168   : > { %3307 = vmatpush1.bf16.msra.mxu0 %v4894_v43  ;;  %3500 = vmatpush1.bf16.msra.mxu1 %v4897_v23 }
 0x169   : > { %3308 = vmatprep.subr.bf16.mxu0 %v4902_v24  ;;  %3501 = vmatprep.subr.bf16.mxu1 %v4905_v25 }
 0x16a   : > { %1815 = vmatmul.mubr.bf16.gmra.mxu0 %v5561_v13  ;;  %2008 = vmatmul.mubr.bf16.gmra.mxu1 %v5561_v13  ;;  %v4923_v13 = vld [vmem:[#allocation8 + $0x1c4] ss:$8 sps:$4 sm:$0xff]  }
 0x16b   : > { %1824 = vmatprep.mubr.bf16.mxu0 %v5564_v17  ;;  %2017 = vmatprep.mubr.bf16.mxu1 %v5564_v17  ;;  %v4918_v17 = vld [vmem:[#allocation8 + $0xc0] ss:$8 sps:$4 sm:$0xff]  }
 0x16c   : > { %3309 = vmatpush2.bf16.msra.mxu0 %v4900_v26  ;;  %3502 = vmatpush2.bf16.msra.mxu1 %v4903_v28 }
 0x16d   : > { %3310 = vmatprep.subr.bf16.mxu0 %v4908_v29  ;;  %3503 = vmatprep.subr.bf16.mxu1 %v4911_v57 }
 0x170   : > { %3311 = vmatpush2.bf16.msra.mxu0 %v4906_v61  ;;  %3504 = vmatpush2.bf16.msra.mxu1 %v4909_v30 }
 0x171   : > { %3312 = vmatprep.subr.bf16.mxu0 %v4914_v31  ;;  %3505 = vmatprep.subr.bf16.mxu1 %v4917_v34 }
 0x172   : > { %1825 = vmatmul.mubr.bf16.gmra.mxu0 %v5571_v33  ;;  %2018 = vmatmul.mubr.bf16.gmra.mxu1 %v5571_v33  ;;  %v4935_v33 = vld [vmem:[#allocation8 + $0x1a4] ss:$8 sps:$4 sm:$0xff]  }
 0x173   : > { %1834 = vmatprep.mubr.bf16.mxu0 %v5574_v37  ;;  %2027 = vmatprep.mubr.bf16.mxu1 %v5574_v37  ;;  %v4930_v37 = vld [vmem:[#allocation8 + $0xa0] ss:$8 sps:$4 sm:$0xff]  }
 0x174   : > { %3313 = vmatpush2.bf16.msra.mxu0 %v4912_v52  ;;  %3506 = vmatpush2.bf16.msra.mxu1 %v4915_v54 }
 0x175   : > { %3314 = vmatprep.subr.bf16.mxu0 %v4920_v55  ;;  %3507 = vmatprep.subr.bf16.mxu1 %v4923_v13  ;;  %v516_v55 = vlaneseq }
 0x178   : > { %3315 = vmatpush2.bf16.msra.mxu0 %v4918_v17  ;;  %3508 = vmatpush2.bf16.msra.mxu1 %v4921_v56 }
 0x179   : > { %3316 = vmatprep.subr.bf16.mxu0 %v4926_v59  ;;  %3509 = vmatprep.subr.bf16.mxu1 %v4929_v60  ;;  %v5806_v60 = vshrl.u32 %v516_v55, 7 }
 0x17a   : > { %1835 = vmatmul.mubr.bf16.gmra.mxu0 %v5581_v53  ;;  %2028 = vmatmul.mubr.bf16.gmra.mxu1 %v5581_v53  ;;  %v4947_v53 = vld [vmem:[#allocation8 + $0x184] ss:$8 sps:$4 sm:$0xff]  }
 0x17b   : > { %1844 = vmatprep.mubr.bf16.mxu0 %v5584_v58  ;;  %2037 = vmatprep.mubr.bf16.mxu1 %v5584_v58  ;;  %v4942_v58 = vld [vmem:[#allocation8 + $0x80] ss:$8 sps:$4 sm:$0xff]   ;;  %7279 = vst [vmem:[#allocation18_spill] sm:$0xff] %v5806_v60 }
 0x17c   : > { %3317 = vmatpush2.bf16.msra.mxu0 %v4924_v62  ;;  %3510 = vmatpush2.bf16.msra.mxu1 %v4927_v63  ;;  %v7257_v63 = vsub.s32 1, %v5806_v60 }
 0x17d   : > { %3318 = vmatprep.subr.bf16.mxu0 %v4932_v0  ;;  %3511 = vmatprep.subr.bf16.mxu1 %v4935_v33  ;;  %v530_v0 = vsub.s32 3, %v5806_v60 }
 0x180   : > { %3319 = vmatpush2.bf16.msra.mxu0 %v4930_v37  ;;  %3512 = vmatpush2.bf16.msra.mxu1 %v4933_v1  ;;  %v514_v1 = vld [vmem:[#allocation7] sm:$0xff] }
 0x181   : > { %3320 = vmatprep.subr.bf16.mxu0 %v4938_v2  ;;  %3513 = vmatprep.subr.bf16.mxu1 %v4941_v3  ;;  %v5828_v3 = vrot.slane %v514_v1, %v7257_v63 }
 0x182   : > { %1845 = vmatmul.mubr.bf16.gmra.mxu0 %v5591_v15  ;;  %2038 = vmatmul.mubr.bf16.gmra.mxu1 %v5591_v15 }
 0x183   : > { %1854 = vmatprep.mubr.bf16.mxu0 %v5594_v20  ;;  %2047 = vmatprep.mubr.bf16.mxu1 %v5594_v20 }
 0x184   : > { %3321 = vmatpush2.bf16.msra.mxu0 %v4936_v6  ;;  %3514 = vmatpush2.bf16.msra.mxu1 %v4939_v9 }
 0x185   : > { %3322 = vmatprep.subr.bf16.mxu0 %v4944_v4  ;;  %3515 = vmatprep.subr.bf16.mxu1 %v4947_v53 }
 0x188   : > { %3323 = vmatpush2.bf16.msra.mxu0 %v4942_v58  ;;  %3516 = vmatpush2.bf16.msra.mxu1 %v4945_v5 }
 0x189   : > { %3678 = vmatprep.subr.bf16.mxu0 %v4950_v7  ;;  %3871 = vmatprep.subr.bf16.mxu1 %v4953_v8  ;;  %v526_v7 = vsub.s32 2, %v5806_v60 }
 0x18a   : > { %v5708_v10 = vpop.f32.mrf.mxu0  ;;  %1855 = vmatmul.mubr.bf16.gmra.mxu0 %v5601_v32  ;;  %v5711_v15 = vpop.f32.mrf.mxu1  ;;  %2048 = vmatmul.mubr.bf16.gmra.mxu1 %v5601_v32 }
 0x18b   : > { %1864 = vmatprep.mubr.bf16.mxu0 %v5604_v35  ;;  %2057 = vmatprep.mubr.bf16.mxu1 %v5604_v35 }
 0x18c   : > { %v5715_v20 = vpop.f32.mrf.mxu0  ;;  %v5718_v11 = vpop.f32.mrf.mxu1 }
 0x18d   : > { %v1393_v8 = vadd.f32 %v5715_v20, %v5828_v3 }
 0x18e   : > { %v5720_v22 = vpop.f32.mrf.mxu0  ;;  %v5722_v27 = vpop.f32.mrf.mxu1 }
 0x190   : > { %v5724_v12 = vpop.f32.mrf.mxu0  ;;  %v5726_v14 = vpop.f32.mrf.mxu1 }
 0x191   : > { %v1397_v4 = vadd.f32 %v5724_v12, %v5828_v3 }
 0x192   : > { %v5728_v16 = vpop.f32.mrf.mxu0  ;;  %1865 = vmatmul.mubr.bf16.gmra.mxu0 %v5611_v36  ;;  %v5731_v32 = vpop.f32.mrf.mxu1  ;;  %2058 = vmatmul.mubr.bf16.gmra.mxu1 %v5611_v36 }
 0x193   : > { %1874 = vmatprep.mubr.bf16.mxu0 %v5614_v38  ;;  %2067 = vmatprep.mubr.bf16.mxu1 %v5614_v38 }
 0x194   : > { %v5735_v35 = vpop.f32.mrf.mxu0  ;;  %v5738_v18 = vpop.f32.mrf.mxu1 }
 0x196   : > { %v5740_v19 = vpop.f32.mrf.mxu0  ;;  %v5742_v21 = vpop.f32.mrf.mxu1 }
 0x198   : > { %v5744_v39 = vpop.f32.mrf.mxu0  ;;  %v5746_v43 = vpop.f32.mrf.mxu1 }
 0x19a   : > { %v5748_v23 = vpop.f32.mrf.mxu0  ;;  %1875 = vmatmul.mubr.bf16.gmra.mxu0 %v5621_v40  ;;  %v5751_v36 = vpop.f32.mrf.mxu1  ;;  %2068 = vmatmul.mubr.bf16.gmra.mxu1 %v5621_v40 }
 0x19b   : > { %1884 = vmatprep.mubr.bf16.mxu0 %v5624_v41  ;;  %2077 = vmatprep.mubr.bf16.mxu1 %v5624_v41 }
 0x19c   : > { %v5755_v38 = vpop.f32.mrf.mxu0  ;;  %v5758_v24 = vpop.f32.mrf.mxu1 }
 0x19e   : > { %v5760_v25 = vpop.f32.mrf.mxu0  ;;  %v5762_v26 = vpop.f32.mrf.mxu1 }
 0x1a0   : > { %v5764_v28 = vpop.f32.mrf.mxu0  ;;  %v5766_v29 = vpop.f32.mrf.mxu1 }
 0x1a2   : > { %v5768_v57 = vpop.f32.mrf.mxu0  ;;  %1885 = vmatmul.mubr.bf16.gmra.mxu0 %v5631_v42  ;;  %v5771_v40 = vpop.f32.mrf.mxu1  ;;  %2078 = vmatmul.mubr.bf16.gmra.mxu1 %v5631_v42 }
 0x1a3   : > { %1894 = vmatprep.mubr.bf16.mxu0 %v5634_v44  ;;  %2087 = vmatprep.mubr.bf16.mxu1 %v5634_v44 }
 0x1a4   : > { %v5775_v41 = vpop.f32.mrf.mxu0  ;;  %v5778_v61 = vpop.f32.mrf.mxu1 }
 0x1a6   : > { %v5780_v30 = vpop.f32.mrf.mxu0  ;;  %v5782_v31 = vpop.f32.mrf.mxu1 }
 0x1a8   : > { %v5784_v34 = vpop.f32.mrf.mxu0  ;;  %v5786_v52 = vpop.f32.mrf.mxu1 }
 0x1aa   : > { %v5788_v54 = vpop.f32.mrf.mxu0  ;;  %1895 = vmatmul.mubr.bf16.gmra.mxu0 %v5641_v45  ;;  %v5791_v42 = vpop.f32.mrf.mxu1  ;;  %2088 = vmatmul.mubr.bf16.gmra.mxu1 %v5641_v45 }
 0x1ab   : > { %1904 = vmatprep.mubr.bf16.mxu0 %v5644_v46  ;;  %2097 = vmatprep.mubr.bf16.mxu1 %v5644_v46 }
 0x1ac   : > { %v5795_v44 = vpop.f32.mrf.mxu0  ;;  %v5798_v13 = vpop.f32.mrf.mxu1 }
 0x1ae   : > { %v5800_v17 = vpop.f32.mrf.mxu0  ;;  %v5802_v56 = vpop.f32.mrf.mxu1 }
 0x1b0   : > { %v5804_v59 = vpop.f32.mrf.mxu0  ;;  %v5808_v62 = vpop.f32.mrf.mxu1 }
 0x1b2   : > { %v5810_v45 = vpop.f32.mrf.mxu0  ;;  %1905 = vmatmul.mubr.bf16.gmra.mxu0 %v5651_v47  ;;  %v5814_v46 = vpop.f32.mrf.mxu1  ;;  %2098 = vmatmul.mubr.bf16.gmra.mxu1 %v5651_v47  ;;  %v5832_v47 = vrot.slane %v514_v1, %v530_v0 }
 0x1b3   : > { %7280 = vst [vmem:[#allocation19_spill] sm:$0xff] %v5814_v46  ;;  %1914 = vmatprep.mubr.bf16.mxu0 %v5654_v48  ;;  %2107 = vmatprep.mubr.bf16.mxu1 %v5654_v48  ;;  %v7258_v48 = vsub.s32 0, %v5806_v60  ;;  %v2129_v46 = vmax.f32 %v1393_v8, 0.0 }
 0x1b4   : > { %v5819_v33 = vpop.f32.mrf.mxu0  ;;  %v5822_v37 = vpop.f32.mrf.mxu1  ;;  %v1590_v58 = vadd.f32 %v5726_v14, %v5832_v47  ;;  %v1586_v12 = vadd.f32 %v5718_v11, %v5832_v47  ;;  %v2137_v14 = vmax.f32 %v1397_v4, 0.0 }
 0x1b6   : > { %v5824_v2 = vpop.f32.mrf.mxu0  ;;  %v5830_v6 = vpop.f32.mrf.mxu1  ;;  %v2139_v20 = vmax.f32 %v1590_v58, 0.0  ;;  %v2131_v11 = vmax.f32 %v1586_v12, 0.0  ;;  %v2385_v60 = vpack.c.bf16 %v2137_v14, %v2129_v46 }
 0x1b7   : > { %7281 = vst [vmem:[#allocation20_spill] sm:$0xff] %v5830_v6 }
 0x1b8   : > { %v5834_v9 = vpop.f32.mrf.mxu0  ;;  %v5838_v53 = vpop.f32.mrf.mxu1 }
 0x1ba   : > { %v5843_v5 = vpop.f32.mrf.mxu0  ;;  %1915 = vmatmul.mubr.bf16.gmra.mxu0 %v5661_v49  ;;  %v5849_v55 = vpop.f32.mrf.mxu1  ;;  %2108 = vmatmul.mubr.bf16.gmra.mxu1 %v5661_v49  ;;  %v5866_v49 = vrot.slane %v514_v1, %v526_v7  ;;  %v1600_v7 = vadd.f32 %v5746_v43, %v5832_v47  ;;  %v1596_v43 = vadd.f32 %v5738_v18, %v5832_v47 }
 0x1bb   : > { %7282 = vst [vmem:[#allocation21_spill] sm:$0xff] %v5843_v5  ;;  %7283 = vst [vmem:[#allocation22_spill] sm:$0xff] %v5849_v55  ;;  %1924 = vmatprep.mubr.bf16.mxu0 %v5664_v50  ;;  %2117 = vmatprep.mubr.bf16.mxu1 %v5664_v50  ;;  %v5862_v5 = vrot.slane %v514_v1, %v7258_v48  ;;  %v1407_v48 = vadd.f32 %v5744_v39, %v5828_v3 }
 0x1bc   : > { %v5855_v0 = vpop.f32.mrf.mxu0  ;;  %v5858_v63 = vpop.f32.mrf.mxu1  ;;  %v1588_v4 = vadd.f32 %v5722_v27, %v5866_v49  ;;  %v1584_v27 = vadd.f32 %v5711_v15, %v5866_v49  ;;  %v1403_v39 = vadd.f32 %v5735_v35, %v5828_v3 }
 0x1bd   : > { %7284 = vst [vmem:[#allocation23_spill] sm:$0xff] %v5855_v0  ;;  %v1395_v0 = vadd.f32 %v5720_v22, %v5862_v5  ;;  %v1391_v1 = vadd.f32 %v5708_v10, %v5862_v5  ;;  %v2387_v22 = vpack.c.bf16 %v2139_v20, %v2131_v11  ;;  %v2153_v20 = vmax.f32 %v1407_v48, 0.0  ;;  %v4948_v48 = vld [vmem:[#allocation8 + $0x270] ss:$8 sps:$4 sm:$0xff]  }
 0x1be   : > { %v5864_v55 = vpop.f32.mrf.mxu0  ;;  %v5868_v6 = vpop.f32.mrf.mxu1  ;;  %v2138_v14 = vmax.f32 %v1588_v4, 0.0  ;;  %v2130_v35 = vmax.f32 %v1584_v27, 0.0  ;;  %v1405_v18 = vadd.f32 %v5740_v19, %v5862_v5  ;;  %v1594_v19 = vadd.f32 %v5731_v32, %v5866_v49 }
 0x1bf   : > { %7285 = vst [vmem:[#allocation24_spill] sm:$0xff] %v5864_v55  ;;  %7286 = vst [vmem:[#allocation25_spill] sm:$0xff] %v5868_v6  ;;  %v2136_v10 = vmax.f32 %v1395_v0, 0.0  ;;  %v2128_v15 = vmax.f32 %v1391_v1, 0.0  ;;  %v1598_v0 = vadd.f32 %v5742_v21, %v5866_v49  ;;  %v1417_v1 = vadd.f32 %v5764_v28, %v5828_v3 }
 0x1c0   : > { %v5872_v50 = vpop.f32.mrf.mxu0  ;;  %v5878_v58 = vpop.f32.mrf.mxu1  ;;  %v1610_v21 = vadd.f32 %v5766_v29, %v5832_v47  ;;  %v1413_v28 = vadd.f32 %v5755_v38, %v5828_v3  ;;  %v1606_v32 = vadd.f32 %v5758_v24, %v5832_v47  ;;  %v4957_v38 = vld [vmem:[#allocation8 + $0x360] ss:$8 sps:$4 sm:$0xff]  }
 0x1c2   : > { %v5884_v8 = vpop.f32.mrf.mxu0  ;;  %1925 = vmatmul.mubr.bf16.gmra.mxu0 %v5671_v51  ;;  %v5891_v12 = vpop.f32.mrf.mxu1  ;;  %2118 = vmatmul.mubr.bf16.gmra.mxu1 %v5671_v51  ;;  %v2384_v51 = vpack.c.bf16 %v2136_v10, %v2128_v15  ;;  %v1401_v10 = vadd.f32 %v5728_v16, %v5862_v5  ;;  %v4959_v15 = vld [vmem:[#allocation8 + $0x364] ss:$8 sps:$4 sm:$0xff]   ;;  %v2154_v16 = vmax.f32 %v1598_v0, 0.0  ;;  %v4965_v0 = vld [vmem:[#allocation8 + $0x354] ss:$8 sps:$4 sm:$0xff]   ;;  %v2161_v24 = vmax.f32 %v1413_v28, 0.0 }
 0x1c3   : > { %7287 = vst [vmem:[#allocation26_spill] sm:$0xff] %v5884_v8  ;;  %7288 = vst [vmem:[#allocation27_spill] sm:$0xff] %v5891_v12  ;;  %3324 = vmatprep.mubr.bf16.mxu0 %v2385_v60  ;;  %3517 = vmatprep.mubr.bf16.mxu1 %v2387_v22  ;;  %v2155_v8 = vmax.f32 %v1600_v7, 0.0  ;;  %v2145_v12 = vmax.f32 %v1403_v39, 0.0  ;;  %v2147_v60 = vmax.f32 %v1596_v43, 0.0  ;;  %v2386_v22 = vpack.c.bf16 %v2138_v14, %v2130_v35 }
 0x1c4   : > { %v5896_v46 = vpop.f32.mrf.mxu0  ;;  %v5898_v11 = vpop.f32.mrf.mxu1  ;;  %v4951_v39 = vld [vmem:[#allocation8 + $0x370] ss:$8 sps:$4 sm:$0xff]   ;;  %v4954_v35 = vld [vmem:[#allocation8 + $0x260] ss:$8 sps:$4 sm:$0xff]  }
 0x1c5   : > { %v2393_v27 = vpack.c.bf16 %v2153_v20, %v2145_v12  ;;  %v2395_v14 = vpack.c.bf16 %v2155_v8, %v2147_v60  ;;  %v2152_v20 = vmax.f32 %v1405_v18, 0.0  ;;  %v4962_v60 = vld [vmem:[#allocation8 + $0x254] ss:$8 sps:$4 sm:$0xff]   ;;  %v4963_v28 = vld [vmem:[#allocation8 + $0x350] ss:$8 sps:$4 sm:$0xff]  }
 0x1c6   : > { %v5900_v6 = vpop.f32.mrf.mxu0  ;;  %v5902_v55 = vpop.f32.mrf.mxu1 }
 0x1c7   : > { %7289 = vst [vmem:[#allocation28_spill] sm:$0xff] %v5902_v55  ;;  %v4956_v55 = vld [vmem:[#allocation8 + $0x264] ss:$8 sps:$4 sm:$0xff]  }
 0x1c8   : > { %v5908_v4 = vpop.f32.mrf.mxu0  ;;  %v5912_v7 = vpop.f32.mrf.mxu1 }
 0x1ca   : > { %v5920_v43 = vpop.f32.mrf.mxu0  ;;  %3325 = vmatmul.mubr.bf16.vlgmr.msra.gmra.mxu0 %v2384_v51  ;;  %v5924_v12 = vpop.f32.mrf.mxu1  ;;  %3518 = vmatmul.mubr.bf16.vlgmr.msra.gmra.mxu1 %v2386_v22  ;;  %v2169_v51 = vmax.f32 %v1417_v1, 0.0  ;;  %v2146_v22 = vmax.f32 %v1594_v19, 0.0  ;;  %v1608_v19 = vadd.f32 %v5762_v26, %v5866_v49  ;;  %v1604_v26 = vadd.f32 %v5751_v36, %v5866_v49 }
 0x1cb   : > { %7290 = vst [vmem:[#allocation29_spill] sm:$0xff] %v5920_v43  ;;  %7291 = vst [vmem:[#allocation30_spill] sm:$0xff] %v5924_v12  ;;  %3334 = vmatprep.mubr.bf16.mxu0 %v2393_v27  ;;  %3527 = vmatprep.mubr.bf16.mxu1 %v2395_v14  ;;  %v2144_v12 = vmax.f32 %v1401_v10, 0.0  ;;  %v2171_v27 = vmax.f32 %v1610_v21, 0.0  ;;  %v4960_v10 = vld [vmem:[#allocation8 + $0x250] ss:$8 sps:$4 sm:$0xff]   ;;  %v1427_v21 = vadd.f32 %v5784_v34, %v5828_v3 }
 0x1cc   : > { %3679 = vmatpush1.bf16.msra.mxu0 %v4948_v48  ;;  %v5928_v29 = vpop.f32.mrf.mxu0  ;;  %v5930_v8 = vpop.f32.mrf.mxu1  ;;  %3872 = vmatpush1.bf16.msra.mxu1 %v4951_v39  ;;  %v1415_v48 = vadd.f32 %v5760_v25, %v5862_v5  ;;  %v2394_v43 = vpack.c.bf16 %v2154_v16, %v2146_v22  ;;  %v2163_v39 = vmax.f32 %v1606_v32, 0.0  ;;  %v2401_v25 = vpack.c.bf16 %v2169_v51, %v2161_v24  ;;  %v4971_v32 = vld [vmem:[#allocation8 + $0x344] ss:$8 sps:$4 sm:$0xff]   ;;  %v4969_v22 = vld [vmem:[#allocation8 + $0x340] ss:$8 sps:$4 sm:$0xff]  }
 0x1cd   : > { %7292 = vst [vmem:[#allocation31_spill] sm:$0xff] %v5930_v8  ;;  %3680 = vmatprep.subr.bf16.mxu0 %v4956_v55  ;;  %3873 = vmatprep.subr.bf16.mxu1 %v4959_v15  ;;  %v2392_v1 = vpack.c.bf16 %v2152_v20, %v2144_v12  ;;  %v1411_v55 = vadd.f32 %v5748_v23, %v5862_v5  ;;  %v4968_v12 = vld [vmem:[#allocation8 + $0x244] ss:$8 sps:$4 sm:$0xff]   ;;  %v2185_v36 = vmax.f32 %v1427_v21, 0.0 }
 0x1ce   : > { %v5932_v18 = vpop.f32.mrf.mxu0  ;;  %v5936_v14 = vpop.f32.mrf.mxu1  ;;  %v1620_v23 = vadd.f32 %v5786_v52, %v5832_v47  ;;  %v2403_v16 = vpack.c.bf16 %v2171_v27, %v2163_v39  ;;  %v2168_v34 = vmax.f32 %v1415_v48, 0.0  ;;  %v1616_v52 = vadd.f32 %v5778_v61, %v5832_v47 }
 0x1cf   : > { %v2160_v27 = vmax.f32 %v1411_v55, 0.0  ;;  %v2162_v61 = vmax.f32 %v1604_v26, 0.0  ;;  %v1421_v55 = vadd.f32 %v5768_v57, %v5862_v5  ;;  %v1618_v21 = vadd.f32 %v5782_v31, %v5866_v49  ;;  %v4975_v57 = vld [vmem:[#allocation8 + $0x330] ss:$8 sps:$4 sm:$0xff]  }
 0x1d0   : > { %v5940_v8 = vpop.f32.mrf.mxu0  ;;  %3681 = vmatpush1.bf16.msra.mxu0 %v4954_v35  ;;  %v5946_v15 = vpop.f32.mrf.mxu1  ;;  %3874 = vmatpush1.bf16.msra.mxu1 %v4957_v38  ;;  %v1423_v35 = vadd.f32 %v5775_v41, %v5828_v3  ;;  %v4974_v41 = vld [vmem:[#allocation8 + $0x234] ss:$8 sps:$4 sm:$0xff]   ;;  %v2187_v48 = vmax.f32 %v1620_v23, 0.0  ;;  %v1630_v31 = vadd.f32 %v5808_v62, %v5832_v47 }
 0x1d1   : > { %3682 = vmatprep.subr.bf16.mxu0 %v4962_v60  ;;  %3875 = vmatprep.subr.bf16.mxu1 %v4965_v0  ;;  %v4966_v60 = vld [vmem:[#allocation8 + $0x240] ss:$8 sps:$4 sm:$0xff]   ;;  %v2170_v0 = vmax.f32 %v1608_v19, 0.0  ;;  %v2400_v39 = vpack.c.bf16 %v2168_v34, %v2160_v27  ;;  %v1425_v19 = vadd.f32 %v5780_v30, %v5862_v5  ;;  %v1614_v30 = vadd.f32 %v5771_v40, %v5866_v49  ;;  %v4983_v27 = vld [vmem:[#allocation8 + $0x324] ss:$8 sps:$4 sm:$0xff]  }
 0x1d2   : > { %v5950_v20 = vpop.f32.mrf.mxu0  ;;  %3335 = vmatmul.mubr.bf16.gmra.mxu0 %v2392_v1  ;;  %v5956_v51 = vpop.f32.mrf.mxu1  ;;  %3528 = vmatmul.mubr.bf16.gmra.mxu1 %v2394_v43  ;;  %v4977_v1 = vld [vmem:[#allocation8 + $0x334] ss:$8 sps:$4 sm:$0xff]   ;;  %v1626_v40 = vadd.f32 %v5798_v13, %v5832_v47 }
 0x1d3   : > { %3344 = vmatprep.mubr.bf16.mxu0 %v2401_v25  ;;  %3537 = vmatprep.mubr.bf16.mxu1 %v2403_v16  ;;  %v2177_v25 = vmax.f32 %v1423_v35, 0.0  ;;  %v2402_v23 = vpack.c.bf16 %v2170_v0, %v2162_v61  ;;  %v4980_v35 = vld [vmem:[#allocation8 + $0x224] ss:$8 sps:$4 sm:$0xff]   ;;  %v4986_v61 = vld [vmem:[#allocation8 + $0x214] ss:$8 sps:$4 sm:$0xff]  }
 0x1d4   : > { %v5960_v38 = vpop.f32.mrf.mxu0  ;;  %3683 = vmatpush1.bf16.msra.mxu0 %v4960_v10  ;;  %v5962_v24 = vpop.f32.mrf.mxu1  ;;  %3876 = vmatpush1.bf16.msra.mxu1 %v4963_v28  ;;  %v2179_v10 = vmax.f32 %v1616_v52, 0.0 }
 0x1d5   : > { %3684 = vmatprep.subr.bf16.mxu0 %v4968_v12  ;;  %3877 = vmatprep.subr.bf16.mxu1 %v4971_v32  ;;  %v4972_v12 = vld [vmem:[#allocation8 + $0x230] ss:$8 sps:$4 sm:$0xff]   ;;  %v1437_v32 = vadd.f32 %v5804_v59, %v5828_v3  ;;  %v2409_v34 = vpack.c.bf16 %v2185_v36, %v2177_v25  ;;  %v1433_v59 = vadd.f32 %v5795_v44, %v5828_v3  ;;  %v2186_v36 = vmax.f32 %v1618_v21, 0.0  ;;  %v4981_v44 = vld [vmem:[#allocation8 + $0x320] ss:$8 sps:$4 sm:$0xff]  }
 0x1d6   : > { %v5964_v43 = vpop.f32.mrf.mxu0  ;;  %v5966_v16 = vpop.f32.mrf.mxu1  ;;  %v2178_v25 = vmax.f32 %v1614_v30, 0.0  ;;  %v4989_v21 = vld [vmem:[#allocation8 + $0x314] ss:$8 sps:$4 sm:$0xff]   ;;  %v1628_v30 = vadd.f32 %v5802_v56, %v5866_v49  ;;  %v1624_v56 = vadd.f32 %v5791_v42, %v5866_v49 }
 0x1d7   : > { %v2193_v13 = vmax.f32 %v1433_v59, 0.0  ;;  %v4987_v59 = vld [vmem:[#allocation8 + $0x310] ss:$8 sps:$4 sm:$0xff]  }
 0x1d8   : > { %v5974_v28 = vpop.f32.mrf.mxu0  ;;  %3685 = vmatpush1.bf16.msra.mxu0 %v4966_v60  ;;  %v5978_v26 = vpop.f32.mrf.mxu1  ;;  %3878 = vmatpush1.bf16.msra.mxu1 %v4969_v22  ;;  %v2411_v60 = vpack.c.bf16 %v2187_v48, %v2179_v10  ;;  %v2184_v22 = vmax.f32 %v1425_v19, 0.0  ;;  %v2201_v48 = vmax.f32 %v1437_v32, 0.0  ;;  %v2203_v10 = vmax.f32 %v1630_v31, 0.0 }
 0x1d9   : > { %3686 = vmatprep.subr.bf16.mxu0 %v4974_v41  ;;  %3879 = vmatprep.subr.bf16.mxu1 %v4977_v1  ;;  %v4978_v41 = vld [vmem:[#allocation8 + $0x220] ss:$8 sps:$4 sm:$0xff]   ;;  %v1447_v31 = vadd.f32 %v5834_v9, %v5828_v3 }
 0x1da   : > { %v5984_v52 = vpop.f32.mrf.mxu0  ;;  %3345 = vmatmul.mubr.bf16.gmra.mxu0 %v2400_v39  ;;  %v5988_v0 = vpop.f32.mrf.mxu1  ;;  %3538 = vmatmul.mubr.bf16.gmra.mxu1 %v2402_v23  ;;  %v2176_v39 = vmax.f32 %v1421_v55, 0.0  ;;  %v1435_v23 = vadd.f32 %v5800_v17, %v5862_v5  ;;  %v4984_v55 = vld [vmem:[#allocation8 + $0x210] ss:$8 sps:$4 sm:$0xff]   ;;  %v2417_v17 = vpack.c.bf16 %v2201_v48, %v2193_v13  ;;  %v1443_v48 = vadd.f32 %v5819_v33, %v5828_v3  ;;  %v4998_v33 = vld [vmem:[#allocation8 + $0x2f4] ss:$8 sps:$4 sm:$0xff]  }
 0x1db   : > { %3354 = vmatprep.mubr.bf16.mxu0 %v2409_v34  ;;  %3547 = vmatprep.mubr.bf16.mxu1 %v2411_v60  ;;  %v2410_v34 = vpack.c.bf16 %v2186_v36, %v2178_v25  ;;  %v4993_v25 = vld [vmem:[#allocation8 + $0x300] ss:$8 sps:$4 sm:$0xff]   ;;  %v2217_v42 = vmax.f32 %v1447_v31, 0.0  ;;  %v7294_v31 = vld [vmem:[#allocation20_spill] sm:$0xff] }
 0x1dc   : > { %v5992_v62 = vpop.f32.mrf.mxu0  ;;  %3687 = vmatpush1.bf16.msra.mxu0 %v4972_v12  ;;  %v5994_v1 = vpop.f32.mrf.mxu1  ;;  %3880 = vmatpush1.bf16.msra.mxu1 %v4975_v57  ;;  %v2408_v32 = vpack.c.bf16 %v2184_v22, %v2176_v39  ;;  %v1431_v57 = vadd.f32 %v5788_v54, %v5862_v5  ;;  %v4992_v22 = vld [vmem:[#allocation8 + $0x204] ss:$8 sps:$4 sm:$0xff]   ;;  %v1640_v54 = vadd.f32 %v5838_v53, %v5832_v47  ;;  %v2200_v9 = vmax.f32 %v1435_v23, 0.0  ;;  %v4990_v39 = vld [vmem:[#allocation8 + $0x200] ss:$8 sps:$4 sm:$0xff]  }
 0x1dd   : > { %3688 = vmatprep.subr.bf16.mxu0 %v4980_v35  ;;  %3881 = vmatprep.subr.bf16.mxu1 %v4983_v27  ;;  %v2195_v35 = vmax.f32 %v1626_v40, 0.0  ;;  %v1636_v53 = vadd.f32 %v5822_v37, %v5832_v47  ;;  %v2194_v37 = vmax.f32 %v1624_v56, 0.0  ;;  %v1457_v56 = vadd.f32 %v5872_v50, %v5828_v3  ;;  %v7297_v50 = vld [vmem:[#allocation23_spill] sm:$0xff] }
 0x1de   : > { %v5996_v19 = vpop.f32.mrf.mxu0  ;;  %v6000_v12 = vpop.f32.mrf.mxu1  ;;  %v2219_v23 = vmax.f32 %v1640_v54, 0.0  ;;  %v4996_v54 = vld [vmem:[#allocation8 + $0x2f0] ss:$8 sps:$4 sm:$0xff]  }
 0x1df   : > { %v2419_v40 = vpack.c.bf16 %v2203_v10, %v2195_v35  ;;  %v2192_v10 = vmax.f32 %v1431_v57, 0.0  ;;  %v1441_v57 = vadd.f32 %v5810_v45, %v5862_v5  ;;  %v4999_v45 = vld [vmem:[#allocation8 + $0x3f0] ss:$8 sps:$4 sm:$0xff]  }
 0x1e0   : > { %v6004_v60 = vpop.f32.mrf.mxu0  ;;  %3689 = vmatpush1.bf16.msra.mxu0 %v4978_v41  ;;  %v6010_v27 = vpop.f32.mrf.mxu1  ;;  %3882 = vmatpush1.bf16.msra.mxu1 %v4981_v44  ;;  %v4995_v41 = vld [vmem:[#allocation8 + $0x304] ss:$8 sps:$4 sm:$0xff]  }
 0x1e1   : > { %3690 = vmatprep.subr.bf16.mxu0 %v4986_v61  ;;  %3883 = vmatprep.subr.bf16.mxu1 %v4989_v21  ;;  %v2202_v21 = vmax.f32 %v1628_v30, 0.0  ;;  %v2416_v35 = vpack.c.bf16 %v2200_v9, %v2192_v10  ;;  %v1445_v30 = vadd.f32 %v5824_v2, %v5862_v5  ;;  %v7295_v2 = vld [vmem:[#allocation19_spill] sm:$0xff] }
 0x1e2   : > { %v6014_v36 = vpop.f32.mrf.mxu0  ;;  %3355 = vmatmul.mubr.bf16.gmra.mxu0 %v2408_v32  ;;  %v6020_v44 = vpop.f32.mrf.mxu1  ;;  %3548 = vmatmul.mubr.bf16.gmra.mxu1 %v2410_v34  ;;  %v5001_v34 = vld [vmem:[#allocation8 + $0x3f4] ss:$8 sps:$4 sm:$0xff]   ;;  %v1634_v10 = vadd.f32 %v7295_v2, %v5866_v49 }
 0x1e3   : > { %7293 = vst [vmem:[#allocation32_spill] sm:$0xff] %v6020_v44  ;;  %3364 = vmatprep.mubr.bf16.mxu0 %v2417_v17  ;;  %3557 = vmatprep.mubr.bf16.mxu1 %v2419_v40  ;;  %v2209_v17 = vmax.f32 %v1443_v48, 0.0  ;;  %v5010_v2 = vld [vmem:[#allocation8 + $0x2d4] ss:$8 sps:$4 sm:$0xff]  }
 0x1e4   : > { %v6024_v61 = vpop.f32.mrf.mxu0  ;;  %3691 = vmatpush1.bf16.msra.mxu0 %v4984_v55  ;;  %v6026_v13 = vpop.f32.mrf.mxu1  ;;  %3884 = vmatpush1.bf16.msra.mxu1 %v4987_v59  ;;  %v2211_v55 = vmax.f32 %v1636_v53, 0.0  ;;  %v1638_v59 = vadd.f32 %v7294_v31, %v5866_v49  ;;  %v5004_v53 = vld [vmem:[#allocation8 + $0x2e4] ss:$8 sps:$4 sm:$0xff]   ;;  %v1650_v31 = vadd.f32 %v5878_v58, %v5832_v47 }
 0x1e5   : > { %3692 = vmatprep.subr.bf16.mxu0 %v4992_v22  ;;  %3885 = vmatprep.subr.bf16.mxu1 %v4995_v41  ;;  %v2418_v41 = vpack.c.bf16 %v2202_v21, %v2194_v37  ;;  %v2425_v48 = vpack.c.bf16 %v2217_v42, %v2209_v17  ;;  %v5007_v21 = vld [vmem:[#allocation8 + $0x3e4] ss:$8 sps:$4 sm:$0xff]   ;;  %v1453_v37 = vadd.f32 %v7297_v50, %v5828_v3  ;;  %v2208_v50 = vmax.f32 %v1441_v57, 0.0  ;;  %v5008_v57 = vld [vmem:[#allocation8 + $0x2d0] ss:$8 sps:$4 sm:$0xff]  }
 0x1e6   : > { %v6028_v32 = vpop.f32.mrf.mxu0  ;;  %v6030_v40 = vpop.f32.mrf.mxu1  ;;  %v1646_v17 = vadd.f32 %v5858_v63, %v5832_v47 }
 0x1e7   : > { %v2225_v63 = vmax.f32 %v1453_v37, 0.0 }
 0x1e8   : > { %v6038_v22 = vpop.f32.mrf.mxu0  ;;  %3693 = vmatpush1.bf16.msra.mxu0 %v4990_v39  ;;  %v6042_v9 = vpop.f32.mrf.mxu1  ;;  %3886 = vmatpush1.bf16.msra.mxu1 %v4993_v25  ;;  %v2427_v39 = vpack.c.bf16 %v2219_v23, %v2211_v55  ;;  %v2216_v25 = vmax.f32 %v1445_v30, 0.0  ;;  %v2233_v23 = vmax.f32 %v1457_v56, 0.0  ;;  %v5005_v55 = vld [vmem:[#allocation8 + $0x3e0] ss:$8 sps:$4 sm:$0xff]  }
 0x1e9   : > { %3694 = vmatprep.subr.bf16.mxu0 %v4998_v33  ;;  %3887 = vmatprep.subr.bf16.mxu1 %v5001_v34  ;;  %v2218_v33 = vmax.f32 %v1638_v59, 0.0  ;;  %v5013_v59 = vld [vmem:[#allocation8 + $0x3d4] ss:$8 sps:$4 sm:$0xff]  }
 0x1ea   : > { %v6048_v44 = vpop.f32.mrf.mxu0  ;;  %3365 = vmatmul.mubr.bf16.gmra.mxu0 %v2416_v35  ;;  %v6052_v42 = vpop.f32.mrf.mxu1  ;;  %3558 = vmatmul.mubr.bf16.gmra.mxu1 %v2418_v41  ;;  %v5002_v35 = vld [vmem:[#allocation8 + $0x2e0] ss:$8 sps:$4 sm:$0xff]   ;;  %v2210_v41 = vmax.f32 %v1634_v10, 0.0  ;;  %v2424_v56 = vpack.c.bf16 %v2216_v25, %v2208_v50  ;;  %v7303_v10 = vld [vmem:[#allocation25_spill] sm:$0xff] }
 0x1eb   : > { %7296 = vst [vmem:[#allocation20_spill] sm:$0xff] %v6048_v44  ;;  %7298 = vst [vmem:[#allocation19_spill] sm:$0xff] %v6052_v42  ;;  %3374 = vmatprep.mubr.bf16.mxu0 %v2425_v48  ;;  %3567 = vmatprep.mubr.bf16.mxu1 %v2427_v39  ;;  %v2235_v48 = vmax.f32 %v1650_v31, 0.0  ;;  %v7301_v39 = vld [vmem:[#allocation24_spill] sm:$0xff]  ;;  %v1648_v31 = vadd.f32 %v7303_v10, %v5866_v49 }
 0x1ec   : > { %v6056_v58 = vpop.f32.mrf.mxu0  ;;  %3695 = vmatpush2.bf16.msra.mxu0 %v4996_v54  ;;  %v6058_v34 = vpop.f32.mrf.mxu1  ;;  %3888 = vmatpush2.bf16.msra.mxu1 %v4999_v45  ;;  %v1455_v42 = vadd.f32 %v7301_v39, %v5862_v5  ;;  %v2426_v44 = vpack.c.bf16 %v2218_v33, %v2210_v41  ;;  %v7302_v45 = vld [vmem:[#allocation21_spill] sm:$0xff]  ;;  %v2433_v39 = vpack.c.bf16 %v2233_v23, %v2225_v63  ;;  %v5016_v33 = vld [vmem:[#allocation8 + $0x2c4] ss:$8 sps:$4 sm:$0xff]  }
 0x1ed   : > { %7299 = vst [vmem:[#allocation23_spill] sm:$0xff] %v6056_v58  ;;  %7300 = vst [vmem:[#allocation33_spill] sm:$0xff] %v6058_v34  ;;  %3696 = vmatprep.subr.bf16.mxu0 %v5004_v53  ;;  %3889 = vmatprep.subr.bf16.mxu1 %v5007_v21  ;;  %v1451_v53 = vadd.f32 %v7302_v45, %v5862_v5  ;;  %v2227_v34 = vmax.f32 %v1646_v17, 0.0  ;;  %v1467_v21 = vadd.f32 %v5908_v4, %v5828_v3  ;;  %v5011_v25 = vld [vmem:[#allocation8 + $0x3d0] ss:$8 sps:$4 sm:$0xff]   ;;  %v7305_v45 = vld [vmem:[#allocation22_spill] sm:$0xff] }
 0x1ee   : > { %v6060_v30 = vpop.f32.mrf.mxu0  ;;  %v6064_v54 = vpop.f32.mrf.mxu1  ;;  %v1660_v17 = vadd.f32 %v5912_v7, %v5832_v47  ;;  %v5019_v41 = vld [vmem:[#allocation8 + $0x3c4] ss:$8 sps:$4 sm:$0xff]   ;;  %v1644_v10 = vadd.f32 %v7305_v45, %v5866_v49  ;;  %v2232_v4 = vmax.f32 %v1455_v42, 0.0  ;;  %v1463_v23 = vadd.f32 %v5896_v46, %v5828_v3  ;;  %v5022_v46 = vld [vmem:[#allocation8 + $0x2b4] ss:$8 sps:$4 sm:$0xff]  }
 0x1ef   : > { %v1656_v7 = vadd.f32 %v5898_v11, %v5832_v47  ;;  %v2234_v63 = vmax.f32 %v1648_v31, 0.0 }
 0x1f0   : > { %v6068_v58 = vpop.f32.mrf.mxu0  ;;  %3697 = vmatpush2.bf16.msra.mxu0 %v5002_v35  ;;  %v6074_v37 = vpop.f32.mrf.mxu1  ;;  %3890 = vmatpush2.bf16.msra.mxu1 %v5005_v55  ;;  %v2435_v35 = vpack.c.bf16 %v2235_v48, %v2227_v34  ;;  %v5014_v34 = vld [vmem:[#allocation8 + $0x2c0] ss:$8 sps:$4 sm:$0xff]   ;;  %v2251_v45 = vmax.f32 %v1660_v17, 0.0  ;;  %v2226_v11 = vmax.f32 %v1644_v10, 0.0  ;;  %v1477_v10 = vadd.f32 %v5940_v8, %v5828_v3 }
 0x1f1   : > { %3698 = vmatprep.subr.bf16.mxu0 %v5010_v2  ;;  %3891 = vmatprep.subr.bf16.mxu1 %v5013_v59  ;;  %v5017_v48 = vld [vmem:[#allocation8 + $0x3c0] ss:$8 sps:$4 sm:$0xff]   ;;  %v2224_v59 = vmax.f32 %v1451_v53, 0.0  ;;  %v2243_v31 = vmax.f32 %v1656_v7, 0.0  ;;  %v5023_v7 = vld [vmem:[#allocation8 + $0x3b0] ss:$8 sps:$4 sm:$0xff]   ;;  %v1473_v8 = vadd.f32 %v5928_v29, %v5828_v3 }
 0x1f2   : > { %v6078_v50 = vpop.f32.mrf.mxu0  ;;  %3375 = vmatmul.mubr.bf16.gmra.mxu0 %v2424_v56  ;;  %v6084_v55 = vpop.f32.mrf.mxu1  ;;  %3568 = vmatmul.mubr.bf16.gmra.mxu1 %v2426_v44  ;;  %v2249_v56 = vmax.f32 %v1467_v21, 0.0  ;;  %v1465_v21 = vadd.f32 %v5900_v6, %v5862_v5  ;;  %v7311_v6 = vld [vmem:[#allocation27_spill] sm:$0xff] }
 0x1f3   : > { %7304 = vst [vmem:[#allocation24_spill] sm:$0xff] %v6078_v50  ;;  %7306 = vst [vmem:[#allocation21_spill] sm:$0xff] %v6084_v55  ;;  %3384 = vmatprep.mubr.bf16.mxu0 %v2433_v39  ;;  %3577 = vmatprep.mubr.bf16.mxu1 %v2435_v35  ;;  %v5025_v39 = vld [vmem:[#allocation8 + $0x3b4] ss:$8 sps:$4 sm:$0xff]   ;;  %v2432_v35 = vpack.c.bf16 %v2232_v4, %v2224_v59  ;;  %v2241_v55 = vmax.f32 %v1463_v23, 0.0 }
 0x1f4   : > { %v6088_v2 = vpop.f32.mrf.mxu0  ;;  %3699 = vmatpush2.bf16.msra.mxu0 %v5008_v57  ;;  %v6090_v42 = vpop.f32.mrf.mxu1  ;;  %3892 = vmatpush2.bf16.msra.mxu1 %v5011_v25  ;;  %v7309_v57 = vld [vmem:[#allocation26_spill] sm:$0xff]  ;;  %v7310_v25 = vld [vmem:[#allocation28_spill] sm:$0xff] }
 0x1f5   : > { %3700 = vmatprep.subr.bf16.mxu0 %v5016_v33  ;;  %3893 = vmatprep.subr.bf16.mxu1 %v5019_v41  ;;  %v1461_v53 = vadd.f32 %v7309_v57, %v5862_v5  ;;  %v1658_v33 = vadd.f32 %v7310_v25, %v5866_v49  ;;  %v5020_v41 = vld [vmem:[#allocation8 + $0x2b0] ss:$8 sps:$4 sm:$0xff]   ;;  %v2441_v23 = vpack.c.bf16 %v2249_v56, %v2241_v55  ;;  %v5028_v59 = vld [vmem:[#allocation8 + $0x2a4] ss:$8 sps:$4 sm:$0xff]   ;;  %v5029_v29 = vld [vmem:[#allocation8 + $0x3a0] ss:$8 sps:$4 sm:$0xff]  }
 0x1f6   : > { %v6092_v44 = vpop.f32.mrf.mxu0  ;;  %v6094_v50 = vpop.f32.mrf.mxu1  ;;  %v1654_v57 = vadd.f32 %v7311_v6, %v5866_v49  ;;  %v1670_v25 = vadd.f32 %v5946_v15, %v5832_v47 }
 0x1f7   : > { %7307 = vst [vmem:[#allocation25_spill] sm:$0xff] %v6092_v44  ;;  %7308 = vst [vmem:[#allocation22_spill] sm:$0xff] %v6094_v50  ;;  %v2434_v44 = vpack.c.bf16 %v2234_v63, %v2226_v11  ;;  %v5031_v63 = vld [vmem:[#allocation8 + $0x3a4] ss:$8 sps:$4 sm:$0xff]   ;;  %v2250_v56 = vmax.f32 %v1658_v33, 0.0  ;;  %v2240_v6 = vmax.f32 %v1461_v53, 0.0  ;;  %v1668_v53 = vadd.f32 %v5936_v14, %v5866_v49 }
 0x1f8   : > { %v6102_v17 = vpop.f32.mrf.mxu0  ;;  %3701 = vmatpush2.bf16.msra.mxu0 %v5014_v34  ;;  %v6106_v4 = vpop.f32.mrf.mxu1  ;;  %3894 = vmatpush2.bf16.msra.mxu1 %v5017_v48  ;;  %v2443_v34 = vpack.c.bf16 %v2251_v45, %v2243_v31  ;;  %v2248_v48 = vmax.f32 %v1465_v21, 0.0  ;;  %v2265_v45 = vmax.f32 %v1477_v10, 0.0  ;;  %v5034_v31 = vld [vmem:[#allocation8 + $0x294] ss:$8 sps:$4 sm:$0xff]   ;;  %v1475_v10 = vadd.f32 %v5932_v18, %v5862_v5 }
 0x1f9   : > { %3702 = vmatprep.subr.bf16.mxu0 %v5022_v46  ;;  %3895 = vmatprep.subr.bf16.mxu1 %v5025_v39  ;;  %v7314_v46 = vld [vmem:[#allocation31_spill] sm:$0xff]  ;;  %v5037_v33 = vld [vmem:[#allocation8 + $0x394] ss:$8 sps:$4 sm:$0xff]  }
 0x1fa   : > { %v6112_v50 = vpop.f32.mrf.mxu0  ;;  %3385 = vmatmul.mubr.bf16.gmra.mxu0 %v2432_v35  ;;  %v6116_v55 = vpop.f32.mrf.mxu1  ;;  %3578 = vmatmul.mubr.bf16.gmra.mxu1 %v2434_v44  ;;  %v1666_v11 = vadd.f32 %v7314_v46, %v5832_v47  ;;  %v5026_v35 = vld [vmem:[#allocation8 + $0x2a0] ss:$8 sps:$4 sm:$0xff]   ;;  %v2242_v44 = vmax.f32 %v1654_v57, 0.0  ;;  %v2257_v46 = vmax.f32 %v1473_v8, 0.0  ;;  %v1487_v57 = vadd.f32 %v5974_v28, %v5828_v3  ;;  %v5035_v8 = vld [vmem:[#allocation8 + $0x390] ss:$8 sps:$4 sm:$0xff]  }
 0x1fb   : > { %7312 = vst [vmem:[#allocation26_spill] sm:$0xff] %v6112_v50  ;;  %7313 = vst [vmem:[#allocation28_spill] sm:$0xff] %v6116_v55  ;;  %3394 = vmatprep.mubr.bf16.mxu0 %v2441_v23  ;;  %3587 = vmatprep.mubr.bf16.mxu1 %v2443_v34  ;;  %v2267_v23 = vmax.f32 %v1670_v25, 0.0  ;;  %v2440_v55 = vpack.c.bf16 %v2248_v48, %v2240_v6  ;;  %v5040_v48 = vld [vmem:[#allocation8 + $0x284] ss:$8 sps:$4 sm:$0xff]  }
 0x1fc   : > { %v6120_v15 = vpop.f32.mrf.mxu0  ;;  %3703 = vmatpush2.bf16.msra.mxu0 %v5020_v41  ;;  %v6122_v39 = vpop.f32.mrf.mxu1  ;;  %3896 = vmatpush2.bf16.msra.mxu1 %v5023_v7  ;;  %v2442_v41 = vpack.c.bf16 %v2250_v56, %v2242_v44  ;;  %v2259_v50 = vmax.f32 %v1666_v11, 0.0  ;;  %v7315_v56 = vld [vmem:[#allocation29_spill] sm:$0xff]  ;;  %v1680_v11 = vadd.f32 %v5978_v26, %v5832_v47  ;;  %v5043_v6 = vld [vmem:[#allocation8 + $0x384] ss:$8 sps:$4 sm:$0xff]   ;;  %v1676_v26 = vadd.f32 %v5962_v24, %v5832_v47 }
 0x1fd   : > { %3704 = vmatprep.subr.bf16.mxu0 %v5028_v59  ;;  %3897 = vmatprep.subr.bf16.mxu1 %v5031_v63  ;;  %v5032_v59 = vld [vmem:[#allocation8 + $0x290] ss:$8 sps:$4 sm:$0xff]   ;;  %v2449_v63 = vpack.c.bf16 %v2265_v45, %v2257_v46  ;;  %v1471_v18 = vadd.f32 %v7315_v56, %v5862_v5  ;;  %v7316_v28 = vld [vmem:[#allocation30_spill] sm:$0xff]  ;;  %v1483_v45 = vadd.f32 %v5960_v38, %v5828_v3 }
 0x1fe   : > { %v6124_v21 = vpop.f32.mrf.mxu0  ;;  %v6126_v34 = vpop.f32.mrf.mxu1  ;;  %v2451_v14 = vpack.c.bf16 %v2267_v23, %v2259_v50  ;;  %v1664_v44 = vadd.f32 %v7316_v28, %v5866_v49  ;;  %v5038_v50 = vld [vmem:[#allocation8 + $0x280] ss:$8 sps:$4 sm:$0xff]   ;;  %v2281_v23 = vmax.f32 %v1487_v57, 0.0  ;;  %v2283_v28 = vmax.f32 %v1680_v11, 0.0 }
 0x1ff   : > { %v5041_v38 = vld [vmem:[#allocation8 + $0x380] ss:$8 sps:$4 sm:$0xff]   ;;  %v2256_v56 = vmax.f32 %v1471_v18, 0.0 }
 0x200   : > { %v6130_v7 = vpop.f32.mrf.mxu0  ;;  %3705 = vmatpush2.bf16.msra.mxu0 %v5026_v35  ;;  %v6136_v25 = vpop.f32.mrf.mxu1  ;;  %3898 = vmatpush2.bf16.msra.mxu1 %v5029_v29 }
 0x201   : > { %3706 = vmatprep.subr.bf16.mxu0 %v5034_v31  ;;  %3899 = vmatprep.subr.bf16.mxu1 %v5037_v33  ;;  %v2264_v31 = vmax.f32 %v1475_v10, 0.0  ;;  %v2258_v10 = vmax.f32 %v1664_v44, 0.0 }
 0x202   : > { %v6142_v35 = vpop.f32.mrf.mxu0  ;;  %3395 = vmatmul.mubr.bf16.gmra.mxu0 %v2440_v55  ;;  %v6148_v29 = vpop.f32.mrf.mxu1  ;;  %3588 = vmatmul.mubr.bf16.gmra.mxu1 %v2442_v41  ;;  %v2266_v55 = vmax.f32 %v1668_v53, 0.0 }
 0x203   : > { %7317 = vst [vmem:[#allocation27_spill] sm:$0xff] %v6148_v29  ;;  %3404 = vmatprep.mubr.bf16.mxu0 %v2449_v63  ;;  %3597 = vmatprep.mubr.bf16.mxu1 %v2451_v14  ;;  %v2273_v63 = vmax.f32 %v1483_v45, 0.0  ;;  %v2448_v14 = vpack.c.bf16 %v2264_v31, %v2256_v56  ;;  %v2275_v29 = vmax.f32 %v1676_v26, 0.0 }
 0x204   : > { %v6152_v46 = vpop.f32.mrf.mxu0  ;;  %3707 = vmatpush2.bf16.msra.mxu0 %v5032_v59  ;;  %v6154_v33 = vpop.f32.mrf.mxu1  ;;  %3900 = vmatpush2.bf16.msra.mxu1 %v5035_v8  ;;  %v1485_v59 = vadd.f32 %v5964_v43, %v5862_v5  ;;  %v2450_v57 = vpack.c.bf16 %v2266_v55, %v2258_v10  ;;  %v1678_v8 = vadd.f32 %v5966_v16, %v5866_v49 }
 0x205   : > { %3708 = vmatprep.subr.bf16.mxu0 %v5040_v48  ;;  %3901 = vmatprep.subr.bf16.mxu1 %v5043_v6  ;;  %v1497_v48 = vadd.f32 %v6004_v60, %v5828_v3  ;;  %v2457_v11 = vpack.c.bf16 %v2281_v23, %v2273_v63  ;;  %v1481_v6 = vadd.f32 %v5950_v20, %v5862_v5 }
 0x206   : > { %v6156_v41 = vpop.f32.mrf.mxu0  ;;  %v6158_v24 = vpop.f32.mrf.mxu1  ;;  %v1690_v43 = vadd.f32 %v6010_v27, %v5832_v47  ;;  %v2459_v45 = vpack.c.bf16 %v2283_v28, %v2275_v29  ;;  %v1674_v16 = vadd.f32 %v5956_v51, %v5866_v49  ;;  %v1493_v60 = vadd.f32 %v5992_v62, %v5828_v3 }
 0x207   : > { %v2280_v26 = vmax.f32 %v1485_v59, 0.0  ;;  %v1686_v20 = vadd.f32 %v5994_v1, %v5832_v47  ;;  %v2297_v55 = vmax.f32 %v1497_v48, 0.0  ;;  %v2272_v23 = vmax.f32 %v1481_v6, 0.0 }
 0x208   : > { %v6162_v53 = vpop.f32.mrf.mxu0  ;;  %3709 = vmatpush2.bf16.msra.mxu0 %v5038_v50  ;;  %v6168_v18 = vpop.f32.mrf.mxu1  ;;  %3902 = vmatpush2.bf16.msra.mxu1 %v5041_v38  ;;  %v2282_v50 = vmax.f32 %v1678_v8, 0.0  ;;  %v2299_v51 = vmax.f32 %v1690_v43, 0.0  ;;  %v2274_v62 = vmax.f32 %v1674_v16, 0.0  ;;  %v2289_v56 = vmax.f32 %v1493_v60, 0.0 }
 0x209   : > { %v2456_v10 = vpack.c.bf16 %v2280_v26, %v2272_v23  ;;  %v2291_v63 = vmax.f32 %v1686_v20, 0.0  ;;  %v1495_v1 = vadd.f32 %v5996_v19, %v5862_v5  ;;  %v1507_v8 = vadd.f32 %v6038_v22, %v5828_v3 }
 0x20a   : > { %v6174_v44 = vpop.f32.mrf.mxu0  ;;  %3405 = vmatmul.mubr.bf16.gmra.mxu0 %v2448_v14  ;;  %v6180_v31 = vpop.f32.mrf.mxu1  ;;  %3598 = vmatmul.mubr.bf16.gmra.mxu1 %v2450_v57  ;;  %v2458_v59 = vpack.c.bf16 %v2282_v50, %v2274_v62  ;;  %v1688_v57 = vadd.f32 %v6000_v12, %v5866_v49  ;;  %v1491_v6 = vadd.f32 %v5984_v52, %v5862_v5 }
 0x20b   : > { %3414 = vmatprep.mubr.bf16.mxu0 %v2457_v11  ;;  %3607 = vmatprep.mubr.bf16.mxu1 %v2459_v45  ;;  %v2465_v11 = vpack.c.bf16 %v2297_v55, %v2289_v56  ;;  %v1700_v43 = vadd.f32 %v6042_v9, %v5832_v47  ;;  %v2467_v19 = vpack.c.bf16 %v2299_v51, %v2291_v63  ;;  %v2296_v60 = vmax.f32 %v1495_v1, 0.0 }
 0x20c   : > { %v6184_v27 = vpop.f32.mrf.mxu0  ;;  %v6186_v29 = vpop.f32.mrf.mxu1  ;;  %v1684_v16 = vadd.f32 %v5988_v0, %v5866_v49  ;;  %v1503_v12 = vadd.f32 %v6024_v61, %v5828_v3  ;;  %v1696_v52 = vadd.f32 %v6026_v13, %v5832_v47  ;;  %v2298_v26 = vmax.f32 %v1688_v57, 0.0 }
 0x20d   : > { %v2313_v20 = vmax.f32 %v1507_v8, 0.0  ;;  %v2288_v55 = vmax.f32 %v1491_v6, 0.0  ;;  %v2315_v0 = vmax.f32 %v1700_v43, 0.0  ;;  %v1505_v13 = vadd.f32 %v6028_v32, %v5862_v5 }
 0x20e   : > { %v6188_v38 = vpop.f32.mrf.mxu0  ;;  %v6190_v28 = vpop.f32.mrf.mxu1  ;;  %v2290_v61 = vmax.f32 %v1684_v16, 0.0  ;;  %v2305_v51 = vmax.f32 %v1503_v12, 0.0  ;;  %v1517_v57 = vadd.f32 %v6068_v58, %v5828_v3  ;;  %v1501_v6 = vadd.f32 %v6014_v36, %v5862_v5  ;;  %v7318_v16 = vld [vmem:[#allocation32_spill] sm:$0xff]  ;;  %v7320_v36 = vld [vmem:[#allocation33_spill] sm:$0xff] }
 0x20f   : > { %v2464_v56 = vpack.c.bf16 %v2296_v60, %v2288_v55  ;;  %v1710_v43 = vadd.f32 %v6074_v37, %v5832_v47  ;;  %v1694_v12 = vadd.f32 %v7318_v16, %v5866_v49 }
 0x210   : > { %v6194_v14 = vpop.f32.mrf.mxu0  ;;  %v6200_v48 = vpop.f32.mrf.mxu1  ;;  %v2466_v1 = vpack.c.bf16 %v2298_v26, %v2290_v61  ;;  %v1706_v26 = vadd.f32 %v7320_v36, %v5832_v47  ;;  %v2329_v55 = vmax.f32 %v1517_v57, 0.0  ;;  %v2304_v61 = vmax.f32 %v1501_v6, 0.0 }
 0x211   : > { %v1527_v57 = vadd.f32 %v6102_v17, %v5828_v3 }
 0x212   : > { %v6206_v45 = vpop.f32.mrf.mxu0  ;;  %3415 = vmatmul.mubr.bf16.gmra.mxu0 %v2456_v10  ;;  %v6212_v22 = vpop.f32.mrf.mxu1  ;;  %3608 = vmatmul.mubr.bf16.gmra.mxu1 %v2458_v59  ;;  %v2307_v10 = vmax.f32 %v1696_v52, 0.0  ;;  %v1698_v59 = vadd.f32 %v6030_v40, %v5866_v49  ;;  %v7319_v40 = vld [vmem:[#allocation23_spill] sm:$0xff]  ;;  %v2312_v52 = vmax.f32 %v1505_v13, 0.0  ;;  %v2323_v13 = vmax.f32 %v1706_v26, 0.0 }
 0x213   : > { %3424 = vmatprep.mubr.bf16.mxu0 %v2465_v11  ;;  %3617 = vmatprep.mubr.bf16.mxu1 %v2467_v19  ;;  %v2473_v11 = vpack.c.bf16 %v2313_v20, %v2305_v51  ;;  %v1513_v60 = vadd.f32 %v7319_v40, %v5828_v3  ;;  %v2331_v51 = vmax.f32 %v1710_v43, 0.0 }
 0x214   : > { %v6216_v9 = vpop.f32.mrf.mxu0  ;;  %v6218_v50 = vpop.f32.mrf.mxu1  ;;  %v2475_v32 = vpack.c.bf16 %v2315_v0, %v2307_v10  ;;  %v2314_v20 = vmax.f32 %v1698_v59, 0.0  ;;  %v2306_v10 = vmax.f32 %v1694_v12, 0.0  ;;  %v1708_v59 = vadd.f32 %v6064_v54, %v5866_v49  ;;  %v7321_v12 = vld [vmem:[#allocation20_spill] sm:$0xff] }
 0x215   : > { %v2321_v16 = vmax.f32 %v1513_v60, 0.0  ;;  %v1511_v60 = vadd.f32 %v7321_v12, %v5862_v5  ;;  %v1523_v54 = vadd.f32 %v6088_v2, %v5828_v3 }
 0x216   : > { %v6220_v23 = vpop.f32.mrf.mxu0  ;;  %v6222_v62 = vpop.f32.mrf.mxu1  ;;  %v2474_v36 = vpack.c.bf16 %v2314_v20, %v2306_v10  ;;  %v7323_v20 = vld [vmem:[#allocation19_spill] sm:$0xff]  ;;  %v1716_v10 = vadd.f32 %v6090_v42, %v5832_v47 }
 0x217   : > { %v2481_v43 = vpack.c.bf16 %v2329_v55, %v2321_v16  ;;  %v2330_v16 = vmax.f32 %v1708_v59, 0.0  ;;  %v7328_v59 = vld [vmem:[#allocation22_spill] sm:$0xff] }
 0x218   : > { %v6226_v63 = vpop.f32.mrf.mxu0  ;;  %v6232_v8 = vpop.f32.mrf.mxu1 }
 0x21a   : > { %v6238_v19 = vpop.f32.mrf.mxu0  ;;  %3425 = vmatmul.mubr.bf16.gmra.mxu0 %v2464_v56  ;;  %v6244_v58 = vpop.f32.mrf.mxu1  ;;  %3618 = vmatmul.mubr.bf16.gmra.mxu1 %v2466_v1  ;;  %v2472_v1 = vpack.c.bf16 %v2312_v52, %v2304_v61  ;;  %v1720_v52 = vadd.f32 %v6106_v4, %v5832_v47  ;;  %v1704_v61 = vadd.f32 %v7323_v20, %v5866_v49 }
 0x21b   : > { %3434 = vmatprep.mubr.bf16.mxu0 %v2473_v11  ;;  %3627 = vmatprep.mubr.bf16.mxu1 %v2475_v32  ;;  %v1515_v11 = vadd.f32 %v6060_v30, %v5862_v5  ;;  %v2483_v30 = vpack.c.bf16 %v2331_v51, %v2323_v13  ;;  %v2320_v13 = vmax.f32 %v1511_v60, 0.0  ;;  %v1537_v60 = vadd.f32 %v6130_v7, %v5828_v3 }
 0x21c   : > { %v6248_v37 = vpop.f32.mrf.mxu0  ;;  %v6250_v0 = vpop.f32.mrf.mxu1  ;;  %v2347_v12 = vmax.f32 %v1720_v52, 0.0  ;;  %v2322_v2 = vmax.f32 %v1704_v61, 0.0 }
 0x21d   : > { %v2328_v55 = vmax.f32 %v1515_v11, 0.0  ;;  %v2339_v11 = vmax.f32 %v1716_v10, 0.0 }
 0x21e   : > { %v6252_v56 = vpop.f32.mrf.mxu0  ;;  %v6254_v40 = vpop.f32.mrf.mxu1 }
 0x220   : > { %v6258_v32 = vpop.f32.mrf.mxu0  ;;  %v6264_v6 = vpop.f32.mrf.mxu1 }
 0x222   : > { %v6270_v26 = vpop.f32.mrf.mxu0  ;;  %3435 = vmatmul.mubr.bf16.gmra.mxu0 %v2472_v1  ;;  %v6276_v17 = vpop.f32.mrf.mxu1  ;;  %3628 = vmatmul.mubr.bf16.gmra.mxu1 %v2474_v36  ;;  %v2345_v1 = vmax.f32 %v1527_v57, 0.0  ;;  %v2480_v36 = vpack.c.bf16 %v2328_v55, %v2320_v13  ;;  %v1718_v57 = vadd.f32 %v7328_v59, %v5866_v49  ;;  %v1730_v55 = vadd.f32 %v6136_v25, %v5832_v47 }
 0x223   : > { %7322 = vst [vmem:[#allocation31_spill] sm:$0xff] %v6270_v26  ;;  %7324 = vst [vmem:[#allocation29_spill] sm:$0xff] %v6276_v17  ;;  %3444 = vmatprep.mubr.bf16.mxu0 %v2481_v43  ;;  %3637 = vmatprep.mubr.bf16.mxu1 %v2483_v30  ;;  %v2337_v26 = vmax.f32 %v1523_v54, 0.0  ;;  %v7327_v43 = vld [vmem:[#allocation25_spill] sm:$0xff]  ;;  %v7329_v54 = vld [vmem:[#allocation24_spill] sm:$0xff]  ;;  %v2491_v13 = vpack.c.bf16 %v2347_v12, %v2339_v11 }
 0x224   : > { %v6280_v4 = vpop.f32.mrf.mxu0  ;;  %v6282_v51 = vpop.f32.mrf.mxu1  ;;  %v1525_v42 = vadd.f32 %v7327_v43, %v5862_v5  ;;  %v1533_v43 = vadd.f32 %v6120_v15, %v5828_v3  ;;  %v2346_v59 = vmax.f32 %v1718_v57, 0.0  ;;  %v1728_v57 = vadd.f32 %v6126_v34, %v5866_v49 }
 0x225   : > { %7325 = vst [vmem:[#allocation30_spill] sm:$0xff] %v6280_v4  ;;  %v2482_v4 = vpack.c.bf16 %v2330_v16, %v2322_v2  ;;  %v2489_v61 = vpack.c.bf16 %v2345_v1, %v2337_v26  ;;  %v7331_v16 = vld [vmem:[#allocation21_spill] sm:$0xff]  ;;  %v1726_v1 = vadd.f32 %v6122_v39, %v5832_v47  ;;  %v1535_v39 = vadd.f32 %v6124_v21, %v5862_v5 }
 0x226   : > { %v6284_v20 = vpop.f32.mrf.mxu0  ;;  %v6286_v17 = vpop.f32.mrf.mxu1  ;;  %v1714_v2 = vadd.f32 %v7331_v16, %v5866_v49  ;;  %v2344_v26 = vmax.f32 %v1525_v42, 0.0  ;;  %v1543_v34 = vadd.f32 %v6152_v46, %v5828_v3 }
 0x227   : > { %7326 = vst [vmem:[#allocation32_spill] sm:$0xff] %v6286_v17  ;;  %v1521_v17 = vadd.f32 %v7329_v54, %v5862_v5  ;;  %v2363_v54 = vmax.f32 %v1730_v55, 0.0  ;;  %v2355_v42 = vmax.f32 %v1726_v1, 0.0 }
 0x228   : > { %v6290_v30 = vpop.f32.mrf.mxu0  ;;  %v6296_v52 = vpop.f32.mrf.mxu1  ;;  %v2338_v15 = vmax.f32 %v1714_v2, 0.0  ;;  %v7334_v2 = vld [vmem:[#allocation26_spill] sm:$0xff] }
 0x229   : > { %v2336_v11 = vmax.f32 %v1521_v17, 0.0  ;;  %v1547_v17 = vadd.f32 %v6162_v53, %v5828_v3  ;;  %v2499_v21 = vpack.c.bf16 %v2363_v54, %v2355_v42  ;;  %v7337_v53 = vld [vmem:[#allocation18_spill] sm:$0xff] }
 0x22a   : > { %v6302_v10 = vpop.f32.mrf.mxu0  ;;  %3445 = vmatmul.mubr.bf16.gmra.mxu0 %v2480_v36  ;;  %v6308_v7 = vpop.f32.mrf.mxu1  ;;  %3638 = vmatmul.mubr.bf16.gmra.mxu1 %v2482_v4  ;;  %v2361_v36 = vmax.f32 %v1537_v60, 0.0 }
 0x22b   : > { %7330 = vst [vmem:[#allocation23_spill] sm:$0xff] %v6302_v10  ;;  %7332 = vst [vmem:[#allocation33_spill] sm:$0xff] %v6308_v7  ;;  %3454 = vmatprep.mubr.bf16.mxu0 %v2489_v61  ;;  %3647 = vmatprep.mubr.bf16.mxu1 %v2491_v13  ;;  %v2353_v10 = vmax.f32 %v1533_v43, 0.0  ;;  %v2488_v4 = vpack.c.bf16 %v2344_v26, %v2336_v11  ;;  %v2490_v13 = vpack.c.bf16 %v2346_v59, %v2338_v15  ;;  %v7336_v59 = vld [vmem:[#allocation28_spill] sm:$0xff] }
 0x22c   : > { %v6312_v25 = vpop.f32.mrf.mxu0  ;;  %v6314_v12 = vpop.f32.mrf.mxu1  ;;  %v1531_v43 = vadd.f32 %v7334_v2, %v5862_v5  ;;  %v1740_v26 = vadd.f32 %v6168_v18, %v5832_v47  ;;  %v1724_v11 = vadd.f32 %v7336_v59, %v5866_v49  ;;  %v538_v15 = vsub.s32 5, %v7337_v53 }
 0x22d   : > { %v2497_v55 = vpack.c.bf16 %v2361_v36, %v2353_v10  ;;  %v2360_v10 = vmax.f32 %v1535_v39, 0.0  ;;  %v1736_v18 = vadd.f32 %v6154_v33, %v5832_v47  ;;  %v546_v36 = vsub.s32 7, %v7337_v53 }
 0x22e   : > { %v6316_v16 = vpop.f32.mrf.mxu0  ;;  %v6318_v7 = vpop.f32.mrf.mxu1  ;;  %v2377_v42 = vmax.f32 %v1547_v17, 0.0  ;;  %v2352_v3 = vmax.f32 %v1531_v43, 0.0  ;;  %v2379_v46 = vmax.f32 %v1740_v26, 0.0  ;;  %v1738_v26 = vadd.f32 %v6158_v24, %v5866_v49  ;;  %v7339_v24 = vld [vmem:[#allocation27_spill] sm:$0xff] }
 0x22f   : > { %7333 = vst [vmem:[#allocation20_spill] sm:$0xff] %v6318_v7  ;;  %v2371_v33 = vmax.f32 %v1736_v18, 0.0  ;;  %v534_v18 = vsub.s32 4, %v7337_v53 }
 0x230   : > { %v6322_v61 = vpop.f32.mrf.mxu0  ;;  %v6328_v60 = vpop.f32.mrf.mxu1  ;;  %v2496_v47 = vpack.c.bf16 %v2360_v10, %v2352_v3  ;;  %v1541_v10 = vadd.f32 %v6142_v35, %v5862_v5 }
 0x232   : > { %v6334_v1 = vpop.f32.mrf.mxu0  ;;  %3455 = vmatmul.mubr.bf16.gmra.mxu0 %v2488_v4  ;;  %v6341_v7 = vpop.f32.mrf.mxu1  ;;  %3648 = vmatmul.mubr.bf16.gmra.mxu1 %v2490_v13  ;;  %v2362_v4 = vmax.f32 %v1728_v57, 0.0  ;;  %v2369_v13 = vmax.f32 %v1543_v34, 0.0 }
 0x233   : > { %7335 = vst [vmem:[#allocation19_spill] sm:$0xff] %v6334_v1  ;;  %7338 = vst [vmem:[#allocation25_spill] sm:$0xff] %v6341_v7  ;;  %3464 = vmatprep.mubr.bf16.mxu0 %v2497_v55  ;;  %3657 = vmatprep.mubr.bf16.mxu1 %v2499_v21  ;;  %v2354_v7 = vmax.f32 %v1724_v11, 0.0  ;;  %v5045_v55 = vld [vmem:[#allocation7] sm:$0xff]  ;;  %v1545_v21 = vadd.f32 %v6156_v41, %v5862_v5 }
 0x234   : > { %v6346_v54 = vpop.f32.mrf.mxu0  ;;  %v6348_v2 = vpop.f32.mrf.mxu1  ;;  %v6352_v39 = vrot.slane %v5045_v55, %v538_v15  ;;  %v6358_v57 = vrot.slane %v5045_v55, %v546_v36  ;;  %v2505_v15 = vpack.c.bf16 %v2377_v42, %v2369_v13 }
 0x235   : > { %v2498_v43 = vpack.c.bf16 %v2362_v4, %v2354_v7  ;;  %v2507_v7 = vpack.c.bf16 %v2379_v46, %v2371_v33  ;;  %v1734_v4 = vadd.f32 %v7339_v24, %v5866_v49  ;;  %v2376_v5 = vmax.f32 %v1545_v21, 0.0 }
 0x236   : > { %v6350_v59 = vpop.f32.mrf.mxu0  ;;  %v6354_v1 = vpop.f32.mrf.mxu1  ;;  %v1783_v11 = vadd.f32 %v6194_v14, %v6352_v39  ;;  %v1976_v41 = vadd.f32 %v6200_v48, %v6358_v57  ;;  %v542_v14 = vsub.s32 6, %v7337_v53  ;;  %v1779_v42 = vadd.f32 %v6184_v27, %v6352_v39 }
 0x237   : > { %v1972_v35 = vadd.f32 %v6186_v29, %v6358_v57  ;;  %v2378_v46 = vmax.f32 %v1738_v26, 0.0  ;;  %v2368_v49 = vmax.f32 %v1541_v10, 0.0  ;;  %v6388_v33 = vrot.slane %v5045_v55, %v534_v18 }
 0x238   : > { %v6360_v17 = vpop.f32.mrf.mxu0  ;;  %v6366_v34 = vpop.f32.mrf.mxu1  ;;  %v2141_v13 = vmax.f32 %v1783_v11, 0.0  ;;  %v2143_v24 = vmax.f32 %v1976_v41, 0.0  ;;  %v2370_v53 = vmax.f32 %v1734_v4, 0.0  ;;  %v2133_v21 = vmax.f32 %v1779_v42, 0.0 }
 0x239   : > { %v2504_v29 = vpack.c.bf16 %v2376_v5, %v2368_v49  ;;  %v1781_v26 = vadd.f32 %v6188_v38, %v6388_v33  ;;  %v1793_v18 = vadd.f32 %v6226_v63, %v6352_v39  ;;  %v1777_v4 = vadd.f32 %v6174_v44, %v6388_v33 }
 0x23a   : > { %v6373_v36 = vpop.f32.mrf.mxu0  ;;  %3465 = vmatmul.mubr.bf16.gmra.mxu0 %v2496_v47  ;;  %v6380_v3 = vpop.f32.mrf.mxu1  ;;  %3658 = vmatmul.mubr.bf16.gmra.mxu1 %v2498_v43  ;;  %v6392_v43 = vrot.slane %v5045_v55, %v542_v14  ;;  %v2389_v55 = vpack.c.bf16 %v2141_v13, %v2133_v21  ;;  %v1986_v14 = vadd.f32 %v6232_v8, %v6358_v57 }
 0x23b   : > { %7340 = vst [vmem:[#allocation22_spill] sm:$0xff] %v6380_v3  ;;  %3474 = vmatprep.mubr.bf16.mxu0 %v2505_v15  ;;  %3667 = vmatprep.mubr.bf16.mxu1 %v2507_v7  ;;  %v2135_v7 = vmax.f32 %v1972_v35, 0.0  ;;  %v2506_v3 = vpack.c.bf16 %v2378_v46, %v2370_v53  ;;  %v2140_v5 = vmax.f32 %v1781_v26, 0.0  ;;  %v1982_v44 = vadd.f32 %v6218_v50, %v6358_v57 }
 0x23c   : > { %v6384_v48 = vpop.f32.mrf.mxu0  ;;  %v6386_v47 = vpop.f32.mrf.mxu1  ;;  %v1974_v10 = vadd.f32 %v6190_v28, %v6392_v43  ;;  %v1970_v53 = vadd.f32 %v6180_v31, %v6392_v43  ;;  %v1789_v28 = vadd.f32 %v6216_v9, %v6352_v39  ;;  %v2157_v46 = vmax.f32 %v1793_v18, 0.0 }
 0x23d   : > { %v2391_v38 = vpack.c.bf16 %v2143_v24, %v2135_v7  ;;  %v2132_v49 = vmax.f32 %v1777_v4, 0.0  ;;  %v2159_v31 = vmax.f32 %v1986_v14, 0.0  ;;  %v2151_v7 = vmax.f32 %v1982_v44, 0.0 }
 0x23e   : > { %v6390_v27 = vpop.f32.mrf.mxu0  ;;  %v6394_v15 = vpop.f32.mrf.mxu1  ;;  %v2142_v35 = vmax.f32 %v1974_v10, 0.0  ;;  %v2134_v9 = vmax.f32 %v1970_v53, 0.0  ;;  %v2149_v21 = vmax.f32 %v1789_v28, 0.0  ;;  %v1791_v50 = vadd.f32 %v6220_v23, %v6388_v33 }
 0x23f   : > { %v1984_v10 = vadd.f32 %v6222_v62, %v6392_v43  ;;  %v1803_v18 = vadd.f32 %v6258_v32, %v6352_v39  ;;  %v1996_v53 = vadd.f32 %v6264_v6, %v6358_v57  ;;  %v2399_v23 = vpack.c.bf16 %v2159_v31, %v2151_v7 }
 0x240   : > { %v6398_v11 = vpop.f32.mrf.mxu0  ;;  %v6404_v41 = vpop.f32.mrf.mxu1  ;;  %v2397_v14 = vpack.c.bf16 %v2157_v46, %v2149_v21  ;;  %v1799_v62 = vadd.f32 %v6248_v37, %v6352_v39  ;;  %v2156_v44 = vmax.f32 %v1791_v50, 0.0 }
 0x241   : > { %v2173_v46 = vmax.f32 %v1803_v18, 0.0  ;;  %v1813_v18 = vadd.f32 %v6290_v30, %v6352_v39 }
 0x242   : > { %v6410_v42 = vpop.f32.mrf.mxu0  ;;  %3475 = vmatmul.mubr.bf16.gmra.mxu0 %v2504_v29  ;;  %v6416_v63 = vpop.f32.mrf.mxu1  ;;  %3668 = vmatmul.mubr.bf16.gmra.mxu1 %v2506_v3  ;;  %v2388_v3 = vpack.c.bf16 %v2140_v5, %v2132_v49  ;;  %v1980_v5 = vadd.f32 %v6212_v22, %v6392_v43  ;;  %v2175_v22 = vmax.f32 %v1996_v53, 0.0  ;;  %v2165_v21 = vmax.f32 %v1799_v62, 0.0 }
 0x243   : > { %3710 = vmatprep.mubr.bf16.mxu0 %v2389_v55  ;;  %3903 = vmatprep.mubr.bf16.mxu1 %v2391_v38  ;;  %v2390_v55 = vpack.c.bf16 %v2142_v35, %v2134_v9  ;;  %v1787_v38 = vadd.f32 %v6206_v45, %v6388_v33  ;;  %v1992_v45 = vadd.f32 %v6250_v0, %v6358_v57  ;;  %v2158_v35 = vmax.f32 %v1984_v10, 0.0 }
 0x244   : > { %v6420_v8 = vpop.f32.mrf.mxu0  ;;  %v6422_v13 = vpop.f32.mrf.mxu1  ;;  %v2150_v37 = vmax.f32 %v1980_v5, 0.0  ;;  %v1801_v0 = vadd.f32 %v6252_v56, %v6388_v33  ;;  %v1994_v10 = vadd.f32 %v6254_v40, %v6392_v43  ;;  %v2405_v53 = vpack.c.bf16 %v2173_v46, %v2165_v21  ;;  %v7341_v40 = vld [vmem:[#allocation30_spill] sm:$0xff] }
 0x245   : > { %v2148_v31 = vmax.f32 %v1787_v38, 0.0  ;;  %v2167_v50 = vmax.f32 %v1992_v45, 0.0  ;;  %v2006_v5 = vadd.f32 %v6296_v52, %v6358_v57  ;;  %v1809_v45 = vadd.f32 %v7341_v40, %v6352_v39 }
 0x246   : > { %v6424_v24 = vpop.f32.mrf.mxu0  ;;  %v6426_v29 = vpop.f32.mrf.mxu1  ;;  %v2174_v46 = vmax.f32 %v1994_v10, 0.0  ;;  %v7343_v10 = vld [vmem:[#allocation32_spill] sm:$0xff] }
 0x247   : > { %v2396_v7 = vpack.c.bf16 %v2156_v44, %v2148_v31  ;;  %v2407_v56 = vpack.c.bf16 %v2175_v22, %v2167_v50  ;;  %v1990_v44 = vadd.f32 %v6244_v58, %v6392_v43  ;;  %v2189_v31 = vmax.f32 %v1813_v18, 0.0 }
 0x248   : > { %v6430_v26 = vpop.f32.mrf.mxu0  ;;  %v6436_v4 = vpop.f32.mrf.mxu1  ;;  %v2191_v58 = vmax.f32 %v2006_v5, 0.0  ;;  %v2181_v50 = vmax.f32 %v1809_v45, 0.0  ;;  %v2004_v18 = vadd.f32 %v7343_v10, %v6392_v43  ;;  %v7344_v45 = vld [vmem:[#allocation31_spill] sm:$0xff] }
 0x24a   : > { %v6442_v28 = vpop.f32.mrf.mxu0  ;;  %3711 = vmatmul.mubr.bf16.vlgmr.msra.gmra.mxu0 %v2388_v3  ;;  %v6448_v32 = vpop.f32.mrf.mxu1  ;;  %3904 = vmatmul.mubr.bf16.vlgmr.msra.gmra.mxu1 %v2390_v55  ;;  %v2190_v10 = vmax.f32 %v2004_v18, 0.0  ;;  %v7349_v18 = vld [vmem:[#allocation20_spill] sm:$0xff] }
 0x24b   : > { %3720 = vmatprep.mubr.bf16.mxu0 %v2397_v14  ;;  %3913 = vmatprep.mubr.bf16.mxu1 %v2399_v23  ;;  %v2398_v14 = vpack.c.bf16 %v2158_v35, %v2150_v37  ;;  %v1797_v23 = vadd.f32 %v6238_v19, %v6388_v33  ;;  %v2172_v35 = vmax.f32 %v1801_v0, 0.0  ;;  %v2002_v19 = vadd.f32 %v6282_v51, %v6358_v57 }
 0x24c   : > { %v6452_v6 = vpop.f32.mrf.mxu0  ;;  %v6454_v49 = vpop.f32.mrf.mxu1  ;;  %v1811_v51 = vadd.f32 %v6284_v20, %v6388_v33 }
 0x24d   : > { %v2164_v37 = vmax.f32 %v1797_v23, 0.0  ;;  %v2183_v0 = vmax.f32 %v2002_v19, 0.0  ;;  %v1823_v23 = vadd.f32 %v6322_v61, %v6352_v39 }
 0x24e   : > { %v6456_v9 = vpop.f32.mrf.mxu0  ;;  %v6458_v3 = vpop.f32.mrf.mxu1 }
 0x24f   : > { %v2415_v20 = vpack.c.bf16 %v2191_v58, %v2183_v0 }
 0x250   : > { %v6462_v55 = vpop.f32.mrf.mxu0  ;;  %v6468_v38 = vpop.f32.mrf.mxu1 }
 0x252   : > { %v6474_v62 = vpop.f32.mrf.mxu0  ;;  %3721 = vmatmul.mubr.bf16.gmra.mxu0 %v2396_v7  ;;  %v6480_v30 = vpop.f32.mrf.mxu1  ;;  %3914 = vmatmul.mubr.bf16.gmra.mxu1 %v2398_v14  ;;  %v2166_v7 = vmax.f32 %v1990_v44, 0.0  ;;  %v2404_v14 = vpack.c.bf16 %v2172_v35, %v2164_v37  ;;  %v2413_v44 = vpack.c.bf16 %v2189_v31, %v2181_v50  ;;  %v2016_v35 = vadd.f32 %v6328_v60, %v6358_v57 }
 0x253   : > { %7342 = vst [vmem:[#allocation24_spill] sm:$0xff] %v6480_v30  ;;  %3730 = vmatprep.mubr.bf16.mxu0 %v2405_v53  ;;  %3923 = vmatprep.mubr.bf16.mxu1 %v2407_v56  ;;  %v1807_v30 = vadd.f32 %v7344_v45, %v6388_v33  ;;  %v2188_v31 = vmax.f32 %v1811_v51, 0.0  ;;  %v2012_v50 = vadd.f32 %v6314_v12, %v6358_v57 }
 0x254   : > { %v6484_v52 = vpop.f32.mrf.mxu0  ;;  %v6486_v22 = vpop.f32.mrf.mxu1  ;;  %v2406_v56 = vpack.c.bf16 %v2174_v46, %v2166_v7  ;;  %v7346_v46 = vld [vmem:[#allocation29_spill] sm:$0xff]  ;;  %v1819_v7 = vadd.f32 %v6312_v25, %v6352_v39  ;;  %v2207_v45 = vmax.f32 %v2016_v35, 0.0  ;;  %v1821_v12 = vadd.f32 %v6316_v16, %v6388_v33 }
 0x255   : > { %v2000_v37 = vadd.f32 %v7346_v46, %v6392_v43  ;;  %v2180_v0 = vmax.f32 %v1807_v30, 0.0  ;;  %v2199_v51 = vmax.f32 %v2012_v50, 0.0  ;;  %v1833_v30 = vadd.f32 %v6360_v17, %v6352_v39 }
 0x256   : > { %v6488_v21 = vpop.f32.mrf.mxu0  ;;  %v6490_v40 = vpop.f32.mrf.mxu1 }
 0x257   : > { %v2182_v25 = vmax.f32 %v2000_v37, 0.0  ;;  %v2423_v16 = vpack.c.bf16 %v2207_v45, %v2199_v51 }
 0x258   : > { %v6494_v53 = vpop.f32.mrf.mxu0  ;;  %v6500_v5 = vpop.f32.mrf.mxu1 }
 0x25a   : > { %v6506_v19 = vpop.f32.mrf.mxu0  ;;  %3731 = vmatmul.mubr.bf16.gmra.mxu0 %v2404_v14  ;;  %v6512_v61 = vpop.f32.mrf.mxu1  ;;  %3924 = vmatmul.mubr.bf16.gmra.mxu1 %v2406_v56  ;;  %v2205_v14 = vmax.f32 %v1823_v23, 0.0  ;;  %v2412_v56 = vpack.c.bf16 %v2188_v31, %v2180_v0  ;;  %v2014_v23 = vadd.f32 %v7349_v18, %v6392_v43  ;;  %v2026_v31 = vadd.f32 %v6366_v34, %v6358_v57 }
 0x25b   : > { %7345 = vst [vmem:[#allocation21_spill] sm:$0xff] %v6506_v19  ;;  %7347 = vst [vmem:[#allocation26_spill] sm:$0xff] %v6512_v61  ;;  %3740 = vmatprep.mubr.bf16.mxu0 %v2413_v44  ;;  %3933 = vmatprep.mubr.bf16.mxu1 %v2415_v20  ;;  %v2197_v19 = vmax.f32 %v1819_v7, 0.0  ;;  %v2414_v20 = vpack.c.bf16 %v2190_v10, %v2182_v25  ;;  %v7350_v7 = vld [vmem:[#allocation23_spill] sm:$0xff]  ;;  %v7352_v10 = vld [vmem:[#allocation33_spill] sm:$0xff]  ;;  %v1829_v25 = vadd.f32 %v6346_v54, %v6352_v39 }
 0x25c   : > { %v6516_v60 = vpop.f32.mrf.mxu0  ;;  %v6518_v58 = vpop.f32.mrf.mxu1  ;;  %v2010_v0 = vadd.f32 %v7352_v10, %v6392_v43  ;;  %v2206_v18 = vmax.f32 %v2014_v23, 0.0  ;;  %v2024_v23 = vadd.f32 %v6354_v1, %v6392_v43  ;;  %v1839_v1 = vadd.f32 %v6384_v48, %v6352_v39 }
 0x25d   : > { %v2421_v37 = vpack.c.bf16 %v2205_v14, %v2197_v19  ;;  %v2204_v19 = vmax.f32 %v1821_v12, 0.0  ;;  %v2022_v14 = vadd.f32 %v6348_v2, %v6358_v57  ;;  %v1831_v2 = vadd.f32 %v6350_v59, %v6388_v33 }
 0x25e   : > { %v6520_v46 = vpop.f32.mrf.mxu0  ;;  %v6522_v61 = vpop.f32.mrf.mxu1  ;;  %v2198_v54 = vmax.f32 %v2010_v0, 0.0  ;;  %v7354_v0 = vld [vmem:[#allocation19_spill] sm:$0xff] }
 0x25f   : > { %7348 = vst [vmem:[#allocation28_spill] sm:$0xff] %v6522_v61  ;;  %v1817_v61 = vadd.f32 %v7350_v7, %v6388_v33  ;;  %v2223_v7 = vmax.f32 %v2026_v31, 0.0  ;;  %v2215_v12 = vmax.f32 %v2022_v14, 0.0 }
 0x260   : > { %v6526_v44 = vpop.f32.mrf.mxu0  ;;  %v6532_v35 = vpop.f32.mrf.mxu1 }
 0x261   : > { %v2196_v51 = vmax.f32 %v1817_v61, 0.0  ;;  %v1843_v61 = vadd.f32 %v6398_v11, %v6352_v39  ;;  %v2431_v59 = vpack.c.bf16 %v2223_v7, %v2215_v12 }
 0x262   : > { %v6538_v50 = vpop.f32.mrf.mxu0  ;;  %3741 = vmatmul.mubr.bf16.gmra.mxu0 %v2412_v56  ;;  %v6544_v17 = vpop.f32.mrf.mxu1  ;;  %3934 = vmatmul.mubr.bf16.gmra.mxu1 %v2414_v20  ;;  %v2221_v56 = vmax.f32 %v1833_v30, 0.0 }
 0x263   : > { %7351 = vst [vmem:[#allocation27_spill] sm:$0xff] %v6538_v50  ;;  %7353 = vst [vmem:[#allocation30_spill] sm:$0xff] %v6544_v17  ;;  %3750 = vmatprep.mubr.bf16.mxu0 %v2421_v37  ;;  %3943 = vmatprep.mubr.bf16.mxu1 %v2423_v16  ;;  %v2213_v50 = vmax.f32 %v1829_v25, 0.0  ;;  %v2420_v20 = vpack.c.bf16 %v2204_v19, %v2196_v51  ;;  %v2422_v16 = vpack.c.bf16 %v2206_v18, %v2198_v54  ;;  %v7356_v18 = vld [vmem:[#allocation25_spill] sm:$0xff] }
 0x264   : > { %v6548_v34 = vpop.f32.mrf.mxu0  ;;  %v6550_v45 = vpop.f32.mrf.mxu1  ;;  %v1827_v25 = vadd.f32 %v7354_v0, %v6388_v33  ;;  %v2036_v19 = vadd.f32 %v6404_v41, %v6358_v57  ;;  %v2020_v51 = vadd.f32 %v7356_v18, %v6392_v43  ;;  %v2222_v54 = vmax.f32 %v2024_v23, 0.0 }
 0x265   : > { %v2429_v31 = vpack.c.bf16 %v2221_v56, %v2213_v50  ;;  %v2220_v50 = vmax.f32 %v1831_v2, 0.0  ;;  %v2032_v56 = vadd.f32 %v6386_v47, %v6358_v57  ;;  %v1841_v47 = vadd.f32 %v6390_v27, %v6388_v33 }
 0x266   : > { %v6552_v10 = vpop.f32.mrf.mxu0  ;;  %v6554_v17 = vpop.f32.mrf.mxu1  ;;  %v2212_v12 = vmax.f32 %v1827_v25, 0.0  ;;  %v2239_v0 = vmax.f32 %v2036_v19, 0.0  ;;  %v2214_v48 = vmax.f32 %v2020_v51, 0.0  ;;  %v2034_v23 = vadd.f32 %v6394_v15, %v6392_v43 }
 0x267   : > { %v2231_v2 = vmax.f32 %v2032_v56, 0.0  ;;  %v1837_v51 = vadd.f32 %v6373_v36, %v6388_v33  ;;  %v7358_v56 = vld [vmem:[#allocation22_spill] sm:$0xff]  ;;  %v1849_v15 = vadd.f32 %v6420_v8, %v6352_v39  ;;  %v2042_v36 = vadd.f32 %v6422_v13, %v6358_v57 }
 0x268   : > { %v6558_v37 = vpop.f32.mrf.mxu0  ;;  %v6564_v30 = vpop.f32.mrf.mxu1  ;;  %v1851_v13 = vadd.f32 %v6424_v24, %v6388_v33 }
 0x269   : > { %v2439_v27 = vpack.c.bf16 %v2239_v0, %v2231_v2 }
 0x26a   : > { %v6570_v14 = vpop.f32.mrf.mxu0  ;;  %3751 = vmatmul.mubr.bf16.gmra.mxu0 %v2420_v20  ;;  %v6576_v11 = vpop.f32.mrf.mxu1  ;;  %3944 = vmatmul.mubr.bf16.gmra.mxu1 %v2422_v16  ;;  %v2237_v20 = vmax.f32 %v1843_v61, 0.0  ;;  %v2428_v16 = vpack.c.bf16 %v2220_v50, %v2212_v12  ;;  %v1853_v61 = vadd.f32 %v6430_v26, %v6352_v39 }
 0x26b   : > { %7355 = vst [vmem:[#allocation32_spill] sm:$0xff] %v6570_v14  ;;  %7357 = vst [vmem:[#allocation31_spill] sm:$0xff] %v6576_v11  ;;  %3760 = vmatprep.mubr.bf16.mxu0 %v2429_v31  ;;  %3953 = vmatprep.mubr.bf16.mxu1 %v2431_v59  ;;  %v2229_v14 = vmax.f32 %v1839_v1, 0.0  ;;  %v2430_v59 = vpack.c.bf16 %v2222_v54, %v2214_v48  ;;  %v2046_v1 = vadd.f32 %v6436_v4, %v6358_v57 }
 0x26c   : > { %v6580_v41 = vpop.f32.mrf.mxu0  ;;  %v6582_v7 = vpop.f32.mrf.mxu1  ;;  %v2030_v54 = vadd.f32 %v7358_v56, %v6392_v43  ;;  %v2253_v12 = vmax.f32 %v1853_v61, 0.0  ;;  %v2228_v48 = vmax.f32 %v1837_v51, 0.0  ;;  %v2245_v56 = vmax.f32 %v1849_v15, 0.0 }
 0x26d   : > { %v2437_v19 = vpack.c.bf16 %v2237_v20, %v2229_v14  ;;  %v2236_v14 = vmax.f32 %v1841_v47, 0.0  ;;  %v2238_v20 = vmax.f32 %v2034_v23, 0.0  ;;  %v2247_v47 = vmax.f32 %v2042_v36, 0.0 }
 0x26e   : > { %v6584_v18 = vpop.f32.mrf.mxu0  ;;  %v6586_v11 = vpop.f32.mrf.mxu1  ;;  %v2230_v8 = vmax.f32 %v2030_v54, 0.0  ;;  %v2044_v23 = vadd.f32 %v6426_v29, %v6392_v43  ;;  %v1863_v61 = vadd.f32 %v6462_v55, %v6352_v39  ;;  %v1847_v54 = vadd.f32 %v6410_v42, %v6388_v33 }
 0x26f   : > { %v2056_v15 = vadd.f32 %v6468_v38, %v6358_v57  ;;  %v2040_v36 = vadd.f32 %v6416_v63, %v6392_v43  ;;  %v1859_v29 = vadd.f32 %v6452_v6, %v6352_v39  ;;  %v2052_v42 = vadd.f32 %v6454_v49, %v6358_v57 }
 0x270   : > { %v6590_v31 = vpop.f32.mrf.mxu0  ;;  %v6596_v25 = vpop.f32.mrf.mxu1  ;;  %v1861_v49 = vadd.f32 %v6456_v9, %v6388_v33 }
 0x271   : > { %v2271_v63 = vmax.f32 %v2056_v15, 0.0  ;;  %v2246_v6 = vmax.f32 %v2040_v36, 0.0  ;;  %v1857_v36 = vadd.f32 %v6442_v28, %v6388_v33  ;;  %v2062_v28 = vadd.f32 %v6486_v22, %v6358_v57 }
 0x272   : > { %v6602_v50 = vpop.f32.mrf.mxu0  ;;  %3761 = vmatmul.mubr.bf16.gmra.mxu0 %v2428_v16  ;;  %v6608_v26 = vpop.f32.mrf.mxu1  ;;  %3954 = vmatmul.mubr.bf16.gmra.mxu1 %v2430_v59  ;;  %v2255_v16 = vmax.f32 %v2046_v1, 0.0  ;;  %v2436_v59 = vpack.c.bf16 %v2236_v14, %v2228_v48  ;;  %v2445_v1 = vpack.c.bf16 %v2253_v12, %v2245_v56  ;;  %v2254_v12 = vmax.f32 %v2044_v23, 0.0 }
 0x273   : > { %7359 = vst [vmem:[#allocation29_spill] sm:$0xff] %v6608_v26  ;;  %3770 = vmatprep.mubr.bf16.mxu0 %v2437_v19  ;;  %3963 = vmatprep.mubr.bf16.mxu1 %v2439_v27  ;;  %v2438_v27 = vpack.c.bf16 %v2238_v20, %v2230_v8  ;;  %v2252_v20 = vmax.f32 %v1851_v13, 0.0  ;;  %v2269_v48 = vmax.f32 %v1863_v61, 0.0  ;;  %v2244_v8 = vmax.f32 %v1847_v54, 0.0 }
 0x274   : > { %v6612_v4 = vpop.f32.mrf.mxu0  ;;  %v6614_v0 = vpop.f32.mrf.mxu1  ;;  %v2447_v24 = vpack.c.bf16 %v2255_v16, %v2247_v47  ;;  %v2263_v13 = vmax.f32 %v2052_v42, 0.0  ;;  %v2054_v23 = vadd.f32 %v6458_v3, %v6392_v43  ;;  %v1873_v61 = vadd.f32 %v6494_v53, %v6352_v39 }
 0x275   : > { %v2050_v42 = vadd.f32 %v6448_v32, %v6392_v43  ;;  %v1869_v3 = vadd.f32 %v6484_v52, %v6352_v39  ;;  %v2260_v52 = vmax.f32 %v1857_v36, 0.0  ;;  %v1871_v22 = vadd.f32 %v6488_v21, %v6388_v33 }
 0x276   : > { %v6616_v2 = vpop.f32.mrf.mxu0  ;;  %v6618_v26 = vpop.f32.mrf.mxu1  ;;  %v2455_v9 = vpack.c.bf16 %v2271_v63, %v2263_v13  ;;  %v2285_v32 = vmax.f32 %v1873_v61, 0.0  ;;  %v2064_v61 = vadd.f32 %v6490_v40, %v6392_v43  ;;  %v1867_v21 = vadd.f32 %v6474_v62, %v6388_v33 }
 0x277   : > { %v2277_v13 = vmax.f32 %v1869_v3, 0.0  ;;  %v2076_v40 = vadd.f32 %v6532_v35, %v6358_v57 }
 0x278   : > { %v6622_v19 = vpop.f32.mrf.mxu0  ;;  %v6628_v51 = vpop.f32.mrf.mxu1 }
 0x27a   : > { %v6634_v14 = vpop.f32.mrf.mxu0  ;;  %3771 = vmatmul.mubr.bf16.gmra.mxu0 %v2436_v59  ;;  %v6640_v55 = vpop.f32.mrf.mxu1  ;;  %3964 = vmatmul.mubr.bf16.gmra.mxu1 %v2438_v27  ;;  %v2261_v59 = vmax.f32 %v1859_v29, 0.0  ;;  %v2444_v27 = vpack.c.bf16 %v2252_v20, %v2244_v8  ;;  %v2066_v29 = vadd.f32 %v6500_v5, %v6358_v57  ;;  %v2270_v8 = vmax.f32 %v2054_v23, 0.0 }
 0x27b   : > { %3780 = vmatprep.mubr.bf16.mxu0 %v2445_v1  ;;  %3973 = vmatprep.mubr.bf16.mxu1 %v2447_v24  ;;  %v2446_v24 = vpack.c.bf16 %v2254_v12, %v2246_v6  ;;  %v2268_v12 = vmax.f32 %v1861_v49, 0.0  ;;  %v2279_v23 = vmax.f32 %v2062_v28, 0.0  ;;  %v7366_v28 = vld [vmem:[#allocation24_spill] sm:$0xff] }
 0x27c   : > { %v6644_v38 = vpop.f32.mrf.mxu0  ;;  %v6646_v16 = vpop.f32.mrf.mxu1  ;;  %v2453_v15 = vpack.c.bf16 %v2269_v48, %v2261_v59  ;;  %v2640_v48 = vld [vmem:[%s7245_s4] sm:$0x3]  ;;  %v2287_v6 = vmax.f32 %v2066_v29, 0.0 }
 0x27e   : > { %v6648_v56 = vpop.f32.mrf.mxu0  ;;  %v6650_v47 = vpop.f32.mrf.mxu1 }
 0x280   : > { %v6654_v1 = vpop.f32.mrf.mxu0  ;;  %v6660_v54 = vpop.f32.mrf.mxu1 }
 0x282   : > { %v6666_v20 = vpop.f32.mrf.mxu0  ;;  %3781 = vmatmul.mubr.bf16.gmra.mxu0 %v2444_v27  ;;  %v6672_v53 = vpop.f32.mrf.mxu1  ;;  %3974 = vmatmul.mubr.bf16.gmra.mxu1 %v2446_v24  ;;  %v2262_v27 = vmax.f32 %v2050_v42, 0.0  ;;  %v7363_v24 = vld [vmem:[#allocation18_spill] sm:$0xff] }
 0x283   : > { %7360 = vst [vmem:[#allocation20_spill] sm:$0xff] %v6666_v20  ;;  %7361 = vst [vmem:[#allocation23_spill] sm:$0xff] %v6672_v53  ;;  %3790 = vmatprep.mubr.bf16.mxu0 %v2453_v15  ;;  %3983 = vmatprep.mubr.bf16.mxu1 %v2455_v9  ;;  %v7364_v15 = vsub.s32 0, %v7363_v24  ;;  %v2452_v53 = vpack.c.bf16 %v2268_v12, %v2260_v52  ;;  %v7365_v29 = vsub.s32 1, %v7363_v24  ;;  %v2284_v24 = vmax.f32 %v1871_v22, 0.0 }
 0x284   : > { %v6676_v5 = vpop.f32.mrf.mxu0  ;;  %v6681_v63 = vpop.f32.mrf.mxu1  ;;  %v2454_v3 = vpack.c.bf16 %v2270_v8, %v2262_v27  ;;  %v1883_v20 = vadd.f32 %v6526_v44, %v6352_v39  ;;  %v2461_v12 = vpack.c.bf16 %v2285_v32, %v2277_v13  ;;  %v2060_v52 = vadd.f32 %v7366_v28, %v6392_v43 }
 0x285   : > { %v6691_v9 = vrot.slane %v2640_v48, %v7364_v15  ;;  %v6699_v42 = vrot.slane %v2640_v48, %v7365_v29  ;;  %v2463_v48 = vpack.c.bf16 %v2287_v6, %v2279_v23  ;;  %v1879_v8 = vadd.f32 %v6516_v60, %v6352_v39 }
 0x286   : > { %v6683_v59 = vpop.f32.mrf.mxu0  ;;  %v6687_v49 = vpop.f32.mrf.mxu1  ;;  %v2286_v44 = vmax.f32 %v2064_v61, 0.0  ;;  %v2072_v32 = vadd.f32 %v6518_v58, %v6358_v57  ;;  %v2276_v29 = vmax.f32 %v1867_v21, 0.0  ;;  %v2301_v35 = vmax.f32 %v1883_v20, 0.0  ;;  %v7368_v20 = vld [vmem:[#allocation21_spill] sm:$0xff] }
 0x287   : > { %7362 = vst [vmem:[#allocation33_spill] sm:$0xff] %v6687_v49  ;;  %v2278_v22 = vmax.f32 %v2060_v52, 0.0  ;;  %v1881_v60 = vadd.f32 %v6520_v46, %v6388_v33  ;;  %v2293_v61 = vmax.f32 %v1879_v8, 0.0  ;;  %v1893_v46 = vadd.f32 %v6558_v37, %v6352_v39 }
 0x288   : > { %v6695_v36 = vpop.f32.mrf.mxu0  ;;  %v6705_v15 = vpop.f32.mrf.mxu1 }
 0x289   : > { %v2462_v21 = vpack.c.bf16 %v2286_v44, %v2278_v22 }
 0x28a   : > { %v3326_v49 = vpop.f32.mrf.mxu0  ;;  %3791 = vmatmul.mubr.bf16.gmra.mxu0 %v2452_v53  ;;  %v3519_v27 = vpop.f32.mrf.mxu1  ;;  %3984 = vmatmul.mubr.bf16.gmra.mxu1 %v2454_v3  ;;  %v2460_v3 = vpack.c.bf16 %v2284_v24, %v2276_v29  ;;  %v2469_v29 = vpack.c.bf16 %v2301_v35, %v2293_v61 }
 0x28b   : > { %v3327_v62 = vadd.f32 %v3326_v49, %v6691_v9  ;;  %3800 = vmatprep.mubr.bf16.mxu0 %v2461_v12  ;;  %3993 = vmatprep.mubr.bf16.mxu1 %v2463_v48  ;;  %v2303_v49 = vmax.f32 %v2076_v40, 0.0 }
 0x28c   : > { %v3328_v13 = vpop.f32.mrf.mxu0  ;;  %v3521_v6 = vpop.f32.mrf.mxu1 }
 0x28d   : > { %v6716_v28 = vadd.f32 %v3519_v27, %v3327_v62  ;;  %v3329_v53 = vadd.f32 %v3328_v13, %v6699_v42  ;;  %v1877_v62 = vadd.f32 %v7368_v20, %v6388_v33  ;;  %v2295_v27 = vmax.f32 %v2072_v32, 0.0  ;;  %v7369_v13 = vld [vmem:[#allocation28_spill] sm:$0xff] }
 0x28e   : > { %v3330_v23 = vpop.f32.mrf.mxu0  ;;  %v3523_v48 = vpop.f32.mrf.mxu1  ;;  %v2074_v52 = vadd.f32 %v7369_v13, %v6392_v43  ;;  %v2086_v32 = vadd.f32 %v6564_v30, %v6358_v57  ;;  %v1889_v20 = vadd.f32 %v6548_v34, %v6352_v39 }
 0x28f   : > { %7367 = vst [vmem:[#allocation19_spill] sm:$0xff] %v6716_v28  ;;  %v6721_v12 = vadd.f32 %v3521_v6, %v3329_v53  ;;  %v3331_v58 = vadd.f32 %v3330_v23, %v6691_v9  ;;  %v7370_v53 = vld [vmem:[#allocation26_spill] sm:$0xff]  ;;  %v2300_v6 = vmax.f32 %v1881_v60, 0.0  ;;  %v2471_v23 = vpack.c.bf16 %v2303_v49, %v2295_v27 }
 0x290   : > { %v3332_v28 = vpop.f32.mrf.mxu0  ;;  %v3525_v8 = vpop.f32.mrf.mxu1  ;;  %v2070_v44 = vadd.f32 %v7370_v53, %v6392_v43  ;;  %v2292_v35 = vmax.f32 %v1877_v62, 0.0  ;;  %v2302_v61 = vmax.f32 %v2074_v52, 0.0  ;;  %v2082_v60 = vadd.f32 %v6550_v45, %v6358_v57 }
 0x291   : > { %v6730_v40 = vadd.f32 %v3523_v48, %v3331_v58  ;;  %v3333_v24 = vadd.f32 %v3332_v28, %v6699_v42  ;;  %v2317_v48 = vmax.f32 %v1893_v46, 0.0  ;;  %v2309_v53 = vmax.f32 %v1889_v20, 0.0  ;;  %v7371_v46 = vld [vmem:[#allocation27_spill] sm:$0xff] }
 0x292   : > { %v3336_v22 = vpop.f32.mrf.mxu0  ;;  %3801 = vmatmul.mubr.bf16.gmra.mxu0 %v2460_v3  ;;  %v3529_v28 = vpop.f32.mrf.mxu1  ;;  %3994 = vmatmul.mubr.bf16.gmra.mxu1 %v2462_v21  ;;  %v2294_v27 = vmax.f32 %v2070_v44, 0.0  ;;  %v2468_v13 = vpack.c.bf16 %v2300_v6, %v2292_v35  ;;  %v1891_v21 = vadd.f32 %v6552_v10, %v6388_v33  ;;  %v2084_v44 = vadd.f32 %v6554_v17, %v6392_v43  ;;  %v7372_v35 = vld [vmem:[#allocation30_spill] sm:$0xff] }
 0x293   : > { %v6739_v37 = vadd.f32 %v3525_v8, %v3333_v24  ;;  %v3337_v58 = vadd.f32 %v3336_v22, %v6691_v9  ;;  %3810 = vmatprep.mubr.bf16.mxu0 %v2469_v29  ;;  %4003 = vmatprep.mubr.bf16.mxu1 %v2471_v23  ;;  %v2319_v24 = vmax.f32 %v2086_v32, 0.0  ;;  %v1887_v22 = vadd.f32 %v7371_v46, %v6388_v33 }
 0x294   : > { %v3338_v30 = vpop.f32.mrf.mxu0  ;;  %v3531_v34 = vpop.f32.mrf.mxu1  ;;  %v2470_v29 = vpack.c.bf16 %v2302_v61, %v2294_v27  ;;  %v2311_v23 = vmax.f32 %v2082_v60, 0.0  ;;  %v1903_v32 = vadd.f32 %v6590_v31, %v6352_v39  ;;  %v2080_v61 = vadd.f32 %v7372_v35, %v6392_v43 }
 0x295   : > { %v6744_v3 = vadd.f32 %v3529_v28, %v3337_v58  ;;  %v3339_v49 = vadd.f32 %v3338_v30, %v6699_v42  ;;  %v2477_v28 = vpack.c.bf16 %v2317_v48, %v2309_v53  ;;  %v2096_v30 = vadd.f32 %v6596_v25, %v6358_v57 }
 0x296   : > { %v3340_v8 = vpop.f32.mrf.mxu0  ;;  %v3533_v52 = vpop.f32.mrf.mxu1  ;;  %v2316_v17 = vmax.f32 %v1891_v21, 0.0  ;;  %v2318_v48 = vmax.f32 %v2084_v44, 0.0  ;;  %v2092_v53 = vadd.f32 %v6582_v7, %v6358_v57  ;;  %v1901_v46 = vadd.f32 %v6584_v18, %v6388_v33 }
 0x297   : > { %v6749_v62 = vadd.f32 %v3531_v34, %v3339_v49  ;;  %v3341_v45 = vadd.f32 %v3340_v8, %v6691_v9  ;;  %v2479_v49 = vpack.c.bf16 %v2319_v24, %v2311_v23  ;;  %v1899_v34 = vadd.f32 %v6580_v41, %v6352_v39 }
 0x298   : > { %v3342_v6 = vpop.f32.mrf.mxu0  ;;  %v3535_v58 = vpop.f32.mrf.mxu1  ;;  %v2335_v23 = vmax.f32 %v2096_v30, 0.0  ;;  %v2327_v35 = vmax.f32 %v2092_v53, 0.0  ;;  %v1913_v18 = vadd.f32 %v6622_v19, %v6352_v39  ;;  %v2106_v53 = vadd.f32 %v6628_v51, %v6358_v57 }
 0x299   : > { %v6758_v20 = vadd.f32 %v3533_v52, %v3341_v45  ;;  %v3343_v10 = vadd.f32 %v3342_v6, %v6699_v42  ;;  %v2308_v45 = vmax.f32 %v1887_v22, 0.0  ;;  %v2310_v52 = vmax.f32 %v2080_v61, 0.0 }
 0x29a   : > { %v3346_v60 = vpop.f32.mrf.mxu0  ;;  %3811 = vmatmul.mubr.bf16.gmra.mxu0 %v2468_v13  ;;  %v3539_v8 = vpop.f32.mrf.mxu1  ;;  %4004 = vmatmul.mubr.bf16.gmra.mxu1 %v2470_v29  ;;  %v2333_v13 = vmax.f32 %v1903_v32, 0.0  ;;  %v2325_v44 = vmax.f32 %v1899_v34, 0.0  ;;  %v7373_v32 = vld [vmem:[#allocation32_spill] sm:$0xff]  ;;  %v2094_v61 = vadd.f32 %v6586_v11, %v6392_v43  ;;  %v2487_v11 = vpack.c.bf16 %v2335_v23, %v2327_v35 }
 0x29b   : > { %v6767_v31 = vadd.f32 %v3535_v58, %v3343_v10  ;;  %v3347_v27 = vadd.f32 %v3346_v60, %v6691_v9  ;;  %3820 = vmatprep.mubr.bf16.mxu0 %v2477_v28  ;;  %4013 = vmatprep.mubr.bf16.mxu1 %v2479_v49  ;;  %v2476_v6 = vpack.c.bf16 %v2316_v17, %v2308_v45 }
 0x29c   : > { %v3348_v25 = vpop.f32.mrf.mxu0  ;;  %v3541_v41 = vpop.f32.mrf.mxu1  ;;  %v2478_v22 = vpack.c.bf16 %v2318_v48, %v2310_v52  ;;  %v1897_v28 = vadd.f32 %v7373_v32, %v6388_v33  ;;  %v2485_v34 = vpack.c.bf16 %v2333_v13, %v2325_v44  ;;  %v2332_v48 = vmax.f32 %v1901_v46, 0.0 }
 0x29d   : > { %v6772_v24 = vadd.f32 %v3539_v8, %v3347_v27  ;;  %v3349_v21 = vadd.f32 %v3348_v25, %v6699_v42  ;;  %v7374_v27 = vld [vmem:[#allocation31_spill] sm:$0xff]  ;;  %v1909_v45 = vadd.f32 %v6612_v4, %v6352_v39  ;;  %v2334_v52 = vmax.f32 %v2094_v61, 0.0 }
 0x29e   : > { %v3350_v29 = vpop.f32.mrf.mxu0  ;;  %v3543_v58 = vpop.f32.mrf.mxu1  ;;  %v2090_v8 = vadd.f32 %v7374_v27, %v6392_v43  ;;  %v2324_v13 = vmax.f32 %v1897_v28, 0.0  ;;  %v2102_v46 = vadd.f32 %v6614_v0, %v6358_v57  ;;  %v1923_v27 = vadd.f32 %v6654_v1, %v6352_v39 }
 0x29f   : > { %v6777_v10 = vadd.f32 %v3541_v41, %v3349_v21  ;;  %v3351_v7 = vadd.f32 %v3350_v29, %v6691_v9  ;;  %v2349_v29 = vmax.f32 %v1913_v18, 0.0  ;;  %v2341_v35 = vmax.f32 %v1909_v45, 0.0 }
 0x2a0   : > { %v3352_v60 = vpop.f32.mrf.mxu0  ;;  %v3545_v17 = vpop.f32.mrf.mxu1  ;;  %v2326_v44 = vmax.f32 %v2090_v8, 0.0  ;;  %v1907_v18 = vadd.f32 %v6602_v50, %v6388_v33  ;;  %v2116_v50 = vadd.f32 %v6660_v54, %v6358_v57 }
 0x2a1   : > { %v6786_v30 = vadd.f32 %v3543_v58, %v3351_v7  ;;  %v3353_v49 = vadd.f32 %v3352_v60, %v6699_v42  ;;  %v2484_v7 = vpack.c.bf16 %v2332_v48, %v2324_v13  ;;  %v2351_v58 = vmax.f32 %v2106_v53, 0.0 }
 0x2a2   : > { %v3356_v25 = vpop.f32.mrf.mxu0  ;;  %3821 = vmatmul.mubr.bf16.gmra.mxu0 %v2476_v6  ;;  %v3549_v41 = vpop.f32.mrf.mxu1  ;;  %4014 = vmatmul.mubr.bf16.gmra.mxu1 %v2478_v22  ;;  %v1911_v22 = vadd.f32 %v6616_v2, %v6388_v33  ;;  %v2486_v60 = vpack.c.bf16 %v2334_v52, %v2326_v44  ;;  %v2493_v53 = vpack.c.bf16 %v2349_v29, %v2341_v35  ;;  %v2340_v29 = vmax.f32 %v1907_v18, 0.0 }
 0x2a3   : > { %v6795_v19 = vadd.f32 %v3545_v17, %v3353_v49  ;;  %v3357_v21 = vadd.f32 %v3356_v25, %v6691_v9  ;;  %3830 = vmatprep.mubr.bf16.mxu0 %v2485_v34  ;;  %4023 = vmatprep.mubr.bf16.mxu1 %v2487_v11  ;;  %v2343_v49 = vmax.f32 %v2102_v46, 0.0  ;;  %v2104_v17 = vadd.f32 %v6618_v26, %v6392_v43  ;;  %v7375_v25 = vld [vmem:[#allocation29_spill] sm:$0xff] }
 0x2a4   : > { %v3358_v51 = vpop.f32.mrf.mxu0  ;;  %v3551_v4 = vpop.f32.mrf.mxu1  ;;  %v2100_v11 = vadd.f32 %v7375_v25, %v6392_v43  ;;  %v2348_v26 = vmax.f32 %v1911_v22, 0.0  ;;  %v1921_v18 = vadd.f32 %v6648_v56, %v6388_v33  ;;  %v2126_v56 = vadd.f32 %v6705_v15, %v6358_v57 }
 0x2a5   : > { %v6800_v6 = vadd.f32 %v3549_v41, %v3357_v21  ;;  %v3359_v23 = vadd.f32 %v3358_v51, %v6699_v42  ;;  %v2495_v21 = vpack.c.bf16 %v2351_v58, %v2343_v49  ;;  %v1919_v41 = vadd.f32 %v6644_v38, %v6352_v39 }
 0x2a6   : > { %v3360_v32 = vpop.f32.mrf.mxu0  ;;  %v3553_v61 = vpop.f32.mrf.mxu1  ;;  %v2350_v46 = vmax.f32 %v2104_v17, 0.0  ;;  %v2112_v51 = vadd.f32 %v6646_v16, %v6358_v57  ;;  %v2367_v58 = vmax.f32 %v2116_v50, 0.0  ;;  %v2492_v35 = vpack.c.bf16 %v2348_v26, %v2340_v29 }
 0x2a7   : > { %v6805_v28 = vadd.f32 %v3551_v4, %v3359_v23  ;;  %v3361_v0 = vadd.f32 %v3360_v32, %v6691_v9  ;;  %v2365_v23 = vmax.f32 %v1923_v27, 0.0  ;;  %v2357_v22 = vmax.f32 %v1919_v41, 0.0 }
 0x2a8   : > { %v3362_v34 = vpop.f32.mrf.mxu0  ;;  %v3555_v48 = vpop.f32.mrf.mxu1  ;;  %v2359_v49 = vmax.f32 %v2112_v51, 0.0  ;;  %v2114_v17 = vadd.f32 %v6650_v47, %v6392_v43  ;;  %v1933_v27 = vadd.f32 %v6695_v36, %v6352_v39  ;;  %v2110_v50 = vadd.f32 %v6640_v55, %v6392_v43 }
 0x2a9   : > { %v6814_v8 = vadd.f32 %v3553_v61, %v3361_v0  ;;  %v3363_v2 = vadd.f32 %v3362_v34, %v6699_v42  ;;  %v2501_v25 = vpack.c.bf16 %v2365_v23, %v2357_v22  ;;  %v1929_v36 = vadd.f32 %v6676_v5, %v6352_v39 }
 0x2aa   : > { %v3366_v45 = vpop.f32.mrf.mxu0  ;;  %3831 = vmatmul.mubr.bf16.gmra.mxu0 %v2484_v7  ;;  %v3559_v52 = vpop.f32.mrf.mxu1  ;;  %4024 = vmatmul.mubr.bf16.gmra.mxu1 %v2486_v60  ;;  %v2342_v7 = vmax.f32 %v2100_v11, 0.0  ;;  %v1917_v11 = vadd.f32 %v6634_v14, %v6388_v33  ;;  %v2364_v14 = vmax.f32 %v1921_v18, 0.0  ;;  %v2122_v55 = vadd.f32 %v6681_v63, %v6358_v57 }
 0x2ab   : > { %v6823_v1 = vadd.f32 %v3555_v48, %v3363_v2  ;;  %v3367_v13 = vadd.f32 %v3366_v45, %v6691_v9  ;;  %3840 = vmatprep.mubr.bf16.mxu0 %v2493_v53  ;;  %4033 = vmatprep.mubr.bf16.mxu1 %v2495_v21  ;;  %v2503_v45 = vpack.c.bf16 %v2367_v58, %v2359_v49  ;;  %v2383_v29 = vmax.f32 %v2126_v56, 0.0 }
 0x2ac   : > { %v3368_v54 = vpop.f32.mrf.mxu0  ;;  %v3561_v38 = vpop.f32.mrf.mxu1  ;;  %v2494_v16 = vpack.c.bf16 %v2350_v46, %v2342_v7  ;;  %v2356_v5 = vmax.f32 %v1917_v11, 0.0  ;;  %v2375_v63 = vmax.f32 %v2122_v55, 0.0 }
 0x2ad   : > { %v6828_v4 = vadd.f32 %v3559_v52, %v3367_v13  ;;  %v3369_v44 = vadd.f32 %v3368_v54, %v6699_v42  ;;  %v2366_v13 = vmax.f32 %v2114_v17, 0.0  ;;  %v2381_v52 = vmax.f32 %v1933_v27, 0.0 }
 0x2ae   : > { %v3370_v32 = vpop.f32.mrf.mxu0  ;;  %v3563_v60 = vpop.f32.mrf.mxu1  ;;  %v2358_v54 = vmax.f32 %v2110_v50, 0.0 }
 0x2af   : > { %v6831_v0 = vadd.f32 %v3561_v38, %v3369_v44  ;;  %v3371_v61 = vadd.f32 %v3370_v32, %v6691_v9  ;;  %v2373_v44 = vmax.f32 %v1929_v36, 0.0  ;;  %v2500_v32 = vpack.c.bf16 %v2364_v14, %v2356_v5 }
 0x2b0   : > { %v3372_v34 = vpop.f32.mrf.mxu0  ;;  %v3565_v53 = vpop.f32.mrf.mxu1  ;;  %v2502_v57 = vpack.c.bf16 %v2366_v13, %v2358_v54 }
 0x2b1   : > { %v6840_v2 = vadd.f32 %v3563_v60, %v3371_v61  ;;  %v3373_v48 = vadd.f32 %v3372_v34, %v6699_v42  ;;  %v7376_v61 = vld [vmem:[#allocation33_spill] sm:$0xff]  ;;  %v2509_v17 = vpack.c.bf16 %v2381_v52, %v2373_v44  ;;  %v7377_v34 = vld [vmem:[#allocation20_spill] sm:$0xff] }
 0x2b2   : > { %v3376_v47 = vpop.f32.mrf.mxu0  ;;  %3841 = vmatmul.mubr.bf16.gmra.mxu0 %v2492_v35  ;;  %v3569_v41 = vpop.f32.mrf.mxu1  ;;  %4034 = vmatmul.mubr.bf16.gmra.mxu1 %v2494_v16  ;;  %v1931_v35 = vadd.f32 %v6683_v59, %v6388_v33  ;;  %v2124_v60 = vadd.f32 %v7376_v61, %v6392_v43  ;;  %v1927_v27 = vadd.f32 %v7377_v34, %v6388_v33 }
 0x2b3   : > { %v6851_v21 = vadd.f32 %v3565_v53, %v3373_v48  ;;  %v3377_v26 = vadd.f32 %v3376_v47, %v6691_v9  ;;  %3850 = vmatprep.mubr.bf16.mxu0 %v2501_v25  ;;  %4043 = vmatprep.mubr.bf16.mxu1 %v2503_v45  ;;  %v2511_v53 = vpack.c.bf16 %v2383_v29, %v2375_v63  ;;  %v7378_v25 = vld [vmem:[#allocation23_spill] sm:$0xff] }
 0x2b4   : > { %v3378_v15 = vpop.f32.mrf.mxu0  ;;  %v3571_v39 = vpop.f32.mrf.mxu1  ;;  %v2120_v11 = vadd.f32 %v7378_v25, %v6392_v43  ;;  %v2380_v47 = vmax.f32 %v1931_v35, 0.0  ;;  %v2382_v36 = vmax.f32 %v2124_v60, 0.0  ;;  %v2372_v14 = vmax.f32 %v1927_v27, 0.0 }
 0x2b5   : > { %v6856_v46 = vadd.f32 %v3569_v41, %v3377_v26  ;;  %v3379_v51 = vadd.f32 %v3378_v15, %v6699_v42 }
 0x2b6   : > { %v3380_v23 = vpop.f32.mrf.mxu0  ;;  %v3573_v58 = vpop.f32.mrf.mxu1  ;;  %v2374_v55 = vmax.f32 %v2120_v11, 0.0 }
 0x2b7   : > { %v6859_v38 = vadd.f32 %v3571_v39, %v3379_v51  ;;  %v3381_v7 = vadd.f32 %v3380_v23, %v6691_v9  ;;  %v2508_v51 = vpack.c.bf16 %v2380_v47, %v2372_v14 }
 0x2b8   : > { %v3382_v22 = vpop.f32.mrf.mxu0  ;;  %v3575_v18 = vpop.f32.mrf.mxu1  ;;  %v2510_v5 = vpack.c.bf16 %v2382_v36, %v2374_v55 }
 0x2b9   : > { %v6866_v16 = vadd.f32 %v3573_v58, %v3381_v7  ;;  %v3383_v49 = vadd.f32 %v3382_v22, %v6699_v42 }
 0x2ba   : > { %v3386_v48 = vpop.f32.mrf.mxu0  ;;  %3851 = vmatmul.mubr.bf16.gmra.mxu0 %v2500_v32  ;;  %v3579_v56 = vpop.f32.mrf.mxu1  ;;  %4044 = vmatmul.mubr.bf16.gmra.mxu1 %v2502_v57 }
 0x2bb   : > { %v6873_v59 = vadd.f32 %v3575_v18, %v3383_v49  ;;  %v3387_v50 = vadd.f32 %v3386_v48, %v6691_v9  ;;  %3860 = vmatprep.mubr.bf16.mxu0 %v2509_v17  ;;  %4053 = vmatprep.mubr.bf16.mxu1 %v2511_v53 }
 0x2bc   : > { %v3388_v45 = vpop.f32.mrf.mxu0  ;;  %v3581_v41 = vpop.f32.mrf.mxu1 }
 0x2bd   : > { %v6876_v26 = vadd.f32 %v3579_v56, %v3387_v50  ;;  %v3389_v33 = vadd.f32 %v3388_v45, %v6699_v42 }
 0x2be   : > { %v3390_v13 = vpop.f32.mrf.mxu0  ;;  %v3583_v52 = vpop.f32.mrf.mxu1 }
 0x2bf   : > { %v6879_v43 = vadd.f32 %v3581_v41, %v3389_v33  ;;  %v3391_v15 = vadd.f32 %v3390_v13, %v6691_v9 }
 0x2c0   : > { %v3392_v39 = vpop.f32.mrf.mxu0  ;;  %v3585_v23 = vpop.f32.mrf.mxu1 }
 0x2c1   : > { %v6882_v54 = vadd.f32 %v3583_v52, %v3391_v15  ;;  %v3393_v29 = vadd.f32 %v3392_v39, %v6699_v42 }
 0x2c2   : > { %v3396_v44 = vpop.f32.mrf.mxu0  ;;  %3861 = vmatmul.mubr.bf16.gmra.mxu0 %v2508_v51  ;;  %v3589_v32 = vpop.f32.mrf.mxu1  ;;  %4054 = vmatmul.mubr.bf16.gmra.mxu1 %v2510_v5 }
 0x2c3   : > { %v6885_v7 = vadd.f32 %v3585_v23, %v3393_v29  ;;  %v3397_v58 = vadd.f32 %v3396_v44, %v6691_v9 }
 0x2c4   : > { %v3398_v57 = vpop.f32.mrf.mxu0  ;;  %v3591_v22 = vpop.f32.mrf.mxu1 }
 0x2c5   : > { %v6888_v63 = vadd.f32 %v3589_v32, %v3397_v58  ;;  %v3399_v35 = vadd.f32 %v3398_v57, %v6699_v42 }
 0x2c6   : > { %v3400_v61 = vpop.f32.mrf.mxu0  ;;  %v3593_v18 = vpop.f32.mrf.mxu1 }
 0x2c7   : > { %v6891_v60 = vadd.f32 %v3591_v22, %v3399_v35  ;;  %v3401_v49 = vadd.f32 %v3400_v61, %v6691_v9 }
 0x2c8   : > { %v3402_v17 = vpop.f32.mrf.mxu0  ;;  %v3595_v48 = vpop.f32.mrf.mxu1 }
 0x2c9   : > { %v6894_v34 = vadd.f32 %v3593_v18, %v3401_v49  ;;  %v3403_v27 = vadd.f32 %v3402_v17, %v6699_v42 }
 0x2ca   : > { %v3406_v53 = vpop.f32.mrf.mxu0  ;;  %v3599_v50 = vpop.f32.mrf.mxu1 }
 0x2cb   : > { %v6897_v25 = vadd.f32 %v3595_v48, %v3403_v27  ;;  %v3407_v11 = vadd.f32 %v3406_v53, %v6691_v9 }
 0x2cc   : > { %v3408_v56 = vpop.f32.mrf.mxu0  ;;  %v3601_v36 = vpop.f32.mrf.mxu1 }
 0x2cd   : > { %v6900_v47 = vadd.f32 %v3599_v50, %v3407_v11  ;;  %v3409_v45 = vadd.f32 %v3408_v56, %v6699_v42 }
 0x2ce   : > { %v3410_v33 = vpop.f32.mrf.mxu0  ;;  %v3603_v13 = vpop.f32.mrf.mxu1 }
 0x2cf   : > { %v6903_v41 = vadd.f32 %v3601_v36, %v3409_v45  ;;  %v3411_v14 = vadd.f32 %v3410_v33, %v6691_v9 }
 0x2d0   : > { %v3412_v55 = vpop.f32.mrf.mxu0  ;;  %v3605_v51 = vpop.f32.mrf.mxu1 }
 0x2d1   : > { %v6906_v15 = vadd.f32 %v3603_v13, %v3411_v14  ;;  %v3413_v52 = vadd.f32 %v3412_v55, %v6699_v42 }
 0x2d2   : > { %v3416_v39 = vpop.f32.mrf.mxu0  ;;  %v3609_v23 = vpop.f32.mrf.mxu1 }
 0x2d3   : > { %v6909_v5 = vadd.f32 %v3605_v51, %v3413_v52  ;;  %v3417_v29 = vadd.f32 %v3416_v39, %v6691_v9 }
 0x2d4   : > { %v3418_v44 = vpop.f32.mrf.mxu0  ;;  %v3611_v57 = vpop.f32.mrf.mxu1 }
 0x2d5   : > { %v6912_v58 = vadd.f32 %v3609_v23, %v3417_v29  ;;  %v3419_v32 = vadd.f32 %v3418_v44, %v6699_v42 }
 0x2d6   : > { %v3420_v35 = vpop.f32.mrf.mxu0  ;;  %v3613_v49 = vpop.f32.mrf.mxu1 }
 0x2d7   : > { %v6915_v22 = vadd.f32 %v3611_v57, %v3419_v32  ;;  %v3421_v61 = vadd.f32 %v3420_v35, %v6691_v9 }
 0x2d8   : > { %v3422_v18 = vpop.f32.mrf.mxu0  ;;  %v3615_v48 = vpop.f32.mrf.mxu1 }
 0x2d9   : > { %v6918_v17 = vadd.f32 %v3613_v49, %v3421_v61  ;;  %v3423_v27 = vadd.f32 %v3422_v18, %v6699_v42 }
 0x2da   : > { %v3426_v53 = vpop.f32.mrf.mxu0  ;;  %v3619_v56 = vpop.f32.mrf.mxu1 }
 0x2db   : > { %v6921_v11 = vadd.f32 %v3615_v48, %v3423_v27  ;;  %v3427_v50 = vadd.f32 %v3426_v53, %v6691_v9 }
 0x2dc   : > { %v3428_v45 = vpop.f32.mrf.mxu0  ;;  %v3621_v14 = vpop.f32.mrf.mxu1 }
 0x2dd   : > { %v6924_v36 = vadd.f32 %v3619_v56, %v3427_v50  ;;  %v3429_v33 = vadd.f32 %v3428_v45, %v6699_v42 }
 0x2de   : > { %v3430_v13 = vpop.f32.mrf.mxu0  ;;  %v3623_v51 = vpop.f32.mrf.mxu1 }
 0x2df   : > { %v6927_v55 = vadd.f32 %v3621_v14, %v3429_v33  ;;  %v3431_v52 = vadd.f32 %v3430_v13, %v6691_v9 }
 0x2e0   : > { %v3432_v39 = vpop.f32.mrf.mxu0  ;;  %v3625_v44 = vpop.f32.mrf.mxu1 }
 0x2e1   : > { %v6930_v29 = vadd.f32 %v3623_v51, %v3431_v52  ;;  %v3433_v23 = vadd.f32 %v3432_v39, %v6699_v42 }
 0x2e2   : > { %v3436_v32 = vpop.f32.mrf.mxu0  ;;  %v3629_v61 = vpop.f32.mrf.mxu1 }
 0x2e3   : > { %v6933_v57 = vadd.f32 %v3625_v44, %v3433_v23  ;;  %v3437_v35 = vadd.f32 %v3436_v32, %v6691_v9 }
 0x2e4   : > { %v3438_v49 = vpop.f32.mrf.mxu0  ;;  %v3631_v48 = vpop.f32.mrf.mxu1 }
 0x2e5   : > { %v6936_v18 = vadd.f32 %v3629_v61, %v3437_v35  ;;  %v3439_v27 = vadd.f32 %v3438_v49, %v6699_v42 }
 0x2e6   : > { %v3440_v53 = vpop.f32.mrf.mxu0  ;;  %v3633_v45 = vpop.f32.mrf.mxu1 }
 0x2e7   : > { %v6939_v50 = vadd.f32 %v3631_v48, %v3439_v27  ;;  %v3441_v56 = vadd.f32 %v3440_v53, %v6691_v9 }
 0x2e8   : > { %v3442_v33 = vpop.f32.mrf.mxu0  ;;  %v3635_v52 = vpop.f32.mrf.mxu1 }
 0x2e9   : > { %v6942_v14 = vadd.f32 %v3633_v45, %v3441_v56  ;;  %v3443_v13 = vadd.f32 %v3442_v33, %v6699_v42 }
 0x2ea   : > { %v3446_v51 = vpop.f32.mrf.mxu0  ;;  %v3639_v44 = vpop.f32.mrf.mxu1 }
 0x2eb   : > { %v6945_v39 = vadd.f32 %v3635_v52, %v3443_v13  ;;  %v3447_v23 = vadd.f32 %v3446_v51, %v6691_v9 }
 0x2ec   : > { %v3448_v32 = vpop.f32.mrf.mxu0  ;;  %v3641_v49 = vpop.f32.mrf.mxu1 }
 0x2ed   : > { %7379 = vst [vmem:[#allocation25_spill] sm:$0xff] %v6945_v39  ;;  %v6948_v35 = vadd.f32 %v3639_v44, %v3447_v23  ;;  %v3449_v61 = vadd.f32 %v3448_v32, %v6699_v42 }
 0x2ee   : > { %v3450_v27 = vpop.f32.mrf.mxu0  ;;  %v3643_v56 = vpop.f32.mrf.mxu1 }
 0x2ef   : > { %7380 = vst [vmem:[#allocation22_spill] sm:$0xff] %v6948_v35  ;;  %v6951_v48 = vadd.f32 %v3641_v49, %v3449_v61  ;;  %v3451_v53 = vadd.f32 %v3450_v27, %v6691_v9 }
 0x2f0   : > { %v3452_v45 = vpop.f32.mrf.mxu0  ;;  %v3645_v52 = vpop.f32.mrf.mxu1 }
 0x2f1   : > { %7381 = vst [vmem:[#allocation18_spill] sm:$0xff] %v6951_v48  ;;  %v6954_v33 = vadd.f32 %v3643_v56, %v3451_v53  ;;  %v3453_v13 = vadd.f32 %v3452_v45, %v6699_v42 }
 0x2f2   : > { %v3456_v51 = vpop.f32.mrf.mxu0  ;;  %v3649_v44 = vpop.f32.mrf.mxu1 }
 0x2f3   : > { %7382 = vst [vmem:[#allocation24_spill] sm:$0xff] %v6954_v33  ;;  %v6957_v39 = vadd.f32 %v3645_v52, %v3453_v13  ;;  %v3457_v23 = vadd.f32 %v3456_v51, %v6691_v9 }
 0x2f4   : > { %v3458_v32 = vpop.f32.mrf.mxu0  ;;  %v3651_v49 = vpop.f32.mrf.mxu1 }
 0x2f5   : > { %7383 = vst [vmem:[#allocation21_spill] sm:$0xff] %v6957_v39  ;;  %v6960_v35 = vadd.f32 %v3649_v44, %v3457_v23  ;;  %v3459_v61 = vadd.f32 %v3458_v32, %v6699_v42 }
 0x2f6   : > { %v3460_v27 = vpop.f32.mrf.mxu0  ;;  %v3653_v56 = vpop.f32.mrf.mxu1 }
 0x2f7   : > { %7384 = vst [vmem:[#allocation28_spill] sm:$0xff] %v6960_v35  ;;  %v6963_v48 = vadd.f32 %v3651_v49, %v3459_v61  ;;  %v3461_v53 = vadd.f32 %v3460_v27, %v6691_v9 }
 0x2f8   : > { %v3462_v45 = vpop.f32.mrf.mxu0  ;;  %v3655_v52 = vpop.f32.mrf.mxu1 }
 0x2f9   : > { %7385 = vst [vmem:[#allocation26_spill] sm:$0xff] %v6963_v48  ;;  %v6966_v33 = vadd.f32 %v3653_v56, %v3461_v53  ;;  %v3463_v13 = vadd.f32 %v3462_v45, %v6699_v42 }
 0x2fa   : > { %v3466_v51 = vpop.f32.mrf.mxu0  ;;  %v3659_v44 = vpop.f32.mrf.mxu1 }
 0x2fb   : > { %7386 = vst [vmem:[#allocation27_spill] sm:$0xff] %v6966_v33  ;;  %v6969_v39 = vadd.f32 %v3655_v52, %v3463_v13  ;;  %v3467_v23 = vadd.f32 %v3466_v51, %v6691_v9 }
 0x2fc   : > { %v3468_v32 = vpop.f32.mrf.mxu0  ;;  %v3661_v49 = vpop.f32.mrf.mxu1 }
 0x2fd   : > { %7387 = vst [vmem:[#allocation30_spill] sm:$0xff] %v6969_v39  ;;  %v6972_v35 = vadd.f32 %v3659_v44, %v3467_v23  ;;  %v3469_v61 = vadd.f32 %v3468_v32, %v6699_v42 }
 0x2fe   : > { %v3470_v27 = vpop.f32.mrf.mxu0  ;;  %v3663_v56 = vpop.f32.mrf.mxu1 }
 0x2ff   : > { %7388 = vst [vmem:[#allocation32_spill] sm:$0xff] %v6972_v35  ;;  %v6975_v48 = vadd.f32 %v3661_v49, %v3469_v61  ;;  %v3471_v53 = vadd.f32 %v3470_v27, %v6691_v9 }
 0x300   : > { %v3472_v45 = vpop.f32.mrf.mxu0  ;;  %v3665_v52 = vpop.f32.mrf.mxu1 }
 0x301   : > { %7389 = vst [vmem:[#allocation31_spill] sm:$0xff] %v6975_v48  ;;  %v6978_v33 = vadd.f32 %v3663_v56, %v3471_v53  ;;  %v3473_v13 = vadd.f32 %v3472_v45, %v6699_v42 }
 0x302   : > { %v3476_v51 = vpop.f32.mrf.mxu0  ;;  %v3669_v44 = vpop.f32.mrf.mxu1 }
 0x303   : > { %7390 = vst [vmem:[#allocation29_spill] sm:$0xff] %v6978_v33  ;;  %v6981_v39 = vadd.f32 %v3665_v52, %v3473_v13  ;;  %v3477_v23 = vadd.f32 %v3476_v51, %v6691_v9 }
 0x304   : > { %v3478_v32 = vpop.f32.mrf.mxu0  ;;  %v3671_v49 = vpop.f32.mrf.mxu1 }
 0x305   : > { %7391 = vst [vmem:[#allocation33_spill] sm:$0xff] %v6981_v39  ;;  %v6984_v35 = vadd.f32 %v3669_v44, %v3477_v23  ;;  %v3479_v61 = vadd.f32 %v3478_v32, %v6699_v42  ;;  %v7395_v44 = vld [vmem:[#allocation19_spill] sm:$0xff] }
 0x306   : > { %v3480_v27 = vpop.f32.mrf.mxu0  ;;  %v3673_v56 = vpop.f32.mrf.mxu1 }
 0x307   : > { %7392 = vst [vmem:[#allocation20_spill] sm:$0xff] %v6984_v35  ;;  %v6987_v48 = vadd.f32 %v3671_v49, %v3479_v61  ;;  %v3481_v53 = vadd.f32 %v3480_v27, %v6691_v9  ;;  %v4064_v61 = vld [vmem:[%s5513_s13] sm:$0xff] }
 0x308   : > { %v3482_v45 = vpop.f32.mrf.mxu0  ;;  %v3675_v51 = vpop.f32.mrf.mxu1 }
 0x309   : > { %7393 = vst [vmem:[#allocation23_spill] sm:$0xff] %v6987_v48  ;;  %v6990_v13 = vadd.f32 %v3673_v56, %v3481_v53  ;;  %v3483_v52 = vadd.f32 %v3482_v45, %v6699_v42  ;;  %v4065_v53 = vld [vmem:[%s5513_s13 + $0x8] sm:$0xff] }
 0x30a   : > { %v3712_v39 = vpop.f32.mrf.mxu0  ;;  %v3905_v35 = vpop.f32.mrf.mxu1 }
 0x30b   : > { %7394 = vst [vmem:[#allocation34_spill] sm:$0xff] %v6990_v13  ;;  %v6993_v23 = vadd.f32 %v3675_v51, %v3483_v52  ;;  %v3713_v32 = vadd.f32 %v3712_v39, %v7395_v44  ;;  %v4066_v52 = vld [vmem:[%s5513_s13 + $0x10] sm:$0xff]  ;;  %v4067_v44 = vld [vmem:[%s5513_s13 + $0x18] sm:$0xff] }
 0x30c   : > { %v3714_v49 = vpop.f32.mrf.mxu0  ;;  %v3907_v27 = vpop.f32.mrf.mxu1 }
 0x30d   : > { %v3906_v48 = vadd.f32 %v3905_v35, %v3713_v32  ;;  %v3715_v9 = vadd.f32 %v3714_v49, %v6721_v12 }
 0x30e   : > { %v3716_v56 = vpop.f32.mrf.mxu0  ;;  %v3909_v33 = vpop.f32.mrf.mxu1 }
 0x30f   : > { %v4128_v13 = vadd.f32 %v4064_v61, %v3906_v48  ;;  %v3908_v42 = vadd.f32 %v3907_v27, %v3715_v9  ;;  %v3717_v45 = vadd.f32 %v3716_v56, %v6730_v40  ;;  %v4068_v27 = vld [vmem:[%s5513_s13 + $0x20] sm:$0xff] }
 0x310   : > { %v3718_v51 = vpop.f32.mrf.mxu0  ;;  %v3911_v48 = vpop.f32.mrf.mxu1 }
 0x311   : > { %4192 = vst [vmem:[%s7003_s30] sm:$0xff] %v4128_v13  ;;  %v4129_v12 = vadd.f32 %v4065_v53, %v3908_v42  ;;  %v3910_v39 = vadd.f32 %v3909_v33, %v3717_v45  ;;  %v3719_v35 = vadd.f32 %v3718_v51, %v6739_v37  ;;  %v4069_v42 = vld [vmem:[%s5513_s13 + $0x28] sm:$0xff] }
 0x312   : > { %v3722_v40 = vpop.f32.mrf.mxu0  ;;  %v3915_v9 = vpop.f32.mrf.mxu1 }
 0x313   : > { %4193 = vst [vmem:[%s7003_s30 + $0x8] sm:$0xff] %v4129_v12  ;;  %v4130_v32 = vadd.f32 %v4066_v52, %v3910_v39  ;;  %v3912_v61 = vadd.f32 %v3911_v48, %v3719_v35  ;;  %v3723_v49 = vadd.f32 %v3722_v40, %v6744_v3  ;;  %v4070_v39 = vld [vmem:[%s5513_s13 + $0x30] sm:$0xff] }
 0x314   : > { %v3724_v56 = vpop.f32.mrf.mxu0  ;;  %v3917_v53 = vpop.f32.mrf.mxu1 }
 0x315   : > { %4194 = vst [vmem:[%s7003_s30 + $0x10] sm:$0xff] %v4130_v32  ;;  %v4131_v13 = vadd.f32 %v4067_v44, %v3912_v61  ;;  %v3916_v33 = vadd.f32 %v3915_v9, %v3723_v49  ;;  %v3725_v37 = vadd.f32 %v3724_v56, %v6749_v62  ;;  %v4071_v32 = vld [vmem:[%s5513_s13 + $0x38] sm:$0xff]  ;;  %v4072_v56 = vld [vmem:[%s5513_s13 + $0x40] sm:$0xff] }
 0x316   : > { %v3726_v45 = vpop.f32.mrf.mxu0  ;;  %v3919_v12 = vpop.f32.mrf.mxu1 }
 0x317   : > { %4195 = vst [vmem:[%s7003_s30 + $0x18] sm:$0xff] %v4131_v13  ;;  %v4132_v52 = vadd.f32 %v4068_v27, %v3916_v33  ;;  %v3918_v51 = vadd.f32 %v3917_v53, %v3725_v37  ;;  %v3727_v3 = vadd.f32 %v3726_v45, %v6758_v20 }
 0x318   : > { %v3728_v35 = vpop.f32.mrf.mxu0  ;;  %v3921_v40 = vpop.f32.mrf.mxu1 }
 0x319   : > { %4196 = vst [vmem:[%s7003_s30 + $0x20] sm:$0xff] %v4132_v52  ;;  %v4133_v48 = vadd.f32 %v4069_v42, %v3918_v51  ;;  %v3920_v44 = vadd.f32 %v3919_v12, %v3727_v3  ;;  %v3729_v62 = vadd.f32 %v3728_v35, %v6767_v31  ;;  %v4073_v42 = vld [vmem:[%s5513_s13 + $0x48] sm:$0xff]  ;;  %v4074_v12 = vld [vmem:[%s5513_s13 + $0x50] sm:$0xff] }
 0x31a   : > { %v3732_v61 = vpop.f32.mrf.mxu0  ;;  %v3925_v27 = vpop.f32.mrf.mxu1 }
 0x31b   : > { %4197 = vst [vmem:[%s7003_s30 + $0x28] sm:$0xff] %v4133_v48  ;;  %v4134_v49 = vadd.f32 %v4070_v39, %v3920_v44  ;;  %v3922_v9 = vadd.f32 %v3921_v40, %v3729_v62  ;;  %v3733_v20 = vadd.f32 %v3732_v61, %v6772_v24  ;;  %v4075_v62 = vld [vmem:[%s5513_s13 + $0x58] sm:$0xff] }
 0x31c   : > { %v3734_v13 = vpop.f32.mrf.mxu0  ;;  %v3927_v53 = vpop.f32.mrf.mxu1 }
 0x31d   : > { %4198 = vst [vmem:[%s7003_s30 + $0x30] sm:$0xff] %v4134_v49  ;;  %v4135_v33 = vadd.f32 %v4071_v32, %v3922_v9  ;;  %v3926_v37 = vadd.f32 %v3925_v27, %v3733_v20  ;;  %v3735_v31 = vadd.f32 %v3734_v13, %v6777_v10  ;;  %v4076_v9 = vld [vmem:[%s5513_s13 + $0x60] sm:$0xff] }
 0x31e   : > { %v3736_v45 = vpop.f32.mrf.mxu0  ;;  %v3929_v3 = vpop.f32.mrf.mxu1 }
 0x31f   : > { %4199 = vst [vmem:[%s7003_s30 + $0x38] sm:$0xff] %v4135_v33  ;;  %v4136_v52 = vadd.f32 %v4072_v56, %v3926_v37  ;;  %v3928_v51 = vadd.f32 %v3927_v53, %v3735_v31  ;;  %v3737_v24 = vadd.f32 %v3736_v45, %v6786_v30  ;;  %v4077_v33 = vld [vmem:[%s5513_s13 + $0x68] sm:$0xff]  ;;  %v4078_v45 = vld [vmem:[%s5513_s13 + $0x70] sm:$0xff] }
 0x320   : > { %v3738_v39 = vpop.f32.mrf.mxu0  ;;  %v3931_v44 = vpop.f32.mrf.mxu1 }
 0x321   : > { %4200 = vst [vmem:[%s7003_s30 + $0x40] sm:$0xff] %v4136_v52  ;;  %v4137_v35 = vadd.f32 %v4073_v42, %v3928_v51  ;;  %v3930_v48 = vadd.f32 %v3929_v3, %v3737_v24  ;;  %v3739_v10 = vadd.f32 %v3738_v39, %v6795_v19 }
 0x322   : > { %v3742_v40 = vpop.f32.mrf.mxu0  ;;  %v3935_v49 = vpop.f32.mrf.mxu1 }
 0x323   : > { %4201 = vst [vmem:[%s7003_s30 + $0x48] sm:$0xff] %v4137_v35  ;;  %v4138_v32 = vadd.f32 %v4074_v12, %v3930_v48  ;;  %v3932_v61 = vadd.f32 %v3931_v44, %v3739_v10  ;;  %v3743_v30 = vadd.f32 %v3742_v40, %v6800_v6  ;;  %v4079_v12 = vld [vmem:[%s5513_s13 + $0x78] sm:$0xff]  ;;  %v4080_v44 = vld [vmem:[%s5513_s13 + $0x80] sm:$0xff] }
 0x324   : > { %v3744_v20 = vpop.f32.mrf.mxu0  ;;  %v3937_v13 = vpop.f32.mrf.mxu1 }
 0x325   : > { %4202 = vst [vmem:[%s7003_s30 + $0x50] sm:$0xff] %v4138_v32  ;;  %v4139_v27 = vadd.f32 %v4075_v62, %v3932_v61  ;;  %v3936_v56 = vadd.f32 %v3935_v49, %v3743_v30  ;;  %v3745_v19 = vadd.f32 %v3744_v20, %v6805_v28  ;;  %v4081_v30 = vld [vmem:[%s5513_s13 + $0x88] sm:$0xff] }
 0x326   : > { %v3746_v37 = vpop.f32.mrf.mxu0  ;;  %v3939_v42 = vpop.f32.mrf.mxu1 }
 0x327   : > { %4203 = vst [vmem:[%s7003_s30 + $0x58] sm:$0xff] %v4139_v27  ;;  %v4140_v31 = vadd.f32 %v4076_v9, %v3936_v56  ;;  %v3938_v53 = vadd.f32 %v3937_v13, %v3745_v19  ;;  %v3747_v6 = vadd.f32 %v3746_v37, %v6814_v8  ;;  %v4082_v56 = vld [vmem:[%s5513_s13 + $0x90] sm:$0xff] }
 0x328   : > { %v3748_v52 = vpop.f32.mrf.mxu0  ;;  %v3941_v3 = vpop.f32.mrf.mxu1 }
 0x329   : > { %4204 = vst [vmem:[%s7003_s30 + $0x60] sm:$0xff] %v4140_v31  ;;  %v4141_v51 = vadd.f32 %v4077_v33, %v3938_v53  ;;  %v3940_v24 = vadd.f32 %v3939_v42, %v3747_v6  ;;  %v3749_v28 = vadd.f32 %v3748_v52, %v6823_v1  ;;  %v4083_v31 = vld [vmem:[%s5513_s13 + $0x98] sm:$0xff]  ;;  %v4084_v52 = vld [vmem:[%s5513_s13 + $0xa0] sm:$0xff] }
 0x32a   : > { %v3752_v39 = vpop.f32.mrf.mxu0  ;;  %v3945_v10 = vpop.f32.mrf.mxu1 }
 0x32b   : > { %4205 = vst [vmem:[%s7003_s30 + $0x68] sm:$0xff] %v4141_v51  ;;  %v4142_v35 = vadd.f32 %v4078_v45, %v3940_v24  ;;  %v3942_v48 = vadd.f32 %v3941_v3, %v3749_v28  ;;  %v3753_v8 = vadd.f32 %v3752_v39, %v6828_v4 }
 0x32c   : > { %v3754_v62 = vpop.f32.mrf.mxu0  ;;  %v3947_v61 = vpop.f32.mrf.mxu1 }
 0x32d   : > { %4206 = vst [vmem:[%s7003_s30 + $0x70] sm:$0xff] %v4142_v35  ;;  %v4143_v40 = vadd.f32 %v4079_v12, %v3942_v48  ;;  %v3946_v32 = vadd.f32 %v3945_v10, %v3753_v8  ;;  %v3755_v1 = vadd.f32 %v3754_v62, %v6831_v0  ;;  %v4085_v12 = vld [vmem:[%s5513_s13 + $0xa8] sm:$0xff]  ;;  %v4086_v10 = vld [vmem:[%s5513_s13 + $0xb0] sm:$0xff] }
 0x32e   : > { %v3756_v49 = vpop.f32.mrf.mxu0  ;;  %v3949_v27 = vpop.f32.mrf.mxu1 }
 0x32f   : > { %4207 = vst [vmem:[%s7003_s30 + $0x78] sm:$0xff] %v4143_v40  ;;  %v4144_v9 = vadd.f32 %v4080_v44, %v3946_v32  ;;  %v3948_v20 = vadd.f32 %v3947_v61, %v3755_v1  ;;  %v3757_v4 = vadd.f32 %v3756_v49, %v6840_v2  ;;  %v4087_v1 = vld [vmem:[%s5513_s13 + $0xb8] sm:$0xff] }
 0x330   : > { %v3758_v19 = vpop.f32.mrf.mxu0  ;;  %v3951_v37 = vpop.f32.mrf.mxu1 }
 0x331   : > { %4208 = vst [vmem:[%s7003_s30 + $0x80] sm:$0xff] %v4144_v9  ;;  %v4145_v13 = vadd.f32 %v4081_v30, %v3948_v20  ;;  %v3950_v33 = vadd.f32 %v3949_v27, %v3757_v4  ;;  %v3759_v0 = vadd.f32 %v3758_v19, %v6851_v21  ;;  %v4088_v20 = vld [vmem:[%s5513_s13 + $0xc0] sm:$0xff] }
 0x332   : > { %v3762_v53 = vpop.f32.mrf.mxu0  ;;  %v3955_v45 = vpop.f32.mrf.mxu1 }
 0x333   : > { %4209 = vst [vmem:[%s7003_s30 + $0x88] sm:$0xff] %v4145_v13  ;;  %v4146_v6 = vadd.f32 %v4082_v56, %v3950_v33  ;;  %v3952_v42 = vadd.f32 %v3951_v37, %v3759_v0  ;;  %v3763_v2 = vadd.f32 %v3762_v53, %v6856_v46  ;;  %v4089_v13 = vld [vmem:[%s5513_s13 + $0xc8] sm:$0xff]  ;;  %v4090_v53 = vld [vmem:[%s5513_s13 + $0xd0] sm:$0xff] }
 0x334   : > { %v3764_v51 = vpop.f32.mrf.mxu0  ;;  %v3957_v3 = vpop.f32.mrf.mxu1 }
 0x335   : > { %4210 = vst [vmem:[%s7003_s30 + $0x90] sm:$0xff] %v4146_v6  ;;  %v4147_v24 = vadd.f32 %v4083_v31, %v3952_v42  ;;  %v3956_v28 = vadd.f32 %v3955_v45, %v3763_v2  ;;  %v3765_v21 = vadd.f32 %v3764_v51, %v6859_v38 }
 0x336   : > { %v3766_v39 = vpop.f32.mrf.mxu0  ;;  %v3959_v8 = vpop.f32.mrf.mxu1 }
 0x337   : > { %4211 = vst [vmem:[%s7003_s30 + $0x98] sm:$0xff] %v4147_v24  ;;  %v4148_v35 = vadd.f32 %v4084_v52, %v3956_v28  ;;  %v3958_v48 = vadd.f32 %v3957_v3, %v3765_v21  ;;  %v3767_v46 = vadd.f32 %v3766_v39, %v6866_v16  ;;  %v4091_v52 = vld [vmem:[%s5513_s13 + $0xd8] sm:$0xff]  ;;  %v4092_v3 = vld [vmem:[%s5513_s13 + $0xe0] sm:$0xff] }
 0x338   : > { %v3768_v44 = vpop.f32.mrf.mxu0  ;;  %v3961_v32 = vpop.f32.mrf.mxu1 }
 0x339   : > { %4212 = vst [vmem:[%s7003_s30 + $0xa0] sm:$0xff] %v4148_v35  ;;  %v4149_v62 = vadd.f32 %v4085_v12, %v3958_v48  ;;  %v3960_v40 = vadd.f32 %v3959_v8, %v3767_v46  ;;  %v3769_v38 = vadd.f32 %v3768_v44, %v6873_v59  ;;  %v4093_v46 = vld [vmem:[%s5513_s13 + $0xe8] sm:$0xff] }
 0x33a   : > { %v3772_v61 = vpop.f32.mrf.mxu0  ;;  %v3965_v9 = vpop.f32.mrf.mxu1 }
 0x33b   : > { %4213 = vst [vmem:[%s7003_s30 + $0xa8] sm:$0xff] %v4149_v62  ;;  %v4150_v30 = vadd.f32 %v4086_v10, %v3960_v40  ;;  %v3962_v49 = vadd.f32 %v3961_v32, %v3769_v38  ;;  %v3773_v16 = vadd.f32 %v3772_v61, %v6876_v26  ;;  %v4094_v40 = vld [vmem:[%s5513_s13 + $0xf0] sm:$0xff] }
 0x33c   : > { %v3774_v4 = vpop.f32.mrf.mxu0  ;;  %v3967_v19 = vpop.f32.mrf.mxu1 }
 0x33d   : > { %4214 = vst [vmem:[%s7003_s30 + $0xb0] sm:$0xff] %v4150_v30  ;;  %v4151_v27 = vadd.f32 %v4087_v1, %v3962_v49  ;;  %v3966_v56 = vadd.f32 %v3965_v9, %v3773_v16  ;;  %v3775_v59 = vadd.f32 %v3774_v4, %v6879_v43  ;;  %v4095_v30 = vld [vmem:[%s5513_s13 + $0xf8] sm:$0xff]  ;;  %v4096_v4 = vld [vmem:[%s5513_s13 + $0x100] sm:$0xff] }
 0x33e   : > { %v3776_v33 = vpop.f32.mrf.mxu0  ;;  %v3969_v31 = vpop.f32.mrf.mxu1 }
 0x33f   : > { %4215 = vst [vmem:[%s7003_s30 + $0xb8] sm:$0xff] %v4151_v27  ;;  %v4152_v0 = vadd.f32 %v4088_v20, %v3966_v56  ;;  %v3968_v37 = vadd.f32 %v3967_v19, %v3775_v59  ;;  %v3777_v26 = vadd.f32 %v3776_v33, %v6882_v54 }
 0x340   : > { %v3778_v6 = vpop.f32.mrf.mxu0  ;;  %v3971_v45 = vpop.f32.mrf.mxu1 }
 0x341   : > { %4216 = vst [vmem:[%s7003_s30 + $0xc0] sm:$0xff] %v4152_v0  ;;  %v4153_v42 = vadd.f32 %v4089_v13, %v3968_v37  ;;  %v3970_v2 = vadd.f32 %v3969_v31, %v3777_v26  ;;  %v3779_v43 = vadd.f32 %v3778_v6, %v6885_v7  ;;  %v4097_v13 = vld [vmem:[%s5513_s13 + $0x108] sm:$0xff]  ;;  %v4098_v31 = vld [vmem:[%s5513_s13 + $0x110] sm:$0xff] }
 0x342   : > { %v3782_v51 = vpop.f32.mrf.mxu0  ;;  %v3975_v21 = vpop.f32.mrf.mxu1 }
 0x343   : > { %4217 = vst [vmem:[%s7003_s30 + $0xc8] sm:$0xff] %v4153_v42  ;;  %v4154_v24 = vadd.f32 %v4090_v53, %v3970_v2  ;;  %v3972_v28 = vadd.f32 %v3971_v45, %v3779_v43  ;;  %v3783_v54 = vadd.f32 %v3782_v51, %v6888_v63  ;;  %v4099_v43 = vld [vmem:[%s5513_s13 + $0x118] sm:$0xff] }
 0x344   : > { %v3784_v12 = vpop.f32.mrf.mxu0  ;;  %v3977_v48 = vpop.f32.mrf.mxu1 }
 0x345   : > { %4218 = vst [vmem:[%s7003_s30 + $0xd0] sm:$0xff] %v4154_v24  ;;  %v4155_v39 = vadd.f32 %v4091_v52, %v3972_v28  ;;  %v3976_v35 = vadd.f32 %v3975_v21, %v3783_v54  ;;  %v3785_v7 = vadd.f32 %v3784_v12, %v6891_v60  ;;  %v4100_v28 = vld [vmem:[%s5513_s13 + $0x120] sm:$0xff] }
 0x346   : > { %v3786_v8 = vpop.f32.mrf.mxu0  ;;  %v3979_v62 = vpop.f32.mrf.mxu1 }
 0x347   : > { %4219 = vst [vmem:[%s7003_s30 + $0xd8] sm:$0xff] %v4155_v39  ;;  %v4156_v10 = vadd.f32 %v4092_v3, %v3976_v35  ;;  %v3978_v44 = vadd.f32 %v3977_v48, %v3785_v7  ;;  %v3787_v63 = vadd.f32 %v3786_v8, %v6894_v34  ;;  %v4101_v39 = vld [vmem:[%s5513_s13 + $0x128] sm:$0xff]  ;;  %v4102_v8 = vld [vmem:[%s5513_s13 + $0x130] sm:$0xff] }
 0x348   : > { %v3788_v38 = vpop.f32.mrf.mxu0  ;;  %v3981_v61 = vpop.f32.mrf.mxu1 }
 0x349   : > { %4220 = vst [vmem:[%s7003_s30 + $0xe0] sm:$0xff] %v4156_v10  ;;  %v4157_v32 = vadd.f32 %v4093_v46, %v3978_v44  ;;  %v3980_v1 = vadd.f32 %v3979_v62, %v3787_v63  ;;  %v3789_v60 = vadd.f32 %v3788_v38, %v6897_v25 }
 0x34a   : > { %v3792_v49 = vpop.f32.mrf.mxu0  ;;  %v3985_v20 = vpop.f32.mrf.mxu1 }
 0x34b   : > { %4221 = vst [vmem:[%s7003_s30 + $0xe8] sm:$0xff] %v4157_v32  ;;  %v4158_v16 = vadd.f32 %v4094_v40, %v3980_v1  ;;  %v3982_v9 = vadd.f32 %v3981_v61, %v3789_v60  ;;  %v3793_v34 = vadd.f32 %v3792_v49, %v6900_v47  ;;  %v4103_v40 = vld [vmem:[%s5513_s13 + $0x138] sm:$0xff]  ;;  %v4104_v61 = vld [vmem:[%s5513_s13 + $0x140] sm:$0xff] }
 0x34c   : > { %v3794_v27 = vpop.f32.mrf.mxu0  ;;  %v3987_v19 = vpop.f32.mrf.mxu1 }
 0x34d   : > { %4222 = vst [vmem:[%s7003_s30 + $0xf0] sm:$0xff] %v4158_v16  ;;  %v4159_v56 = vadd.f32 %v4095_v30, %v3982_v9  ;;  %v3986_v59 = vadd.f32 %v3985_v20, %v3793_v34  ;;  %v3795_v25 = vadd.f32 %v3794_v27, %v6903_v41  ;;  %v4105_v34 = vld [vmem:[%s5513_s13 + $0x148] sm:$0xff] }
 0x34e   : > { %v3796_v33 = vpop.f32.mrf.mxu0  ;;  %v3989_v26 = vpop.f32.mrf.mxu1 }
 0x34f   : > { %4223 = vst [vmem:[%s7003_s30 + $0xf8] sm:$0xff] %v4159_v56  ;;  %v4160_v0 = vadd.f32 %v4096_v4, %v3986_v59  ;;  %v3988_v37 = vadd.f32 %v3987_v19, %v3795_v25  ;;  %v3797_v47 = vadd.f32 %v3796_v33, %v6906_v15  ;;  %v4106_v59 = vld [vmem:[%s5513_s13 + $0x150] sm:$0xff] }
 0x350   : > { %v3798_v53 = vpop.f32.mrf.mxu0  ;;  %v3991_v2 = vpop.f32.mrf.mxu1 }
 0x351   : > { %4224 = vst [vmem:[%s7003_s30 + $0x100] sm:$0xff] %v4160_v0  ;;  %v4161_v6 = vadd.f32 %v4097_v13, %v3988_v37  ;;  %v3990_v42 = vadd.f32 %v3989_v26, %v3797_v47  ;;  %v3799_v41 = vadd.f32 %v3798_v53, %v6909_v5  ;;  %v4107_v0 = vld [vmem:[%s5513_s13 + $0x158] sm:$0xff]  ;;  %v4108_v53 = vld [vmem:[%s5513_s13 + $0x160] sm:$0xff] }
 0x352   : > { %v3802_v45 = vpop.f32.mrf.mxu0  ;;  %v3995_v24 = vpop.f32.mrf.mxu1 }
 0x353   : > { %4225 = vst [vmem:[%s7003_s30 + $0x108] sm:$0xff] %v4161_v6  ;;  %v4162_v52 = vadd.f32 %v4098_v31, %v3990_v42  ;;  %v3992_v51 = vadd.f32 %v3991_v2, %v3799_v41  ;;  %v3803_v15 = vadd.f32 %v3802_v45, %v6912_v58 }
 0x354   : > { %v3804_v54 = vpop.f32.mrf.mxu0  ;;  %v3997_v12 = vpop.f32.mrf.mxu1 }
 0x355   : > { %4226 = vst [vmem:[%s7003_s30 + $0x110] sm:$0xff] %v4162_v52  ;;  %v4163_v21 = vadd.f32 %v4099_v43, %v3992_v51  ;;  %v3996_v3 = vadd.f32 %v3995_v24, %v3803_v15  ;;  %v3805_v5 = vadd.f32 %v3804_v54, %v6915_v22  ;;  %v4109_v43 = vld [vmem:[%s5513_s13 + $0x168] sm:$0xff]  ;;  %v4110_v24 = vld [vmem:[%s5513_s13 + $0x170] sm:$0xff] }
 0x356   : > { %v3806_v35 = vpop.f32.mrf.mxu0  ;;  %v3999_v46 = vpop.f32.mrf.mxu1 }
 0x357   : > { %4227 = vst [vmem:[%s7003_s30 + $0x118] sm:$0xff] %v4163_v21  ;;  %v4164_v7 = vadd.f32 %v4100_v28, %v3996_v3  ;;  %v3998_v48 = vadd.f32 %v3997_v12, %v3805_v5  ;;  %v3807_v58 = vadd.f32 %v3806_v35, %v6918_v17  ;;  %v7396_v3 = vld [vmem:[#allocation25_spill] sm:$0xff] }
 0x358   : > { %v3808_v10 = vpop.f32.mrf.mxu0  ;;  %v4001_v62 = vpop.f32.mrf.mxu1  ;;  %v4111_v12 = vld [vmem:[%s5513_s13 + $0x178] sm:$0xff] }
 0x359   : > { %4228 = vst [vmem:[%s7003_s30 + $0x120] sm:$0xff] %v4164_v7  ;;  %v4165_v44 = vadd.f32 %v4101_v39, %v3998_v48  ;;  %v4000_v63 = vadd.f32 %v3999_v46, %v3807_v58  ;;  %v3809_v22 = vadd.f32 %v3808_v10, %v6921_v11  ;;  %v7397_v48 = vld [vmem:[#allocation22_spill] sm:$0xff] }
 0x35a   : > { %v3812_v38 = vpop.f32.mrf.mxu0  ;;  %v4005_v60 = vpop.f32.mrf.mxu1  ;;  %v4112_v46 = vld [vmem:[%s5513_s13 + $0x180] sm:$0xff] }
 0x35b   : > { %4229 = vst [vmem:[%s7003_s30 + $0x128] sm:$0xff] %v4165_v44  ;;  %v4166_v32 = vadd.f32 %v4102_v8, %v4000_v63  ;;  %v4002_v1 = vadd.f32 %v4001_v62, %v3809_v22  ;;  %v3813_v17 = vadd.f32 %v3812_v38, %v6924_v36  ;;  %v7398_v63 = vld [vmem:[#allocation18_spill] sm:$0xff] }
 0x35c   : > { %v3814_v30 = vpop.f32.mrf.mxu0  ;;  %v4007_v9 = vpop.f32.mrf.mxu1 }
 0x35d   : > { %4230 = vst [vmem:[%s7003_s30 + $0x130] sm:$0xff] %v4166_v32  ;;  %v4167_v49 = vadd.f32 %v4103_v40, %v4002_v1  ;;  %v4006_v16 = vadd.f32 %v4005_v60, %v3813_v17  ;;  %v3815_v11 = vadd.f32 %v3814_v30, %v6927_v55  ;;  %v4113_v40 = vld [vmem:[%s5513_s13 + $0x188] sm:$0xff]  ;;  %v7399_v17 = vld [vmem:[#allocation24_spill] sm:$0xff] }
 0x35e   : > { %v3816_v20 = vpop.f32.mrf.mxu0  ;;  %v4009_v56 = vpop.f32.mrf.mxu1  ;;  %v4114_v30 = vld [vmem:[%s5513_s13 + $0x190] sm:$0xff] }
 0x35f   : > { %4231 = vst [vmem:[%s7003_s30 + $0x138] sm:$0xff] %v4167_v49  ;;  %v4168_v4 = vadd.f32 %v4104_v61, %v4006_v16  ;;  %v4008_v27 = vadd.f32 %v4007_v9, %v3815_v11  ;;  %v3817_v36 = vadd.f32 %v3816_v20, %v6930_v29  ;;  %v7400_v9 = vld [vmem:[#allocation21_spill] sm:$0xff] }
 0x360   : > { %v3818_v25 = vpop.f32.mrf.mxu0  ;;  %v4011_v33 = vpop.f32.mrf.mxu1 }
 0x361   : > { %4232 = vst [vmem:[%s7003_s30 + $0x140] sm:$0xff] %v4168_v4  ;;  %v4169_v19 = vadd.f32 %v4105_v34, %v4008_v27  ;;  %v4010_v13 = vadd.f32 %v4009_v56, %v3817_v36  ;;  %v3819_v55 = vadd.f32 %v3818_v25, %v6933_v57  ;;  %v4115_v4 = vld [vmem:[%s5513_s13 + $0x198] sm:$0xff] }
 0x362   : > { %v3822_v37 = vpop.f32.mrf.mxu0  ;;  %v4015_v31 = vpop.f32.mrf.mxu1 }
 0x363   : > { %4233 = vst [vmem:[%s7003_s30 + $0x148] sm:$0xff] %v4169_v19  ;;  %v4170_v47 = vadd.f32 %v4106_v59, %v4010_v13  ;;  %v4012_v26 = vadd.f32 %v4011_v33, %v3819_v55  ;;  %v3823_v29 = vadd.f32 %v3822_v37, %v6936_v18  ;;  %v7401_v59 = vld [vmem:[#allocation28_spill] sm:$0xff]  ;;  %v4116_v13 = vld [vmem:[%s5513_s13 + $0x1a0] sm:$0xff] }
 0x364   : > { %v3824_v6 = vpop.f32.mrf.mxu0  ;;  %v4017_v2 = vpop.f32.mrf.mxu1  ;;  %v7402_v37 = vld [vmem:[#allocation26_spill] sm:$0xff] }
 0x365   : > { %4234 = vst [vmem:[%s7003_s30 + $0x150] sm:$0xff] %v4170_v47  ;;  %v4171_v42 = vadd.f32 %v4107_v0, %v4012_v26  ;;  %v4016_v41 = vadd.f32 %v4015_v31, %v3823_v29  ;;  %v3825_v57 = vadd.f32 %v3824_v6, %v6939_v50  ;;  %v4117_v29 = vld [vmem:[%s5513_s13 + $0x1a8] sm:$0xff] }
 0x366   : > { %v3826_v45 = vpop.f32.mrf.mxu0  ;;  %v4019_v15 = vpop.f32.mrf.mxu1 }
 0x367   : > { %4235 = vst [vmem:[%s7003_s30 + $0x158] sm:$0xff] %v4171_v42  ;;  %v4172_v52 = vadd.f32 %v4108_v53, %v4016_v41  ;;  %v4018_v51 = vadd.f32 %v4017_v2, %v3825_v57  ;;  %v3827_v18 = vadd.f32 %v3826_v45, %v6942_v14  ;;  %v7403_v42 = vld [vmem:[#allocation27_spill] sm:$0xff]  ;;  %v4118_v2 = vld [vmem:[%s5513_s13 + $0x1b0] sm:$0xff] }
 0x368   : > { %v3828_v28 = vpop.f32.mrf.mxu0  ;;  %v4021_v5 = vpop.f32.mrf.mxu1 }
 0x369   : > { %4236 = vst [vmem:[%s7003_s30 + $0x160] sm:$0xff] %v4172_v52  ;;  %v4173_v54 = vadd.f32 %v4109_v43, %v4018_v51  ;;  %v4020_v21 = vadd.f32 %v4019_v15, %v3827_v18  ;;  %v3829_v50 = vadd.f32 %v3828_v28, %v7396_v3  ;;  %v7404_v51 = vld [vmem:[#allocation30_spill] sm:$0xff]  ;;  %v7405_v3 = vld [vmem:[#allocation32_spill] sm:$0xff] }
 0x36a   : > { %v3832_v39 = vpop.f32.mrf.mxu0  ;;  %v4025_v58 = vpop.f32.mrf.mxu1 }
 0x36b   : > { %4237 = vst [vmem:[%s7003_s30 + $0x168] sm:$0xff] %v4173_v54  ;;  %v4174_v35 = vadd.f32 %v4110_v24, %v4020_v21  ;;  %v4022_v7 = vadd.f32 %v4021_v5, %v3829_v50  ;;  %v3833_v14 = vadd.f32 %v3832_v39, %v7397_v48  ;;  %v4119_v24 = vld [vmem:[%s5513_s13 + $0x1b8] sm:$0xff]  ;;  %v7406_v48 = vld [vmem:[#allocation31_spill] sm:$0xff] }
 0x36c   : > { %v3834_v8 = vpop.f32.mrf.mxu0  ;;  %v4027_v62 = vpop.f32.mrf.mxu1 }
 0x36d   : > { %4238 = vst [vmem:[%s7003_s30 + $0x170] sm:$0xff] %v4174_v35  ;;  %v4175_v10 = vadd.f32 %v4111_v12, %v4022_v7  ;;  %v4026_v44 = vadd.f32 %v4025_v58, %v3833_v14  ;;  %v3835_v22 = vadd.f32 %v3834_v8, %v7398_v63  ;;  %v4120_v12 = vld [vmem:[%s5513_s13 + $0x1c0] sm:$0xff]  ;;  %v7407_v63 = vld [vmem:[#allocation29_spill] sm:$0xff] }
 0x36e   : > { %v3836_v38 = vpop.f32.mrf.mxu0  ;;  %v4029_v61 = vpop.f32.mrf.mxu1 }
 0x36f   : > { %4239 = vst [vmem:[%s7003_s30 + $0x178] sm:$0xff] %v4175_v10  ;;  %v4176_v32 = vadd.f32 %v4112_v46, %v4026_v44  ;;  %v4028_v1 = vadd.f32 %v4027_v62, %v3835_v22  ;;  %v3837_v60 = vadd.f32 %v3836_v38, %v7399_v17  ;;  %v4121_v46 = vld [vmem:[%s5513_s13 + $0x1c8] sm:$0xff]  ;;  %v7408_v17 = vld [vmem:[#allocation33_spill] sm:$0xff] }
 0x370   : > { %v3838_v49 = vpop.f32.mrf.mxu0  ;;  %v4031_v20 = vpop.f32.mrf.mxu1 }
 0x371   : > { %4240 = vst [vmem:[%s7003_s30 + $0x180] sm:$0xff] %v4176_v32  ;;  %v4177_v16 = vadd.f32 %v4113_v40, %v4028_v1  ;;  %v4030_v11 = vadd.f32 %v4029_v61, %v3837_v60  ;;  %v3839_v34 = vadd.f32 %v3838_v49, %v7400_v9  ;;  %v4122_v40 = vld [vmem:[%s5513_s13 + $0x1d0] sm:$0xff] }
 0x372   : > { %v3842_v27 = vpop.f32.mrf.mxu0  ;;  %v4035_v19 = vpop.f32.mrf.mxu1  ;;  %v7409_v9 = vld [vmem:[#allocation20_spill] sm:$0xff] }
 0x373   : > { %4241 = vst [vmem:[%s7003_s30 + $0x188] sm:$0xff] %v4177_v16  ;;  %v4178_v36 = vadd.f32 %v4114_v30, %v4030_v11  ;;  %v4032_v56 = vadd.f32 %v4031_v20, %v3839_v34  ;;  %v3843_v25 = vadd.f32 %v3842_v27, %v7401_v59  ;;  %v4123_v30 = vld [vmem:[%s5513_s13 + $0x1d8] sm:$0xff]  ;;  %v7410_v59 = vld [vmem:[#allocation23_spill] sm:$0xff] }
 0x374   : > { %v3844_v55 = vpop.f32.mrf.mxu0  ;;  %v4037_v26 = vpop.f32.mrf.mxu1 }
 0x375   : > { %4242 = vst [vmem:[%s7003_s30 + $0x190] sm:$0xff] %v4178_v36  ;;  %v4179_v33 = vadd.f32 %v4115_v4, %v4032_v56  ;;  %v4036_v0 = vadd.f32 %v4035_v19, %v3843_v25  ;;  %v3845_v47 = vadd.f32 %v3844_v55, %v7402_v37  ;;  %v4124_v4 = vld [vmem:[%s5513_s13 + $0x1e0] sm:$0xff] }
 0x376   : > { %v3846_v31 = vpop.f32.mrf.mxu0  ;;  %v4039_v57 = vpop.f32.mrf.mxu1  ;;  %v7411_v37 = vld [vmem:[#allocation34_spill] sm:$0xff] }
 0x377   : > { %4243 = vst [vmem:[%s7003_s30 + $0x198] sm:$0xff] %v4179_v33  ;;  %v4180_v53 = vadd.f32 %v4116_v13, %v4036_v0  ;;  %v4038_v6 = vadd.f32 %v4037_v26, %v3845_v47  ;;  %v3847_v41 = vadd.f32 %v3846_v31, %v7403_v42  ;;  %v4125_v13 = vld [vmem:[%s5513_s13 + $0x1e8] sm:$0xff] }
 0x378   : > { %v3848_v43 = vpop.f32.mrf.mxu0  ;;  %v4041_v15 = vpop.f32.mrf.mxu1 }
 0x379   : > { %4244 = vst [vmem:[%s7003_s30 + $0x1a0] sm:$0xff] %v4180_v53  ;;  %v4181_v45 = vadd.f32 %v4117_v29, %v4038_v6  ;;  %v4040_v52 = vadd.f32 %v4039_v57, %v3847_v41  ;;  %v3849_v18 = vadd.f32 %v3848_v43, %v7404_v51  ;;  %v4126_v29 = vld [vmem:[%s5513_s13 + $0x1f0] sm:$0xff]  ;;  %v4127_v57 = vld [vmem:[%s5513_s13 + $0x1f8] sm:$0xff] }
 0x37a   : > { %v3852_v28 = vpop.f32.mrf.mxu0  ;;  %v4045_v5 = vpop.f32.mrf.mxu1 }
 0x37b   : > { %4245 = vst [vmem:[%s7003_s30 + $0x1a8] sm:$0xff] %v4181_v45  ;;  %v4182_v54 = vadd.f32 %v4118_v2, %v4040_v52  ;;  %v4042_v21 = vadd.f32 %v4041_v15, %v3849_v18  ;;  %v3853_v50 = vadd.f32 %v3852_v28, %v7405_v3 }
 0x37c   : > { %v3854_v39 = vpop.f32.mrf.mxu0  ;;  %v4047_v58 = vpop.f32.mrf.mxu1 }
 0x37d   : > { %4246 = vst [vmem:[%s7003_s30 + $0x1b0] sm:$0xff] %v4182_v54  ;;  %v4183_v35 = vadd.f32 %v4119_v24, %v4042_v21  ;;  %v4046_v7 = vadd.f32 %v4045_v5, %v3853_v50  ;;  %v3855_v14 = vadd.f32 %v3854_v39, %v7406_v48 }
 0x37e   : > { %v3856_v8 = vpop.f32.mrf.mxu0  ;;  %v4049_v62 = vpop.f32.mrf.mxu1 }
 0x37f   : > { %4247 = vst [vmem:[%s7003_s30 + $0x1b8] sm:$0xff] %v4183_v35  ;;  %v4184_v10 = vadd.f32 %v4120_v12, %v4046_v7  ;;  %v4048_v44 = vadd.f32 %v4047_v58, %v3855_v14  ;;  %v3857_v22 = vadd.f32 %v3856_v8, %v7407_v63 }
 0x380   : > { %v3858_v38 = vpop.f32.mrf.mxu0  ;;  %v4051_v61 = vpop.f32.mrf.mxu1 }
 0x381   : > { %4248 = vst [vmem:[%s7003_s30 + $0x1c0] sm:$0xff] %v4184_v10  ;;  %v4185_v32 = vadd.f32 %v4121_v46, %v4048_v44  ;;  %v4050_v1 = vadd.f32 %v4049_v62, %v3857_v22  ;;  %v3859_v60 = vadd.f32 %v3858_v38, %v7408_v17 }
 0x382   : > { %v3862_v49 = vpop.f32.mrf.mxu0  ;;  %v4055_v20 = vpop.f32.mrf.mxu1 }
 0x383   : > { %4249 = vst [vmem:[%s7003_s30 + $0x1c8] sm:$0xff] %v4185_v32  ;;  %v4186_v16 = vadd.f32 %v4122_v40, %v4050_v1  ;;  %v4052_v11 = vadd.f32 %v4051_v61, %v3859_v60  ;;  %v3863_v34 = vadd.f32 %v3862_v49, %v7409_v9 }
 0x384   : > { %v3864_v27 = vpop.f32.mrf.mxu0  ;;  %v4057_v19 = vpop.f32.mrf.mxu1 }
 0x385   : > { %4250 = vst [vmem:[%s7003_s30 + $0x1d0] sm:$0xff] %v4186_v16  ;;  %v4187_v36 = vadd.f32 %v4123_v30, %v4052_v11  ;;  %v4056_v56 = vadd.f32 %v4055_v20, %v3863_v34  ;;  %v3865_v25 = vadd.f32 %v3864_v27, %v7410_v59 }
 0x386   : > { %v3866_v55 = vpop.f32.mrf.mxu0  ;;  %v4059_v26 = vpop.f32.mrf.mxu1 }
 0x387   : > { %4251 = vst [vmem:[%s7003_s30 + $0x1d8] sm:$0xff] %v4187_v36  ;;  %v4188_v33 = vadd.f32 %v4124_v4, %v4056_v56  ;;  %v4058_v0 = vadd.f32 %v4057_v19, %v3865_v25  ;;  %v3867_v47 = vadd.f32 %v3866_v55, %v7411_v37 }
 0x388   : > { %v3868_v31 = vpop.f32.mrf.mxu0  ;;  %v4061_v41 = vpop.f32.mrf.mxu1 }
 0x389   : > { %4252 = vst [vmem:[%s7003_s30 + $0x1e0] sm:$0xff] %v4188_v33  ;;  %v4189_v53 = vadd.f32 %v4125_v13, %v4058_v0  ;;  %v4060_v6 = vadd.f32 %v4059_v26, %v3867_v47  ;;  %v3869_v42 = vadd.f32 %v3868_v31, %v6993_v23 }
 0x38b   : > { %4253 = vst [vmem:[%s7003_s30 + $0x1e8] sm:$0xff] %v4189_v53  ;;  %v4190_v2 = vadd.f32 %v4126_v29, %v4060_v6  ;;  %v4062_v43 = vadd.f32 %v4061_v41, %v3869_v42 }
 0x38d   : > { %4254 = vst [vmem:[%s7003_s30 + $0x1f0] sm:$0xff] %v4190_v2  ;;  %v4191_v23 = vadd.f32 %v4127_v57, %v4062_v43 }
 0x38f   : > { %4255 = vst [vmem:[%s7003_s30 + $0x1f8] sm:$0xff] %v4191_v23 }
 0x390   : > { %5193 = shalt.err (!%p5190_p10)
}
 0x391   : > { %s5194_s26 = scalar_lea.hbm %s7194_s14, 8192  ;;  %s5198_s27 = scalar_lea.hbm %s7247_s6, 16384 }
 0x392   : > { %p5195_p13 = scmp.ne.s32.totalorder %s7194_s14, %s5194_s26  ;;  %p5199_p9 = scmp.lt.s32.totalorder %s7194_s14, %s7247_s6 }
 0x393   : > { %p5200_p0 = scmp.lt.s32.totalorder %s5198_s27, %s5194_s26 }
 0x394   : > { %p5196_p7 = pnand %p5195_p13, %p7412_p11 }
 0x395   : > { %p5201_p3 = por %p5200_p0, %p5199_p9 }
 0x396   : > { %p5197_p2 = pneg %p5196_p7 }
 0x398   : > { %p5202_p1 = pnand %p5201_p3, %p5197_p2 }
 0x39a   : > { %5205 = shalt.err (!%p5202_p1)
}
 0x39b   : > { %s5270_s10 = smov 256   ;;  %s5271_s7 = smov 16  }
 0x39c   : > { %4730 = dma.vmem_to_hbm [thread:$0]  (%p7412_p11), %s7196_s20, 8192, %s7194_s14, %s4257_s25, %s5270_s10, %s5270_s10, %s5271_s7  }
 0x39d PF: > { %s4286_s9 = sand.u32 1, %s5244_s21   ;;  %p7413_p4 = scmp.ne.s32.totalorder %s7263_s28, 0 }
 0x39e   : > { %p7414_p6 = scmp.ge.s32.totalorder %s5256_s24, 2  ;;  %s4287_s8 = scalar_lea.sflag [#allocation4], %s4286_s9 }
 0x3a0   : > { %p4750_p8 = pnand %p7414_p6, %p7413_p4 }
 0x3a2   : > { %p4751_p12 = pneg %p4750_p8 }
 0x3a4   : > { %5239 = dma.done.wait (%p4751_p12), %s4287_s8, 8192  }
 0x3a5   : > { %5241 = vsyncadd (%p4751_p12), %s4287_s8, 4294959104  ;;  %s7415_s24 = sld [smem:[#allocation17_spill]]  ;;  %s7416_s21 = smov %s5248_s22 }
 0x3a6   : > { %s7417_s22 = smov %s5252_s23  ;;  %s7418_s23 = smov %s5380_s17 }
 0x3ab   : > { %p21_p5 = scmp.ge.s32.totalorder %s7415_s24, 4  }
 0x3ad   :  { %23 = sbr.rel (!%p21_p5) target bundleno = 7 (0x7), region = 112 }
 0x3b2   :  { %4292 = vsyncpa [#allocation3], 1 }
 0x3b3   :  { %4294 = vsyncpa [#allocation3 + $0x1], 1 }
 0x3b4   :  { %4295 = vsyncpa [#allocation6], 1 }
 0x3b5   :  { %4296 = vsyncpa [#allocation9], 1 }
 0x3b6   :  { %4297 = vsyncpa [#allocation4], 1 }
 0x3b7   :  { %4299 = vsyncpa [#allocation4 + $0x1], 1 }

// kernel: tpu_custom_call.1
= control target key start
LH: loop header
LB: loop body
LE: loop exit
PB: predicated region body
PF: predicated region fallthrough
CT: control target
= control target key end

     0   :  { %11 = vsyncpa [#allocation3], 0  ;;  %s7241_s0 = inlined_call_operand.hbm [shape: bf16[512,256], index: 0, kind: input, shape index: {}]   ;;  %s7242_s1 = inlined_call_operand.hbm [shape: bf16[256,1024], index: 1, kind: input, shape index: {}]   ;;  %s7243_s2 = inlined_call_operand.hbm [shape: f32[1,1024], index: 2, kind: input, shape index: {}]   ;;  %s7244_s3 = inlined_call_operand.hbm [shape: bf16[1024,256], index: 3, kind: input, shape index: {}]   ;;  %s7245_s4 = inlined_call_operand.vmem [shape: f32[1,256], index: 4, kind: input, shape index: {}]   ;;  %s7246_s5 = inlined_call_operand.hbm [shape: f32[512,256], index: 5, kind: input, shape index: {}]   ;;  %s7247_s6 = inlined_call_operand.hbm [shape: f32[512,256], index: 6, kind: output, shape index: {}]  }
   0x1   :  { %13 = vsyncpa [#allocation3 + $0x1], 0 }
   0x2   :  { %14 = vsyncpa [#allocation6], 0 }
   0x3   :  { %15 = vsyncpa [#allocation9], 0 }
   0x4   :  { %16 = vsyncpa [#allocation4], 0 }
   0x5   :  { %18 = vsyncpa [#allocation4 + $0x1], 0  ;;  %s5307_s21 = smov 0   ;;  %s5309_s22 = smov 0  }
   0x6   :  { %s5311_s23 = smov 0   ;;  %s5313_s24 = smov 0  }
   0x7 LB: > { %s5328_s25 = sadd.s32 4294967295, %s5256_s24   ;;  %s4393_s26 = sadd.s32 4294967294, %s5256_s24   ;;  %s5256_s24 = sphi %s5313_s24, %s7415_s24   ;;  %s5252_s23 = sphi %s5311_s23, %s7418_s23   ;;  %s5248_s22 = sphi %s5309_s22, %s7417_s22   ;;  %s5244_s21 = sphi %s5307_s21, %s7416_s21  }
   0x8   : > { %p44_p0 = scmp.ne.s32.totalorder %s5248_s22, %s5244_s21  ;;  %p7250_p1 = scmp.eq.s32.totalorder %s5328_s25, 0 }
   0x9   : > { %p178_p2 = scmp.eq.s32.totalorder %s5328_s25, 1  ;;  %p184_p3 = scmp.eq.s32.totalorder %s4393_s26, 1 }
   0xa   : > { %p5337_p4 = por %p7250_p1, %p44_p0  ;;  %p4394_p5 = scmp.ge.s32.totalorder %s5256_s24, 1 }
   0xb   : > { %p5342_p6 = por %p184_p3, %p44_p0  ;;  %p191_p7 = scmp.lt.s32.totalorder %s5256_s24, 3 }
   0xc   : > { %s7262_s27 = scalar_select %p5337_p4, 1, 0 }
   0xd   : > { %s7263_s28 = scalar_select %p5342_p6, 1, 0 }
   0xe   : > { %p5347_p8 = pnand %p4394_p5, %p191_p7  ;;  %s5258_s30 = smov [#allocation5]  }
   0xf   : > { %s203_s7 = sshll.u32 %s5258_s30, 4  ;;  %s5361_s9 = sadd.s32 1, %s5256_s24   ;;  %s204_s7 = int_to_ptr.vmem [resolvable:$true] %s203_s7 }
  0x10   : > { %s7264_s29 = scalar_select %p5347_p8, 1, 0 }
  0x11   : > { %p4732_p9 = pneg %p5347_p8  ;;  %7266 = sst [smem:[#allocation17_spill]] %s5361_s9 }
  0x12   : > { %s31_s10 = sadd.s32 1, %s5252_s23  ;;  %s28_s11 = ssub.s32 %s5256_s24, %s5361_s9 }
  0x13   : > { %p5356_p11 = pnand %p4732_p9, %p7250_p1  ;;  %s5057_s12 = scalar_lea.vmem %s204_s7, 16384 }
  0x14   : > { %p5058_p13 = scmp.ne.s32.totalorder %s204_s7, %s5057_s12  ;;  %p5065_p5 = scmp.lt.s32.totalorder %s204_s7, %s204_s7 }
  0x15   : > { %p7251_p12 = pneg %p5356_p11  ;;  %p5066_p7 = scmp.lt.s32.totalorder %s5057_s12, %s5057_s12 }
  0x17   : > { %p5060_p0 = pnand %p5058_p13, %p7251_p12  ;;  %p5067_p9 = por %p5066_p7, %p5065_p5 }
  0x19   : > { %p5061_p3 = pneg %p5060_p0 }
  0x1b   : > { %p5068_p10 = pnand %p5067_p9, %p5061_p3 }
  0x1d   : > { %5071 = shalt.err (!%p5068_p10)
}
  0x1e   : > { %s5259_s13 = smov 512   ;;  %s5260_s14 = smov 32  }
  0x1f   : > { %4735 = dma.hbm_to_vmem [thread:$0]  (!%p5356_p11), %s7242_s1, 16384, %s204_s7, [#allocation6], %s5259_s13, %s5259_s13, %s5260_s14  }
  0x20   : > { %p29_p13 = scmp.eq.s32.totalorder %s28_s11, 0  ;;  %p38_p0 = scmp.ne.s32.totalorder %s5252_s23, %s5248_s22 }
  0x21   : > { %p39_p10 = scmp.eq.s32.totalorder %s5256_s24, 0  ;;  %p4756_p7 = scmp.lt.s32.totalorder %s5256_s24, 2 }
  0x22   : > { %s5380_s17 = scalar_select %p29_p13, %s5252_s23, %s31_s10  }
  0x23   : > { %p40_p3 = por %p39_p10, %p38_p0  ;;  %p5384_p5 = por %p178_p2, %p38_p0 }
  0x24   : > { %s244_s19 = sand.u32 1, %s5256_s24   ;;  %s246_s20 = sand.u32 1, %s5252_s23  }
  0x25   : > { %s7267_s18 = scalar_select %p5384_p5, 1, 0 }
  0x26   : > { %s4399_s26 = sshll.u32 %s246_s20, 8  ;;  %s4709_s30 = sshll.u32 %s5256_s24, 12 }
  0x27   : > { %s5395_s7 = scalar_lea.hbm %s7241_s0, %s4709_s30  ;;  %s248_s10 = scalar_lea.vmem [#allocation2], %s4399_s26 }
  0x28   : > { %s256_s11 = sshll.u32 %s248_s10, 4  ;;  %p5399_p2 = pnand %p4756_p7, %p40_p3  ;;  %s5397_s11 = int_to_ptr.vmem [resolvable:$true] %s256_s11 }
  0x29   : > { %s5403_s14 = sshll.u32 %s246_s20, 9  ;;  %s5405_s15 = scalar_lea.sflag [#allocation3], %s244_s19 }
  0x2a   : > { %s5072_s9 = scalar_lea.hbm %s5395_s7, 4096  ;;  %p5074_p13 = pneg %p5399_p2 }
  0x2b   : > { %p5073_p9 = scmp.ne.s32.totalorder %s5395_s7, %s5072_s9  ;;  %s5077_s30 = scalar_lea.hbm %s7241_s0, 8192 }
  0x2c   : > { %p5078_p3 = scmp.lt.s32.totalorder %s5395_s7, %s7241_s0  ;;  %p5079_p7 = scmp.lt.s32.totalorder %s5077_s30, %s5072_s9 }
  0x2d   : > { %p5075_p0 = pnand %p5074_p13, %p5073_p9 }
  0x2e   : > { %p5080_p1 = por %p5079_p7, %p5078_p3 }
  0x2f   : > { %p5076_p10 = pneg %p5075_p0 }
  0x31   : > { %p5081_p12 = pnand %p5080_p1, %p5076_p10 }
  0x33   : > { %5084 = shalt.err (!%p5081_p12)
}
  0x34   : > { %s5085_s19 = scalar_lea.vmem %s5397_s11, 4096  ;;  %s5261_s20 = smov [#allocation2]  }
  0x35   : > { %p5086_p6 = scmp.ne.s32.totalorder %s5397_s11, %s5085_s19  ;;  %s5090_s16 = sshll.u32 %s5261_s20, 4  ;;  %s5091_s16 = int_to_ptr.vmem [resolvable:$false] %s5090_s16 }
  0x36   : > { %s5092_s26 = scalar_lea.vmem %s5091_s16, 8192  ;;  %p5093_p5 = scmp.lt.s32.totalorder %s5397_s11, %s5091_s16 }
  0x37   : > { %p5088_p9 = pnand %p5086_p6, %p5074_p13  ;;  %p5094_p4 = scmp.lt.s32.totalorder %s5092_s26, %s5085_s19 }
  0x39   : > { %p5089_p0 = pneg %p5088_p9  ;;  %p5095_p8 = por %p5094_p4, %p5093_p5 }
  0x3b   : > { %p5096_p3 = pnand %p5095_p8, %p5089_p0 }
  0x3d   : > { %5099 = shalt.err (!%p5096_p3)
}
  0x3e   : > { %s7255_s9 = smov 128   ;;  %s7256_s30 = smov 8  }
  0x3f   : > { %4745 = dma.hbm_to_vmem [thread:$0]  (!%p5399_p2), %s5395_s7, 4096, %s5397_s11, %s5405_s15, %s7255_s9, %s7255_s9, %s7256_s30  }
  0x40   : > { %s270_s12 = scalar_lea.vmem [#allocation10], %s5403_s14  ;;  %s5264_s19 = smov [#allocation7]  }
  0x41   : > { %s5436_s10 = sshll.u32 %s270_s12, 4  ;;  %s217_s20 = sshll.u32 %s5264_s19, 4  ;;  %s218_s20 = int_to_ptr.vmem [resolvable:$true] %s217_s20  ;;  %s5464_s10 = int_to_ptr.vmem [resolvable:$true] %s5436_s10 }
  0x42   : > { %s5111_s16 = scalar_lea.vmem %s218_s20, 128  ;;  %p7269_p4 = pneg %p5356_p11 }
  0x43   : > { %p5112_p1 = scmp.ne.s32.totalorder %s218_s20, %s5111_s16  ;;  %p5119_p12 = scmp.lt.s32.totalorder %s218_s20, %s218_s20 }
  0x44   : > { %p5120_p5 = scmp.lt.s32.totalorder %s5111_s16, %s5111_s16 }
  0x45   : > { %p5114_p6 = pnand %p5112_p1, %p7269_p4 }
  0x46   : > { %p5121_p10 = por %p5120_p5, %p5119_p12 }
  0x47   : > { %p5115_p8 = pneg %p5114_p6 }
  0x49   : > { %p5122_p7 = pnand %p5121_p10, %p5115_p8 }
  0x4b   : > { %5125 = shalt.err (!%p5122_p7)
}
  0x4c   : > { %4738 = dma.hbm_to_vmem [thread:$0]  (!%p5356_p11), %s7243_s2, 128, %s218_s20, [#allocation6]  }
  0x4d   : > { %s5265_s14 = smov [#allocation8]   ;;  %s4711_s12 = sshll.u32 %s5256_s24, 13 }
  0x4e   : > { %s227_s26 = sshll.u32 %s5265_s14, 4  ;;  %s5450_s30 = scalar_lea.hbm %s7246_s5, %s4711_s12  ;;  %s228_s26 = int_to_ptr.vmem [resolvable:$true] %s227_s26 }
  0x4f   : > { %s5137_s16 = scalar_lea.vmem %s228_s26, 16384  ;;  %p7270_p0 = pmov %p7269_p4 }
  0x50   : > { %p5138_p9 = scmp.ne.s32.totalorder %s228_s26, %s5137_s16  ;;  %p5145_p4 = scmp.lt.s32.totalorder %s228_s26, %s228_s26 }
  0x51   : > { %p5146_p6 = scmp.lt.s32.totalorder %s5137_s16, %s5137_s16 }
  0x52   : > { %p5140_p3 = pnand %p5138_p9, %p7270_p0 }
  0x53   : > { %p5147_p8 = por %p5146_p6, %p5145_p4 }
  0x54   : > { %p5141_p1 = pneg %p5140_p3 }
  0x56   : > { %p5148_p12 = pnand %p5147_p8, %p5141_p1 }
  0x58   : > { %5151 = shalt.err (!%p5148_p12)
}
  0x59   : > { %s7271_s20 = smov 8   ;;  %s7272_s7 = smov 128  }
  0x5a   : > { %4741 = dma.hbm_to_vmem [thread:$0]  (!%p5356_p11), %s7244_s3, 16384, %s228_s26, [#allocation9], %s7272_s7, %s7272_s7, %s7271_s20  }
  0x5b   : > { %s5152_s14 = scalar_lea.hbm %s5450_s30, 8192  ;;  %s5157_s19 = scalar_lea.hbm %s7246_s5, 16384 }
  0x5c   : > { %p5153_p5 = scmp.ne.s32.totalorder %s5450_s30, %s5152_s14  ;;  %p5158_p9 = scmp.lt.s32.totalorder %s5450_s30, %s7246_s5 }
  0x5d   : > { %p5159_p0 = scmp.lt.s32.totalorder %s5157_s19, %s5152_s14 }
  0x5e   : > { %p5155_p10 = pnand %p5153_p5, %p5074_p13 }
  0x5f   : > { %p5160_p3 = por %p5159_p0, %p5158_p9 }
  0x60   : > { %p5156_p7 = pneg %p5155_p10 }
  0x62   : > { %p5161_p1 = pnand %p5160_p3, %p5156_p7 }
  0x64   : > { %5164 = shalt.err (!%p5161_p1)
}
  0x65   : > { %s5165_s26 = scalar_lea.vmem %s5464_s10, 8192  ;;  %s5266_s20 = smov [#allocation10]  }
  0x66   : > { %p5166_p11 = scmp.ne.s32.totalorder %s5464_s10, %s5165_s26  ;;  %s5170_s7 = sshll.u32 %s5266_s20, 4  ;;  %s5171_s7 = int_to_ptr.vmem [resolvable:$false] %s5170_s7 }
  0x67   : > { %s5172_s9 = scalar_lea.vmem %s5171_s7, 16384  ;;  %p5173_p8 = scmp.lt.s32.totalorder %s5464_s10, %s5171_s7 }
  0x68   : > { %p5168_p4 = pnand %p5166_p11, %p5074_p13  ;;  %p5174_p12 = scmp.lt.s32.totalorder %s5172_s9, %s5165_s26 }
  0x6a   : > { %p5169_p6 = pneg %p5168_p4  ;;  %p5175_p5 = por %p5174_p12, %p5173_p8 }
  0x6c   : > { %p5176_p10 = pnand %p5175_p5, %p5169_p6 }
  0x6e   : > { %5179 = shalt.err (!%p5176_p10)
}
  0x6f   : > { %s5267_s14 = smov 256   ;;  %s5268_s8 = smov 16  }
  0x70   : > { %4748 = dma.hbm_to_vmem [thread:$0]  (!%p5399_p2), %s5450_s30, 8192, %s5464_s10, %s5405_s15, %s5267_s14, %s5267_s14, %s5268_s8  }
  0x71   : > { %p7273_p13 = scmp.ne.s32.totalorder %s7264_s29, 0 }
  0x73   : > { %290 = sbr.rel (%p7273_p13) target bundleno = 925 (0x39d), region = 44 }
  0x78   : > { %s292_s12 = sand.u32 1, %s5328_s25   ;;  %s5493_s19 = sand.u32 1, %s5248_s22  }
  0x79   : > { %s4408_s16 = sshll.u32 %s5493_s19, 8  ;;  %s293_s11 = scalar_lea.sflag [#allocation3], %s292_s12 }
  0x7a   : > { %s5496_s26 = scalar_lea.vmem [#allocation2], %s4408_s16  ;;  %p7274_p7 = scmp.ne.s32.totalorder %s7262_s27, 0 }
  0x7c   : > { %5223 = dma.done.wait (%p7274_p7), %s293_s11, 4096  }
  0x7d   : > { %5225 = vsyncadd (%p7274_p7), %s293_s11, 4294963200  ;;  %p7275_p2 = scmp.eq.s32.totalorder %s5328_s25, 0 }
  0x7f   : > { %5227 = dma.done.wait (%p7275_p2), [#allocation6], 16512   ;;  %p7276_p9 = pmov %p7275_p2 }
  0x80   : > { %p7277_p0 = pmov %p7275_p2 }
  0x81   : > { %5229 = vsyncadd (%p7276_p9), [#allocation6], 4294950784 }
  0x82   : > { %5231 = dma.done.wait (%p7277_p0), [#allocation9], 16384   ;;  %p7278_p3 = pmov %p7277_p0 }
  0x83   : > { %s4412_s29 = sshll.u32 %s5493_s19, 9 }
  0x84   : > { %5233 = vsyncadd (%p7278_p3), [#allocation9], 4294950912  ;;  %s5513_s13 = scalar_lea.vmem [#allocation10], %s4412_s29 }
  0x85   : > { %5235 = dma.done.wait (%p7274_p7), %s293_s11, 8192  }
  0x86   : > { %5237 = vsyncadd (%p7274_p7), %s293_s11, 4294959104  ;;  %v442_v0 = vld [vmem:[#allocation5 + $0x1c0] sm:$0xff]  ;;  %v443_v2 = vld [vmem:[#allocation5 + $0x1c8] sm:$0xff]  ;;  %s7003_s30 = scalar_lea.vmem [#allocation11], %s4412_s29  ;;  %s4713_s10 = sshll.u32 %s5328_s25, 13 }
  0x87   : > { %v446_v1 = vld [vmem:[#allocation5 + $0x1e0] sm:$0xff]  ;;  %v447_v4 = vld [vmem:[#allocation5 + $0x1e8] sm:$0xff]  ;;  %s4271_s20 = sshll.u32 %s7003_s30, 4  ;;  %s7194_s14 = scalar_lea.hbm %s7247_s6, %s4713_s10  ;;  %s7196_s20 = int_to_ptr.vmem [resolvable:$true] %s4271_s20 }
  0x88   : > { %v4503_v3 = vcombine.high %v442_v0, %v446_v1  ;;  %v4502_v5 = vcombine.low %v442_v0, %v446_v1  ;;  %v434_v6 = vld [vmem:[#allocation5 + $0x180] sm:$0xff]  ;;  %v4505_v8 = vcombine.high %v443_v2, %v447_v4  ;;  %v4504_v9 = vcombine.low %v443_v2, %v447_v4  ;;  %v435_v11 = vld [vmem:[#allocation5 + $0x188] sm:$0xff]  ;;  %s4257_s25 = scalar_lea.sflag [#allocation4], %s5493_s19  ;;  %s5180_s8 = scalar_lea.vmem %s7196_s20, 8192 }
  0x89   : > { %v438_v7 = vld [vmem:[#allocation5 + $0x1a0] sm:$0xff]  ;;  %v439_v12 = vld [vmem:[#allocation5 + $0x1a8] sm:$0xff]  ;;  %p5181_p1 = scmp.ne.s32.totalorder %s7196_s20, %s5180_s8  ;;  %p7412_p11 = scmp.ne.s32.totalorder %s7267_s18, 0 }
  0x8a   : > { %v4495_v10 = vcombine.high %v434_v6, %v438_v7  ;;  %v426_v13 = vld [vmem:[#allocation5 + $0x140] sm:$0xff]  ;;  %1356 = vmatprep.subr.bf16.mxu0 %v4503_v3  ;;  %v4497_v14 = vcombine.high %v435_v11, %v439_v12  ;;  %v427_v16 = vld [vmem:[#allocation5 + $0x148] sm:$0xff]  ;;  %1549 = vmatprep.subr.bf16.mxu1 %v4505_v8  ;;  %v4494_v18 = vcombine.low %v434_v6, %v438_v7  ;;  %s5269_s12 = smov [#allocation11]  }
  0x8b   : > { %v430_v15 = vld [vmem:[#allocation5 + $0x160] sm:$0xff]  ;;  %v431_v17 = vld [vmem:[#allocation5 + $0x168] sm:$0xff]  ;;  %1357 = vmatpush1.bf16.msra.mxu0 %v4502_v5  ;;  %1550 = vmatpush1.bf16.msra.mxu1 %v4504_v9  ;;  %v4496_v19 = vcombine.low %v435_v11, %v439_v12  ;;  %p5182_p4 = pnand %p5181_p1, %p7412_p11  ;;  %s5184_s16 = sshll.u32 %s5269_s12, 4  ;;  %s5185_s16 = int_to_ptr.vmem [resolvable:$false] %s5184_s16 }
  0x8c   : > { %1358 = vmatprep.subr.bf16.mxu0 %v4495_v10  ;;  %v4487_v20 = vcombine.high %v426_v13, %v430_v15  ;;  %1551 = vmatprep.subr.bf16.mxu1 %v4497_v14  ;;  %v4489_v21 = vcombine.high %v427_v16, %v431_v17  ;;  %v418_v22 = vld [vmem:[#allocation5 + $0x100] sm:$0xff]  ;;  %v419_v24 = vld [vmem:[#allocation5 + $0x108] sm:$0xff]  ;;  %v4486_v26 = vcombine.low %v426_v13, %v430_v15  ;;  %s5186_s11 = scalar_lea.vmem %s5185_s16, 16384  ;;  %p5187_p8 = scmp.lt.s32.totalorder %s7196_s20, %s5185_s16 }
  0x8d   : > { %v422_v23 = vld [vmem:[#allocation5 + $0x120] sm:$0xff]  ;;  %v423_v25 = vld [vmem:[#allocation5 + $0x128] sm:$0xff]  ;;  %v4488_v27 = vcombine.low %v427_v16, %v431_v17  ;;  %p5183_p6 = pneg %p5182_p4  ;;  %p5188_p12 = scmp.lt.s32.totalorder %s5186_s11, %s5180_s8 }
  0x8e   : > { %v4479_v28 = vcombine.high %v418_v22, %v422_v23  ;;  %v4481_v29 = vcombine.high %v419_v24, %v423_v25  ;;  %v410_v30 = vld [vmem:[#allocation5 + $0xc0] sm:$0xff]  ;;  %v411_v32 = vld [vmem:[#allocation5 + $0xc8] sm:$0xff]  ;;  %v4478_v34 = vcombine.low %v418_v22, %v422_v23  ;;  %v4480_v35 = vcombine.low %v419_v24, %v423_v25 }
  0x8f   : > { %1359 = vmatpush1.bf16.msra.mxu0 %v4494_v18  ;;  %1552 = vmatpush1.bf16.msra.mxu1 %v4496_v19  ;;  %v414_v31 = vld [vmem:[#allocation5 + $0xe0] sm:$0xff]  ;;  %v415_v33 = vld [vmem:[#allocation5 + $0xe8] sm:$0xff]  ;;  %p5189_p5 = por %p5188_p12, %p5187_p8 }
  0x90   : > { %1360 = vmatprep.subr.bf16.mxu0 %v4487_v20  ;;  %1553 = vmatprep.subr.bf16.mxu1 %v4489_v21  ;;  %v4471_v36 = vcombine.high %v410_v30, %v414_v31  ;;  %v4473_v37 = vcombine.high %v411_v32, %v415_v33  ;;  %v402_v38 = vld [vmem:[#allocation5 + $0x80] sm:$0xff]  ;;  %v403_v40 = vld [vmem:[#allocation5 + $0x88] sm:$0xff]  ;;  %v4470_v42 = vcombine.low %v410_v30, %v414_v31 }
  0x91   : > { %v406_v39 = vld [vmem:[#allocation5 + $0xa0] sm:$0xff]  ;;  %v407_v41 = vld [vmem:[#allocation5 + $0xa8] sm:$0xff]  ;;  %v4472_v43 = vcombine.low %v411_v32, %v415_v33  ;;  %p5190_p10 = pnand %p5189_p5, %p5183_p6 }
  0x92   : > { %v4463_v44 = vcombine.high %v402_v38, %v406_v39  ;;  %v4465_v45 = vcombine.high %v403_v40, %v407_v41  ;;  %v394_v46 = vld [vmem:[#allocation5 + $0x40] sm:$0xff]  ;;  %v395_v48 = vld [vmem:[#allocation5 + $0x48] sm:$0xff]  ;;  %v4462_v50 = vcombine.low %v402_v38, %v406_v39  ;;  %v4464_v51 = vcombine.low %v403_v40, %v407_v41 }
  0x93   : > { %1361 = vmatpush1.bf16.msra.mxu0 %v4486_v26  ;;  %1554 = vmatpush1.bf16.msra.mxu1 %v4488_v27  ;;  %v398_v47 = vld [vmem:[#allocation5 + $0x60] sm:$0xff]  ;;  %v399_v49 = vld [vmem:[#allocation5 + $0x68] sm:$0xff] }
  0x94   : > { %1362 = vmatprep.subr.bf16.mxu0 %v4479_v28  ;;  %1555 = vmatprep.subr.bf16.mxu1 %v4481_v29  ;;  %v4455_v52 = vcombine.high %v394_v46, %v398_v47  ;;  %v4457_v53 = vcombine.high %v395_v48, %v399_v49  ;;  %v386_v54 = vld [vmem:[#allocation5] sm:$0xff]  ;;  %v387_v57 = vld [vmem:[#allocation5 + $0x8] sm:$0xff]  ;;  %v4454_v59 = vcombine.low %v394_v46, %v398_v47 }
  0x95   : > { %v390_v55 = vld [vmem:[#allocation5 + $0x20] sm:$0xff]  ;;  %v391_v58 = vld [vmem:[#allocation5 + $0x28] sm:$0xff]  ;;  %v4456_v60 = vcombine.low %v395_v48, %v399_v49 }
  0x96   : > { %v4804_v56 = vld [vmem:[%s5496_s26 + $0x4] ss:$8 sps:$4 sm:$0xff]   ;;  %v4447_v61 = vcombine.high %v386_v54, %v390_v55  ;;  %v4449_v62 = vcombine.high %v387_v57, %v391_v58  ;;  %v4446_v3 = vcombine.low %v386_v54, %v390_v55  ;;  %v4448_v4 = vcombine.low %v387_v57, %v391_v58 }
  0x97   : > { %1363 = vmatpush1.bf16.msra.mxu0 %v4478_v34  ;;  %1556 = vmatpush1.bf16.msra.mxu1 %v4480_v35  ;;  %v506_v63 = vld [vmem:[#allocation5 + $0x3c0] sm:$0xff]  ;;  %v507_v1 = vld [vmem:[#allocation5 + $0x3c8] sm:$0xff] }
  0x98   : > { %1364 = vmatprep.subr.bf16.mxu0 %v4471_v36  ;;  %1557 = vmatprep.subr.bf16.mxu1 %v4473_v37  ;;  %v510_v0 = vld [vmem:[#allocation5 + $0x3e0] sm:$0xff]  ;;  %v511_v2 = vld [vmem:[#allocation5 + $0x3e8] sm:$0xff] }
  0x99   : > { %1388 = vmatprep.mubr.bf16.mxu0 %v4804_v56  ;;  %1581 = vmatprep.mubr.bf16.mxu1 %v4804_v56  ;;  %v4567_v5 = vcombine.high %v506_v63, %v510_v0  ;;  %v4569_v6 = vcombine.high %v507_v1, %v511_v2  ;;  %v498_v7 = vld [vmem:[#allocation5 + $0x380] sm:$0xff]  ;;  %v499_v9 = vld [vmem:[#allocation5 + $0x388] sm:$0xff]  ;;  %v4566_v11 = vcombine.low %v506_v63, %v510_v0  ;;  %v444_v63 = vld [vmem:[#allocation5 + $0x1d0] sm:$0xff] }
  0x9a   : > { %v502_v8 = vld [vmem:[#allocation5 + $0x3a0] sm:$0xff]  ;;  %v503_v10 = vld [vmem:[#allocation5 + $0x3a8] sm:$0xff]  ;;  %v4568_v12 = vcombine.low %v507_v1, %v511_v2  ;;  %v448_v0 = vld [vmem:[#allocation5 + $0x1f0] sm:$0xff] }
  0x9b   : > { %1365 = vmatpush1.bf16.msra.mxu0 %v4470_v42  ;;  %1558 = vmatpush1.bf16.msra.mxu1 %v4472_v43  ;;  %v4559_v13 = vcombine.high %v498_v7, %v502_v8  ;;  %v4561_v14 = vcombine.high %v499_v9, %v503_v10  ;;  %v490_v15 = vld [vmem:[#allocation5 + $0x340] sm:$0xff]  ;;  %v491_v17 = vld [vmem:[#allocation5 + $0x348] sm:$0xff]  ;;  %v4558_v19 = vcombine.low %v498_v7, %v502_v8  ;;  %v445_v1 = vld [vmem:[#allocation5 + $0x1d8] sm:$0xff] }
  0x9c   : > { %1366 = vmatprep.subr.bf16.mxu0 %v4463_v44  ;;  %1559 = vmatprep.subr.bf16.mxu1 %v4465_v45  ;;  %v494_v16 = vld [vmem:[#allocation5 + $0x360] sm:$0xff]  ;;  %v495_v18 = vld [vmem:[#allocation5 + $0x368] sm:$0xff]  ;;  %v4560_v20 = vcombine.low %v499_v9, %v503_v10  ;;  %v449_v2 = vld [vmem:[#allocation5 + $0x1f8] sm:$0xff] }
  0x9d   : > { %v4551_v21 = vcombine.high %v490_v15, %v494_v16  ;;  %v4553_v22 = vcombine.high %v491_v17, %v495_v18  ;;  %v482_v23 = vld [vmem:[#allocation5 + $0x300] sm:$0xff]  ;;  %v483_v25 = vld [vmem:[#allocation5 + $0x308] sm:$0xff]  ;;  %v4550_v27 = vcombine.low %v490_v15, %v494_v16  ;;  %v4552_v28 = vcombine.low %v491_v17, %v495_v18  ;;  %v436_v8 = vld [vmem:[#allocation5 + $0x190] sm:$0xff] }
  0x9e   : > { %v486_v24 = vld [vmem:[#allocation5 + $0x320] sm:$0xff]  ;;  %v487_v26 = vld [vmem:[#allocation5 + $0x328] sm:$0xff]  ;;  %v4509_v7 = vcombine.high %v445_v1, %v449_v2  ;;  %v5524_v9 = vld [vmem:[%s5496_s26 + $0x14] ss:$8 sps:$4 sm:$0xff]   ;;  %v4508_v16 = vcombine.low %v445_v1, %v449_v2 }
  0x9f   : > { %1367 = vmatpush1.bf16.msra.mxu0 %v4462_v50  ;;  %1560 = vmatpush1.bf16.msra.mxu1 %v4464_v51  ;;  %v4543_v29 = vcombine.high %v482_v23, %v486_v24  ;;  %v4545_v30 = vcombine.high %v483_v25, %v487_v26  ;;  %v474_v31 = vld [vmem:[#allocation5 + $0x2c0] sm:$0xff]  ;;  %v475_v33 = vld [vmem:[#allocation5 + $0x2c8] sm:$0xff]  ;;  %v4542_v35 = vcombine.low %v482_v23, %v486_v24  ;;  %v440_v10 = vld [vmem:[#allocation5 + $0x1b0] sm:$0xff] }
  0xa0   : > { %1368 = vmatprep.subr.bf16.mxu0 %v4455_v52  ;;  %1561 = vmatprep.subr.bf16.mxu1 %v4457_v53  ;;  %v478_v32 = vld [vmem:[#allocation5 + $0x2e0] sm:$0xff]  ;;  %v479_v34 = vld [vmem:[#allocation5 + $0x2e8] sm:$0xff]  ;;  %v4544_v36 = vcombine.low %v483_v25, %v487_v26  ;;  %v432_v15 = vld [vmem:[#allocation5 + $0x170] sm:$0xff] }
  0xa1   : > { %v4535_v37 = vcombine.high %v474_v31, %v478_v32  ;;  %v4537_v38 = vcombine.high %v475_v33, %v479_v34  ;;  %v466_v39 = vld [vmem:[#allocation5 + $0x280] sm:$0xff]  ;;  %v467_v41 = vld [vmem:[#allocation5 + $0x288] sm:$0xff]  ;;  %v4534_v43 = vcombine.low %v474_v31, %v478_v32  ;;  %v4536_v44 = vcombine.low %v475_v33, %v479_v34  ;;  %v429_v17 = vld [vmem:[#allocation5 + $0x158] sm:$0xff] }
  0xa2   : > { %v470_v40 = vld [vmem:[#allocation5 + $0x2a0] sm:$0xff]  ;;  %v471_v42 = vld [vmem:[#allocation5 + $0x2a8] sm:$0xff]  ;;  %v433_v18 = vld [vmem:[#allocation5 + $0x178] sm:$0xff] }
  0xa3   : > { %1369 = vmatpush1.bf16.msra.mxu0 %v4454_v59  ;;  %1562 = vmatpush1.bf16.msra.mxu1 %v4456_v60  ;;  %v4527_v45 = vcombine.high %v466_v39, %v470_v40  ;;  %v4529_v46 = vcombine.high %v467_v41, %v471_v42  ;;  %v458_v47 = vld [vmem:[#allocation5 + $0x240] sm:$0xff]  ;;  %v459_v49 = vld [vmem:[#allocation5 + $0x248] sm:$0xff]  ;;  %v4526_v51 = vcombine.low %v466_v39, %v470_v40  ;;  %v420_v25 = vld [vmem:[#allocation5 + $0x110] sm:$0xff] }
  0xa4   : > { %1370 = vmatprep.subr.bf16.mxu0 %v4447_v61  ;;  %1563 = vmatprep.subr.bf16.mxu1 %v4449_v62  ;;  %v462_v48 = vld [vmem:[#allocation5 + $0x260] sm:$0xff]  ;;  %v463_v50 = vld [vmem:[#allocation5 + $0x268] sm:$0xff]  ;;  %v4528_v52 = vcombine.low %v467_v41, %v471_v42  ;;  %v424_v26 = vld [vmem:[#allocation5 + $0x130] sm:$0xff]  ;;  %v4492_v34 = vcombine.low %v429_v17, %v433_v18 }
  0xa5   : > { %v4519_v53 = vcombine.high %v458_v47, %v462_v48  ;;  %v4521_v54 = vcombine.high %v459_v49, %v463_v50  ;;  %v450_v55 = vld [vmem:[#allocation5 + $0x200] sm:$0xff]  ;;  %v451_v57 = vld [vmem:[#allocation5 + $0x208] sm:$0xff]  ;;  %v4518_v59 = vcombine.low %v458_v47, %v462_v48  ;;  %v4520_v60 = vcombine.low %v459_v49, %v463_v50  ;;  %v412_v32 = vld [vmem:[#allocation5 + $0xd0] sm:$0xff] }
  0xa6   : > { %v454_v56 = vld [vmem:[#allocation5 + $0x220] sm:$0xff]  ;;  %v455_v58 = vld [vmem:[#allocation5 + $0x228] sm:$0xff]  ;;  %v416_v33 = vld [vmem:[#allocation5 + $0xf0] sm:$0xff]  ;;  %v4482_v40 = vcombine.low %v420_v25, %v424_v26 }
  0xa7   : > { %1371 = vmatpush1.bf16.msra.mxu0 %v4446_v3  ;;  %1564 = vmatpush1.bf16.msra.mxu1 %v4448_v4  ;;  %v4511_v61 = vcombine.high %v450_v55, %v454_v56  ;;  %v4513_v62 = vcombine.high %v451_v57, %v455_v58  ;;  %v4510_v3 = vcombine.low %v450_v55, %v454_v56  ;;  %v5541_v39 = vld [vmem:[%s5496_s26 + $0x20] ss:$8 sps:$4 sm:$0xff]   ;;  %v404_v41 = vld [vmem:[#allocation5 + $0x90] sm:$0xff]  ;;  %v409_v47 = vld [vmem:[#allocation5 + $0xb8] sm:$0xff] }
  0xa8   : > { %1372 = vmatprep.subr.bf16.mxu0 %v4567_v5  ;;  %1565 = vmatprep.subr.bf16.mxu1 %v4569_v6  ;;  %v4512_v4 = vcombine.low %v451_v57, %v455_v58  ;;  %v4507_v5 = vcombine.high %v444_v63, %v448_v0  ;;  %v5521_v6 = vld [vmem:[%s5496_s26] ss:$8 sps:$4 sm:$0xff]   ;;  %v408_v42 = vld [vmem:[#allocation5 + $0xb0] sm:$0xff]  ;;  %v4474_v49 = vcombine.low %v412_v32, %v416_v33  ;;  %v397_v55 = vld [vmem:[#allocation5 + $0x58] sm:$0xff] }
  0xa9   : > { %v396_v50 = vld [vmem:[#allocation5 + $0x50] sm:$0xff]  ;;  %v401_v56 = vld [vmem:[#allocation5 + $0x78] sm:$0xff]  ;;  %v4466_v58 = vcombine.low %v404_v41, %v408_v42 }
  0xaa   : > { %v5551_v57 = vld [vmem:[%s5496_s26 + $0x30] ss:$8 sps:$4 sm:$0xff]   ;;  %v4461_v2 = vcombine.high %v397_v55, %v401_v56 }
  0xab   : > { %1373 = vmatpush2.bf16.msra.mxu0 %v4566_v11  ;;  %1566 = vmatpush2.bf16.msra.mxu1 %v4568_v12  ;;  %v437_v11 = vld [vmem:[#allocation5 + $0x198] sm:$0xff] }
  0xac   : > { %1374 = vmatprep.subr.bf16.mxu0 %v4559_v13  ;;  %1567 = vmatprep.subr.bf16.mxu1 %v4561_v14  ;;  %v441_v12 = vld [vmem:[#allocation5 + $0x1b8] sm:$0xff]  ;;  %v4506_v13 = vcombine.low %v444_v63, %v448_v0  ;;  %v428_v14 = vld [vmem:[#allocation5 + $0x150] sm:$0xff] }
  0xad   : > { %v4500_v23 = vcombine.low %v437_v11, %v441_v12  ;;  %v4491_v24 = vcombine.high %v428_v14, %v432_v15  ;;  %v4490_v31 = vcombine.low %v428_v14, %v432_v15  ;;  %v389_v0 = vld [vmem:[#allocation5 + $0x18] sm:$0xff]  ;;  %v500_v15 = vld [vmem:[#allocation5 + $0x390] sm:$0xff] }
  0xae   : > { %v393_v1 = vld [vmem:[#allocation5 + $0x38] sm:$0xff] }
  0xaf   : > { %1375 = vmatpush2.bf16.msra.mxu0 %v4558_v19  ;;  %1568 = vmatpush2.bf16.msra.mxu1 %v4560_v20  ;;  %v4499_v19 = vcombine.high %v436_v8, %v440_v10  ;;  %v4501_v20 = vcombine.high %v437_v11, %v441_v12  ;;  %v509_v11 = vld [vmem:[#allocation5 + $0x3d8] sm:$0xff] }
  0xb0   : > { %1376 = vmatprep.subr.bf16.mxu0 %v4551_v21  ;;  %1569 = vmatprep.subr.bf16.mxu1 %v4553_v22  ;;  %v4498_v21 = vcombine.low %v436_v8, %v440_v10  ;;  %v5530_v22 = vld [vmem:[%s5496_s26 + $0x10] ss:$8 sps:$4 sm:$0xff]   ;;  %v4453_v10 = vcombine.high %v389_v0, %v393_v1 }
  0xb1   : > { %v513_v12 = vld [vmem:[#allocation5 + $0x3f8] sm:$0xff] }
  0xb3   : > { %1377 = vmatpush2.bf16.msra.mxu0 %v4550_v27  ;;  %1570 = vmatpush2.bf16.msra.mxu1 %v4552_v28  ;;  %v5534_v27 = vld [vmem:[%s5496_s26 + $0x24] ss:$8 sps:$4 sm:$0xff]   ;;  %v4493_v28 = vcombine.high %v429_v17, %v433_v18  ;;  %v5564_v17 = vld [vmem:[%s5496_s26 + $0x54] ss:$8 sps:$4 sm:$0xff]   ;;  %v4452_v18 = vcombine.low %v389_v0, %v393_v1 }
  0xb4   : > { %1378 = vmatprep.subr.bf16.mxu0 %v4543_v29  ;;  %1571 = vmatprep.subr.bf16.mxu1 %v4545_v30  ;;  %v421_v29 = vld [vmem:[#allocation5 + $0x118] sm:$0xff] }
  0xb5   : > { %v425_v30 = vld [vmem:[#allocation5 + $0x138] sm:$0xff] }
  0xb7   : > { %1379 = vmatpush2.bf16.msra.mxu0 %v4542_v35  ;;  %1572 = vmatpush2.bf16.msra.mxu1 %v4544_v36  ;;  %v4483_v35 = vcombine.high %v420_v25, %v424_v26  ;;  %v4485_v36 = vcombine.high %v421_v29, %v425_v30  ;;  %v492_v25 = vld [vmem:[#allocation5 + $0x350] sm:$0xff] }
  0xb8   : > { %1380 = vmatprep.subr.bf16.mxu0 %v4535_v37  ;;  %1573 = vmatprep.subr.bf16.mxu1 %v4537_v38  ;;  %v413_v37 = vld [vmem:[#allocation5 + $0xd8] sm:$0xff]  ;;  %v496_v26 = vld [vmem:[#allocation5 + $0x370] sm:$0xff] }
  0xb9   : > { %v417_v38 = vld [vmem:[#allocation5 + $0xf8] sm:$0xff] }
  0xba   : > { %v4477_v48 = vcombine.high %v413_v37, %v417_v38 }
  0xbb   : > { %1381 = vmatpush2.bf16.msra.mxu0 %v4534_v43  ;;  %1574 = vmatpush2.bf16.msra.mxu1 %v4536_v44  ;;  %v5544_v43 = vld [vmem:[%s5496_s26 + $0x34] ss:$8 sps:$4 sm:$0xff]   ;;  %v4484_v44 = vcombine.low %v421_v29, %v425_v30 }
  0xbc   : > { %1382 = vmatprep.subr.bf16.mxu0 %v4527_v45  ;;  %1575 = vmatprep.subr.bf16.mxu1 %v4529_v46  ;;  %v4475_v45 = vcombine.high %v412_v32, %v416_v33  ;;  %v405_v46 = vld [vmem:[#allocation5 + $0x98] sm:$0xff] }
  0xbd   : > { %v497_v32 = vld [vmem:[#allocation5 + $0x378] sm:$0xff] }
  0xbe   : > { %v5571_v33 = vld [vmem:[%s5496_s26 + $0x50] ss:$8 sps:$4 sm:$0xff]  }
  0xbf   : > { %1383 = vmatpush2.bf16.msra.mxu0 %v4526_v51  ;;  %1576 = vmatpush2.bf16.msra.mxu1 %v4528_v52  ;;  %v400_v51 = vld [vmem:[#allocation5 + $0x70] sm:$0xff]  ;;  %v4476_v52 = vcombine.low %v413_v37, %v417_v38  ;;  %v5574_v37 = vld [vmem:[%s5496_s26 + $0x64] ss:$8 sps:$4 sm:$0xff]  }
  0xc0   : > { %1384 = vmatprep.subr.bf16.mxu0 %v4519_v53  ;;  %1577 = vmatprep.subr.bf16.mxu1 %v4521_v54  ;;  %v4467_v53 = vcombine.high %v404_v41, %v408_v42  ;;  %v4469_v54 = vcombine.high %v405_v46, %v409_v47  ;;  %v4459_v63 = vcombine.high %v396_v50, %v400_v51  ;;  %v485_v41 = vld [vmem:[#allocation5 + $0x318] sm:$0xff] }
  0xc1   : > { %v489_v42 = vld [vmem:[#allocation5 + $0x338] sm:$0xff] }
  0xc3   : > { %1385 = vmatpush2.bf16.msra.mxu0 %v4518_v59  ;;  %1578 = vmatpush2.bf16.msra.mxu1 %v4520_v60  ;;  %v388_v59 = vld [vmem:[#allocation5 + $0x10] sm:$0xff] }
  0xc4   : > { %1386 = vmatprep.subr.bf16.mxu0 %v4511_v61  ;;  %1579 = vmatprep.subr.bf16.mxu1 %v4513_v62  ;;  %v392_v60 = vld [vmem:[#allocation5 + $0x30] sm:$0xff]  ;;  %v5554_v61 = vld [vmem:[%s5496_s26 + $0x44] ss:$8 sps:$4 sm:$0xff]   ;;  %v4468_v62 = vcombine.low %v405_v46, %v409_v47 }
  0xc5   : > { %v4451_v8 = vcombine.high %v388_v59, %v392_v60  ;;  %v4450_v14 = vcombine.low %v388_v59, %v392_v60  ;;  %v476_v46 = vld [vmem:[#allocation5 + $0x2d0] sm:$0xff]  ;;  %v4548_v59 = vcombine.low %v485_v41, %v489_v42 }
  0xc6   : > { %v480_v47 = vld [vmem:[#allocation5 + $0x2f0] sm:$0xff] }
  0xc7   : > { %1387 = vmatpush2.bf16.msra.mxu0 %v4510_v3  ;;  %1580 = vmatpush2.bf16.msra.mxu1 %v4512_v4  ;;  %v4458_v3 = vcombine.low %v396_v50, %v400_v51  ;;  %v508_v4 = vld [vmem:[#allocation5 + $0x3d0] sm:$0xff]  ;;  %v4549_v50 = vcombine.high %v485_v41, %v489_v42  ;;  %v477_v51 = vld [vmem:[#allocation5 + $0x2d8] sm:$0xff]  ;;  %v4539_v60 = vcombine.high %v476_v46, %v480_v47 }
  0xc8   : > { %1742 = vmatprep.subr.bf16.mxu0 %v4507_v5  ;;  %1935 = vmatprep.subr.bf16.mxu1 %v4509_v7  ;;  %v512_v5 = vld [vmem:[#allocation5 + $0x3f0] sm:$0xff]  ;;  %v4460_v7 = vcombine.low %v397_v55, %v401_v56  ;;  %v4538_v1 = vcombine.low %v476_v46, %v480_v47 }
  0xc9   : > { %v468_v55 = vld [vmem:[#allocation5 + $0x290] sm:$0xff] }
  0xca   : > { %1389 = vmatmul.mubr.bf16.vlgmr.msra.gmra.mxu0 %v5521_v6  ;;  %1582 = vmatmul.mubr.bf16.vlgmr.msra.gmra.mxu1 %v5521_v6  ;;  %v472_v56 = vld [vmem:[#allocation5 + $0x2b0] sm:$0xff] }
  0xcb   : > { %1743 = vmatpush1.bf16.msra.mxu0 %v4506_v13  ;;  %1936 = vmatpush1.bf16.msra.mxu1 %v4508_v16  ;;  %v5561_v13 = vld [vmem:[%s5496_s26 + $0x40] ss:$8 sps:$4 sm:$0xff]   ;;  %v504_v16 = vld [vmem:[#allocation5 + $0x3b0] sm:$0xff] }
  0xcc   : > { %1398 = vmatprep.mubr.bf16.mxu0 %v5524_v9  ;;  %1591 = vmatprep.mubr.bf16.mxu1 %v5524_v9  ;;  %v4563_v29 = vcombine.high %v500_v15, %v504_v16  ;;  %v5624_v41 = vld [vmem:[%s5496_s26 + $0xb4] ss:$8 sps:$4 sm:$0xff]   ;;  %v5631_v42 = vld [vmem:[%s5496_s26 + $0xb0] ss:$8 sps:$4 sm:$0xff]  }
  0xcd   : > { %1744 = vmatprep.subr.bf16.mxu0 %v4499_v19  ;;  %1937 = vmatprep.subr.bf16.mxu1 %v4501_v20  ;;  %v4571_v19 = vcombine.high %v508_v4, %v512_v5  ;;  %v501_v20 = vld [vmem:[#allocation5 + $0x398] sm:$0xff] }
  0xce   : > { %v5644_v46 = vld [vmem:[%s5496_s26 + $0xd4] ss:$8 sps:$4 sm:$0xff]   ;;  %v5651_v47 = vld [vmem:[%s5496_s26 + $0xd0] ss:$8 sps:$4 sm:$0xff]  }
  0xcf   : > { %1745 = vmatpush1.bf16.msra.mxu0 %v4498_v21  ;;  %1938 = vmatpush1.bf16.msra.mxu1 %v4500_v23  ;;  %v505_v21 = vld [vmem:[#allocation5 + $0x3b8] sm:$0xff]  ;;  %v4573_v23 = vcombine.high %v509_v11, %v513_v12 }
  0xd0   : > { %1746 = vmatprep.subr.bf16.mxu0 %v4491_v24  ;;  %1939 = vmatprep.subr.bf16.mxu1 %v4493_v28  ;;  %v4570_v24 = vcombine.low %v508_v4, %v512_v5  ;;  %v4572_v28 = vcombine.low %v509_v11, %v513_v12  ;;  %v4565_v30 = vcombine.high %v501_v20, %v505_v21  ;;  %v460_v5 = vld [vmem:[#allocation5 + $0x250] sm:$0xff] }
  0xd1   : > { %v4564_v38 = vcombine.low %v501_v20, %v505_v21  ;;  %v4530_v11 = vcombine.low %v468_v55, %v472_v56  ;;  %v5594_v20 = vld [vmem:[%s5496_s26 + $0x84] ss:$8 sps:$4 sm:$0xff]   ;;  %v453_v21 = vld [vmem:[#allocation5 + $0x218] sm:$0xff] }
  0xd2   : > { %1399 = vmatmul.mubr.bf16.gmra.mxu0 %v5530_v22  ;;  %1592 = vmatmul.mubr.bf16.gmra.mxu1 %v5530_v22 }
  0xd3   : > { %1408 = vmatprep.mubr.bf16.mxu0 %v5534_v27  ;;  %1601 = vmatprep.mubr.bf16.mxu1 %v5534_v27 }
  0xd4   : > { %1747 = vmatpush1.bf16.msra.mxu0 %v4490_v31  ;;  %1940 = vmatpush1.bf16.msra.mxu1 %v4492_v34  ;;  %v493_v31 = vld [vmem:[#allocation5 + $0x358] sm:$0xff]  ;;  %v4562_v34 = vcombine.low %v500_v15, %v504_v16 }
  0xd5   : > { %1748 = vmatprep.subr.bf16.mxu0 %v4483_v35  ;;  %1941 = vmatprep.subr.bf16.mxu1 %v4485_v36  ;;  %v484_v35 = vld [vmem:[#allocation5 + $0x310] sm:$0xff] }
  0xd6   : > { %v488_v36 = vld [vmem:[#allocation5 + $0x330] sm:$0xff] }
  0xd7   : > { %v5591_v15 = vld [vmem:[%s5496_s26 + $0x70] ss:$8 sps:$4 sm:$0xff]  }
  0xd8   : > { %1749 = vmatpush1.bf16.msra.mxu0 %v4482_v40  ;;  %1942 = vmatpush1.bf16.msra.mxu1 %v4484_v44  ;;  %v4555_v40 = vcombine.high %v492_v25, %v496_v26  ;;  %v4557_v44 = vcombine.high %v493_v31, %v497_v32 }
  0xd9   : > { %1750 = vmatprep.subr.bf16.mxu0 %v4475_v45  ;;  %1943 = vmatprep.subr.bf16.mxu1 %v4477_v48  ;;  %v4554_v45 = vcombine.low %v492_v25, %v496_v26  ;;  %v4556_v48 = vcombine.low %v493_v31, %v497_v32  ;;  %v4854_v31 = vld [vmem:[#allocation8 + $0x74] ss:$8 sps:$4 sm:$0xff]   ;;  %v5601_v32 = vld [vmem:[%s5496_s26 + $0x80] ss:$8 sps:$4 sm:$0xff]  }
  0xda   : > { %1409 = vmatmul.mubr.bf16.gmra.mxu0 %v5541_v39  ;;  %1602 = vmatmul.mubr.bf16.gmra.mxu1 %v5541_v39 }
  0xdb   : > { %1418 = vmatprep.mubr.bf16.mxu0 %v5544_v43  ;;  %1611 = vmatprep.mubr.bf16.mxu1 %v5544_v43 }
  0xdc   : > { %1751 = vmatpush1.bf16.msra.mxu0 %v4474_v49  ;;  %1944 = vmatpush1.bf16.msra.mxu1 %v4476_v52  ;;  %v4547_v49 = vcombine.high %v484_v35, %v488_v36  ;;  %v481_v52 = vld [vmem:[#allocation5 + $0x2f8] sm:$0xff] }
  0xdd   : > { %1752 = vmatprep.subr.bf16.mxu0 %v4467_v53  ;;  %1945 = vmatprep.subr.bf16.mxu1 %v4469_v54  ;;  %v5581_v53 = vld [vmem:[%s5496_s26 + $0x60] ss:$8 sps:$4 sm:$0xff]   ;;  %v4546_v54 = vcombine.low %v484_v35, %v488_v36  ;;  %v4541_v0 = vcombine.high %v477_v51, %v481_v52  ;;  %v5604_v35 = vld [vmem:[%s5496_s26 + $0x94] ss:$8 sps:$4 sm:$0xff]   ;;  %v5611_v36 = vld [vmem:[%s5496_s26 + $0x90] ss:$8 sps:$4 sm:$0xff]  }
  0xe0   : > { %1753 = vmatpush1.bf16.msra.mxu0 %v4466_v58  ;;  %1946 = vmatpush1.bf16.msra.mxu1 %v4468_v62  ;;  %v5584_v58 = vld [vmem:[%s5496_s26 + $0x74] ss:$8 sps:$4 sm:$0xff]  }
  0xe1   : > { %1754 = vmatprep.subr.bf16.mxu0 %v4459_v63  ;;  %1947 = vmatprep.subr.bf16.mxu1 %v4461_v2  ;;  %v469_v62 = vld [vmem:[#allocation5 + $0x298] sm:$0xff]  ;;  %v4540_v2 = vcombine.low %v477_v51, %v481_v52  ;;  %v5044_v52 = vld [vmem:[%s5496_s26 + $0x4] ss:$8 sps:$4 sm:$0xff]  }
  0xe2   : > { %1419 = vmatmul.mubr.bf16.gmra.mxu0 %v5551_v57  ;;  %1612 = vmatmul.mubr.bf16.gmra.mxu1 %v5551_v57  ;;  %v473_v63 = vld [vmem:[#allocation5 + $0x2b8] sm:$0xff] }
  0xe3   : > { %1428 = vmatprep.mubr.bf16.mxu0 %v5554_v61  ;;  %1621 = vmatprep.mubr.bf16.mxu1 %v5554_v61  ;;  %v4533_v4 = vcombine.high %v469_v62, %v473_v63  ;;  %v4532_v12 = vcombine.low %v469_v62, %v473_v63  ;;  %v5671_v51 = vld [vmem:[%s5496_s26 + $0xf0] ss:$8 sps:$4 sm:$0xff]   ;;  %v4866_v63 = vld [vmem:[#allocation8 + $0x54] ss:$8 sps:$4 sm:$0xff]  }
  0xe4   : > { %1755 = vmatpush1.bf16.msra.mxu0 %v4458_v3  ;;  %1948 = vmatpush1.bf16.msra.mxu1 %v4460_v7  ;;  %v4531_v3 = vcombine.high %v468_v55, %v472_v56  ;;  %v464_v7 = vld [vmem:[#allocation5 + $0x270] sm:$0xff]  ;;  %v4855_v55 = vld [vmem:[#allocation8 + $0x170] ss:$8 sps:$4 sm:$0xff]  }
  0xe5   : > { %1756 = vmatprep.subr.bf16.mxu0 %v4451_v8  ;;  %1949 = vmatprep.subr.bf16.mxu1 %v4453_v10  ;;  %v461_v8 = vld [vmem:[#allocation5 + $0x258] sm:$0xff]  ;;  %v4860_v56 = vld [vmem:[#allocation8 + $0x64] ss:$8 sps:$4 sm:$0xff]   ;;  %v4861_v62 = vld [vmem:[#allocation8 + $0x160] ss:$8 sps:$4 sm:$0xff]  }
  0xe6   : > { %v465_v10 = vld [vmem:[#allocation5 + $0x278] sm:$0xff] }
  0xe7   : > { %v4525_v16 = vcombine.high %v461_v8, %v465_v10  ;;  %v4524_v25 = vcombine.low %v461_v8, %v465_v10  ;;  %v4876_v8 = vld [vmem:[#allocation8 + $0x30] ss:$8 sps:$4 sm:$0xff]  }
  0xe8   : > { %1757 = vmatpush1.bf16.msra.mxu0 %v4450_v14  ;;  %1950 = vmatpush1.bf16.msra.mxu1 %v4452_v18  ;;  %v4523_v14 = vcombine.high %v460_v5, %v464_v7  ;;  %v452_v18 = vld [vmem:[#allocation5 + $0x210] sm:$0xff]  ;;  %v4879_v10 = vld [vmem:[#allocation8 + $0x130] ss:$8 sps:$4 sm:$0xff]  }
  0xe9   : > { %1758 = vmatprep.subr.bf16.mxu0 %v4571_v19  ;;  %1951 = vmatprep.subr.bf16.mxu1 %v4573_v23  ;;  %v456_v19 = vld [vmem:[#allocation5 + $0x230] sm:$0xff]  ;;  %v457_v23 = vld [vmem:[#allocation5 + $0x238] sm:$0xff] }
  0xea   : > { %1429 = vmatmul.mubr.bf16.gmra.mxu0 %v5561_v13  ;;  %1622 = vmatmul.mubr.bf16.gmra.mxu1 %v5561_v13  ;;  %v4515_v26 = vcombine.high %v452_v18, %v456_v19 }
  0xeb   : > { %1438 = vmatprep.mubr.bf16.mxu0 %v5564_v17  ;;  %1631 = vmatprep.mubr.bf16.mxu1 %v5564_v17 }
  0xec   : > { %1759 = vmatpush2.bf16.msra.mxu0 %v4570_v24  ;;  %1952 = vmatpush2.bf16.msra.mxu1 %v4572_v28  ;;  %v4522_v24 = vcombine.low %v460_v5, %v464_v7  ;;  %v4517_v28 = vcombine.high %v453_v21, %v457_v23  ;;  %v4878_v5 = vld [vmem:[#allocation8 + $0x34] ss:$8 sps:$4 sm:$0xff]  }
  0xed   : > { %1760 = vmatprep.subr.bf16.mxu0 %v4563_v29  ;;  %1953 = vmatprep.subr.bf16.mxu1 %v4565_v30  ;;  %v4514_v29 = vcombine.low %v452_v18, %v456_v19  ;;  %v4516_v30 = vcombine.low %v453_v21, %v457_v23  ;;  %v4881_v7 = vld [vmem:[#allocation8 + $0x134] ss:$8 sps:$4 sm:$0xff]   ;;  %v4888_v18 = vld [vmem:[#allocation8 + $0x10] ss:$8 sps:$4 sm:$0xff]   ;;  %v4896_v21 = vld [vmem:[#allocation8 + $0x4] ss:$8 sps:$4 sm:$0xff]  }
  0xee   : > { %v4891_v19 = vld [vmem:[#allocation8 + $0x110] ss:$8 sps:$4 sm:$0xff]   ;;  %v4897_v23 = vld [vmem:[#allocation8 + $0x100] ss:$8 sps:$4 sm:$0xff]  }
  0xf0   : > { %1761 = vmatpush2.bf16.msra.mxu0 %v4562_v34  ;;  %1954 = vmatpush2.bf16.msra.mxu1 %v4564_v38  ;;  %v4857_v34 = vld [vmem:[#allocation8 + $0x174] ss:$8 sps:$4 sm:$0xff]  }
  0xf1   : > { %1762 = vmatprep.subr.bf16.mxu0 %v4555_v40  ;;  %1955 = vmatprep.subr.bf16.mxu1 %v4557_v44  ;;  %v5614_v38 = vld [vmem:[%s5496_s26 + $0xa4] ss:$8 sps:$4 sm:$0xff]   ;;  %v5621_v40 = vld [vmem:[%s5496_s26 + $0xa0] ss:$8 sps:$4 sm:$0xff]  }
  0xf2   : > { %1439 = vmatmul.mubr.bf16.gmra.mxu0 %v5571_v33  ;;  %1632 = vmatmul.mubr.bf16.gmra.mxu1 %v5571_v33  ;;  %v5634_v44 = vld [vmem:[%s5496_s26 + $0xc4] ss:$8 sps:$4 sm:$0xff]  }
  0xf3   : > { %1448 = vmatprep.mubr.bf16.mxu0 %v5574_v37  ;;  %1641 = vmatprep.mubr.bf16.mxu1 %v5574_v37 }
  0xf4   : > { %1763 = vmatpush2.bf16.msra.mxu0 %v4554_v45  ;;  %1956 = vmatpush2.bf16.msra.mxu1 %v4556_v48  ;;  %v5641_v45 = vld [vmem:[%s5496_s26 + $0xc0] ss:$8 sps:$4 sm:$0xff]   ;;  %v5654_v48 = vld [vmem:[%s5496_s26 + $0xe4] ss:$8 sps:$4 sm:$0xff]  }
  0xf5   : > { %1764 = vmatprep.subr.bf16.mxu0 %v4547_v49  ;;  %1957 = vmatprep.subr.bf16.mxu1 %v4549_v50  ;;  %v5661_v49 = vld [vmem:[%s5496_s26 + $0xe0] ss:$8 sps:$4 sm:$0xff]   ;;  %v5664_v50 = vld [vmem:[%s5496_s26 + $0xf4] ss:$8 sps:$4 sm:$0xff]  }
  0xf8   : > { %1765 = vmatpush2.bf16.msra.mxu0 %v4546_v54  ;;  %1958 = vmatpush2.bf16.msra.mxu1 %v4548_v59  ;;  %v4852_v54 = vld [vmem:[#allocation8 + $0x70] ss:$8 sps:$4 sm:$0xff]   ;;  %v4863_v59 = vld [vmem:[#allocation8 + $0x164] ss:$8 sps:$4 sm:$0xff]  }
  0xf9   : > { %1766 = vmatprep.subr.bf16.mxu0 %v4539_v60  ;;  %1959 = vmatprep.subr.bf16.mxu1 %v4541_v0  ;;  %v4858_v60 = vld [vmem:[#allocation8 + $0x60] ss:$8 sps:$4 sm:$0xff]   ;;  %v4869_v0 = vld [vmem:[#allocation8 + $0x154] ss:$8 sps:$4 sm:$0xff]  }
  0xfa   : > { %1449 = vmatmul.mubr.bf16.gmra.mxu0 %v5581_v53  ;;  %1642 = vmatmul.mubr.bf16.gmra.mxu1 %v5581_v53 }
  0xfb   : > { %1458 = vmatprep.mubr.bf16.mxu0 %v5584_v58  ;;  %1651 = vmatprep.mubr.bf16.mxu1 %v5584_v58 }
  0xfc   : > { %1767 = vmatpush2.bf16.msra.mxu0 %v4538_v1  ;;  %1960 = vmatpush2.bf16.msra.mxu1 %v4540_v2  ;;  %v4864_v1 = vld [vmem:[#allocation8 + $0x50] ss:$8 sps:$4 sm:$0xff]  }
  0xfd   : > { %1768 = vmatprep.subr.bf16.mxu0 %v4531_v3  ;;  %1961 = vmatprep.subr.bf16.mxu1 %v4533_v4  ;;  %v4867_v2 = vld [vmem:[#allocation8 + $0x150] ss:$8 sps:$4 sm:$0xff]   ;;  %v4872_v3 = vld [vmem:[#allocation8 + $0x44] ss:$8 sps:$4 sm:$0xff]   ;;  %v4873_v4 = vld [vmem:[#allocation8 + $0x140] ss:$8 sps:$4 sm:$0xff]  }
 0x100   : > { %1769 = vmatpush2.bf16.msra.mxu0 %v4530_v11  ;;  %1962 = vmatpush2.bf16.msra.mxu1 %v4532_v12  ;;  %v4884_v11 = vld [vmem:[#allocation8 + $0x24] ss:$8 sps:$4 sm:$0xff]   ;;  %v4885_v12 = vld [vmem:[#allocation8 + $0x120] ss:$8 sps:$4 sm:$0xff]  }
 0x101   : > { %1770 = vmatprep.subr.bf16.mxu0 %v4523_v14  ;;  %1963 = vmatprep.subr.bf16.mxu1 %v4525_v16  ;;  %v4890_v14 = vld [vmem:[#allocation8 + $0x14] ss:$8 sps:$4 sm:$0xff]  }
 0x102   : > { %1459 = vmatmul.mubr.bf16.gmra.mxu0 %v5591_v15  ;;  %1652 = vmatmul.mubr.bf16.gmra.mxu1 %v5591_v15  ;;  %v4893_v16 = vld [vmem:[#allocation8 + $0x114] ss:$8 sps:$4 sm:$0xff]  }
 0x103   : > { %1468 = vmatprep.mubr.bf16.mxu0 %v5594_v20  ;;  %1661 = vmatprep.mubr.bf16.mxu1 %v5594_v20 }
 0x104   : > { %1771 = vmatpush2.bf16.msra.mxu0 %v4522_v24  ;;  %1964 = vmatpush2.bf16.msra.mxu1 %v4524_v25  ;;  %v4902_v24 = vld [vmem:[#allocation8 + $0xf4] ss:$8 sps:$4 sm:$0xff]  }
 0x105   : > { %1772 = vmatprep.subr.bf16.mxu0 %v4515_v26  ;;  %1965 = vmatprep.subr.bf16.mxu1 %v4517_v28  ;;  %v4905_v25 = vld [vmem:[#allocation8 + $0x1f4] ss:$8 sps:$4 sm:$0xff]   ;;  %v4900_v26 = vld [vmem:[#allocation8 + $0xf0] ss:$8 sps:$4 sm:$0xff]  }
 0x106   : > { %v4903_v28 = vld [vmem:[#allocation8 + $0x1f0] ss:$8 sps:$4 sm:$0xff]  }
 0x108   : > { %1773 = vmatpush2.bf16.msra.mxu0 %v4514_v29  ;;  %1966 = vmatpush2.bf16.msra.mxu1 %v4516_v30  ;;  %v4908_v29 = vld [vmem:[#allocation8 + $0xe4] ss:$8 sps:$4 sm:$0xff]   ;;  %v4909_v30 = vld [vmem:[#allocation8 + $0x1e0] ss:$8 sps:$4 sm:$0xff]  }
 0x109   : > { %3292 = vmatprep.subr.bf16.mxu0 %v4854_v31  ;;  %3485 = vmatprep.subr.bf16.mxu1 %v4857_v34  ;;  %v4914_v31 = vld [vmem:[#allocation8 + $0xd4] ss:$8 sps:$4 sm:$0xff]  }
 0x10a   : > { %1469 = vmatmul.mubr.bf16.gmra.mxu0 %v5601_v32  ;;  %1662 = vmatmul.mubr.bf16.gmra.mxu1 %v5601_v32  ;;  %v4917_v34 = vld [vmem:[#allocation8 + $0x1d4] ss:$8 sps:$4 sm:$0xff]  }
 0x10b   : > { %1478 = vmatprep.mubr.bf16.mxu0 %v5604_v35  ;;  %1671 = vmatprep.mubr.bf16.mxu1 %v5604_v35 }
 0x112   : > { %1479 = vmatmul.mubr.bf16.gmra.mxu0 %v5611_v36  ;;  %1672 = vmatmul.mubr.bf16.gmra.mxu1 %v5611_v36 }
 0x113   : > { %1488 = vmatprep.mubr.bf16.mxu0 %v5614_v38  ;;  %1681 = vmatprep.mubr.bf16.mxu1 %v5614_v38 }
 0x11a   : > { %1489 = vmatmul.mubr.bf16.gmra.mxu0 %v5621_v40  ;;  %1682 = vmatmul.mubr.bf16.gmra.mxu1 %v5621_v40 }
 0x11b   : > { %1498 = vmatprep.mubr.bf16.mxu0 %v5624_v41  ;;  %1691 = vmatprep.mubr.bf16.mxu1 %v5624_v41 }
 0x122   : > { %1499 = vmatmul.mubr.bf16.gmra.mxu0 %v5631_v42  ;;  %1692 = vmatmul.mubr.bf16.gmra.mxu1 %v5631_v42 }
 0x123   : > { %1508 = vmatprep.mubr.bf16.mxu0 %v5634_v44  ;;  %1701 = vmatprep.mubr.bf16.mxu1 %v5634_v44 }
 0x12a   : > { %1509 = vmatmul.mubr.bf16.gmra.mxu0 %v5641_v45  ;;  %1702 = vmatmul.mubr.bf16.gmra.mxu1 %v5641_v45 }
 0x12b   : > { %1518 = vmatprep.mubr.bf16.mxu0 %v5644_v46  ;;  %1711 = vmatprep.mubr.bf16.mxu1 %v5644_v46 }
 0x132   : > { %1519 = vmatmul.mubr.bf16.gmra.mxu0 %v5651_v47  ;;  %1712 = vmatmul.mubr.bf16.gmra.mxu1 %v5651_v47 }
 0x133   : > { %1528 = vmatprep.mubr.bf16.mxu0 %v5654_v48  ;;  %1721 = vmatprep.mubr.bf16.mxu1 %v5654_v48 }
 0x13a   : > { %1529 = vmatmul.mubr.bf16.gmra.mxu0 %v5661_v49  ;;  %1722 = vmatmul.mubr.bf16.gmra.mxu1 %v5661_v49 }
 0x13b   : > { %1538 = vmatprep.mubr.bf16.mxu0 %v5664_v50  ;;  %1731 = vmatprep.mubr.bf16.mxu1 %v5664_v50 }
 0x142   : > { %1539 = vmatmul.mubr.bf16.gmra.mxu0 %v5671_v51  ;;  %1732 = vmatmul.mubr.bf16.gmra.mxu1 %v5671_v51 }
 0x143   : > { %1774 = vmatprep.mubr.bf16.mxu0 %v5044_v52  ;;  %1967 = vmatprep.mubr.bf16.mxu1 %v5044_v52  ;;  %v4912_v52 = vld [vmem:[#allocation8 + $0xd0] ss:$8 sps:$4 sm:$0xff]  }
 0x14a   : > { %1775 = vmatmul.mubr.bf16.vlgmr.msra.gmra.mxu0 %v5521_v6  ;;  %1968 = vmatmul.mubr.bf16.vlgmr.msra.gmra.mxu1 %v5521_v6  ;;  %v4875_v6 = vld [vmem:[#allocation8 + $0x144] ss:$8 sps:$4 sm:$0xff]  }
 0x14b   : > { %3293 = vmatpush1.bf16.msra.mxu0 %v4852_v54  ;;  %3486 = vmatpush1.bf16.msra.mxu1 %v4855_v55  ;;  %v4915_v54 = vld [vmem:[#allocation8 + $0x1d0] ss:$8 sps:$4 sm:$0xff]   ;;  %v4920_v55 = vld [vmem:[#allocation8 + $0xc4] ss:$8 sps:$4 sm:$0xff]  }
 0x14c   : > { %1784 = vmatprep.mubr.bf16.mxu0 %v5524_v9  ;;  %1977 = vmatprep.mubr.bf16.mxu1 %v5524_v9  ;;  %v4870_v9 = vld [vmem:[#allocation8 + $0x40] ss:$8 sps:$4 sm:$0xff]  }
 0x14d   : > { %3294 = vmatprep.subr.bf16.mxu0 %v4860_v56  ;;  %3487 = vmatprep.subr.bf16.mxu1 %v4863_v59  ;;  %v4921_v56 = vld [vmem:[#allocation8 + $0x1c0] ss:$8 sps:$4 sm:$0xff]   ;;  %v4926_v59 = vld [vmem:[#allocation8 + $0xb4] ss:$8 sps:$4 sm:$0xff]  }
 0x14f   : > { %3295 = vmatpush1.bf16.msra.mxu0 %v4858_v60  ;;  %3488 = vmatpush1.bf16.msra.mxu1 %v4861_v62  ;;  %v4929_v60 = vld [vmem:[#allocation8 + $0x1b4] ss:$8 sps:$4 sm:$0xff]   ;;  %v4924_v62 = vld [vmem:[#allocation8 + $0xb0] ss:$8 sps:$4 sm:$0xff]  }
 0x150   : > { %3296 = vmatprep.subr.bf16.mxu0 %v4866_v63  ;;  %3489 = vmatprep.subr.bf16.mxu1 %v4869_v0  ;;  %v4927_v63 = vld [vmem:[#allocation8 + $0x1b0] ss:$8 sps:$4 sm:$0xff]   ;;  %v4932_v0 = vld [vmem:[#allocation8 + $0xa4] ss:$8 sps:$4 sm:$0xff]  }
 0x152   : > { %1785 = vmatmul.mubr.bf16.gmra.mxu0 %v5530_v22  ;;  %1978 = vmatmul.mubr.bf16.gmra.mxu1 %v5530_v22  ;;  %v4887_v22 = vld [vmem:[#allocation8 + $0x124] ss:$8 sps:$4 sm:$0xff]  }
 0x153   : > { %1794 = vmatprep.mubr.bf16.mxu0 %v5534_v27  ;;  %1987 = vmatprep.mubr.bf16.mxu1 %v5534_v27  ;;  %v4882_v27 = vld [vmem:[#allocation8 + $0x20] ss:$8 sps:$4 sm:$0xff]  }
 0x154   : > { %3297 = vmatpush1.bf16.msra.mxu0 %v4864_v1  ;;  %3490 = vmatpush1.bf16.msra.mxu1 %v4867_v2  ;;  %v4933_v1 = vld [vmem:[#allocation8 + $0x1a0] ss:$8 sps:$4 sm:$0xff]   ;;  %v4938_v2 = vld [vmem:[#allocation8 + $0x94] ss:$8 sps:$4 sm:$0xff]  }
 0x155   : > { %3298 = vmatprep.subr.bf16.mxu0 %v4872_v3  ;;  %3491 = vmatprep.subr.bf16.mxu1 %v4875_v6  ;;  %v4941_v3 = vld [vmem:[#allocation8 + $0x194] ss:$8 sps:$4 sm:$0xff]   ;;  %v4936_v6 = vld [vmem:[#allocation8 + $0x90] ss:$8 sps:$4 sm:$0xff]  }
 0x158   : > { %3299 = vmatpush1.bf16.msra.mxu0 %v4870_v9  ;;  %3492 = vmatpush1.bf16.msra.mxu1 %v4873_v4  ;;  %v4939_v9 = vld [vmem:[#allocation8 + $0x190] ss:$8 sps:$4 sm:$0xff]   ;;  %v4944_v4 = vld [vmem:[#allocation8 + $0x84] ss:$8 sps:$4 sm:$0xff]  }
 0x159   : > { %3300 = vmatprep.subr.bf16.mxu0 %v4878_v5  ;;  %3493 = vmatprep.subr.bf16.mxu1 %v4881_v7  ;;  %v4945_v5 = vld [vmem:[#allocation8 + $0x180] ss:$8 sps:$4 sm:$0xff]   ;;  %v4950_v7 = vld [vmem:[#allocation8 + $0x274] ss:$8 sps:$4 sm:$0xff]  }
 0x15a   : > { %1795 = vmatmul.mubr.bf16.gmra.mxu0 %v5541_v39  ;;  %1988 = vmatmul.mubr.bf16.gmra.mxu1 %v5541_v39  ;;  %v4899_v39 = vld [vmem:[#allocation8 + $0x104] ss:$8 sps:$4 sm:$0xff]  }
 0x15b   : > { %1804 = vmatprep.mubr.bf16.mxu0 %v5544_v43  ;;  %1997 = vmatprep.mubr.bf16.mxu1 %v5544_v43  ;;  %v4894_v43 = vld [vmem:[#allocation8] ss:$8 sps:$4 sm:$0xff]  }
 0x15c   : > { %3301 = vmatpush1.bf16.msra.mxu0 %v4876_v8  ;;  %3494 = vmatpush1.bf16.msra.mxu1 %v4879_v10  ;;  %v4953_v8 = vld [vmem:[#allocation8 + $0x374] ss:$8 sps:$4 sm:$0xff]  }
 0x15d   : > { %3302 = vmatprep.subr.bf16.mxu0 %v4884_v11  ;;  %3495 = vmatprep.subr.bf16.mxu1 %v4887_v22 }
 0x160   : > { %3303 = vmatpush1.bf16.msra.mxu0 %v4882_v27  ;;  %3496 = vmatpush1.bf16.msra.mxu1 %v4885_v12 }
 0x161   : > { %3304 = vmatprep.subr.bf16.mxu0 %v4890_v14  ;;  %3497 = vmatprep.subr.bf16.mxu1 %v4893_v16 }
 0x162   : > { %1805 = vmatmul.mubr.bf16.gmra.mxu0 %v5551_v57  ;;  %1998 = vmatmul.mubr.bf16.gmra.mxu1 %v5551_v57  ;;  %v4911_v57 = vld [vmem:[#allocation8 + $0x1e4] ss:$8 sps:$4 sm:$0xff]  }
 0x163   : > { %1814 = vmatprep.mubr.bf16.mxu0 %v5554_v61  ;;  %2007 = vmatprep.mubr.bf16.mxu1 %v5554_v61  ;;  %v4906_v61 = vld [vmem:[#allocation8 + $0xe0] ss:$8 sps:$4 sm:$0xff]  }
 0x164   : > { %3305 = vmatpush1.bf16.msra.mxu0 %v4888_v18  ;;  %3498 = vmatpush1.bf16.msra.mxu1 %v4891_v19 }
 0x165   : > { %3306 = vmatprep.subr.bf16.mxu0 %v4896_v21  ;;  %3499 = vmatprep.subr.bf16.mxu1 %v4899_v39 }
 0x168   : > { %3307 = vmatpush1.bf16.msra.mxu0 %v4894_v43  ;;  %3500 = vmatpush1.bf16.msra.mxu1 %v4897_v23 }
 0x169   : > { %3308 = vmatprep.subr.bf16.mxu0 %v4902_v24  ;;  %3501 = vmatprep.subr.bf16.mxu1 %v4905_v25 }
 0x16a   : > { %1815 = vmatmul.mubr.bf16.gmra.mxu0 %v5561_v13  ;;  %2008 = vmatmul.mubr.bf16.gmra.mxu1 %v5561_v13  ;;  %v4923_v13 = vld [vmem:[#allocation8 + $0x1c4] ss:$8 sps:$4 sm:$0xff]  }
 0x16b   : > { %1824 = vmatprep.mubr.bf16.mxu0 %v5564_v17  ;;  %2017 = vmatprep.mubr.bf16.mxu1 %v5564_v17  ;;  %v4918_v17 = vld [vmem:[#allocation8 + $0xc0] ss:$8 sps:$4 sm:$0xff]  }
 0x16c   : > { %3309 = vmatpush2.bf16.msra.mxu0 %v4900_v26  ;;  %3502 = vmatpush2.bf16.msra.mxu1 %v4903_v28 }
 0x16d   : > { %3310 = vmatprep.subr.bf16.mxu0 %v4908_v29  ;;  %3503 = vmatprep.subr.bf16.mxu1 %v4911_v57 }
 0x170   : > { %3311 = vmatpush2.bf16.msra.mxu0 %v4906_v61  ;;  %3504 = vmatpush2.bf16.msra.mxu1 %v4909_v30 }
 0x171   : > { %3312 = vmatprep.subr.bf16.mxu0 %v4914_v31  ;;  %3505 = vmatprep.subr.bf16.mxu1 %v4917_v34 }
 0x172   : > { %1825 = vmatmul.mubr.bf16.gmra.mxu0 %v5571_v33  ;;  %2018 = vmatmul.mubr.bf16.gmra.mxu1 %v5571_v33  ;;  %v4935_v33 = vld [vmem:[#allocation8 + $0x1a4] ss:$8 sps:$4 sm:$0xff]  }
 0x173   : > { %1834 = vmatprep.mubr.bf16.mxu0 %v5574_v37  ;;  %2027 = vmatprep.mubr.bf16.mxu1 %v5574_v37  ;;  %v4930_v37 = vld [vmem:[#allocation8 + $0xa0] ss:$8 sps:$4 sm:$0xff]  }
 0x174   : > { %3313 = vmatpush2.bf16.msra.mxu0 %v4912_v52  ;;  %3506 = vmatpush2.bf16.msra.mxu1 %v4915_v54 }
 0x175   : > { %3314 = vmatprep.subr.bf16.mxu0 %v4920_v55  ;;  %3507 = vmatprep.subr.bf16.mxu1 %v4923_v13  ;;  %v516_v55 = vlaneseq }
 0x178   : > { %3315 = vmatpush2.bf16.msra.mxu0 %v4918_v17  ;;  %3508 = vmatpush2.bf16.msra.mxu1 %v4921_v56 }
 0x179   : > { %3316 = vmatprep.subr.bf16.mxu0 %v4926_v59  ;;  %3509 = vmatprep.subr.bf16.mxu1 %v4929_v60  ;;  %v5806_v60 = vshrl.u32 %v516_v55, 7 }
 0x17a   : > { %1835 = vmatmul.mubr.bf16.gmra.mxu0 %v5581_v53  ;;  %2028 = vmatmul.mubr.bf16.gmra.mxu1 %v5581_v53  ;;  %v4947_v53 = vld [vmem:[#allocation8 + $0x184] ss:$8 sps:$4 sm:$0xff]  }
 0x17b   : > { %1844 = vmatprep.mubr.bf16.mxu0 %v5584_v58  ;;  %2037 = vmatprep.mubr.bf16.mxu1 %v5584_v58  ;;  %v4942_v58 = vld [vmem:[#allocation8 + $0x80] ss:$8 sps:$4 sm:$0xff]   ;;  %7279 = vst [vmem:[#allocation18_spill] sm:$0xff] %v5806_v60 }
 0x17c   : > { %3317 = vmatpush2.bf16.msra.mxu0 %v4924_v62  ;;  %3510 = vmatpush2.bf16.msra.mxu1 %v4927_v63  ;;  %v7257_v63 = vsub.s32 1, %v5806_v60 }
 0x17d   : > { %3318 = vmatprep.subr.bf16.mxu0 %v4932_v0  ;;  %3511 = vmatprep.subr.bf16.mxu1 %v4935_v33  ;;  %v530_v0 = vsub.s32 3, %v5806_v60 }
 0x180   : > { %3319 = vmatpush2.bf16.msra.mxu0 %v4930_v37  ;;  %3512 = vmatpush2.bf16.msra.mxu1 %v4933_v1  ;;  %v514_v1 = vld [vmem:[#allocation7] sm:$0xff] }
 0x181   : > { %3320 = vmatprep.subr.bf16.mxu0 %v4938_v2  ;;  %3513 = vmatprep.subr.bf16.mxu1 %v4941_v3  ;;  %v5828_v3 = vrot.slane %v514_v1, %v7257_v63 }
 0x182   : > { %1845 = vmatmul.mubr.bf16.gmra.mxu0 %v5591_v15  ;;  %2038 = vmatmul.mubr.bf16.gmra.mxu1 %v5591_v15 }
 0x183   : > { %1854 = vmatprep.mubr.bf16.mxu0 %v5594_v20  ;;  %2047 = vmatprep.mubr.bf16.mxu1 %v5594_v20 }
 0x184   : > { %3321 = vmatpush2.bf16.msra.mxu0 %v4936_v6  ;;  %3514 = vmatpush2.bf16.msra.mxu1 %v4939_v9 }
 0x185   : > { %3322 = vmatprep.subr.bf16.mxu0 %v4944_v4  ;;  %3515 = vmatprep.subr.bf16.mxu1 %v4947_v53 }
 0x188   : > { %3323 = vmatpush2.bf16.msra.mxu0 %v4942_v58  ;;  %3516 = vmatpush2.bf16.msra.mxu1 %v4945_v5 }
 0x189   : > { %3678 = vmatprep.subr.bf16.mxu0 %v4950_v7  ;;  %3871 = vmatprep.subr.bf16.mxu1 %v4953_v8  ;;  %v526_v7 = vsub.s32 2, %v5806_v60 }
 0x18a   : > { %v5708_v10 = vpop.f32.mrf.mxu0  ;;  %1855 = vmatmul.mubr.bf16.gmra.mxu0 %v5601_v32  ;;  %v5711_v15 = vpop.f32.mrf.mxu1  ;;  %2048 = vmatmul.mubr.bf16.gmra.mxu1 %v5601_v32 }
 0x18b   : > { %1864 = vmatprep.mubr.bf16.mxu0 %v5604_v35  ;;  %2057 = vmatprep.mubr.bf16.mxu1 %v5604_v35 }
 0x18c   : > { %v5715_v20 = vpop.f32.mrf.mxu0  ;;  %v5718_v11 = vpop.f32.mrf.mxu1 }
 0x18d   : > { %v1393_v8 = vadd.f32 %v5715_v20, %v5828_v3 }
 0x18e   : > { %v5720_v22 = vpop.f32.mrf.mxu0  ;;  %v5722_v27 = vpop.f32.mrf.mxu1 }
 0x190   : > { %v5724_v12 = vpop.f32.mrf.mxu0  ;;  %v5726_v14 = vpop.f32.mrf.mxu1 }
 0x191   : > { %v1397_v4 = vadd.f32 %v5724_v12, %v5828_v3 }
 0x192   : > { %v5728_v16 = vpop.f32.mrf.mxu0  ;;  %1865 = vmatmul.mubr.bf16.gmra.mxu0 %v5611_v36  ;;  %v5731_v32 = vpop.f32.mrf.mxu1  ;;  %2058 = vmatmul.mubr.bf16.gmra.mxu1 %v5611_v36 }
 0x193   : > { %1874 = vmatprep.mubr.bf16.mxu0 %v5614_v38  ;;  %2067 = vmatprep.mubr.bf16.mxu1 %v5614_v38 }
 0x194   : > { %v5735_v35 = vpop.f32.mrf.mxu0  ;;  %v5738_v18 = vpop.f32.mrf.mxu1 }
 0x196   : > { %v5740_v19 = vpop.f32.mrf.mxu0  ;;  %v5742_v21 = vpop.f32.mrf.mxu1 }
 0x198   : > { %v5744_v39 = vpop.f32.mrf.mxu0  ;;  %v5746_v43 = vpop.f32.mrf.mxu1 }
 0x19a   : > { %v5748_v23 = vpop.f32.mrf.mxu0  ;;  %1875 = vmatmul.mubr.bf16.gmra.mxu0 %v5621_v40  ;;  %v5751_v36 = vpop.f32.mrf.mxu1  ;;  %2068 = vmatmul.mubr.bf16.gmra.mxu1 %v5621_v40 }
 0x19b   : > { %1884 = vmatprep.mubr.bf16.mxu0 %v5624_v41  ;;  %2077 = vmatprep.mubr.bf16.mxu1 %v5624_v41 }
 0x19c   : > { %v5755_v38 = vpop.f32.mrf.mxu0  ;;  %v5758_v24 = vpop.f32.mrf.mxu1 }
 0x19e   : > { %v5760_v25 = vpop.f32.mrf.mxu0  ;;  %v5762_v26 = vpop.f32.mrf.mxu1 }
 0x1a0   : > { %v5764_v28 = vpop.f32.mrf.mxu0  ;;  %v5766_v29 = vpop.f32.mrf.mxu1 }
 0x1a2   : > { %v5768_v57 = vpop.f32.mrf.mxu0  ;;  %1885 = vmatmul.mubr.bf16.gmra.mxu0 %v5631_v42  ;;  %v5771_v40 = vpop.f32.mrf.mxu1  ;;  %2078 = vmatmul.mubr.bf16.gmra.mxu1 %v5631_v42 }
 0x1a3   : > { %1894 = vmatprep.mubr.bf16.mxu0 %v5634_v44  ;;  %2087 = vmatprep.mubr.bf16.mxu1 %v5634_v44 }
 0x1a4   : > { %v5775_v41 = vpop.f32.mrf.mxu0  ;;  %v5778_v61 = vpop.f32.mrf.mxu1 }
 0x1a6   : > { %v5780_v30 = vpop.f32.mrf.mxu0  ;;  %v5782_v31 = vpop.f32.mrf.mxu1 }
 0x1a8   : > { %v5784_v34 = vpop.f32.mrf.mxu0  ;;  %v5786_v52 = vpop.f32.mrf.mxu1 }
 0x1aa   : > { %v5788_v54 = vpop.f32.mrf.mxu0  ;;  %1895 = vmatmul.mubr.bf16.gmra.mxu0 %v5641_v45  ;;  %v5791_v42 = vpop.f32.mrf.mxu1  ;;  %2088 = vmatmul.mubr.bf16.gmra.mxu1 %v5641_v45 }
 0x1ab   : > { %1904 = vmatprep.mubr.bf16.mxu0 %v5644_v46  ;;  %2097 = vmatprep.mubr.bf16.mxu1 %v5644_v46 }
 0x1ac   : > { %v5795_v44 = vpop.f32.mrf.mxu0  ;;  %v5798_v13 = vpop.f32.mrf.mxu1 }
 0x1ae   : > { %v5800_v17 = vpop.f32.mrf.mxu0  ;;  %v5802_v56 = vpop.f32.mrf.mxu1 }
 0x1b0   : > { %v5804_v59 = vpop.f32.mrf.mxu0  ;;  %v5808_v62 = vpop.f32.mrf.mxu1 }
 0x1b2   : > { %v5810_v45 = vpop.f32.mrf.mxu0  ;;  %1905 = vmatmul.mubr.bf16.gmra.mxu0 %v5651_v47  ;;  %v5814_v46 = vpop.f32.mrf.mxu1  ;;  %2098 = vmatmul.mubr.bf16.gmra.mxu1 %v5651_v47  ;;  %v5832_v47 = vrot.slane %v514_v1, %v530_v0 }
 0x1b3   : > { %7280 = vst [vmem:[#allocation19_spill] sm:$0xff] %v5814_v46  ;;  %1914 = vmatprep.mubr.bf16.mxu0 %v5654_v48  ;;  %2107 = vmatprep.mubr.bf16.mxu1 %v5654_v48  ;;  %v7258_v48 = vsub.s32 0, %v5806_v60  ;;  %v2129_v46 = vmax.f32 %v1393_v8, 0.0 }
 0x1b4   : > { %v5819_v33 = vpop.f32.mrf.mxu0  ;;  %v5822_v37 = vpop.f32.mrf.mxu1  ;;  %v1590_v58 = vadd.f32 %v5726_v14, %v5832_v47  ;;  %v1586_v12 = vadd.f32 %v5718_v11, %v5832_v47  ;;  %v2137_v14 = vmax.f32 %v1397_v4, 0.0 }
 0x1b6   : > { %v5824_v2 = vpop.f32.mrf.mxu0  ;;  %v5830_v6 = vpop.f32.mrf.mxu1  ;;  %v2139_v20 = vmax.f32 %v1590_v58, 0.0  ;;  %v2131_v11 = vmax.f32 %v1586_v12, 0.0  ;;  %v2385_v60 = vpack.c.bf16 %v2137_v14, %v2129_v46 }
 0x1b7   : > { %7281 = vst [vmem:[#allocation20_spill] sm:$0xff] %v5830_v6 }
 0x1b8   : > { %v5834_v9 = vpop.f32.mrf.mxu0  ;;  %v5838_v53 = vpop.f32.mrf.mxu1 }
 0x1ba   : > { %v5843_v5 = vpop.f32.mrf.mxu0  ;;  %1915 = vmatmul.mubr.bf16.gmra.mxu0 %v5661_v49  ;;  %v5849_v55 = vpop.f32.mrf.mxu1  ;;  %2108 = vmatmul.mubr.bf16.gmra.mxu1 %v5661_v49  ;;  %v5866_v49 = vrot.slane %v514_v1, %v526_v7  ;;  %v1600_v7 = vadd.f32 %v5746_v43, %v5832_v47  ;;  %v1596_v43 = vadd.f32 %v5738_v18, %v5832_v47 }
 0x1bb   : > { %7282 = vst [vmem:[#allocation21_spill] sm:$0xff] %v5843_v5  ;;  %7283 = vst [vmem:[#allocation22_spill] sm:$0xff] %v5849_v55  ;;  %1924 = vmatprep.mubr.bf16.mxu0 %v5664_v50  ;;  %2117 = vmatprep.mubr.bf16.mxu1 %v5664_v50  ;;  %v5862_v5 = vrot.slane %v514_v1, %v7258_v48  ;;  %v1407_v48 = vadd.f32 %v5744_v39, %v5828_v3 }
 0x1bc   : > { %v5855_v0 = vpop.f32.mrf.mxu0  ;;  %v5858_v63 = vpop.f32.mrf.mxu1  ;;  %v1588_v4 = vadd.f32 %v5722_v27, %v5866_v49  ;;  %v1584_v27 = vadd.f32 %v5711_v15, %v5866_v49  ;;  %v1403_v39 = vadd.f32 %v5735_v35, %v5828_v3 }
 0x1bd   : > { %7284 = vst [vmem:[#allocation23_spill] sm:$0xff] %v5855_v0  ;;  %v1395_v0 = vadd.f32 %v5720_v22, %v5862_v5  ;;  %v1391_v1 = vadd.f32 %v5708_v10, %v5862_v5  ;;  %v2387_v22 = vpack.c.bf16 %v2139_v20, %v2131_v11  ;;  %v2153_v20 = vmax.f32 %v1407_v48, 0.0  ;;  %v4948_v48 = vld [vmem:[#allocation8 + $0x270] ss:$8 sps:$4 sm:$0xff]  }
 0x1be   : > { %v5864_v55 = vpop.f32.mrf.mxu0  ;;  %v5868_v6 = vpop.f32.mrf.mxu1  ;;  %v2138_v14 = vmax.f32 %v1588_v4, 0.0  ;;  %v2130_v35 = vmax.f32 %v1584_v27, 0.0  ;;  %v1405_v18 = vadd.f32 %v5740_v19, %v5862_v5  ;;  %v1594_v19 = vadd.f32 %v5731_v32, %v5866_v49 }
 0x1bf   : > { %7285 = vst [vmem:[#allocation24_spill] sm:$0xff] %v5864_v55  ;;  %7286 = vst [vmem:[#allocation25_spill] sm:$0xff] %v5868_v6  ;;  %v2136_v10 = vmax.f32 %v1395_v0, 0.0  ;;  %v2128_v15 = vmax.f32 %v1391_v1, 0.0  ;;  %v1598_v0 = vadd.f32 %v5742_v21, %v5866_v49  ;;  %v1417_v1 = vadd.f32 %v5764_v28, %v5828_v3 }
 0x1c0   : > { %v5872_v50 = vpop.f32.mrf.mxu0  ;;  %v5878_v58 = vpop.f32.mrf.mxu1  ;;  %v1610_v21 = vadd.f32 %v5766_v29, %v5832_v47  ;;  %v1413_v28 = vadd.f32 %v5755_v38, %v5828_v3  ;;  %v1606_v32 = vadd.f32 %v5758_v24, %v5832_v47  ;;  %v4957_v38 = vld [vmem:[#allocation8 + $0x360] ss:$8 sps:$4 sm:$0xff]  }
 0x1c2   : > { %v5884_v8 = vpop.f32.mrf.mxu0  ;;  %1925 = vmatmul.mubr.bf16.gmra.mxu0 %v5671_v51  ;;  %v5891_v12 = vpop.f32.mrf.mxu1  ;;  %2118 = vmatmul.mubr.bf16.gmra.mxu1 %v5671_v51  ;;  %v2384_v51 = vpack.c.bf16 %v2136_v10, %v2128_v15  ;;  %v1401_v10 = vadd.f32 %v5728_v16, %v5862_v5  ;;  %v4959_v15 = vld [vmem:[#allocation8 + $0x364] ss:$8 sps:$4 sm:$0xff]   ;;  %v2154_v16 = vmax.f32 %v1598_v0, 0.0  ;;  %v4965_v0 = vld [vmem:[#allocation8 + $0x354] ss:$8 sps:$4 sm:$0xff]   ;;  %v2161_v24 = vmax.f32 %v1413_v28, 0.0 }
 0x1c3   : > { %7287 = vst [vmem:[#allocation26_spill] sm:$0xff] %v5884_v8  ;;  %7288 = vst [vmem:[#allocation27_spill] sm:$0xff] %v5891_v12  ;;  %3324 = vmatprep.mubr.bf16.mxu0 %v2385_v60  ;;  %3517 = vmatprep.mubr.bf16.mxu1 %v2387_v22  ;;  %v2155_v8 = vmax.f32 %v1600_v7, 0.0  ;;  %v2145_v12 = vmax.f32 %v1403_v39, 0.0  ;;  %v2147_v60 = vmax.f32 %v1596_v43, 0.0  ;;  %v2386_v22 = vpack.c.bf16 %v2138_v14, %v2130_v35 }
 0x1c4   : > { %v5896_v46 = vpop.f32.mrf.mxu0  ;;  %v5898_v11 = vpop.f32.mrf.mxu1  ;;  %v4951_v39 = vld [vmem:[#allocation8 + $0x370] ss:$8 sps:$4 sm:$0xff]   ;;  %v4954_v35 = vld [vmem:[#allocation8 + $0x260] ss:$8 sps:$4 sm:$0xff]  }
 0x1c5   : > { %v2393_v27 = vpack.c.bf16 %v2153_v20, %v2145_v12  ;;  %v2395_v14 = vpack.c.bf16 %v2155_v8, %v2147_v60  ;;  %v2152_v20 = vmax.f32 %v1405_v18, 0.0  ;;  %v4962_v60 = vld [vmem:[#allocation8 + $0x254] ss:$8 sps:$4 sm:$0xff]   ;;  %v4963_v28 = vld [vmem:[#allocation8 + $0x350] ss:$8 sps:$4 sm:$0xff]  }
 0x1c6   : > { %v5900_v6 = vpop.f32.mrf.mxu0  ;;  %v5902_v55 = vpop.f32.mrf.mxu1 }
 0x1c7   : > { %7289 = vst [vmem:[#allocation28_spill] sm:$0xff] %v5902_v55  ;;  %v4956_v55 = vld [vmem:[#allocation8 + $0x264] ss:$8 sps:$4 sm:$0xff]  }
 0x1c8   : > { %v5908_v4 = vpop.f32.mrf.mxu0  ;;  %v5912_v7 = vpop.f32.mrf.mxu1 }
 0x1ca   : > { %v5920_v43 = vpop.f32.mrf.mxu0  ;;  %3325 = vmatmul.mubr.bf16.vlgmr.msra.gmra.mxu0 %v2384_v51  ;;  %v5924_v12 = vpop.f32.mrf.mxu1  ;;  %3518 = vmatmul.mubr.bf16.vlgmr.msra.gmra.mxu1 %v2386_v22  ;;  %v2169_v51 = vmax.f32 %v1417_v1, 0.0  ;;  %v2146_v22 = vmax.f32 %v1594_v19, 0.0  ;;  %v1608_v19 = vadd.f32 %v5762_v26, %v5866_v49  ;;  %v1604_v26 = vadd.f32 %v5751_v36, %v5866_v49 }
 0x1cb   : > { %7290 = vst [vmem:[#allocation29_spill] sm:$0xff] %v5920_v43  ;;  %7291 = vst [vmem:[#allocation30_spill] sm:$0xff] %v5924_v12  ;;  %3334 = vmatprep.mubr.bf16.mxu0 %v2393_v27  ;;  %3527 = vmatprep.mubr.bf16.mxu1 %v2395_v14  ;;  %v2144_v12 = vmax.f32 %v1401_v10, 0.0  ;;  %v2171_v27 = vmax.f32 %v1610_v21, 0.0  ;;  %v4960_v10 = vld [vmem:[#allocation8 + $0x250] ss:$8 sps:$4 sm:$0xff]   ;;  %v1427_v21 = vadd.f32 %v5784_v34, %v5828_v3 }
 0x1cc   : > { %3679 = vmatpush1.bf16.msra.mxu0 %v4948_v48  ;;  %v5928_v29 = vpop.f32.mrf.mxu0  ;;  %v5930_v8 = vpop.f32.mrf.mxu1  ;;  %3872 = vmatpush1.bf16.msra.mxu1 %v4951_v39  ;;  %v1415_v48 = vadd.f32 %v5760_v25, %v5862_v5  ;;  %v2394_v43 = vpack.c.bf16 %v2154_v16, %v2146_v22  ;;  %v2163_v39 = vmax.f32 %v1606_v32, 0.0  ;;  %v2401_v25 = vpack.c.bf16 %v2169_v51, %v2161_v24  ;;  %v4971_v32 = vld [vmem:[#allocation8 + $0x344] ss:$8 sps:$4 sm:$0xff]   ;;  %v4969_v22 = vld [vmem:[#allocation8 + $0x340] ss:$8 sps:$4 sm:$0xff]  }
 0x1cd   : > { %7292 = vst [vmem:[#allocation31_spill] sm:$0xff] %v5930_v8  ;;  %3680 = vmatprep.subr.bf16.mxu0 %v4956_v55  ;;  %3873 = vmatprep.subr.bf16.mxu1 %v4959_v15  ;;  %v2392_v1 = vpack.c.bf16 %v2152_v20, %v2144_v12  ;;  %v1411_v55 = vadd.f32 %v5748_v23, %v5862_v5  ;;  %v4968_v12 = vld [vmem:[#allocation8 + $0x244] ss:$8 sps:$4 sm:$0xff]   ;;  %v2185_v36 = vmax.f32 %v1427_v21, 0.0 }
 0x1ce   : > { %v5932_v18 = vpop.f32.mrf.mxu0  ;;  %v5936_v14 = vpop.f32.mrf.mxu1  ;;  %v1620_v23 = vadd.f32 %v5786_v52, %v5832_v47  ;;  %v2403_v16 = vpack.c.bf16 %v2171_v27, %v2163_v39  ;;  %v2168_v34 = vmax.f32 %v1415_v48, 0.0  ;;  %v1616_v52 = vadd.f32 %v5778_v61, %v5832_v47 }
 0x1cf   : > { %v2160_v27 = vmax.f32 %v1411_v55, 0.0  ;;  %v2162_v61 = vmax.f32 %v1604_v26, 0.0  ;;  %v1421_v55 = vadd.f32 %v5768_v57, %v5862_v5  ;;  %v1618_v21 = vadd.f32 %v5782_v31, %v5866_v49  ;;  %v4975_v57 = vld [vmem:[#allocation8 + $0x330] ss:$8 sps:$4 sm:$0xff]  }
 0x1d0   : > { %v5940_v8 = vpop.f32.mrf.mxu0  ;;  %3681 = vmatpush1.bf16.msra.mxu0 %v4954_v35  ;;  %v5946_v15 = vpop.f32.mrf.mxu1  ;;  %3874 = vmatpush1.bf16.msra.mxu1 %v4957_v38  ;;  %v1423_v35 = vadd.f32 %v5775_v41, %v5828_v3  ;;  %v4974_v41 = vld [vmem:[#allocation8 + $0x234] ss:$8 sps:$4 sm:$0xff]   ;;  %v2187_v48 = vmax.f32 %v1620_v23, 0.0  ;;  %v1630_v31 = vadd.f32 %v5808_v62, %v5832_v47 }
 0x1d1   : > { %3682 = vmatprep.subr.bf16.mxu0 %v4962_v60  ;;  %3875 = vmatprep.subr.bf16.mxu1 %v4965_v0  ;;  %v4966_v60 = vld [vmem:[#allocation8 + $0x240] ss:$8 sps:$4 sm:$0xff]   ;;  %v2170_v0 = vmax.f32 %v1608_v19, 0.0  ;;  %v2400_v39 = vpack.c.bf16 %v2168_v34, %v2160_v27  ;;  %v1425_v19 = vadd.f32 %v5780_v30, %v5862_v5  ;;  %v1614_v30 = vadd.f32 %v5771_v40, %v5866_v49  ;;  %v4983_v27 = vld [vmem:[#allocation8 + $0x324] ss:$8 sps:$4 sm:$0xff]  }
 0x1d2   : > { %v5950_v20 = vpop.f32.mrf.mxu0  ;;  %3335 = vmatmul.mubr.bf16.gmra.mxu0 %v2392_v1  ;;  %v5956_v51 = vpop.f32.mrf.mxu1  ;;  %3528 = vmatmul.mubr.bf16.gmra.mxu1 %v2394_v43  ;;  %v4977_v1 = vld [vmem:[#allocation8 + $0x334] ss:$8 sps:$4 sm:$0xff]   ;;  %v1626_v40 = vadd.f32 %v5798_v13, %v5832_v47 }
 0x1d3   : > { %3344 = vmatprep.mubr.bf16.mxu0 %v2401_v25  ;;  %3537 = vmatprep.mubr.bf16.mxu1 %v2403_v16  ;;  %v2177_v25 = vmax.f32 %v1423_v35, 0.0  ;;  %v2402_v23 = vpack.c.bf16 %v2170_v0, %v2162_v61  ;;  %v4980_v35 = vld [vmem:[#allocation8 + $0x224] ss:$8 sps:$4 sm:$0xff]   ;;  %v4986_v61 = vld [vmem:[#allocation8 + $0x214] ss:$8 sps:$4 sm:$0xff]  }
 0x1d4   : > { %v5960_v38 = vpop.f32.mrf.mxu0  ;;  %3683 = vmatpush1.bf16.msra.mxu0 %v4960_v10  ;;  %v5962_v24 = vpop.f32.mrf.mxu1  ;;  %3876 = vmatpush1.bf16.msra.mxu1 %v4963_v28  ;;  %v2179_v10 = vmax.f32 %v1616_v52, 0.0 }
 0x1d5   : > { %3684 = vmatprep.subr.bf16.mxu0 %v4968_v12  ;;  %3877 = vmatprep.subr.bf16.mxu1 %v4971_v32  ;;  %v4972_v12 = vld [vmem:[#allocation8 + $0x230] ss:$8 sps:$4 sm:$0xff]   ;;  %v1437_v32 = vadd.f32 %v5804_v59, %v5828_v3  ;;  %v2409_v34 = vpack.c.bf16 %v2185_v36, %v2177_v25  ;;  %v1433_v59 = vadd.f32 %v5795_v44, %v5828_v3  ;;  %v2186_v36 = vmax.f32 %v1618_v21, 0.0  ;;  %v4981_v44 = vld [vmem:[#allocation8 + $0x320] ss:$8 sps:$4 sm:$0xff]  }
 0x1d6   : > { %v5964_v43 = vpop.f32.mrf.mxu0  ;;  %v5966_v16 = vpop.f32.mrf.mxu1  ;;  %v2178_v25 = vmax.f32 %v1614_v30, 0.0  ;;  %v4989_v21 = vld [vmem:[#allocation8 + $0x314] ss:$8 sps:$4 sm:$0xff]   ;;  %v1628_v30 = vadd.f32 %v5802_v56, %v5866_v49  ;;  %v1624_v56 = vadd.f32 %v5791_v42, %v5866_v49 }
 0x1d7   : > { %v2193_v13 = vmax.f32 %v1433_v59, 0.0  ;;  %v4987_v59 = vld [vmem:[#allocation8 + $0x310] ss:$8 sps:$4 sm:$0xff]  }
 0x1d8   : > { %v5974_v28 = vpop.f32.mrf.mxu0  ;;  %3685 = vmatpush1.bf16.msra.mxu0 %v4966_v60  ;;  %v5978_v26 = vpop.f32.mrf.mxu1  ;;  %3878 = vmatpush1.bf16.msra.mxu1 %v4969_v22  ;;  %v2411_v60 = vpack.c.bf16 %v2187_v48, %v2179_v10  ;;  %v2184_v22 = vmax.f32 %v1425_v19, 0.0  ;;  %v2201_v48 = vmax.f32 %v1437_v32, 0.0  ;;  %v2203_v10 = vmax.f32 %v1630_v31, 0.0 }
 0x1d9   : > { %3686 = vmatprep.subr.bf16.mxu0 %v4974_v41  ;;  %3879 = vmatprep.subr.bf16.mxu1 %v4977_v1  ;;  %v4978_v41 = vld [vmem:[#allocation8 + $0x220] ss:$8 sps:$4 sm:$0xff]   ;;  %v1447_v31 = vadd.f32 %v5834_v9, %v5828_v3 }
 0x1da   : > { %v5984_v52 = vpop.f32.mrf.mxu0  ;;  %3345 = vmatmul.mubr.bf16.gmra.mxu0 %v2400_v39  ;;  %v5988_v0 = vpop.f32.mrf.mxu1  ;;  %3538 = vmatmul.mubr.bf16.gmra.mxu1 %v2402_v23  ;;  %v2176_v39 = vmax.f32 %v1421_v55, 0.0  ;;  %v1435_v23 = vadd.f32 %v5800_v17, %v5862_v5  ;;  %v4984_v55 = vld [vmem:[#allocation8 + $0x210] ss:$8 sps:$4 sm:$0xff]   ;;  %v2417_v17 = vpack.c.bf16 %v2201_v48, %v2193_v13  ;;  %v1443_v48 = vadd.f32 %v5819_v33, %v5828_v3  ;;  %v4998_v33 = vld [vmem:[#allocation8 + $0x2f4] ss:$8 sps:$4 sm:$0xff]  }
 0x1db   : > { %3354 = vmatprep.mubr.bf16.mxu0 %v2409_v34  ;;  %3547 = vmatprep.mubr.bf16.mxu1 %v2411_v60  ;;  %v2410_v34 = vpack.c.bf16 %v2186_v36, %v2178_v25  ;;  %v4993_v25 = vld [vmem:[#allocation8 + $0x300] ss:$8 sps:$4 sm:$0xff]   ;;  %v2217_v42 = vmax.f32 %v1447_v31, 0.0  ;;  %v7294_v31 = vld [vmem:[#allocation20_spill] sm:$0xff] }
 0x1dc   : > { %v5992_v62 = vpop.f32.mrf.mxu0  ;;  %3687 = vmatpush1.bf16.msra.mxu0 %v4972_v12  ;;  %v5994_v1 = vpop.f32.mrf.mxu1  ;;  %3880 = vmatpush1.bf16.msra.mxu1 %v4975_v57  ;;  %v2408_v32 = vpack.c.bf16 %v2184_v22, %v2176_v39  ;;  %v1431_v57 = vadd.f32 %v5788_v54, %v5862_v5  ;;  %v4992_v22 = vld [vmem:[#allocation8 + $0x204] ss:$8 sps:$4 sm:$0xff]   ;;  %v1640_v54 = vadd.f32 %v5838_v53, %v5832_v47  ;;  %v2200_v9 = vmax.f32 %v1435_v23, 0.0  ;;  %v4990_v39 = vld [vmem:[#allocation8 + $0x200] ss:$8 sps:$4 sm:$0xff]  }
 0x1dd   : > { %3688 = vmatprep.subr.bf16.mxu0 %v4980_v35  ;;  %3881 = vmatprep.subr.bf16.mxu1 %v4983_v27  ;;  %v2195_v35 = vmax.f32 %v1626_v40, 0.0  ;;  %v1636_v53 = vadd.f32 %v5822_v37, %v5832_v47  ;;  %v2194_v37 = vmax.f32 %v1624_v56, 0.0  ;;  %v1457_v56 = vadd.f32 %v5872_v50, %v5828_v3  ;;  %v7297_v50 = vld [vmem:[#allocation23_spill] sm:$0xff] }
 0x1de   : > { %v5996_v19 = vpop.f32.mrf.mxu0  ;;  %v6000_v12 = vpop.f32.mrf.mxu1  ;;  %v2219_v23 = vmax.f32 %v1640_v54, 0.0  ;;  %v4996_v54 = vld [vmem:[#allocation8 + $0x2f0] ss:$8 sps:$4 sm:$0xff]  }
 0x1df   : > { %v2419_v40 = vpack.c.bf16 %v2203_v10, %v2195_v35  ;;  %v2192_v10 = vmax.f32 %v1431_v57, 0.0  ;;  %v1441_v57 = vadd.f32 %v5810_v45, %v5862_v5  ;;  %v4999_v45 = vld [vmem:[#allocation8 + $0x3f0] ss:$8 sps:$4 sm:$0xff]  }
 0x1e0   : > { %v6004_v60 = vpop.f32.mrf.mxu0  ;;  %3689 = vmatpush1.bf16.msra.mxu0 %v4978_v41  ;;  %v6010_v27 = vpop.f32.mrf.mxu1  ;;  %3882 = vmatpush1.bf16.msra.mxu1 %v4981_v44  ;;  %v4995_v41 = vld [vmem:[#allocation8 + $0x304] ss:$8 sps:$4 sm:$0xff]  }
 0x1e1   : > { %3690 = vmatprep.subr.bf16.mxu0 %v4986_v61  ;;  %3883 = vmatprep.subr.bf16.mxu1 %v4989_v21  ;;  %v2202_v21 = vmax.f32 %v1628_v30, 0.0  ;;  %v2416_v35 = vpack.c.bf16 %v2200_v9, %v2192_v10  ;;  %v1445_v30 = vadd.f32 %v5824_v2, %v5862_v5  ;;  %v7295_v2 = vld [vmem:[#allocation19_spill] sm:$0xff] }
 0x1e2   : > { %v6014_v36 = vpop.f32.mrf.mxu0  ;;  %3355 = vmatmul.mubr.bf16.gmra.mxu0 %v2408_v32  ;;  %v6020_v44 = vpop.f32.mrf.mxu1  ;;  %3548 = vmatmul.mubr.bf16.gmra.mxu1 %v2410_v34  ;;  %v5001_v34 = vld [vmem:[#allocation8 + $0x3f4] ss:$8 sps:$4 sm:$0xff]   ;;  %v1634_v10 = vadd.f32 %v7295_v2, %v5866_v49 }
 0x1e3   : > { %7293 = vst [vmem:[#allocation32_spill] sm:$0xff] %v6020_v44  ;;  %3364 = vmatprep.mubr.bf16.mxu0 %v2417_v17  ;;  %3557 = vmatprep.mubr.bf16.mxu1 %v2419_v40  ;;  %v2209_v17 = vmax.f32 %v1443_v48, 0.0  ;;  %v5010_v2 = vld [vmem:[#allocation8 + $0x2d4] ss:$8 sps:$4 sm:$0xff]  }
 0x1e4   : > { %v6024_v61 = vpop.f32.mrf.mxu0  ;;  %3691 = vmatpush1.bf16.msra.mxu0 %v4984_v55  ;;  %v6026_v13 = vpop.f32.mrf.mxu1  ;;  %3884 = vmatpush1.bf16.msra.mxu1 %v4987_v59  ;;  %v2211_v55 = vmax.f32 %v1636_v53, 0.0  ;;  %v1638_v59 = vadd.f32 %v7294_v31, %v5866_v49  ;;  %v5004_v53 = vld [vmem:[#allocation8 + $0x2e4] ss:$8 sps:$4 sm:$0xff]   ;;  %v1650_v31 = vadd.f32 %v5878_v58, %v5832_v47 }
 0x1e5   : > { %3692 = vmatprep.subr.bf16.mxu0 %v4992_v22  ;;  %3885 = vmatprep.subr.bf16.mxu1 %v4995_v41  ;;  %v2418_v41 = vpack.c.bf16 %v2202_v21, %v2194_v37  ;;  %v2425_v48 = vpack.c.bf16 %v2217_v42, %v2209_v17  ;;  %v5007_v21 = vld [vmem:[#allocation8 + $0x3e4] ss:$8 sps:$4 sm:$0xff]   ;;  %v1453_v37 = vadd.f32 %v7297_v50, %v5828_v3  ;;  %v2208_v50 = vmax.f32 %v1441_v57, 0.0  ;;  %v5008_v57 = vld [vmem:[#allocation8 + $0x2d0] ss:$8 sps:$4 sm:$0xff]  }
 0x1e6   : > { %v6028_v32 = vpop.f32.mrf.mxu0  ;;  %v6030_v40 = vpop.f32.mrf.mxu1  ;;  %v1646_v17 = vadd.f32 %v5858_v63, %v5832_v47 }
 0x1e7   : > { %v2225_v63 = vmax.f32 %v1453_v37, 0.0 }
 0x1e8   : > { %v6038_v22 = vpop.f32.mrf.mxu0  ;;  %3693 = vmatpush1.bf16.msra.mxu0 %v4990_v39  ;;  %v6042_v9 = vpop.f32.mrf.mxu1  ;;  %3886 = vmatpush1.bf16.msra.mxu1 %v4993_v25  ;;  %v2427_v39 = vpack.c.bf16 %v2219_v23, %v2211_v55  ;;  %v2216_v25 = vmax.f32 %v1445_v30, 0.0  ;;  %v2233_v23 = vmax.f32 %v1457_v56, 0.0  ;;  %v5005_v55 = vld [vmem:[#allocation8 + $0x3e0] ss:$8 sps:$4 sm:$0xff]  }
 0x1e9   : > { %3694 = vmatprep.subr.bf16.mxu0 %v4998_v33  ;;  %3887 = vmatprep.subr.bf16.mxu1 %v5001_v34  ;;  %v2218_v33 = vmax.f32 %v1638_v59, 0.0  ;;  %v5013_v59 = vld [vmem:[#allocation8 + $0x3d4] ss:$8 sps:$4 sm:$0xff]  }
 0x1ea   : > { %v6048_v44 = vpop.f32.mrf.mxu0  ;;  %3365 = vmatmul.mubr.bf16.gmra.mxu0 %v2416_v35  ;;  %v6052_v42 = vpop.f32.mrf.mxu1  ;;  %3558 = vmatmul.mubr.bf16.gmra.mxu1 %v2418_v41  ;;  %v5002_v35 = vld [vmem:[#allocation8 + $0x2e0] ss:$8 sps:$4 sm:$0xff]   ;;  %v2210_v41 = vmax.f32 %v1634_v10, 0.0  ;;  %v2424_v56 = vpack.c.bf16 %v2216_v25, %v2208_v50  ;;  %v7303_v10 = vld [vmem:[#allocation25_spill] sm:$0xff] }
 0x1eb   : > { %7296 = vst [vmem:[#allocation20_spill] sm:$0xff] %v6048_v44  ;;  %7298 = vst [vmem:[#allocation19_spill] sm:$0xff] %v6052_v42  ;;  %3374 = vmatprep.mubr.bf16.mxu0 %v2425_v48  ;;  %3567 = vmatprep.mubr.bf16.mxu1 %v2427_v39  ;;  %v2235_v48 = vmax.f32 %v1650_v31, 0.0  ;;  %v7301_v39 = vld [vmem:[#allocation24_spill] sm:$0xff]  ;;  %v1648_v31 = vadd.f32 %v7303_v10, %v5866_v49 }
 0x1ec   : > { %v6056_v58 = vpop.f32.mrf.mxu0  ;;  %3695 = vmatpush2.bf16.msra.mxu0 %v4996_v54  ;;  %v6058_v34 = vpop.f32.mrf.mxu1  ;;  %3888 = vmatpush2.bf16.msra.mxu1 %v4999_v45  ;;  %v1455_v42 = vadd.f32 %v7301_v39, %v5862_v5  ;;  %v2426_v44 = vpack.c.bf16 %v2218_v33, %v2210_v41  ;;  %v7302_v45 = vld [vmem:[#allocation21_spill] sm:$0xff]  ;;  %v2433_v39 = vpack.c.bf16 %v2233_v23, %v2225_v63  ;;  %v5016_v33 = vld [vmem:[#allocation8 + $0x2c4] ss:$8 sps:$4 sm:$0xff]  }
 0x1ed   : > { %7299 = vst [vmem:[#allocation23_spill] sm:$0xff] %v6056_v58  ;;  %7300 = vst [vmem:[#allocation33_spill] sm:$0xff] %v6058_v34  ;;  %3696 = vmatprep.subr.bf16.mxu0 %v5004_v53  ;;  %3889 = vmatprep.subr.bf16.mxu1 %v5007_v21  ;;  %v1451_v53 = vadd.f32 %v7302_v45, %v5862_v5  ;;  %v2227_v34 = vmax.f32 %v1646_v17, 0.0  ;;  %v1467_v21 = vadd.f32 %v5908_v4, %v5828_v3  ;;  %v5011_v25 = vld [vmem:[#allocation8 + $0x3d0] ss:$8 sps:$4 sm:$0xff]   ;;  %v7305_v45 = vld [vmem:[#allocation22_spill] sm:$0xff] }
 0x1ee   : > { %v6060_v30 = vpop.f32.mrf.mxu0  ;;  %v6064_v54 = vpop.f32.mrf.mxu1  ;;  %v1660_v17 = vadd.f32 %v5912_v7, %v5832_v47  ;;  %v5019_v41 = vld [vmem:[#allocation8 + $0x3c4] ss:$8 sps:$4 sm:$0xff]   ;;  %v1644_v10 = vadd.f32 %v7305_v45, %v5866_v49  ;;  %v2232_v4 = vmax.f32 %v1455_v42, 0.0  ;;  %v1463_v23 = vadd.f32 %v5896_v46, %v5828_v3  ;;  %v5022_v46 = vld [vmem:[#allocation8 + $0x2b4] ss:$8 sps:$4 sm:$0xff]  }
 0x1ef   : > { %v1656_v7 = vadd.f32 %v5898_v11, %v5832_v47  ;;  %v2234_v63 = vmax.f32 %v1648_v31, 0.0 }
 0x1f0   : > { %v6068_v58 = vpop.f32.mrf.mxu0  ;;  %3697 = vmatpush2.bf16.msra.mxu0 %v5002_v35  ;;  %v6074_v37 = vpop.f32.mrf.mxu1  ;;  %3890 = vmatpush2.bf16.msra.mxu1 %v5005_v55  ;;  %v2435_v35 = vpack.c.bf16 %v2235_v48, %v2227_v34  ;;  %v5014_v34 = vld [vmem:[#allocation8 + $0x2c0] ss:$8 sps:$4 sm:$0xff]   ;;  %v2251_v45 = vmax.f32 %v1660_v17, 0.0  ;;  %v2226_v11 = vmax.f32 %v1644_v10, 0.0  ;;  %v1477_v10 = vadd.f32 %v5940_v8, %v5828_v3 }
 0x1f1   : > { %3698 = vmatprep.subr.bf16.mxu0 %v5010_v2  ;;  %3891 = vmatprep.subr.bf16.mxu1 %v5013_v59  ;;  %v5017_v48 = vld [vmem:[#allocation8 + $0x3c0] ss:$8 sps:$4 sm:$0xff]   ;;  %v2224_v59 = vmax.f32 %v1451_v53, 0.0  ;;  %v2243_v31 = vmax.f32 %v1656_v7, 0.0  ;;  %v5023_v7 = vld [vmem:[#allocation8 + $0x3b0] ss:$8 sps:$4 sm:$0xff]   ;;  %v1473_v8 = vadd.f32 %v5928_v29, %v5828_v3 }
 0x1f2   : > { %v6078_v50 = vpop.f32.mrf.mxu0  ;;  %3375 = vmatmul.mubr.bf16.gmra.mxu0 %v2424_v56  ;;  %v6084_v55 = vpop.f32.mrf.mxu1  ;;  %3568 = vmatmul.mubr.bf16.gmra.mxu1 %v2426_v44  ;;  %v2249_v56 = vmax.f32 %v1467_v21, 0.0  ;;  %v1465_v21 = vadd.f32 %v5900_v6, %v5862_v5  ;;  %v7311_v6 = vld [vmem:[#allocation27_spill] sm:$0xff] }
 0x1f3   : > { %7304 = vst [vmem:[#allocation24_spill] sm:$0xff] %v6078_v50  ;;  %7306 = vst [vmem:[#allocation21_spill] sm:$0xff] %v6084_v55  ;;  %3384 = vmatprep.mubr.bf16.mxu0 %v2433_v39  ;;  %3577 = vmatprep.mubr.bf16.mxu1 %v2435_v35  ;;  %v5025_v39 = vld [vmem:[#allocation8 + $0x3b4] ss:$8 sps:$4 sm:$0xff]   ;;  %v2432_v35 = vpack.c.bf16 %v2232_v4, %v2224_v59  ;;  %v2241_v55 = vmax.f32 %v1463_v23, 0.0 }
 0x1f4   : > { %v6088_v2 = vpop.f32.mrf.mxu0  ;;  %3699 = vmatpush2.bf16.msra.mxu0 %v5008_v57  ;;  %v6090_v42 = vpop.f32.mrf.mxu1  ;;  %3892 = vmatpush2.bf16.msra.mxu1 %v5011_v25  ;;  %v7309_v57 = vld [vmem:[#allocation26_spill] sm:$0xff]  ;;  %v7310_v25 = vld [vmem:[#allocation28_spill] sm:$0xff] }
 0x1f5   : > { %3700 = vmatprep.subr.bf16.mxu0 %v5016_v33  ;;  %3893 = vmatprep.subr.bf16.mxu1 %v5019_v41  ;;  %v1461_v53 = vadd.f32 %v7309_v57, %v5862_v5  ;;  %v1658_v33 = vadd.f32 %v7310_v25, %v5866_v49  ;;  %v5020_v41 = vld [vmem:[#allocation8 + $0x2b0] ss:$8 sps:$4 sm:$0xff]   ;;  %v2441_v23 = vpack.c.bf16 %v2249_v56, %v2241_v55  ;;  %v5028_v59 = vld [vmem:[#allocation8 + $0x2a4] ss:$8 sps:$4 sm:$0xff]   ;;  %v5029_v29 = vld [vmem:[#allocation8 + $0x3a0] ss:$8 sps:$4 sm:$0xff]  }
 0x1f6   : > { %v6092_v44 = vpop.f32.mrf.mxu0  ;;  %v6094_v50 = vpop.f32.mrf.mxu1  ;;  %v1654_v57 = vadd.f32 %v7311_v6, %v5866_v49  ;;  %v1670_v25 = vadd.f32 %v5946_v15, %v5832_v47 }
 0x1f7   : > { %7307 = vst [vmem:[#allocation25_spill] sm:$0xff] %v6092_v44  ;;  %7308 = vst [vmem:[#allocation22_spill] sm:$0xff] %v6094_v50  ;;  %v2434_v44 = vpack.c.bf16 %v2234_v63, %v2226_v11  ;;  %v5031_v63 = vld [vmem:[#allocation8 + $0x3a4] ss:$8 sps:$4 sm:$0xff]   ;;  %v2250_v56 = vmax.f32 %v1658_v33, 0.0  ;;  %v2240_v6 = vmax.f32 %v1461_v53, 0.0  ;;  %v1668_v53 = vadd.f32 %v5936_v14, %v5866_v49 }
 0x1f8   : > { %v6102_v17 = vpop.f32.mrf.mxu0  ;;  %3701 = vmatpush2.bf16.msra.mxu0 %v5014_v34  ;;  %v6106_v4 = vpop.f32.mrf.mxu1  ;;  %3894 = vmatpush2.bf16.msra.mxu1 %v5017_v48  ;;  %v2443_v34 = vpack.c.bf16 %v2251_v45, %v2243_v31  ;;  %v2248_v48 = vmax.f32 %v1465_v21, 0.0  ;;  %v2265_v45 = vmax.f32 %v1477_v10, 0.0  ;;  %v5034_v31 = vld [vmem:[#allocation8 + $0x294] ss:$8 sps:$4 sm:$0xff]   ;;  %v1475_v10 = vadd.f32 %v5932_v18, %v5862_v5 }
 0x1f9   : > { %3702 = vmatprep.subr.bf16.mxu0 %v5022_v46  ;;  %3895 = vmatprep.subr.bf16.mxu1 %v5025_v39  ;;  %v7314_v46 = vld [vmem:[#allocation31_spill] sm:$0xff]  ;;  %v5037_v33 = vld [vmem:[#allocation8 + $0x394] ss:$8 sps:$4 sm:$0xff]  }
 0x1fa   : > { %v6112_v50 = vpop.f32.mrf.mxu0  ;;  %3385 = vmatmul.mubr.bf16.gmra.mxu0 %v2432_v35  ;;  %v6116_v55 = vpop.f32.mrf.mxu1  ;;  %3578 = vmatmul.mubr.bf16.gmra.mxu1 %v2434_v44  ;;  %v1666_v11 = vadd.f32 %v7314_v46, %v5832_v47  ;;  %v5026_v35 = vld [vmem:[#allocation8 + $0x2a0] ss:$8 sps:$4 sm:$0xff]   ;;  %v2242_v44 = vmax.f32 %v1654_v57, 0.0  ;;  %v2257_v46 = vmax.f32 %v1473_v8, 0.0  ;;  %v1487_v57 = vadd.f32 %v5974_v28, %v5828_v3  ;;  %v5035_v8 = vld [vmem:[#allocation8 + $0x390] ss:$8 sps:$4 sm:$0xff]  }
 0x1fb   : > { %7312 = vst [vmem:[#allocation26_spill] sm:$0xff] %v6112_v50  ;;  %7313 = vst [vmem:[#allocation28_spill] sm:$0xff] %v6116_v55  ;;  %3394 = vmatprep.mubr.bf16.mxu0 %v2441_v23  ;;  %3587 = vmatprep.mubr.bf16.mxu1 %v2443_v34  ;;  %v2267_v23 = vmax.f32 %v1670_v25, 0.0  ;;  %v2440_v55 = vpack.c.bf16 %v2248_v48, %v2240_v6  ;;  %v5040_v48 = vld [vmem:[#allocation8 + $0x284] ss:$8 sps:$4 sm:$0xff]  }
 0x1fc   : > { %v6120_v15 = vpop.f32.mrf.mxu0  ;;  %3703 = vmatpush2.bf16.msra.mxu0 %v5020_v41  ;;  %v6122_v39 = vpop.f32.mrf.mxu1  ;;  %3896 = vmatpush2.bf16.msra.mxu1 %v5023_v7  ;;  %v2442_v41 = vpack.c.bf16 %v2250_v56, %v2242_v44  ;;  %v2259_v50 = vmax.f32 %v1666_v11, 0.0  ;;  %v7315_v56 = vld [vmem:[#allocation29_spill] sm:$0xff]  ;;  %v1680_v11 = vadd.f32 %v5978_v26, %v5832_v47  ;;  %v5043_v6 = vld [vmem:[#allocation8 + $0x384] ss:$8 sps:$4 sm:$0xff]   ;;  %v1676_v26 = vadd.f32 %v5962_v24, %v5832_v47 }
 0x1fd   : > { %3704 = vmatprep.subr.bf16.mxu0 %v5028_v59  ;;  %3897 = vmatprep.subr.bf16.mxu1 %v5031_v63  ;;  %v5032_v59 = vld [vmem:[#allocation8 + $0x290] ss:$8 sps:$4 sm:$0xff]   ;;  %v2449_v63 = vpack.c.bf16 %v2265_v45, %v2257_v46  ;;  %v1471_v18 = vadd.f32 %v7315_v56, %v5862_v5  ;;  %v7316_v28 = vld [vmem:[#allocation30_spill] sm:$0xff]  ;;  %v1483_v45 = vadd.f32 %v5960_v38, %v5828_v3 }
 0x1fe   : > { %v6124_v21 = vpop.f32.mrf.mxu0  ;;  %v6126_v34 = vpop.f32.mrf.mxu1  ;;  %v2451_v14 = vpack.c.bf16 %v2267_v23, %v2259_v50  ;;  %v1664_v44 = vadd.f32 %v7316_v28, %v5866_v49  ;;  %v5038_v50 = vld [vmem:[#allocation8 + $0x280] ss:$8 sps:$4 sm:$0xff]   ;;  %v2281_v23 = vmax.f32 %v1487_v57, 0.0  ;;  %v2283_v28 = vmax.f32 %v1680_v11, 0.0 }
 0x1ff   : > { %v5041_v38 = vld [vmem:[#allocation8 + $0x380] ss:$8 sps:$4 sm:$0xff]   ;;  %v2256_v56 = vmax.f32 %v1471_v18, 0.0 }
 0x200   : > { %v6130_v7 = vpop.f32.mrf.mxu0  ;;  %3705 = vmatpush2.bf16.msra.mxu0 %v5026_v35  ;;  %v6136_v25 = vpop.f32.mrf.mxu1  ;;  %3898 = vmatpush2.bf16.msra.mxu1 %v5029_v29 }
 0x201   : > { %3706 = vmatprep.subr.bf16.mxu0 %v5034_v31  ;;  %3899 = vmatprep.subr.bf16.mxu1 %v5037_v33  ;;  %v2264_v31 = vmax.f32 %v1475_v10, 0.0  ;;  %v2258_v10 = vmax.f32 %v1664_v44, 0.0 }
 0x202   : > { %v6142_v35 = vpop.f32.mrf.mxu0  ;;  %3395 = vmatmul.mubr.bf16.gmra.mxu0 %v2440_v55  ;;  %v6148_v29 = vpop.f32.mrf.mxu1  ;;  %3588 = vmatmul.mubr.bf16.gmra.mxu1 %v2442_v41  ;;  %v2266_v55 = vmax.f32 %v1668_v53, 0.0 }
 0x203   : > { %7317 = vst [vmem:[#allocation27_spill] sm:$0xff] %v6148_v29  ;;  %3404 = vmatprep.mubr.bf16.mxu0 %v2449_v63  ;;  %3597 = vmatprep.mubr.bf16.mxu1 %v2451_v14  ;;  %v2273_v63 = vmax.f32 %v1483_v45, 0.0  ;;  %v2448_v14 = vpack.c.bf16 %v2264_v31, %v2256_v56  ;;  %v2275_v29 = vmax.f32 %v1676_v26, 0.0 }
 0x204   : > { %v6152_v46 = vpop.f32.mrf.mxu0  ;;  %3707 = vmatpush2.bf16.msra.mxu0 %v5032_v59  ;;  %v6154_v33 = vpop.f32.mrf.mxu1  ;;  %3900 = vmatpush2.bf16.msra.mxu1 %v5035_v8  ;;  %v1485_v59 = vadd.f32 %v5964_v43, %v5862_v5  ;;  %v2450_v57 = vpack.c.bf16 %v2266_v55, %v2258_v10  ;;  %v1678_v8 = vadd.f32 %v5966_v16, %v5866_v49 }
 0x205   : > { %3708 = vmatprep.subr.bf16.mxu0 %v5040_v48  ;;  %3901 = vmatprep.subr.bf16.mxu1 %v5043_v6  ;;  %v1497_v48 = vadd.f32 %v6004_v60, %v5828_v3  ;;  %v2457_v11 = vpack.c.bf16 %v2281_v23, %v2273_v63  ;;  %v1481_v6 = vadd.f32 %v5950_v20, %v5862_v5 }
 0x206   : > { %v6156_v41 = vpop.f32.mrf.mxu0  ;;  %v6158_v24 = vpop.f32.mrf.mxu1  ;;  %v1690_v43 = vadd.f32 %v6010_v27, %v5832_v47  ;;  %v2459_v45 = vpack.c.bf16 %v2283_v28, %v2275_v29  ;;  %v1674_v16 = vadd.f32 %v5956_v51, %v5866_v49  ;;  %v1493_v60 = vadd.f32 %v5992_v62, %v5828_v3 }
 0x207   : > { %v2280_v26 = vmax.f32 %v1485_v59, 0.0  ;;  %v1686_v20 = vadd.f32 %v5994_v1, %v5832_v47  ;;  %v2297_v55 = vmax.f32 %v1497_v48, 0.0  ;;  %v2272_v23 = vmax.f32 %v1481_v6, 0.0 }
 0x208   : > { %v6162_v53 = vpop.f32.mrf.mxu0  ;;  %3709 = vmatpush2.bf16.msra.mxu0 %v5038_v50  ;;  %v6168_v18 = vpop.f32.mrf.mxu1  ;;  %3902 = vmatpush2.bf16.msra.mxu1 %v5041_v38  ;;  %v2282_v50 = vmax.f32 %v1678_v8, 0.0  ;;  %v2299_v51 = vmax.f32 %v1690_v43, 0.0  ;;  %v2274_v62 = vmax.f32 %v1674_v16, 0.0  ;;  %v2289_v56 = vmax.f32 %v1493_v60, 0.0 }
 0x209   : > { %v2456_v10 = vpack.c.bf16 %v2280_v26, %v2272_v23  ;;  %v2291_v63 = vmax.f32 %v1686_v20, 0.0  ;;  %v1495_v1 = vadd.f32 %v5996_v19, %v5862_v5  ;;  %v1507_v8 = vadd.f32 %v6038_v22, %v5828_v3 }
 0x20a   : > { %v6174_v44 = vpop.f32.mrf.mxu0  ;;  %3405 = vmatmul.mubr.bf16.gmra.mxu0 %v2448_v14  ;;  %v6180_v31 = vpop.f32.mrf.mxu1  ;;  %3598 = vmatmul.mubr.bf16.gmra.mxu1 %v2450_v57  ;;  %v2458_v59 = vpack.c.bf16 %v2282_v50, %v2274_v62  ;;  %v1688_v57 = vadd.f32 %v6000_v12, %v5866_v49  ;;  %v1491_v6 = vadd.f32 %v5984_v52, %v5862_v5 }
 0x20b   : > { %3414 = vmatprep.mubr.bf16.mxu0 %v2457_v11  ;;  %3607 = vmatprep.mubr.bf16.mxu1 %v2459_v45  ;;  %v2465_v11 = vpack.c.bf16 %v2297_v55, %v2289_v56  ;;  %v1700_v43 = vadd.f32 %v6042_v9, %v5832_v47  ;;  %v2467_v19 = vpack.c.bf16 %v2299_v51, %v2291_v63  ;;  %v2296_v60 = vmax.f32 %v1495_v1, 0.0 }
 0x20c   : > { %v6184_v27 = vpop.f32.mrf.mxu0  ;;  %v6186_v29 = vpop.f32.mrf.mxu1  ;;  %v1684_v16 = vadd.f32 %v5988_v0, %v5866_v49  ;;  %v1503_v12 = vadd.f32 %v6024_v61, %v5828_v3  ;;  %v1696_v52 = vadd.f32 %v6026_v13, %v5832_v47  ;;  %v2298_v26 = vmax.f32 %v1688_v57, 0.0 }
 0x20d   : > { %v2313_v20 = vmax.f32 %v1507_v8, 0.0  ;;  %v2288_v55 = vmax.f32 %v1491_v6, 0.0  ;;  %v2315_v0 = vmax.f32 %v1700_v43, 0.0  ;;  %v1505_v13 = vadd.f32 %v6028_v32, %v5862_v5 }
 0x20e   : > { %v6188_v38 = vpop.f32.mrf.mxu0  ;;  %v6190_v28 = vpop.f32.mrf.mxu1  ;;  %v2290_v61 = vmax.f32 %v1684_v16, 0.0  ;;  %v2305_v51 = vmax.f32 %v1503_v12, 0.0  ;;  %v1517_v57 = vadd.f32 %v6068_v58, %v5828_v3  ;;  %v1501_v6 = vadd.f32 %v6014_v36, %v5862_v5  ;;  %v7318_v16 = vld [vmem:[#allocation32_spill] sm:$0xff]  ;;  %v7320_v36 = vld [vmem:[#allocation33_spill] sm:$0xff] }
 0x20f   : > { %v2464_v56 = vpack.c.bf16 %v2296_v60, %v2288_v55  ;;  %v1710_v43 = vadd.f32 %v6074_v37, %v5832_v47  ;;  %v1694_v12 = vadd.f32 %v7318_v16, %v5866_v49 }
 0x210   : > { %v6194_v14 = vpop.f32.mrf.mxu0  ;;  %v6200_v48 = vpop.f32.mrf.mxu1  ;;  %v2466_v1 = vpack.c.bf16 %v2298_v26, %v2290_v61  ;;  %v1706_v26 = vadd.f32 %v7320_v36, %v5832_v47  ;;  %v2329_v55 = vmax.f32 %v1517_v57, 0.0  ;;  %v2304_v61 = vmax.f32 %v1501_v6, 0.0 }
 0x211   : > { %v1527_v57 = vadd.f32 %v6102_v17, %v5828_v3 }
 0x212   : > { %v6206_v45 = vpop.f32.mrf.mxu0  ;;  %3415 = vmatmul.mubr.bf16.gmra.mxu0 %v2456_v10  ;;  %v6212_v22 = vpop.f32.mrf.mxu1  ;;  %3608 = vmatmul.mubr.bf16.gmra.mxu1 %v2458_v59  ;;  %v2307_v10 = vmax.f32 %v1696_v52, 0.0  ;;  %v1698_v59 = vadd.f32 %v6030_v40, %v5866_v49  ;;  %v7319_v40 = vld [vmem:[#allocation23_spill] sm:$0xff]  ;;  %v2312_v52 = vmax.f32 %v1505_v13, 0.0  ;;  %v2323_v13 = vmax.f32 %v1706_v26, 0.0 }
 0x213   : > { %3424 = vmatprep.mubr.bf16.mxu0 %v2465_v11  ;;  %3617 = vmatprep.mubr.bf16.mxu1 %v2467_v19  ;;  %v2473_v11 = vpack.c.bf16 %v2313_v20, %v2305_v51  ;;  %v1513_v60 = vadd.f32 %v7319_v40, %v5828_v3  ;;  %v2331_v51 = vmax.f32 %v1710_v43, 0.0 }
 0x214   : > { %v6216_v9 = vpop.f32.mrf.mxu0  ;;  %v6218_v50 = vpop.f32.mrf.mxu1  ;;  %v2475_v32 = vpack.c.bf16 %v2315_v0, %v2307_v10  ;;  %v2314_v20 = vmax.f32 %v1698_v59, 0.0  ;;  %v2306_v10 = vmax.f32 %v1694_v12, 0.0  ;;  %v1708_v59 = vadd.f32 %v6064_v54, %v5866_v49  ;;  %v7321_v12 = vld [vmem:[#allocation20_spill] sm:$0xff] }
 0x215   : > { %v2321_v16 = vmax.f32 %v1513_v60, 0.0  ;;  %v1511_v60 = vadd.f32 %v7321_v12, %v5862_v5  ;;  %v1523_v54 = vadd.f32 %v6088_v2, %v5828_v3 }
 0x216   : > { %v6220_v23 = vpop.f32.mrf.mxu0  ;;  %v6222_v62 = vpop.f32.mrf.mxu1  ;;  %v2474_v36 = vpack.c.bf16 %v2314_v20, %v2306_v10  ;;  %v7323_v20 = vld [vmem:[#allocation19_spill] sm:$0xff]  ;;  %v1716_v10 = vadd.f32 %v6090_v42, %v5832_v47 }
 0x217   : > { %v2481_v43 = vpack.c.bf16 %v2329_v55, %v2321_v16  ;;  %v2330_v16 = vmax.f32 %v1708_v59, 0.0  ;;  %v7328_v59 = vld [vmem:[#allocation22_spill] sm:$0xff] }
 0x218   : > { %v6226_v63 = vpop.f32.mrf.mxu0  ;;  %v6232_v8 = vpop.f32.mrf.mxu1 }
 0x21a   : > { %v6238_v19 = vpop.f32.mrf.mxu0  ;;  %3425 = vmatmul.mubr.bf16.gmra.mxu0 %v2464_v56  ;;  %v6244_v58 = vpop.f32.mrf.mxu1  ;;  %3618 = vmatmul.mubr.bf16.gmra.mxu1 %v2466_v1  ;;  %v2472_v1 = vpack.c.bf16 %v2312_v52, %v2304_v61  ;;  %v1720_v52 = vadd.f32 %v6106_v4, %v5832_v47  ;;  %v1704_v61 = vadd.f32 %v7323_v20, %v5866_v49 }
 0x21b   : > { %3434 = vmatprep.mubr.bf16.mxu0 %v2473_v11  ;;  %3627 = vmatprep.mubr.bf16.mxu1 %v2475_v32  ;;  %v1515_v11 = vadd.f32 %v6060_v30, %v5862_v5  ;;  %v2483_v30 = vpack.c.bf16 %v2331_v51, %v2323_v13  ;;  %v2320_v13 = vmax.f32 %v1511_v60, 0.0  ;;  %v1537_v60 = vadd.f32 %v6130_v7, %v5828_v3 }
 0x21c   : > { %v6248_v37 = vpop.f32.mrf.mxu0  ;;  %v6250_v0 = vpop.f32.mrf.mxu1  ;;  %v2347_v12 = vmax.f32 %v1720_v52, 0.0  ;;  %v2322_v2 = vmax.f32 %v1704_v61, 0.0 }
 0x21d   : > { %v2328_v55 = vmax.f32 %v1515_v11, 0.0  ;;  %v2339_v11 = vmax.f32 %v1716_v10, 0.0 }
 0x21e   : > { %v6252_v56 = vpop.f32.mrf.mxu0  ;;  %v6254_v40 = vpop.f32.mrf.mxu1 }
 0x220   : > { %v6258_v32 = vpop.f32.mrf.mxu0  ;;  %v6264_v6 = vpop.f32.mrf.mxu1 }
 0x222   : > { %v6270_v26 = vpop.f32.mrf.mxu0  ;;  %3435 = vmatmul.mubr.bf16.gmra.mxu0 %v2472_v1  ;;  %v6276_v17 = vpop.f32.mrf.mxu1  ;;  %3628 = vmatmul.mubr.bf16.gmra.mxu1 %v2474_v36  ;;  %v2345_v1 = vmax.f32 %v1527_v57, 0.0  ;;  %v2480_v36 = vpack.c.bf16 %v2328_v55, %v2320_v13  ;;  %v1718_v57 = vadd.f32 %v7328_v59, %v5866_v49  ;;  %v1730_v55 = vadd.f32 %v6136_v25, %v5832_v47 }
 0x223   : > { %7322 = vst [vmem:[#allocation31_spill] sm:$0xff] %v6270_v26  ;;  %7324 = vst [vmem:[#allocation29_spill] sm:$0xff] %v6276_v17  ;;  %3444 = vmatprep.mubr.bf16.mxu0 %v2481_v43  ;;  %3637 = vmatprep.mubr.bf16.mxu1 %v2483_v30  ;;  %v2337_v26 = vmax.f32 %v1523_v54, 0.0  ;;  %v7327_v43 = vld [vmem:[#allocation25_spill] sm:$0xff]  ;;  %v7329_v54 = vld [vmem:[#allocation24_spill] sm:$0xff]  ;;  %v2491_v13 = vpack.c.bf16 %v2347_v12, %v2339_v11 }
 0x224   : > { %v6280_v4 = vpop.f32.mrf.mxu0  ;;  %v6282_v51 = vpop.f32.mrf.mxu1  ;;  %v1525_v42 = vadd.f32 %v7327_v43, %v5862_v5  ;;  %v1533_v43 = vadd.f32 %v6120_v15, %v5828_v3  ;;  %v2346_v59 = vmax.f32 %v1718_v57, 0.0  ;;  %v1728_v57 = vadd.f32 %v6126_v34, %v5866_v49 }
 0x225   : > { %7325 = vst [vmem:[#allocation30_spill] sm:$0xff] %v6280_v4  ;;  %v2482_v4 = vpack.c.bf16 %v2330_v16, %v2322_v2  ;;  %v2489_v61 = vpack.c.bf16 %v2345_v1, %v2337_v26  ;;  %v7331_v16 = vld [vmem:[#allocation21_spill] sm:$0xff]  ;;  %v1726_v1 = vadd.f32 %v6122_v39, %v5832_v47  ;;  %v1535_v39 = vadd.f32 %v6124_v21, %v5862_v5 }
 0x226   : > { %v6284_v20 = vpop.f32.mrf.mxu0  ;;  %v6286_v17 = vpop.f32.mrf.mxu1  ;;  %v1714_v2 = vadd.f32 %v7331_v16, %v5866_v49  ;;  %v2344_v26 = vmax.f32 %v1525_v42, 0.0  ;;  %v1543_v34 = vadd.f32 %v6152_v46, %v5828_v3 }
 0x227   : > { %7326 = vst [vmem:[#allocation32_spill] sm:$0xff] %v6286_v17  ;;  %v1521_v17 = vadd.f32 %v7329_v54, %v5862_v5  ;;  %v2363_v54 = vmax.f32 %v1730_v55, 0.0  ;;  %v2355_v42 = vmax.f32 %v1726_v1, 0.0 }
 0x228   : > { %v6290_v30 = vpop.f32.mrf.mxu0  ;;  %v6296_v52 = vpop.f32.mrf.mxu1  ;;  %v2338_v15 = vmax.f32 %v1714_v2, 0.0  ;;  %v7334_v2 = vld [vmem:[#allocation26_spill] sm:$0xff] }
 0x229   : > { %v2336_v11 = vmax.f32 %v1521_v17, 0.0  ;;  %v1547_v17 = vadd.f32 %v6162_v53, %v5828_v3  ;;  %v2499_v21 = vpack.c.bf16 %v2363_v54, %v2355_v42  ;;  %v7337_v53 = vld [vmem:[#allocation18_spill] sm:$0xff] }
 0x22a   : > { %v6302_v10 = vpop.f32.mrf.mxu0  ;;  %3445 = vmatmul.mubr.bf16.gmra.mxu0 %v2480_v36  ;;  %v6308_v7 = vpop.f32.mrf.mxu1  ;;  %3638 = vmatmul.mubr.bf16.gmra.mxu1 %v2482_v4  ;;  %v2361_v36 = vmax.f32 %v1537_v60, 0.0 }
 0x22b   : > { %7330 = vst [vmem:[#allocation23_spill] sm:$0xff] %v6302_v10  ;;  %7332 = vst [vmem:[#allocation33_spill] sm:$0xff] %v6308_v7  ;;  %3454 = vmatprep.mubr.bf16.mxu0 %v2489_v61  ;;  %3647 = vmatprep.mubr.bf16.mxu1 %v2491_v13  ;;  %v2353_v10 = vmax.f32 %v1533_v43, 0.0  ;;  %v2488_v4 = vpack.c.bf16 %v2344_v26, %v2336_v11  ;;  %v2490_v13 = vpack.c.bf16 %v2346_v59, %v2338_v15  ;;  %v7336_v59 = vld [vmem:[#allocation28_spill] sm:$0xff] }
 0x22c   : > { %v6312_v25 = vpop.f32.mrf.mxu0  ;;  %v6314_v12 = vpop.f32.mrf.mxu1  ;;  %v1531_v43 = vadd.f32 %v7334_v2, %v5862_v5  ;;  %v1740_v26 = vadd.f32 %v6168_v18, %v5832_v47  ;;  %v1724_v11 = vadd.f32 %v7336_v59, %v5866_v49  ;;  %v538_v15 = vsub.s32 5, %v7337_v53 }
 0x22d   : > { %v2497_v55 = vpack.c.bf16 %v2361_v36, %v2353_v10  ;;  %v2360_v10 = vmax.f32 %v1535_v39, 0.0  ;;  %v1736_v18 = vadd.f32 %v6154_v33, %v5832_v47  ;;  %v546_v36 = vsub.s32 7, %v7337_v53 }
 0x22e   : > { %v6316_v16 = vpop.f32.mrf.mxu0  ;;  %v6318_v7 = vpop.f32.mrf.mxu1  ;;  %v2377_v42 = vmax.f32 %v1547_v17, 0.0  ;;  %v2352_v3 = vmax.f32 %v1531_v43, 0.0  ;;  %v2379_v46 = vmax.f32 %v1740_v26, 0.0  ;;  %v1738_v26 = vadd.f32 %v6158_v24, %v5866_v49  ;;  %v7339_v24 = vld [vmem:[#allocation27_spill] sm:$0xff] }
 0x22f   : > { %7333 = vst [vmem:[#allocation20_spill] sm:$0xff] %v6318_v7  ;;  %v2371_v33 = vmax.f32 %v1736_v18, 0.0  ;;  %v534_v18 = vsub.s32 4, %v7337_v53 }
 0x230   : > { %v6322_v61 = vpop.f32.mrf.mxu0  ;;  %v6328_v60 = vpop.f32.mrf.mxu1  ;;  %v2496_v47 = vpack.c.bf16 %v2360_v10, %v2352_v3  ;;  %v1541_v10 = vadd.f32 %v6142_v35, %v5862_v5 }
 0x232   : > { %v6334_v1 = vpop.f32.mrf.mxu0  ;;  %3455 = vmatmul.mubr.bf16.gmra.mxu0 %v2488_v4  ;;  %v6341_v7 = vpop.f32.mrf.mxu1  ;;  %3648 = vmatmul.mubr.bf16.gmra.mxu1 %v2490_v13  ;;  %v2362_v4 = vmax.f32 %v1728_v57, 0.0  ;;  %v2369_v13 = vmax.f32 %v1543_v34, 0.0 }
 0x233   : > { %7335 = vst [vmem:[#allocation19_spill] sm:$0xff] %v6334_v1  ;;  %7338 = vst [vmem:[#allocation25_spill] sm:$0xff] %v6341_v7  ;;  %3464 = vmatprep.mubr.bf16.mxu0 %v2497_v55  ;;  %3657 = vmatprep.mubr.bf16.mxu1 %v2499_v21  ;;  %v2354_v7 = vmax.f32 %v1724_v11, 0.0  ;;  %v5045_v55 = vld [vmem:[#allocation7] sm:$0xff]  ;;  %v1545_v21 = vadd.f32 %v6156_v41, %v5862_v5 }
 0x234   : > { %v6346_v54 = vpop.f32.mrf.mxu0  ;;  %v6348_v2 = vpop.f32.mrf.mxu1  ;;  %v6352_v39 = vrot.slane %v5045_v55, %v538_v15  ;;  %v6358_v57 = vrot.slane %v5045_v55, %v546_v36  ;;  %v2505_v15 = vpack.c.bf16 %v2377_v42, %v2369_v13 }
 0x235   : > { %v2498_v43 = vpack.c.bf16 %v2362_v4, %v2354_v7  ;;  %v2507_v7 = vpack.c.bf16 %v2379_v46, %v2371_v33  ;;  %v1734_v4 = vadd.f32 %v7339_v24, %v5866_v49  ;;  %v2376_v5 = vmax.f32 %v1545_v21, 0.0 }
 0x236   : > { %v6350_v59 = vpop.f32.mrf.mxu0  ;;  %v6354_v1 = vpop.f32.mrf.mxu1  ;;  %v1783_v11 = vadd.f32 %v6194_v14, %v6352_v39  ;;  %v1976_v41 = vadd.f32 %v6200_v48, %v6358_v57  ;;  %v542_v14 = vsub.s32 6, %v7337_v53  ;;  %v1779_v42 = vadd.f32 %v6184_v27, %v6352_v39 }
 0x237   : > { %v1972_v35 = vadd.f32 %v6186_v29, %v6358_v57  ;;  %v2378_v46 = vmax.f32 %v1738_v26, 0.0  ;;  %v2368_v49 = vmax.f32 %v1541_v10, 0.0  ;;  %v6388_v33 = vrot.slane %v5045_v55, %v534_v18 }
 0x238   : > { %v6360_v17 = vpop.f32.mrf.mxu0  ;;  %v6366_v34 = vpop.f32.mrf.mxu1  ;;  %v2141_v13 = vmax.f32 %v1783_v11, 0.0  ;;  %v2143_v24 = vmax.f32 %v1976_v41, 0.0  ;;  %v2370_v53 = vmax.f32 %v1734_v4, 0.0  ;;  %v2133_v21 = vmax.f32 %v1779_v42, 0.0 }
 0x239   : > { %v2504_v29 = vpack.c.bf16 %v2376_v5, %v2368_v49  ;;  %v1781_v26 = vadd.f32 %v6188_v38, %v6388_v33  ;;  %v1793_v18 = vadd.f32 %v6226_v63, %v6352_v39  ;;  %v1777_v4 = vadd.f32 %v6174_v44, %v6388_v33 }
 0x23a   : > { %v6373_v36 = vpop.f32.mrf.mxu0  ;;  %3465 = vmatmul.mubr.bf16.gmra.mxu0 %v2496_v47  ;;  %v6380_v3 = vpop.f32.mrf.mxu1  ;;  %3658 = vmatmul.mubr.bf16.gmra.mxu1 %v2498_v43  ;;  %v6392_v43 = vrot.slane %v5045_v55, %v542_v14  ;;  %v2389_v55 = vpack.c.bf16 %v2141_v13, %v2133_v21  ;;  %v1986_v14 = vadd.f32 %v6232_v8, %v6358_v57 }
 0x23b   : > { %7340 = vst [vmem:[#allocation22_spill] sm:$0xff] %v6380_v3  ;;  %3474 = vmatprep.mubr.bf16.mxu0 %v2505_v15  ;;  %3667 = vmatprep.mubr.bf16.mxu1 %v2507_v7  ;;  %v2135_v7 = vmax.f32 %v1972_v35, 0.0  ;;  %v2506_v3 = vpack.c.bf16 %v2378_v46, %v2370_v53  ;;  %v2140_v5 = vmax.f32 %v1781_v26, 0.0  ;;  %v1982_v44 = vadd.f32 %v6218_v50, %v6358_v57 }
 0x23c   : > { %v6384_v48 = vpop.f32.mrf.mxu0  ;;  %v6386_v47 = vpop.f32.mrf.mxu1  ;;  %v1974_v10 = vadd.f32 %v6190_v28, %v6392_v43  ;;  %v1970_v53 = vadd.f32 %v6180_v31, %v6392_v43  ;;  %v1789_v28 = vadd.f32 %v6216_v9, %v6352_v39  ;;  %v2157_v46 = vmax.f32 %v1793_v18, 0.0 }
 0x23d   : > { %v2391_v38 = vpack.c.bf16 %v2143_v24, %v2135_v7  ;;  %v2132_v49 = vmax.f32 %v1777_v4, 0.0  ;;  %v2159_v31 = vmax.f32 %v1986_v14, 0.0  ;;  %v2151_v7 = vmax.f32 %v1982_v44, 0.0 }
 0x23e   : > { %v6390_v27 = vpop.f32.mrf.mxu0  ;;  %v6394_v15 = vpop.f32.mrf.mxu1  ;;  %v2142_v35 = vmax.f32 %v1974_v10, 0.0  ;;  %v2134_v9 = vmax.f32 %v1970_v53, 0.0  ;;  %v2149_v21 = vmax.f32 %v1789_v28, 0.0  ;;  %v1791_v50 = vadd.f32 %v6220_v23, %v6388_v33 }
 0x23f   : > { %v1984_v10 = vadd.f32 %v6222_v62, %v6392_v43  ;;  %v1803_v18 = vadd.f32 %v6258_v32, %v6352_v39  ;;  %v1996_v53 = vadd.f32 %v6264_v6, %v6358_v57  ;;  %v2399_v23 = vpack.c.bf16 %v2159_v31, %v2151_v7 }
 0x240   : > { %v6398_v11 = vpop.f32.mrf.mxu0  ;;  %v6404_v41 = vpop.f32.mrf.mxu1  ;;  %v2397_v14 = vpack.c.bf16 %v2157_v46, %v2149_v21  ;;  %v1799_v62 = vadd.f32 %v6248_v37, %v6352_v39  ;;  %v2156_v44 = vmax.f32 %v1791_v50, 0.0 }
 0x241   : > { %v2173_v46 = vmax.f32 %v1803_v18, 0.0  ;;  %v1813_v18 = vadd.f32 %v6290_v30, %v6352_v39 }
 0x242   : > { %v6410_v42 = vpop.f32.mrf.mxu0  ;;  %3475 = vmatmul.mubr.bf16.gmra.mxu0 %v2504_v29  ;;  %v6416_v63 = vpop.f32.mrf.mxu1  ;;  %3668 = vmatmul.mubr.bf16.gmra.mxu1 %v2506_v3  ;;  %v2388_v3 = vpack.c.bf16 %v2140_v5, %v2132_v49  ;;  %v1980_v5 = vadd.f32 %v6212_v22, %v6392_v43  ;;  %v2175_v22 = vmax.f32 %v1996_v53, 0.0  ;;  %v2165_v21 = vmax.f32 %v1799_v62, 0.0 }
 0x243   : > { %3710 = vmatprep.mubr.bf16.mxu0 %v2389_v55  ;;  %3903 = vmatprep.mubr.bf16.mxu1 %v2391_v38  ;;  %v2390_v55 = vpack.c.bf16 %v2142_v35, %v2134_v9  ;;  %v1787_v38 = vadd.f32 %v6206_v45, %v6388_v33  ;;  %v1992_v45 = vadd.f32 %v6250_v0, %v6358_v57  ;;  %v2158_v35 = vmax.f32 %v1984_v10, 0.0 }
 0x244   : > { %v6420_v8 = vpop.f32.mrf.mxu0  ;;  %v6422_v13 = vpop.f32.mrf.mxu1  ;;  %v2150_v37 = vmax.f32 %v1980_v5, 0.0  ;;  %v1801_v0 = vadd.f32 %v6252_v56, %v6388_v33  ;;  %v1994_v10 = vadd.f32 %v6254_v40, %v6392_v43  ;;  %v2405_v53 = vpack.c.bf16 %v2173_v46, %v2165_v21  ;;  %v7341_v40 = vld [vmem:[#allocation30_spill] sm:$0xff] }
 0x245   : > { %v2148_v31 = vmax.f32 %v1787_v38, 0.0  ;;  %v2167_v50 = vmax.f32 %v1992_v45, 0.0  ;;  %v2006_v5 = vadd.f32 %v6296_v52, %v6358_v57  ;;  %v1809_v45 = vadd.f32 %v7341_v40, %v6352_v39 }
 0x246   : > { %v6424_v24 = vpop.f32.mrf.mxu0  ;;  %v6426_v29 = vpop.f32.mrf.mxu1  ;;  %v2174_v46 = vmax.f32 %v1994_v10, 0.0  ;;  %v7343_v10 = vld [vmem:[#allocation32_spill] sm:$0xff] }
 0x247   : > { %v2396_v7 = vpack.c.bf16 %v2156_v44, %v2148_v31  ;;  %v2407_v56 = vpack.c.bf16 %v2175_v22, %v2167_v50  ;;  %v1990_v44 = vadd.f32 %v6244_v58, %v6392_v43  ;;  %v2189_v31 = vmax.f32 %v1813_v18, 0.0 }
 0x248   : > { %v6430_v26 = vpop.f32.mrf.mxu0  ;;  %v6436_v4 = vpop.f32.mrf.mxu1  ;;  %v2191_v58 = vmax.f32 %v2006_v5, 0.0  ;;  %v2181_v50 = vmax.f32 %v1809_v45, 0.0  ;;  %v2004_v18 = vadd.f32 %v7343_v10, %v6392_v43  ;;  %v7344_v45 = vld [vmem:[#allocation31_spill] sm:$0xff] }
 0x24a   : > { %v6442_v28 = vpop.f32.mrf.mxu0  ;;  %3711 = vmatmul.mubr.bf16.vlgmr.msra.gmra.mxu0 %v2388_v3  ;;  %v6448_v32 = vpop.f32.mrf.mxu1  ;;  %3904 = vmatmul.mubr.bf16.vlgmr.msra.gmra.mxu1 %v2390_v55  ;;  %v2190_v10 = vmax.f32 %v2004_v18, 0.0  ;;  %v7349_v18 = vld [vmem:[#allocation20_spill] sm:$0xff] }
 0x24b   : > { %3720 = vmatprep.mubr.bf16.mxu0 %v2397_v14  ;;  %3913 = vmatprep.mubr.bf16.mxu1 %v2399_v23  ;;  %v2398_v14 = vpack.c.bf16 %v2158_v35, %v2150_v37  ;;  %v1797_v23 = vadd.f32 %v6238_v19, %v6388_v33  ;;  %v2172_v35 = vmax.f32 %v1801_v0, 0.0  ;;  %v2002_v19 = vadd.f32 %v6282_v51, %v6358_v57 }
 0x24c   : > { %v6452_v6 = vpop.f32.mrf.mxu0  ;;  %v6454_v49 = vpop.f32.mrf.mxu1  ;;  %v1811_v51 = vadd.f32 %v6284_v20, %v6388_v33 }
 0x24d   : > { %v2164_v37 = vmax.f32 %v1797_v23, 0.0  ;;  %v2183_v0 = vmax.f32 %v2002_v19, 0.0  ;;  %v1823_v23 = vadd.f32 %v6322_v61, %v6352_v39 }
 0x24e   : > { %v6456_v9 = vpop.f32.mrf.mxu0  ;;  %v6458_v3 = vpop.f32.mrf.mxu1 }
 0x24f   : > { %v2415_v20 = vpack.c.bf16 %v2191_v58, %v2183_v0 }
 0x250   : > { %v6462_v55 = vpop.f32.mrf.mxu0  ;;  %v6468_v38 = vpop.f32.mrf.mxu1 }
 0x252   : > { %v6474_v62 = vpop.f32.mrf.mxu0  ;;  %3721 = vmatmul.mubr.bf16.gmra.mxu0 %v2396_v7  ;;  %v6480_v30 = vpop.f32.mrf.mxu1  ;;  %3914 = vmatmul.mubr.bf16.gmra.mxu1 %v2398_v14  ;;  %v2166_v7 = vmax.f32 %v1990_v44, 0.0  ;;  %v2404_v14 = vpack.c.bf16 %v2172_v35, %v2164_v37  ;;  %v2413_v44 = vpack.c.bf16 %v2189_v31, %v2181_v50  ;;  %v2016_v35 = vadd.f32 %v6328_v60, %v6358_v57 }
 0x253   : > { %7342 = vst [vmem:[#allocation24_spill] sm:$0xff] %v6480_v30  ;;  %3730 = vmatprep.mubr.bf16.mxu0 %v2405_v53  ;;  %3923 = vmatprep.mubr.bf16.mxu1 %v2407_v56  ;;  %v1807_v30 = vadd.f32 %v7344_v45, %v6388_v33  ;;  %v2188_v31 = vmax.f32 %v1811_v51, 0.0  ;;  %v2012_v50 = vadd.f32 %v6314_v12, %v6358_v57 }
 0x254   : > { %v6484_v52 = vpop.f32.mrf.mxu0  ;;  %v6486_v22 = vpop.f32.mrf.mxu1  ;;  %v2406_v56 = vpack.c.bf16 %v2174_v46, %v2166_v7  ;;  %v7346_v46 = vld [vmem:[#allocation29_spill] sm:$0xff]  ;;  %v1819_v7 = vadd.f32 %v6312_v25, %v6352_v39  ;;  %v2207_v45 = vmax.f32 %v2016_v35, 0.0  ;;  %v1821_v12 = vadd.f32 %v6316_v16, %v6388_v33 }
 0x255   : > { %v2000_v37 = vadd.f32 %v7346_v46, %v6392_v43  ;;  %v2180_v0 = vmax.f32 %v1807_v30, 0.0  ;;  %v2199_v51 = vmax.f32 %v2012_v50, 0.0  ;;  %v1833_v30 = vadd.f32 %v6360_v17, %v6352_v39 }
 0x256   : > { %v6488_v21 = vpop.f32.mrf.mxu0  ;;  %v6490_v40 = vpop.f32.mrf.mxu1 }
 0x257   : > { %v2182_v25 = vmax.f32 %v2000_v37, 0.0  ;;  %v2423_v16 = vpack.c.bf16 %v2207_v45, %v2199_v51 }
 0x258   : > { %v6494_v53 = vpop.f32.mrf.mxu0  ;;  %v6500_v5 = vpop.f32.mrf.mxu1 }
 0x25a   : > { %v6506_v19 = vpop.f32.mrf.mxu0  ;;  %3731 = vmatmul.mubr.bf16.gmra.mxu0 %v2404_v14  ;;  %v6512_v61 = vpop.f32.mrf.mxu1  ;;  %3924 = vmatmul.mubr.bf16.gmra.mxu1 %v2406_v56  ;;  %v2205_v14 = vmax.f32 %v1823_v23, 0.0  ;;  %v2412_v56 = vpack.c.bf16 %v2188_v31, %v2180_v0  ;;  %v2014_v23 = vadd.f32 %v7349_v18, %v6392_v43  ;;  %v2026_v31 = vadd.f32 %v6366_v34, %v6358_v57 }
 0x25b   : > { %7345 = vst [vmem:[#allocation21_spill] sm:$0xff] %v6506_v19  ;;  %7347 = vst [vmem:[#allocation26_spill] sm:$0xff] %v6512_v61  ;;  %3740 = vmatprep.mubr.bf16.mxu0 %v2413_v44  ;;  %3933 = vmatprep.mubr.bf16.mxu1 %v2415_v20  ;;  %v2197_v19 = vmax.f32 %v1819_v7, 0.0  ;;  %v2414_v20 = vpack.c.bf16 %v2190_v10, %v2182_v25  ;;  %v7350_v7 = vld [vmem:[#allocation23_spill] sm:$0xff]  ;;  %v7352_v10 = vld [vmem:[#allocation33_spill] sm:$0xff]  ;;  %v1829_v25 = vadd.f32 %v6346_v54, %v6352_v39 }
 0x25c   : > { %v6516_v60 = vpop.f32.mrf.mxu0  ;;  %v6518_v58 = vpop.f32.mrf.mxu1  ;;  %v2010_v0 = vadd.f32 %v7352_v10, %v6392_v43  ;;  %v2206_v18 = vmax.f32 %v2014_v23, 0.0  ;;  %v2024_v23 = vadd.f32 %v6354_v1, %v6392_v43  ;;  %v1839_v1 = vadd.f32 %v6384_v48, %v6352_v39 }
 0x25d   : > { %v2421_v37 = vpack.c.bf16 %v2205_v14, %v2197_v19  ;;  %v2204_v19 = vmax.f32 %v1821_v12, 0.0  ;;  %v2022_v14 = vadd.f32 %v6348_v2, %v6358_v57  ;;  %v1831_v2 = vadd.f32 %v6350_v59, %v6388_v33 }
 0x25e   : > { %v6520_v46 = vpop.f32.mrf.mxu0  ;;  %v6522_v61 = vpop.f32.mrf.mxu1  ;;  %v2198_v54 = vmax.f32 %v2010_v0, 0.0  ;;  %v7354_v0 = vld [vmem:[#allocation19_spill] sm:$0xff] }
 0x25f   : > { %7348 = vst [vmem:[#allocation28_spill] sm:$0xff] %v6522_v61  ;;  %v1817_v61 = vadd.f32 %v7350_v7, %v6388_v33  ;;  %v2223_v7 = vmax.f32 %v2026_v31, 0.0  ;;  %v2215_v12 = vmax.f32 %v2022_v14, 0.0 }
 0x260   : > { %v6526_v44 = vpop.f32.mrf.mxu0  ;;  %v6532_v35 = vpop.f32.mrf.mxu1 }
 0x261   : > { %v2196_v51 = vmax.f32 %v1817_v61, 0.0  ;;  %v1843_v61 = vadd.f32 %v6398_v11, %v6352_v39  ;;  %v2431_v59 = vpack.c.bf16 %v2223_v7, %v2215_v12 }
 0x262   : > { %v6538_v50 = vpop.f32.mrf.mxu0  ;;  %3741 = vmatmul.mubr.bf16.gmra.mxu0 %v2412_v56  ;;  %v6544_v17 = vpop.f32.mrf.mxu1  ;;  %3934 = vmatmul.mubr.bf16.gmra.mxu1 %v2414_v20  ;;  %v2221_v56 = vmax.f32 %v1833_v30, 0.0 }
 0x263   : > { %7351 = vst [vmem:[#allocation27_spill] sm:$0xff] %v6538_v50  ;;  %7353 = vst [vmem:[#allocation30_spill] sm:$0xff] %v6544_v17  ;;  %3750 = vmatprep.mubr.bf16.mxu0 %v2421_v37  ;;  %3943 = vmatprep.mubr.bf16.mxu1 %v2423_v16  ;;  %v2213_v50 = vmax.f32 %v1829_v25, 0.0  ;;  %v2420_v20 = vpack.c.bf16 %v2204_v19, %v2196_v51  ;;  %v2422_v16 = vpack.c.bf16 %v2206_v18, %v2198_v54  ;;  %v7356_v18 = vld [vmem:[#allocation25_spill] sm:$0xff] }
 0x264   : > { %v6548_v34 = vpop.f32.mrf.mxu0  ;;  %v6550_v45 = vpop.f32.mrf.mxu1  ;;  %v1827_v25 = vadd.f32 %v7354_v0, %v6388_v33  ;;  %v2036_v19 = vadd.f32 %v6404_v41, %v6358_v57  ;;  %v2020_v51 = vadd.f32 %v7356_v18, %v6392_v43  ;;  %v2222_v54 = vmax.f32 %v2024_v23, 0.0 }
 0x265   : > { %v2429_v31 = vpack.c.bf16 %v2221_v56, %v2213_v50  ;;  %v2220_v50 = vmax.f32 %v1831_v2, 0.0  ;;  %v2032_v56 = vadd.f32 %v6386_v47, %v6358_v57  ;;  %v1841_v47 = vadd.f32 %v6390_v27, %v6388_v33 }
 0x266   : > { %v6552_v10 = vpop.f32.mrf.mxu0  ;;  %v6554_v17 = vpop.f32.mrf.mxu1  ;;  %v2212_v12 = vmax.f32 %v1827_v25, 0.0  ;;  %v2239_v0 = vmax.f32 %v2036_v19, 0.0  ;;  %v2214_v48 = vmax.f32 %v2020_v51, 0.0  ;;  %v2034_v23 = vadd.f32 %v6394_v15, %v6392_v43 }
 0x267   : > { %v2231_v2 = vmax.f32 %v2032_v56, 0.0  ;;  %v1837_v51 = vadd.f32 %v6373_v36, %v6388_v33  ;;  %v7358_v56 = vld [vmem:[#allocation22_spill] sm:$0xff]  ;;  %v1849_v15 = vadd.f32 %v6420_v8, %v6352_v39  ;;  %v2042_v36 = vadd.f32 %v6422_v13, %v6358_v57 }
 0x268   : > { %v6558_v37 = vpop.f32.mrf.mxu0  ;;  %v6564_v30 = vpop.f32.mrf.mxu1  ;;  %v1851_v13 = vadd.f32 %v6424_v24, %v6388_v33 }
 0x269   : > { %v2439_v27 = vpack.c.bf16 %v2239_v0, %v2231_v2 }
 0x26a   : > { %v6570_v14 = vpop.f32.mrf.mxu0  ;;  %3751 = vmatmul.mubr.bf16.gmra.mxu0 %v2420_v20  ;;  %v6576_v11 = vpop.f32.mrf.mxu1  ;;  %3944 = vmatmul.mubr.bf16.gmra.mxu1 %v2422_v16  ;;  %v2237_v20 = vmax.f32 %v1843_v61, 0.0  ;;  %v2428_v16 = vpack.c.bf16 %v2220_v50, %v2212_v12  ;;  %v1853_v61 = vadd.f32 %v6430_v26, %v6352_v39 }
 0x26b   : > { %7355 = vst [vmem:[#allocation32_spill] sm:$0xff] %v6570_v14  ;;  %7357 = vst [vmem:[#allocation31_spill] sm:$0xff] %v6576_v11  ;;  %3760 = vmatprep.mubr.bf16.mxu0 %v2429_v31  ;;  %3953 = vmatprep.mubr.bf16.mxu1 %v2431_v59  ;;  %v2229_v14 = vmax.f32 %v1839_v1, 0.0  ;;  %v2430_v59 = vpack.c.bf16 %v2222_v54, %v2214_v48  ;;  %v2046_v1 = vadd.f32 %v6436_v4, %v6358_v57 }
 0x26c   : > { %v6580_v41 = vpop.f32.mrf.mxu0  ;;  %v6582_v7 = vpop.f32.mrf.mxu1  ;;  %v2030_v54 = vadd.f32 %v7358_v56, %v6392_v43  ;;  %v2253_v12 = vmax.f32 %v1853_v61, 0.0  ;;  %v2228_v48 = vmax.f32 %v1837_v51, 0.0  ;;  %v2245_v56 = vmax.f32 %v1849_v15, 0.0 }
 0x26d   : > { %v2437_v19 = vpack.c.bf16 %v2237_v20, %v2229_v14  ;;  %v2236_v14 = vmax.f32 %v1841_v47, 0.0  ;;  %v2238_v20 = vmax.f32 %v2034_v23, 0.0  ;;  %v2247_v47 = vmax.f32 %v2042_v36, 0.0 }
 0x26e   : > { %v6584_v18 = vpop.f32.mrf.mxu0  ;;  %v6586_v11 = vpop.f32.mrf.mxu1  ;;  %v2230_v8 = vmax.f32 %v2030_v54, 0.0  ;;  %v2044_v23 = vadd.f32 %v6426_v29, %v6392_v43  ;;  %v1863_v61 = vadd.f32 %v6462_v55, %v6352_v39  ;;  %v1847_v54 = vadd.f32 %v6410_v42, %v6388_v33 }
 0x26f   : > { %v2056_v15 = vadd.f32 %v6468_v38, %v6358_v57  ;;  %v2040_v36 = vadd.f32 %v6416_v63, %v6392_v43  ;;  %v1859_v29 = vadd.f32 %v6452_v6, %v6352_v39  ;;  %v2052_v42 = vadd.f32 %v6454_v49, %v6358_v57 }
 0x270   : > { %v6590_v31 = vpop.f32.mrf.mxu0  ;;  %v6596_v25 = vpop.f32.mrf.mxu1  ;;  %v1861_v49 = vadd.f32 %v6456_v9, %v6388_v33 }
 0x271   : > { %v2271_v63 = vmax.f32 %v2056_v15, 0.0  ;;  %v2246_v6 = vmax.f32 %v2040_v36, 0.0  ;;  %v1857_v36 = vadd.f32 %v6442_v28, %v6388_v33  ;;  %v2062_v28 = vadd.f32 %v6486_v22, %v6358_v57 }
 0x272   : > { %v6602_v50 = vpop.f32.mrf.mxu0  ;;  %3761 = vmatmul.mubr.bf16.gmra.mxu0 %v2428_v16  ;;  %v6608_v26 = vpop.f32.mrf.mxu1  ;;  %3954 = vmatmul.mubr.bf16.gmra.mxu1 %v2430_v59  ;;  %v2255_v16 = vmax.f32 %v2046_v1, 0.0  ;;  %v2436_v59 = vpack.c.bf16 %v2236_v14, %v2228_v48  ;;  %v2445_v1 = vpack.c.bf16 %v2253_v12, %v2245_v56  ;;  %v2254_v12 = vmax.f32 %v2044_v23, 0.0 }
 0x273   : > { %7359 = vst [vmem:[#allocation29_spill] sm:$0xff] %v6608_v26  ;;  %3770 = vmatprep.mubr.bf16.mxu0 %v2437_v19  ;;  %3963 = vmatprep.mubr.bf16.mxu1 %v2439_v27  ;;  %v2438_v27 = vpack.c.bf16 %v2238_v20, %v2230_v8  ;;  %v2252_v20 = vmax.f32 %v1851_v13, 0.0  ;;  %v2269_v48 = vmax.f32 %v1863_v61, 0.0  ;;  %v2244_v8 = vmax.f32 %v1847_v54, 0.0 }
 0x274   : > { %v6612_v4 = vpop.f32.mrf.mxu0  ;;  %v6614_v0 = vpop.f32.mrf.mxu1  ;;  %v2447_v24 = vpack.c.bf16 %v2255_v16, %v2247_v47  ;;  %v2263_v13 = vmax.f32 %v2052_v42, 0.0  ;;  %v2054_v23 = vadd.f32 %v6458_v3, %v6392_v43  ;;  %v1873_v61 = vadd.f32 %v6494_v53, %v6352_v39 }
 0x275   : > { %v2050_v42 = vadd.f32 %v6448_v32, %v6392_v43  ;;  %v1869_v3 = vadd.f32 %v6484_v52, %v6352_v39  ;;  %v2260_v52 = vmax.f32 %v1857_v36, 0.0  ;;  %v1871_v22 = vadd.f32 %v6488_v21, %v6388_v33 }
 0x276   : > { %v6616_v2 = vpop.f32.mrf.mxu0  ;;  %v6618_v26 = vpop.f32.mrf.mxu1  ;;  %v2455_v9 = vpack.c.bf16 %v2271_v63, %v2263_v13  ;;  %v2285_v32 = vmax.f32 %v1873_v61, 0.0  ;;  %v2064_v61 = vadd.f32 %v6490_v40, %v6392_v43  ;;  %v1867_v21 = vadd.f32 %v6474_v62, %v6388_v33 }
 0x277   : > { %v2277_v13 = vmax.f32 %v1869_v3, 0.0  ;;  %v2076_v40 = vadd.f32 %v6532_v35, %v6358_v57 }
 0x278   : > { %v6622_v19 = vpop.f32.mrf.mxu0  ;;  %v6628_v51 = vpop.f32.mrf.mxu1 }
 0x27a   : > { %v6634_v14 = vpop.f32.mrf.mxu0  ;;  %3771 = vmatmul.mubr.bf16.gmra.mxu0 %v2436_v59  ;;  %v6640_v55 = vpop.f32.mrf.mxu1  ;;  %3964 = vmatmul.mubr.bf16.gmra.mxu1 %v2438_v27  ;;  %v2261_v59 = vmax.f32 %v1859_v29, 0.0  ;;  %v2444_v27 = vpack.c.bf16 %v2252_v20, %v2244_v8  ;;  %v2066_v29 = vadd.f32 %v6500_v5, %v6358_v57  ;;  %v2270_v8 = vmax.f32 %v2054_v23, 0.0 }
 0x27b   : > { %3780 = vmatprep.mubr.bf16.mxu0 %v2445_v1  ;;  %3973 = vmatprep.mubr.bf16.mxu1 %v2447_v24  ;;  %v2446_v24 = vpack.c.bf16 %v2254_v12, %v2246_v6  ;;  %v2268_v12 = vmax.f32 %v1861_v49, 0.0  ;;  %v2279_v23 = vmax.f32 %v2062_v28, 0.0  ;;  %v7366_v28 = vld [vmem:[#allocation24_spill] sm:$0xff] }
 0x27c   : > { %v6644_v38 = vpop.f32.mrf.mxu0  ;;  %v6646_v16 = vpop.f32.mrf.mxu1  ;;  %v2453_v15 = vpack.c.bf16 %v2269_v48, %v2261_v59  ;;  %v2640_v48 = vld [vmem:[%s7245_s4] sm:$0x3]  ;;  %v2287_v6 = vmax.f32 %v2066_v29, 0.0 }
 0x27e   : > { %v6648_v56 = vpop.f32.mrf.mxu0  ;;  %v6650_v47 = vpop.f32.mrf.mxu1 }
 0x280   : > { %v6654_v1 = vpop.f32.mrf.mxu0  ;;  %v6660_v54 = vpop.f32.mrf.mxu1 }
 0x282   : > { %v6666_v20 = vpop.f32.mrf.mxu0  ;;  %3781 = vmatmul.mubr.bf16.gmra.mxu0 %v2444_v27  ;;  %v6672_v53 = vpop.f32.mrf.mxu1  ;;  %3974 = vmatmul.mubr.bf16.gmra.mxu1 %v2446_v24  ;;  %v2262_v27 = vmax.f32 %v2050_v42, 0.0  ;;  %v7363_v24 = vld [vmem:[#allocation18_spill] sm:$0xff] }
 0x283   : > { %7360 = vst [vmem:[#allocation20_spill] sm:$0xff] %v6666_v20  ;;  %7361 = vst [vmem:[#allocation23_spill] sm:$0xff] %v6672_v53  ;;  %3790 = vmatprep.mubr.bf16.mxu0 %v2453_v15  ;;  %3983 = vmatprep.mubr.bf16.mxu1 %v2455_v9  ;;  %v7364_v15 = vsub.s32 0, %v7363_v24  ;;  %v2452_v53 = vpack.c.bf16 %v2268_v12, %v2260_v52  ;;  %v7365_v29 = vsub.s32 1, %v7363_v24  ;;  %v2284_v24 = vmax.f32 %v1871_v22, 0.0 }
 0x284   : > { %v6676_v5 = vpop.f32.mrf.mxu0  ;;  %v6681_v63 = vpop.f32.mrf.mxu1  ;;  %v2454_v3 = vpack.c.bf16 %v2270_v8, %v2262_v27  ;;  %v1883_v20 = vadd.f32 %v6526_v44, %v6352_v39  ;;  %v2461_v12 = vpack.c.bf16 %v2285_v32, %v2277_v13  ;;  %v2060_v52 = vadd.f32 %v7366_v28, %v6392_v43 }
 0x285   : > { %v6691_v9 = vrot.slane %v2640_v48, %v7364_v15  ;;  %v6699_v42 = vrot.slane %v2640_v48, %v7365_v29  ;;  %v2463_v48 = vpack.c.bf16 %v2287_v6, %v2279_v23  ;;  %v1879_v8 = vadd.f32 %v6516_v60, %v6352_v39 }
 0x286   : > { %v6683_v59 = vpop.f32.mrf.mxu0  ;;  %v6687_v49 = vpop.f32.mrf.mxu1  ;;  %v2286_v44 = vmax.f32 %v2064_v61, 0.0  ;;  %v2072_v32 = vadd.f32 %v6518_v58, %v6358_v57  ;;  %v2276_v29 = vmax.f32 %v1867_v21, 0.0  ;;  %v2301_v35 = vmax.f32 %v1883_v20, 0.0  ;;  %v7368_v20 = vld [vmem:[#allocation21_spill] sm:$0xff] }
 0x287   : > { %7362 = vst [vmem:[#allocation33_spill] sm:$0xff] %v6687_v49  ;;  %v2278_v22 = vmax.f32 %v2060_v52, 0.0  ;;  %v1881_v60 = vadd.f32 %v6520_v46, %v6388_v33  ;;  %v2293_v61 = vmax.f32 %v1879_v8, 0.0  ;;  %v1893_v46 = vadd.f32 %v6558_v37, %v6352_v39 }
 0x288   : > { %v6695_v36 = vpop.f32.mrf.mxu0  ;;  %v6705_v15 = vpop.f32.mrf.mxu1 }
 0x289   : > { %v2462_v21 = vpack.c.bf16 %v2286_v44, %v2278_v22 }
 0x28a   : > { %v3326_v49 = vpop.f32.mrf.mxu0  ;;  %3791 = vmatmul.mubr.bf16.gmra.mxu0 %v2452_v53  ;;  %v3519_v27 = vpop.f32.mrf.mxu1  ;;  %3984 = vmatmul.mubr.bf16.gmra.mxu1 %v2454_v3  ;;  %v2460_v3 = vpack.c.bf16 %v2284_v24, %v2276_v29  ;;  %v2469_v29 = vpack.c.bf16 %v2301_v35, %v2293_v61 }
 0x28b   : > { %v3327_v62 = vadd.f32 %v3326_v49, %v6691_v9  ;;  %3800 = vmatprep.mubr.bf16.mxu0 %v2461_v12  ;;  %3993 = vmatprep.mubr.bf16.mxu1 %v2463_v48  ;;  %v2303_v49 = vmax.f32 %v2076_v40, 0.0 }
 0x28c   : > { %v3328_v13 = vpop.f32.mrf.mxu0  ;;  %v3521_v6 = vpop.f32.mrf.mxu1 }
 0x28d   : > { %v6716_v28 = vadd.f32 %v3519_v27, %v3327_v62  ;;  %v3329_v53 = vadd.f32 %v3328_v13, %v6699_v42  ;;  %v1877_v62 = vadd.f32 %v7368_v20, %v6388_v33  ;;  %v2295_v27 = vmax.f32 %v2072_v32, 0.0  ;;  %v7369_v13 = vld [vmem:[#allocation28_spill] sm:$0xff] }
 0x28e   : > { %v3330_v23 = vpop.f32.mrf.mxu0  ;;  %v3523_v48 = vpop.f32.mrf.mxu1  ;;  %v2074_v52 = vadd.f32 %v7369_v13, %v6392_v43  ;;  %v2086_v32 = vadd.f32 %v6564_v30, %v6358_v57  ;;  %v1889_v20 = vadd.f32 %v6548_v34, %v6352_v39 }
 0x28f   : > { %7367 = vst [vmem:[#allocation19_spill] sm:$0xff] %v6716_v28  ;;  %v6721_v12 = vadd.f32 %v3521_v6, %v3329_v53  ;;  %v3331_v58 = vadd.f32 %v3330_v23, %v6691_v9  ;;  %v7370_v53 = vld [vmem:[#allocation26_spill] sm:$0xff]  ;;  %v2300_v6 = vmax.f32 %v1881_v60, 0.0  ;;  %v2471_v23 = vpack.c.bf16 %v2303_v49, %v2295_v27 }
 0x290   : > { %v3332_v28 = vpop.f32.mrf.mxu0  ;;  %v3525_v8 = vpop.f32.mrf.mxu1  ;;  %v2070_v44 = vadd.f32 %v7370_v53, %v6392_v43  ;;  %v2292_v35 = vmax.f32 %v1877_v62, 0.0  ;;  %v2302_v61 = vmax.f32 %v2074_v52, 0.0  ;;  %v2082_v60 = vadd.f32 %v6550_v45, %v6358_v57 }
 0x291   : > { %v6730_v40 = vadd.f32 %v3523_v48, %v3331_v58  ;;  %v3333_v24 = vadd.f32 %v3332_v28, %v6699_v42  ;;  %v2317_v48 = vmax.f32 %v1893_v46, 0.0  ;;  %v2309_v53 = vmax.f32 %v1889_v20, 0.0  ;;  %v7371_v46 = vld [vmem:[#allocation27_spill] sm:$0xff] }
 0x292   : > { %v3336_v22 = vpop.f32.mrf.mxu0  ;;  %3801 = vmatmul.mubr.bf16.gmra.mxu0 %v2460_v3  ;;  %v3529_v28 = vpop.f32.mrf.mxu1  ;;  %3994 = vmatmul.mubr.bf16.gmra.mxu1 %v2462_v21  ;;  %v2294_v27 = vmax.f32 %v2070_v44, 0.0  ;;  %v2468_v13 = vpack.c.bf16 %v2300_v6, %v2292_v35  ;;  %v1891_v21 = vadd.f32 %v6552_v10, %v6388_v33  ;;  %v2084_v44 = vadd.f32 %v6554_v17, %v6392_v43  ;;  %v7372_v35 = vld [vmem:[#allocation30_spill] sm:$0xff] }
 0x293   : > { %v6739_v37 = vadd.f32 %v3525_v8, %v3333_v24  ;;  %v3337_v58 = vadd.f32 %v3336_v22, %v6691_v9  ;;  %3810 = vmatprep.mubr.bf16.mxu0 %v2469_v29  ;;  %4003 = vmatprep.mubr.bf16.mxu1 %v2471_v23  ;;  %v2319_v24 = vmax.f32 %v2086_v32, 0.0  ;;  %v1887_v22 = vadd.f32 %v7371_v46, %v6388_v33 }
 0x294   : > { %v3338_v30 = vpop.f32.mrf.mxu0  ;;  %v3531_v34 = vpop.f32.mrf.mxu1  ;;  %v2470_v29 = vpack.c.bf16 %v2302_v61, %v2294_v27  ;;  %v2311_v23 = vmax.f32 %v2082_v60, 0.0  ;;  %v1903_v32 = vadd.f32 %v6590_v31, %v6352_v39  ;;  %v2080_v61 = vadd.f32 %v7372_v35, %v6392_v43 }
 0x295   : > { %v6744_v3 = vadd.f32 %v3529_v28, %v3337_v58  ;;  %v3339_v49 = vadd.f32 %v3338_v30, %v6699_v42  ;;  %v2477_v28 = vpack.c.bf16 %v2317_v48, %v2309_v53  ;;  %v2096_v30 = vadd.f32 %v6596_v25, %v6358_v57 }
 0x296   : > { %v3340_v8 = vpop.f32.mrf.mxu0  ;;  %v3533_v52 = vpop.f32.mrf.mxu1  ;;  %v2316_v17 = vmax.f32 %v1891_v21, 0.0  ;;  %v2318_v48 = vmax.f32 %v2084_v44, 0.0  ;;  %v2092_v53 = vadd.f32 %v6582_v7, %v6358_v57  ;;  %v1901_v46 = vadd.f32 %v6584_v18, %v6388_v33 }
 0x297   : > { %v6749_v62 = vadd.f32 %v3531_v34, %v3339_v49  ;;  %v3341_v45 = vadd.f32 %v3340_v8, %v6691_v9  ;;  %v2479_v49 = vpack.c.bf16 %v2319_v24, %v2311_v23  ;;  %v1899_v34 = vadd.f32 %v6580_v41, %v6352_v39 }
 0x298   : > { %v3342_v6 = vpop.f32.mrf.mxu0  ;;  %v3535_v58 = vpop.f32.mrf.mxu1  ;;  %v2335_v23 = vmax.f32 %v2096_v30, 0.0  ;;  %v2327_v35 = vmax.f32 %v2092_v53, 0.0  ;;  %v1913_v18 = vadd.f32 %v6622_v19, %v6352_v39  ;;  %v2106_v53 = vadd.f32 %v6628_v51, %v6358_v57 }
 0x299   : > { %v6758_v20 = vadd.f32 %v3533_v52, %v3341_v45  ;;  %v3343_v10 = vadd.f32 %v3342_v6, %v6699_v42  ;;  %v2308_v45 = vmax.f32 %v1887_v22, 0.0  ;;  %v2310_v52 = vmax.f32 %v2080_v61, 0.0 }
 0x29a   : > { %v3346_v60 = vpop.f32.mrf.mxu0  ;;  %3811 = vmatmul.mubr.bf16.gmra.mxu0 %v2468_v13  ;;  %v3539_v8 = vpop.f32.mrf.mxu1  ;;  %4004 = vmatmul.mubr.bf16.gmra.mxu1 %v2470_v29  ;;  %v2333_v13 = vmax.f32 %v1903_v32, 0.0  ;;  %v2325_v44 = vmax.f32 %v1899_v34, 0.0  ;;  %v7373_v32 = vld [vmem:[#allocation32_spill] sm:$0xff]  ;;  %v2094_v61 = vadd.f32 %v6586_v11, %v6392_v43  ;;  %v2487_v11 = vpack.c.bf16 %v2335_v23, %v2327_v35 }
 0x29b   : > { %v6767_v31 = vadd.f32 %v3535_v58, %v3343_v10  ;;  %v3347_v27 = vadd.f32 %v3346_v60, %v6691_v9  ;;  %3820 = vmatprep.mubr.bf16.mxu0 %v2477_v28  ;;  %4013 = vmatprep.mubr.bf16.mxu1 %v2479_v49  ;;  %v2476_v6 = vpack.c.bf16 %v2316_v17, %v2308_v45 }
 0x29c   : > { %v3348_v25 = vpop.f32.mrf.mxu0  ;;  %v3541_v41 = vpop.f32.mrf.mxu1  ;;  %v2478_v22 = vpack.c.bf16 %v2318_v48, %v2310_v52  ;;  %v1897_v28 = vadd.f32 %v7373_v32, %v6388_v33  ;;  %v2485_v34 = vpack.c.bf16 %v2333_v13, %v2325_v44  ;;  %v2332_v48 = vmax.f32 %v1901_v46, 0.0 }
 0x29d   : > { %v6772_v24 = vadd.f32 %v3539_v8, %v3347_v27  ;;  %v3349_v21 = vadd.f32 %v3348_v25, %v6699_v42  ;;  %v7374_v27 = vld [vmem:[#allocation31_spill] sm:$0xff]  ;;  %v1909_v45 = vadd.f32 %v6612_v4, %v6352_v39  ;;  %v2334_v52 = vmax.f32 %v2094_v61, 0.0 }
 0x29e   : > { %v3350_v29 = vpop.f32.mrf.mxu0  ;;  %v3543_v58 = vpop.f32.mrf.mxu1  ;;  %v2090_v8 = vadd.f32 %v7374_v27, %v6392_v43  ;;  %v2324_v13 = vmax.f32 %v1897_v28, 0.0  ;;  %v2102_v46 = vadd.f32 %v6614_v0, %v6358_v57  ;;  %v1923_v27 = vadd.f32 %v6654_v1, %v6352_v39 }
 0x29f   : > { %v6777_v10 = vadd.f32 %v3541_v41, %v3349_v21  ;;  %v3351_v7 = vadd.f32 %v3350_v29, %v6691_v9  ;;  %v2349_v29 = vmax.f32 %v1913_v18, 0.0  ;;  %v2341_v35 = vmax.f32 %v1909_v45, 0.0 }
 0x2a0   : > { %v3352_v60 = vpop.f32.mrf.mxu0  ;;  %v3545_v17 = vpop.f32.mrf.mxu1  ;;  %v2326_v44 = vmax.f32 %v2090_v8, 0.0  ;;  %v1907_v18 = vadd.f32 %v6602_v50, %v6388_v33  ;;  %v2116_v50 = vadd.f32 %v6660_v54, %v6358_v57 }
 0x2a1   : > { %v6786_v30 = vadd.f32 %v3543_v58, %v3351_v7  ;;  %v3353_v49 = vadd.f32 %v3352_v60, %v6699_v42  ;;  %v2484_v7 = vpack.c.bf16 %v2332_v48, %v2324_v13  ;;  %v2351_v58 = vmax.f32 %v2106_v53, 0.0 }
 0x2a2   : > { %v3356_v25 = vpop.f32.mrf.mxu0  ;;  %3821 = vmatmul.mubr.bf16.gmra.mxu0 %v2476_v6  ;;  %v3549_v41 = vpop.f32.mrf.mxu1  ;;  %4014 = vmatmul.mubr.bf16.gmra.mxu1 %v2478_v22  ;;  %v1911_v22 = vadd.f32 %v6616_v2, %v6388_v33  ;;  %v2486_v60 = vpack.c.bf16 %v2334_v52, %v2326_v44  ;;  %v2493_v53 = vpack.c.bf16 %v2349_v29, %v2341_v35  ;;  %v2340_v29 = vmax.f32 %v1907_v18, 0.0 }
 0x2a3   : > { %v6795_v19 = vadd.f32 %v3545_v17, %v3353_v49  ;;  %v3357_v21 = vadd.f32 %v3356_v25, %v6691_v9  ;;  %3830 = vmatprep.mubr.bf16.mxu0 %v2485_v34  ;;  %4023 = vmatprep.mubr.bf16.mxu1 %v2487_v11  ;;  %v2343_v49 = vmax.f32 %v2102_v46, 0.0  ;;  %v2104_v17 = vadd.f32 %v6618_v26, %v6392_v43  ;;  %v7375_v25 = vld [vmem:[#allocation29_spill] sm:$0xff] }
 0x2a4   : > { %v3358_v51 = vpop.f32.mrf.mxu0  ;;  %v3551_v4 = vpop.f32.mrf.mxu1  ;;  %v2100_v11 = vadd.f32 %v7375_v25, %v6392_v43  ;;  %v2348_v26 = vmax.f32 %v1911_v22, 0.0  ;;  %v1921_v18 = vadd.f32 %v6648_v56, %v6388_v33  ;;  %v2126_v56 = vadd.f32 %v6705_v15, %v6358_v57 }
 0x2a5   : > { %v6800_v6 = vadd.f32 %v3549_v41, %v3357_v21  ;;  %v3359_v23 = vadd.f32 %v3358_v51, %v6699_v42  ;;  %v2495_v21 = vpack.c.bf16 %v2351_v58, %v2343_v49  ;;  %v1919_v41 = vadd.f32 %v6644_v38, %v6352_v39 }
 0x2a6   : > { %v3360_v32 = vpop.f32.mrf.mxu0  ;;  %v3553_v61 = vpop.f32.mrf.mxu1  ;;  %v2350_v46 = vmax.f32 %v2104_v17, 0.0  ;;  %v2112_v51 = vadd.f32 %v6646_v16, %v6358_v57  ;;  %v2367_v58 = vmax.f32 %v2116_v50, 0.0  ;;  %v2492_v35 = vpack.c.bf16 %v2348_v26, %v2340_v29 }
 0x2a7   : > { %v6805_v28 = vadd.f32 %v3551_v4, %v3359_v23  ;;  %v3361_v0 = vadd.f32 %v3360_v32, %v6691_v9  ;;  %v2365_v23 = vmax.f32 %v1923_v27, 0.0  ;;  %v2357_v22 = vmax.f32 %v1919_v41, 0.0 }
 0x2a8   : > { %v3362_v34 = vpop.f32.mrf.mxu0  ;;  %v3555_v48 = vpop.f32.mrf.mxu1  ;;  %v2359_v49 = vmax.f32 %v2112_v51, 0.0  ;;  %v2114_v17 = vadd.f32 %v6650_v47, %v6392_v43  ;;  %v1933_v27 = vadd.f32 %v6695_v36, %v6352_v39  ;;  %v2110_v50 = vadd.f32 %v6640_v55, %v6392_v43 }
 0x2a9   : > { %v6814_v8 = vadd.f32 %v3553_v61, %v3361_v0  ;;  %v3363_v2 = vadd.f32 %v3362_v34, %v6699_v42  ;;  %v2501_v25 = vpack.c.bf16 %v2365_v23, %v2357_v22  ;;  %v1929_v36 = vadd.f32 %v6676_v5, %v6352_v39 }
 0x2aa   : > { %v3366_v45 = vpop.f32.mrf.mxu0  ;;  %3831 = vmatmul.mubr.bf16.gmra.mxu0 %v2484_v7  ;;  %v3559_v52 = vpop.f32.mrf.mxu1  ;;  %4024 = vmatmul.mubr.bf16.gmra.mxu1 %v2486_v60  ;;  %v2342_v7 = vmax.f32 %v2100_v11, 0.0  ;;  %v1917_v11 = vadd.f32 %v6634_v14, %v6388_v33  ;;  %v2364_v14 = vmax.f32 %v1921_v18, 0.0  ;;  %v2122_v55 = vadd.f32 %v6681_v63, %v6358_v57 }
 0x2ab   : > { %v6823_v1 = vadd.f32 %v3555_v48, %v3363_v2  ;;  %v3367_v13 = vadd.f32 %v3366_v45, %v6691_v9  ;;  %3840 = vmatprep.mubr.bf16.mxu0 %v2493_v53  ;;  %4033 = vmatprep.mubr.bf16.mxu1 %v2495_v21  ;;  %v2503_v45 = vpack.c.bf16 %v2367_v58, %v2359_v49  ;;  %v2383_v29 = vmax.f32 %v2126_v56, 0.0 }
 0x2ac   : > { %v3368_v54 = vpop.f32.mrf.mxu0  ;;  %v3561_v38 = vpop.f32.mrf.mxu1  ;;  %v2494_v16 = vpack.c.bf16 %v2350_v46, %v2342_v7  ;;  %v2356_v5 = vmax.f32 %v1917_v11, 0.0  ;;  %v2375_v63 = vmax.f32 %v2122_v55, 0.0 }
 0x2ad   : > { %v6828_v4 = vadd.f32 %v3559_v52, %v3367_v13  ;;  %v3369_v44 = vadd.f32 %v3368_v54, %v6699_v42  ;;  %v2366_v13 = vmax.f32 %v2114_v17, 0.0  ;;  %v2381_v52 = vmax.f32 %v1933_v27, 0.0 }
 0x2ae   : > { %v3370_v32 = vpop.f32.mrf.mxu0  ;;  %v3563_v60 = vpop.f32.mrf.mxu1  ;;  %v2358_v54 = vmax.f32 %v2110_v50, 0.0 }
 0x2af   : > { %v6831_v0 = vadd.f32 %v3561_v38, %v3369_v44  ;;  %v3371_v61 = vadd.f32 %v3370_v32, %v6691_v9  ;;  %v2373_v44 = vmax.f32 %v1929_v36, 0.0  ;;  %v2500_v32 = vpack.c.bf16 %v2364_v14, %v2356_v5 }
 0x2b0   : > { %v3372_v34 = vpop.f32.mrf.mxu0  ;;  %v3565_v53 = vpop.f32.mrf.mxu1  ;;  %v2502_v57 = vpack.c.bf16 %v2366_v13, %v2358_v54 }
 0x2b1   : > { %v6840_v2 = vadd.f32 %v3563_v60, %v3371_v61  ;;  %v3373_v48 = vadd.f32 %v3372_v34, %v6699_v42  ;;  %v7376_v61 = vld [vmem:[#allocation33_spill] sm:$0xff]  ;;  %v2509_v17 = vpack.c.bf16 %v2381_v52, %v2373_v44  ;;  %v7377_v34 = vld [vmem:[#allocation20_spill] sm:$0xff] }
 0x2b2   : > { %v3376_v47 = vpop.f32.mrf.mxu0  ;;  %3841 = vmatmul.mubr.bf16.gmra.mxu0 %v2492_v35  ;;  %v3569_v41 = vpop.f32.mrf.mxu1  ;;  %4034 = vmatmul.mubr.bf16.gmra.mxu1 %v2494_v16  ;;  %v1931_v35 = vadd.f32 %v6683_v59, %v6388_v33  ;;  %v2124_v60 = vadd.f32 %v7376_v61, %v6392_v43  ;;  %v1927_v27 = vadd.f32 %v7377_v34, %v6388_v33 }
 0x2b3   : > { %v6851_v21 = vadd.f32 %v3565_v53, %v3373_v48  ;;  %v3377_v26 = vadd.f32 %v3376_v47, %v6691_v9  ;;  %3850 = vmatprep.mubr.bf16.mxu0 %v2501_v25  ;;  %4043 = vmatprep.mubr.bf16.mxu1 %v2503_v45  ;;  %v2511_v53 = vpack.c.bf16 %v2383_v29, %v2375_v63  ;;  %v7378_v25 = vld [vmem:[#allocation23_spill] sm:$0xff] }
 0x2b4   : > { %v3378_v15 = vpop.f32.mrf.mxu0  ;;  %v3571_v39 = vpop.f32.mrf.mxu1  ;;  %v2120_v11 = vadd.f32 %v7378_v25, %v6392_v43  ;;  %v2380_v47 = vmax.f32 %v1931_v35, 0.0  ;;  %v2382_v36 = vmax.f32 %v2124_v60, 0.0  ;;  %v2372_v14 = vmax.f32 %v1927_v27, 0.0 }
 0x2b5   : > { %v6856_v46 = vadd.f32 %v3569_v41, %v3377_v26  ;;  %v3379_v51 = vadd.f32 %v3378_v15, %v6699_v42 }
 0x2b6   : > { %v3380_v23 = vpop.f32.mrf.mxu0  ;;  %v3573_v58 = vpop.f32.mrf.mxu1  ;;  %v2374_v55 = vmax.f32 %v2120_v11, 0.0 }
 0x2b7   : > { %v6859_v38 = vadd.f32 %v3571_v39, %v3379_v51  ;;  %v3381_v7 = vadd.f32 %v3380_v23, %v6691_v9  ;;  %v2508_v51 = vpack.c.bf16 %v2380_v47, %v2372_v14 }
 0x2b8   : > { %v3382_v22 = vpop.f32.mrf.mxu0  ;;  %v3575_v18 = vpop.f32.mrf.mxu1  ;;  %v2510_v5 = vpack.c.bf16 %v2382_v36, %v2374_v55 }
 0x2b9   : > { %v6866_v16 = vadd.f32 %v3573_v58, %v3381_v7  ;;  %v3383_v49 = vadd.f32 %v3382_v22, %v6699_v42 }
 0x2ba   : > { %v3386_v48 = vpop.f32.mrf.mxu0  ;;  %3851 = vmatmul.mubr.bf16.gmra.mxu0 %v2500_v32  ;;  %v3579_v56 = vpop.f32.mrf.mxu1  ;;  %4044 = vmatmul.mubr.bf16.gmra.mxu1 %v2502_v57 }
 0x2bb   : > { %v6873_v59 = vadd.f32 %v3575_v18, %v3383_v49  ;;  %v3387_v50 = vadd.f32 %v3386_v48, %v6691_v9  ;;  %3860 = vmatprep.mubr.bf16.mxu0 %v2509_v17  ;;  %4053 = vmatprep.mubr.bf16.mxu1 %v2511_v53 }
 0x2bc   : > { %v3388_v45 = vpop.f32.mrf.mxu0  ;;  %v3581_v41 = vpop.f32.mrf.mxu1 }
 0x2bd   : > { %v6876_v26 = vadd.f32 %v3579_v56, %v3387_v50  ;;  %v3389_v33 = vadd.f32 %v3388_v45, %v6699_v42 }
 0x2be   : > { %v3390_v13 = vpop.f32.mrf.mxu0  ;;  %v3583_v52 = vpop.f32.mrf.mxu1 }
 0x2bf   : > { %v6879_v43 = vadd.f32 %v3581_v41, %v3389_v33  ;;  %v3391_v15 = vadd.f32 %v3390_v13, %v6691_v9 }
 0x2c0   : > { %v3392_v39 = vpop.f32.mrf.mxu0  ;;  %v3585_v23 = vpop.f32.mrf.mxu1 }
 0x2c1   : > { %v6882_v54 = vadd.f32 %v3583_v52, %v3391_v15  ;;  %v3393_v29 = vadd.f32 %v3392_v39, %v6699_v42 }
 0x2c2   : > { %v3396_v44 = vpop.f32.mrf.mxu0  ;;  %3861 = vmatmul.mubr.bf16.gmra.mxu0 %v2508_v51  ;;  %v3589_v32 = vpop.f32.mrf.mxu1  ;;  %4054 = vmatmul.mubr.bf16.gmra.mxu1 %v2510_v5 }
 0x2c3   : > { %v6885_v7 = vadd.f32 %v3585_v23, %v3393_v29  ;;  %v3397_v58 = vadd.f32 %v3396_v44, %v6691_v9 }
 0x2c4   : > { %v3398_v57 = vpop.f32.mrf.mxu0  ;;  %v3591_v22 = vpop.f32.mrf.mxu1 }
 0x2c5   : > { %v6888_v63 = vadd.f32 %v3589_v32, %v3397_v58  ;;  %v3399_v35 = vadd.f32 %v3398_v57, %v6699_v42 }
 0x2c6   : > { %v3400_v61 = vpop.f32.mrf.mxu0  ;;  %v3593_v18 = vpop.f32.mrf.mxu1 }
 0x2c7   : > { %v6891_v60 = vadd.f32 %v3591_v22, %v3399_v35  ;;  %v3401_v49 = vadd.f32 %v3400_v61, %v6691_v9 }
 0x2c8   : > { %v3402_v17 = vpop.f32.mrf.mxu0  ;;  %v3595_v48 = vpop.f32.mrf.mxu1 }
 0x2c9   : > { %v6894_v34 = vadd.f32 %v3593_v18, %v3401_v49  ;;  %v3403_v27 = vadd.f32 %v3402_v17, %v6699_v42 }
 0x2ca   : > { %v3406_v53 = vpop.f32.mrf.mxu0  ;;  %v3599_v50 = vpop.f32.mrf.mxu1 }
 0x2cb   : > { %v6897_v25 = vadd.f32 %v3595_v48, %v3403_v27  ;;  %v3407_v11 = vadd.f32 %v3406_v53, %v6691_v9 }
 0x2cc   : > { %v3408_v56 = vpop.f32.mrf.mxu0  ;;  %v3601_v36 = vpop.f32.mrf.mxu1 }
 0x2cd   : > { %v6900_v47 = vadd.f32 %v3599_v50, %v3407_v11  ;;  %v3409_v45 = vadd.f32 %v3408_v56, %v6699_v42 }
 0x2ce   : > { %v3410_v33 = vpop.f32.mrf.mxu0  ;;  %v3603_v13 = vpop.f32.mrf.mxu1 }
 0x2cf   : > { %v6903_v41 = vadd.f32 %v3601_v36, %v3409_v45  ;;  %v3411_v14 = vadd.f32 %v3410_v33, %v6691_v9 }
 0x2d0   : > { %v3412_v55 = vpop.f32.mrf.mxu0  ;;  %v3605_v51 = vpop.f32.mrf.mxu1 }
 0x2d1   : > { %v6906_v15 = vadd.f32 %v3603_v13, %v3411_v14  ;;  %v3413_v52 = vadd.f32 %v3412_v55, %v6699_v42 }
 0x2d2   : > { %v3416_v39 = vpop.f32.mrf.mxu0  ;;  %v3609_v23 = vpop.f32.mrf.mxu1 }
 0x2d3   : > { %v6909_v5 = vadd.f32 %v3605_v51, %v3413_v52  ;;  %v3417_v29 = vadd.f32 %v3416_v39, %v6691_v9 }
 0x2d4   : > { %v3418_v44 = vpop.f32.mrf.mxu0  ;;  %v3611_v57 = vpop.f32.mrf.mxu1 }
 0x2d5   : > { %v6912_v58 = vadd.f32 %v3609_v23, %v3417_v29  ;;  %v3419_v32 = vadd.f32 %v3418_v44, %v6699_v42 }
 0x2d6   : > { %v3420_v35 = vpop.f32.mrf.mxu0  ;;  %v3613_v49 = vpop.f32.mrf.mxu1 }
 0x2d7   : > { %v6915_v22 = vadd.f32 %v3611_v57, %v3419_v32  ;;  %v3421_v61 = vadd.f32 %v3420_v35, %v6691_v9 }
 0x2d8   : > { %v3422_v18 = vpop.f32.mrf.mxu0  ;;  %v3615_v48 = vpop.f32.mrf.mxu1 }
 0x2d9   : > { %v6918_v17 = vadd.f32 %v3613_v49, %v3421_v61  ;;  %v3423_v27 = vadd.f32 %v3422_v18, %v6699_v42 }
 0x2da   : > { %v3426_v53 = vpop.f32.mrf.mxu0  ;;  %v3619_v56 = vpop.f32.mrf.mxu1 }
 0x2db   : > { %v6921_v11 = vadd.f32 %v3615_v48, %v3423_v27  ;;  %v3427_v50 = vadd.f32 %v3426_v53, %v6691_v9 }
 0x2dc   : > { %v3428_v45 = vpop.f32.mrf.mxu0  ;;  %v3621_v14 = vpop.f32.mrf.mxu1 }
 0x2dd   : > { %v6924_v36 = vadd.f32 %v3619_v56, %v3427_v50  ;;  %v3429_v33 = vadd.f32 %v3428_v45, %v6699_v42 }
 0x2de   : > { %v3430_v13 = vpop.f32.mrf.mxu0  ;;  %v3623_v51 = vpop.f32.mrf.mxu1 }
 0x2df   : > { %v6927_v55 = vadd.f32 %v3621_v14, %v3429_v33  ;;  %v3431_v52 = vadd.f32 %v3430_v13, %v6691_v9 }
 0x2e0   : > { %v3432_v39 = vpop.f32.mrf.mxu0  ;;  %v3625_v44 = vpop.f32.mrf.mxu1 }
 0x2e1   : > { %v6930_v29 = vadd.f32 %v3623_v51, %v3431_v52  ;;  %v3433_v23 = vadd.f32 %v3432_v39, %v6699_v42 }
 0x2e2   : > { %v3436_v32 = vpop.f32.mrf.mxu0  ;;  %v3629_v61 = vpop.f32.mrf.mxu1 }
 0x2e3   : > { %v6933_v57 = vadd.f32 %v3625_v44, %v3433_v23  ;;  %v3437_v35 = vadd.f32 %v3436_v32, %v6691_v9 }
 0x2e4   : > { %v3438_v49 = vpop.f32.mrf.mxu0  ;;  %v3631_v48 = vpop.f32.mrf.mxu1 }
 0x2e5   : > { %v6936_v18 = vadd.f32 %v3629_v61, %v3437_v35  ;;  %v3439_v27 = vadd.f32 %v3438_v49, %v6699_v42 }
 0x2e6   : > { %v3440_v53 = vpop.f32.mrf.mxu0  ;;  %v3633_v45 = vpop.f32.mrf.mxu1 }
 0x2e7   : > { %v6939_v50 = vadd.f32 %v3631_v48, %v3439_v27  ;;  %v3441_v56 = vadd.f32 %v3440_v53, %v6691_v9 }
 0x2e8   : > { %v3442_v33 = vpop.f32.mrf.mxu0  ;;  %v3635_v52 = vpop.f32.mrf.mxu1 }
 0x2e9   : > { %v6942_v14 = vadd.f32 %v3633_v45, %v3441_v56  ;;  %v3443_v13 = vadd.f32 %v3442_v33, %v6699_v42 }
 0x2ea   : > { %v3446_v51 = vpop.f32.mrf.mxu0  ;;  %v3639_v44 = vpop.f32.mrf.mxu1 }
 0x2eb   : > { %v6945_v39 = vadd.f32 %v3635_v52, %v3443_v13  ;;  %v3447_v23 = vadd.f32 %v3446_v51, %v6691_v9 }
 0x2ec   : > { %v3448_v32 = vpop.f32.mrf.mxu0  ;;  %v3641_v49 = vpop.f32.mrf.mxu1 }
 0x2ed   : > { %7379 = vst [vmem:[#allocation25_spill] sm:$0xff] %v6945_v39  ;;  %v6948_v35 = vadd.f32 %v3639_v44, %v3447_v23  ;;  %v3449_v61 = vadd.f32 %v3448_v32, %v6699_v42 }
 0x2ee   : > { %v3450_v27 = vpop.f32.mrf.mxu0  ;;  %v3643_v56 = vpop.f32.mrf.mxu1 }
 0x2ef   : > { %7380 = vst [vmem:[#allocation22_spill] sm:$0xff] %v6948_v35  ;;  %v6951_v48 = vadd.f32 %v3641_v49, %v3449_v61  ;;  %v3451_v53 = vadd.f32 %v3450_v27, %v6691_v9 }
 0x2f0   : > { %v3452_v45 = vpop.f32.mrf.mxu0  ;;  %v3645_v52 = vpop.f32.mrf.mxu1 }
 0x2f1   : > { %7381 = vst [vmem:[#allocation18_spill] sm:$0xff] %v6951_v48  ;;  %v6954_v33 = vadd.f32 %v3643_v56, %v3451_v53  ;;  %v3453_v13 = vadd.f32 %v3452_v45, %v6699_v42 }
 0x2f2   : > { %v3456_v51 = vpop.f32.mrf.mxu0  ;;  %v3649_v44 = vpop.f32.mrf.mxu1 }
 0x2f3   : > { %7382 = vst [vmem:[#allocation24_spill] sm:$0xff] %v6954_v33  ;;  %v6957_v39 = vadd.f32 %v3645_v52, %v3453_v13  ;;  %v3457_v23 = vadd.f32 %v3456_v51, %v6691_v9 }
 0x2f4   : > { %v3458_v32 = vpop.f32.mrf.mxu0  ;;  %v3651_v49 = vpop.f32.mrf.mxu1 }
 0x2f5   : > { %7383 = vst [vmem:[#allocation21_spill] sm:$0xff] %v6957_v39  ;;  %v6960_v35 = vadd.f32 %v3649_v44, %v3457_v23  ;;  %v3459_v61 = vadd.f32 %v3458_v32, %v6699_v42 }
 0x2f6   : > { %v3460_v27 = vpop.f32.mrf.mxu0  ;;  %v3653_v56 = vpop.f32.mrf.mxu1 }
 0x2f7   : > { %7384 = vst [vmem:[#allocation28_spill] sm:$0xff] %v6960_v35  ;;  %v6963_v48 = vadd.f32 %v3651_v49, %v3459_v61  ;;  %v3461_v53 = vadd.f32 %v3460_v27, %v6691_v9 }
 0x2f8   : > { %v3462_v45 = vpop.f32.mrf.mxu0  ;;  %v3655_v52 = vpop.f32.mrf.mxu1 }
 0x2f9   : > { %7385 = vst [vmem:[#allocation26_spill] sm:$0xff] %v6963_v48  ;;  %v6966_v33 = vadd.f32 %v3653_v56, %v3461_v53  ;;  %v3463_v13 = vadd.f32 %v3462_v45, %v6699_v42 }
 0x2fa   : > { %v3466_v51 = vpop.f32.mrf.mxu0  ;;  %v3659_v44 = vpop.f32.mrf.mxu1 }
 0x2fb   : > { %7386 = vst [vmem:[#allocation27_spill] sm:$0xff] %v6966_v33  ;;  %v6969_v39 = vadd.f32 %v3655_v52, %v3463_v13  ;;  %v3467_v23 = vadd.f32 %v3466_v51, %v6691_v9 }
 0x2fc   : > { %v3468_v32 = vpop.f32.mrf.mxu0  ;;  %v3661_v49 = vpop.f32.mrf.mxu1 }
 0x2fd   : > { %7387 = vst [vmem:[#allocation30_spill] sm:$0xff] %v6969_v39  ;;  %v6972_v35 = vadd.f32 %v3659_v44, %v3467_v23  ;;  %v3469_v61 = vadd.f32 %v3468_v32, %v6699_v42 }
 0x2fe   : > { %v3470_v27 = vpop.f32.mrf.mxu0  ;;  %v3663_v56 = vpop.f32.mrf.mxu1 }
 0x2ff   : > { %7388 = vst [vmem:[#allocation32_spill] sm:$0xff] %v6972_v35  ;;  %v6975_v48 = vadd.f32 %v3661_v49, %v3469_v61  ;;  %v3471_v53 = vadd.f32 %v3470_v27, %v6691_v9 }
 0x300   : > { %v3472_v45 = vpop.f32.mrf.mxu0  ;;  %v3665_v52 = vpop.f32.mrf.mxu1 }
 0x301   : > { %7389 = vst [vmem:[#allocation31_spill] sm:$0xff] %v6975_v48  ;;  %v6978_v33 = vadd.f32 %v3663_v56, %v3471_v53  ;;  %v3473_v13 = vadd.f32 %v3472_v45, %v6699_v42 }
 0x302   : > { %v3476_v51 = vpop.f32.mrf.mxu0  ;;  %v3669_v44 = vpop.f32.mrf.mxu1 }
 0x303   : > { %7390 = vst [vmem:[#allocation29_spill] sm:$0xff] %v6978_v33  ;;  %v6981_v39 = vadd.f32 %v3665_v52, %v3473_v13  ;;  %v3477_v23 = vadd.f32 %v3476_v51, %v6691_v9 }
 0x304   : > { %v3478_v32 = vpop.f32.mrf.mxu0  ;;  %v3671_v49 = vpop.f32.mrf.mxu1 }
 0x305   : > { %7391 = vst [vmem:[#allocation33_spill] sm:$0xff] %v6981_v39  ;;  %v6984_v35 = vadd.f32 %v3669_v44, %v3477_v23  ;;  %v3479_v61 = vadd.f32 %v3478_v32, %v6699_v42  ;;  %v7395_v44 = vld [vmem:[#allocation19_spill] sm:$0xff] }
 0x306   : > { %v3480_v27 = vpop.f32.mrf.mxu0  ;;  %v3673_v56 = vpop.f32.mrf.mxu1 }
 0x307   : > { %7392 = vst [vmem:[#allocation20_spill] sm:$0xff] %v6984_v35  ;;  %v6987_v48 = vadd.f32 %v3671_v49, %v3479_v61  ;;  %v3481_v53 = vadd.f32 %v3480_v27, %v6691_v9  ;;  %v4064_v61 = vld [vmem:[%s5513_s13] sm:$0xff] }
 0x308   : > { %v3482_v45 = vpop.f32.mrf.mxu0  ;;  %v3675_v51 = vpop.f32.mrf.mxu1 }
 0x309   : > { %7393 = vst [vmem:[#allocation23_spill] sm:$0xff] %v6987_v48  ;;  %v6990_v13 = vadd.f32 %v3673_v56, %v3481_v53  ;;  %v3483_v52 = vadd.f32 %v3482_v45, %v6699_v42  ;;  %v4065_v53 = vld [vmem:[%s5513_s13 + $0x8] sm:$0xff] }
 0x30a   : > { %v3712_v39 = vpop.f32.mrf.mxu0  ;;  %v3905_v35 = vpop.f32.mrf.mxu1 }
 0x30b   : > { %7394 = vst [vmem:[#allocation34_spill] sm:$0xff] %v6990_v13  ;;  %v6993_v23 = vadd.f32 %v3675_v51, %v3483_v52  ;;  %v3713_v32 = vadd.f32 %v3712_v39, %v7395_v44  ;;  %v4066_v52 = vld [vmem:[%s5513_s13 + $0x10] sm:$0xff]  ;;  %v4067_v44 = vld [vmem:[%s5513_s13 + $0x18] sm:$0xff] }
 0x30c   : > { %v3714_v49 = vpop.f32.mrf.mxu0  ;;  %v3907_v27 = vpop.f32.mrf.mxu1 }
 0x30d   : > { %v3906_v48 = vadd.f32 %v3905_v35, %v3713_v32  ;;  %v3715_v9 = vadd.f32 %v3714_v49, %v6721_v12 }
 0x30e   : > { %v3716_v56 = vpop.f32.mrf.mxu0  ;;  %v3909_v33 = vpop.f32.mrf.mxu1 }
 0x30f   : > { %v4128_v13 = vadd.f32 %v4064_v61, %v3906_v48  ;;  %v3908_v42 = vadd.f32 %v3907_v27, %v3715_v9  ;;  %v3717_v45 = vadd.f32 %v3716_v56, %v6730_v40  ;;  %v4068_v27 = vld [vmem:[%s5513_s13 + $0x20] sm:$0xff] }
 0x310   : > { %v3718_v51 = vpop.f32.mrf.mxu0  ;;  %v3911_v48 = vpop.f32.mrf.mxu1 }
 0x311   : > { %4192 = vst [vmem:[%s7003_s30] sm:$0xff] %v4128_v13  ;;  %v4129_v12 = vadd.f32 %v4065_v53, %v3908_v42  ;;  %v3910_v39 = vadd.f32 %v3909_v33, %v3717_v45  ;;  %v3719_v35 = vadd.f32 %v3718_v51, %v6739_v37  ;;  %v4069_v42 = vld [vmem:[%s5513_s13 + $0x28] sm:$0xff] }
 0x312   : > { %v3722_v40 = vpop.f32.mrf.mxu0  ;;  %v3915_v9 = vpop.f32.mrf.mxu1 }
 0x313   : > { %4193 = vst [vmem:[%s7003_s30 + $0x8] sm:$0xff] %v4129_v12  ;;  %v4130_v32 = vadd.f32 %v4066_v52, %v3910_v39  ;;  %v3912_v61 = vadd.f32 %v3911_v48, %v3719_v35  ;;  %v3723_v49 = vadd.f32 %v3722_v40, %v6744_v3  ;;  %v4070_v39 = vld [vmem:[%s5513_s13 + $0x30] sm:$0xff] }
 0x314   : > { %v3724_v56 = vpop.f32.mrf.mxu0  ;;  %v3917_v53 = vpop.f32.mrf.mxu1 }
 0x315   : > { %4194 = vst [vmem:[%s7003_s30 + $0x10] sm:$0xff] %v4130_v32  ;;  %v4131_v13 = vadd.f32 %v4067_v44, %v3912_v61  ;;  %v3916_v33 = vadd.f32 %v3915_v9, %v3723_v49  ;;  %v3725_v37 = vadd.f32 %v3724_v56, %v6749_v62  ;;  %v4071_v32 = vld [vmem:[%s5513_s13 + $0x38] sm:$0xff]  ;;  %v4072_v56 = vld [vmem:[%s5513_s13 + $0x40] sm:$0xff] }
 0x316   : > { %v3726_v45 = vpop.f32.mrf.mxu0  ;;  %v3919_v12 = vpop.f32.mrf.mxu1 }
 0x317   : > { %4195 = vst [vmem:[%s7003_s30 + $0x18] sm:$0xff] %v4131_v13  ;;  %v4132_v52 = vadd.f32 %v4068_v27, %v3916_v33  ;;  %v3918_v51 = vadd.f32 %v3917_v53, %v3725_v37  ;;  %v3727_v3 = vadd.f32 %v3726_v45, %v6758_v20 }
 0x318   : > { %v3728_v35 = vpop.f32.mrf.mxu0  ;;  %v3921_v40 = vpop.f32.mrf.mxu1 }
 0x319   : > { %4196 = vst [vmem:[%s7003_s30 + $0x20] sm:$0xff] %v4132_v52  ;;  %v4133_v48 = vadd.f32 %v4069_v42, %v3918_v51  ;;  %v3920_v44 = vadd.f32 %v3919_v12, %v3727_v3  ;;  %v3729_v62 = vadd.f32 %v3728_v35, %v6767_v31  ;;  %v4073_v42 = vld [vmem:[%s5513_s13 + $0x48] sm:$0xff]  ;;  %v4074_v12 = vld [vmem:[%s5513_s13 + $0x50] sm:$0xff] }
 0x31a   : > { %v3732_v61 = vpop.f32.mrf.mxu0  ;;  %v3925_v27 = vpop.f32.mrf.mxu1 }
 0x31b   : > { %4197 = vst [vmem:[%s7003_s30 + $0x28] sm:$0xff] %v4133_v48  ;;  %v4134_v49 = vadd.f32 %v4070_v39, %v3920_v44  ;;  %v3922_v9 = vadd.f32 %v3921_v40, %v3729_v62  ;;  %v3733_v20 = vadd.f32 %v3732_v61, %v6772_v24  ;;  %v4075_v62 = vld [vmem:[%s5513_s13 + $0x58] sm:$0xff] }
 0x31c   : > { %v3734_v13 = vpop.f32.mrf.mxu0  ;;  %v3927_v53 = vpop.f32.mrf.mxu1 }
 0x31d   : > { %4198 = vst [vmem:[%s7003_s30 + $0x30] sm:$0xff] %v4134_v49  ;;  %v4135_v33 = vadd.f32 %v4071_v32, %v3922_v9  ;;  %v3926_v37 = vadd.f32 %v3925_v27, %v3733_v20  ;;  %v3735_v31 = vadd.f32 %v3734_v13, %v6777_v10  ;;  %v4076_v9 = vld [vmem:[%s5513_s13 + $0x60] sm:$0xff] }
 0x31e   : > { %v3736_v45 = vpop.f32.mrf.mxu0  ;;  %v3929_v3 = vpop.f32.mrf.mxu1 }
 0x31f   : > { %4199 = vst [vmem:[%s7003_s30 + $0x38] sm:$0xff] %v4135_v33  ;;  %v4136_v52 = vadd.f32 %v4072_v56, %v3926_v37  ;;  %v3928_v51 = vadd.f32 %v3927_v53, %v3735_v31  ;;  %v3737_v24 = vadd.f32 %v3736_v45, %v6786_v30  ;;  %v4077_v33 = vld [vmem:[%s5513_s13 + $0x68] sm:$0xff]  ;;  %v4078_v45 = vld [vmem:[%s5513_s13 + $0x70] sm:$0xff] }
 0x320   : > { %v3738_v39 = vpop.f32.mrf.mxu0  ;;  %v3931_v44 = vpop.f32.mrf.mxu1 }
 0x321   : > { %4200 = vst [vmem:[%s7003_s30 + $0x40] sm:$0xff] %v4136_v52  ;;  %v4137_v35 = vadd.f32 %v4073_v42, %v3928_v51  ;;  %v3930_v48 = vadd.f32 %v3929_v3, %v3737_v24  ;;  %v3739_v10 = vadd.f32 %v3738_v39, %v6795_v19 }
 0x322   : > { %v3742_v40 = vpop.f32.mrf.mxu0  ;;  %v3935_v49 = vpop.f32.mrf.mxu1 }
 0x323   : > { %4201 = vst [vmem:[%s7003_s30 + $0x48] sm:$0xff] %v4137_v35  ;;  %v4138_v32 = vadd.f32 %v4074_v12, %v3930_v48  ;;  %v3932_v61 = vadd.f32 %v3931_v44, %v3739_v10  ;;  %v3743_v30 = vadd.f32 %v3742_v40, %v6800_v6  ;;  %v4079_v12 = vld [vmem:[%s5513_s13 + $0x78] sm:$0xff]  ;;  %v4080_v44 = vld [vmem:[%s5513_s13 + $0x80] sm:$0xff] }
 0x324   : > { %v3744_v20 = vpop.f32.mrf.mxu0  ;;  %v3937_v13 = vpop.f32.mrf.mxu1 }
 0x325   : > { %4202 = vst [vmem:[%s7003_s30 + $0x50] sm:$0xff] %v4138_v32  ;;  %v4139_v27 = vadd.f32 %v4075_v62, %v3932_v61  ;;  %v3936_v56 = vadd.f32 %v3935_v49, %v3743_v30  ;;  %v3745_v19 = vadd.f32 %v3744_v20, %v6805_v28  ;;  %v4081_v30 = vld [vmem:[%s5513_s13 + $0x88] sm:$0xff] }
 0x326   : > { %v3746_v37 = vpop.f32.mrf.mxu0  ;;  %v3939_v42 = vpop.f32.mrf.mxu1 }
 0x327   : > { %4203 = vst [vmem:[%s7003_s30 + $0x58] sm:$0xff] %v4139_v27  ;;  %v4140_v31 = vadd.f32 %v4076_v9, %v3936_v56  ;;  %v3938_v53 = vadd.f32 %v3937_v13, %v3745_v19  ;;  %v3747_v6 = vadd.f32 %v3746_v37, %v6814_v8  ;;  %v4082_v56 = vld [vmem:[%s5513_s13 + $0x90] sm:$0xff] }
 0x328   : > { %v3748_v52 = vpop.f32.mrf.mxu0  ;;  %v3941_v3 = vpop.f32.mrf.mxu1 }
 0x329   : > { %4204 = vst [vmem:[%s7003_s30 + $0x60] sm:$0xff] %v4140_v31  ;;  %v4141_v51 = vadd.f32 %v4077_v33, %v3938_v53  ;;  %v3940_v24 = vadd.f32 %v3939_v42, %v3747_v6  ;;  %v3749_v28 = vadd.f32 %v3748_v52, %v6823_v1  ;;  %v4083_v31 = vld [vmem:[%s5513_s13 + $0x98] sm:$0xff]  ;;  %v4084_v52 = vld [vmem:[%s5513_s13 + $0xa0] sm:$0xff] }
 0x32a   : > { %v3752_v39 = vpop.f32.mrf.mxu0  ;;  %v3945_v10 = vpop.f32.mrf.mxu1 }
 0x32b   : > { %4205 = vst [vmem:[%s7003_s30 + $0x68] sm:$0xff] %v4141_v51  ;;  %v4142_v35 = vadd.f32 %v4078_v45, %v3940_v24  ;;  %v3942_v48 = vadd.f32 %v3941_v3, %v3749_v28  ;;  %v3753_v8 = vadd.f32 %v3752_v39, %v6828_v4 }
 0x32c   : > { %v3754_v62 = vpop.f32.mrf.mxu0  ;;  %v3947_v61 = vpop.f32.mrf.mxu1 }
 0x32d   : > { %4206 = vst [vmem:[%s7003_s30 + $0x70] sm:$0xff] %v4142_v35  ;;  %v4143_v40 = vadd.f32 %v4079_v12, %v3942_v48  ;;  %v3946_v32 = vadd.f32 %v3945_v10, %v3753_v8  ;;  %v3755_v1 = vadd.f32 %v3754_v62, %v6831_v0  ;;  %v4085_v12 = vld [vmem:[%s5513_s13 + $0xa8] sm:$0xff]  ;;  %v4086_v10 = vld [vmem:[%s5513_s13 + $0xb0] sm:$0xff] }
 0x32e   : > { %v3756_v49 = vpop.f32.mrf.mxu0  ;;  %v3949_v27 = vpop.f32.mrf.mxu1 }
 0x32f   : > { %4207 = vst [vmem:[%s7003_s30 + $0x78] sm:$0xff] %v4143_v40  ;;  %v4144_v9 = vadd.f32 %v4080_v44, %v3946_v32  ;;  %v3948_v20 = vadd.f32 %v3947_v61, %v3755_v1  ;;  %v3757_v4 = vadd.f32 %v3756_v49, %v6840_v2  ;;  %v4087_v1 = vld [vmem:[%s5513_s13 + $0xb8] sm:$0xff] }
 0x330   : > { %v3758_v19 = vpop.f32.mrf.mxu0  ;;  %v3951_v37 = vpop.f32.mrf.mxu1 }
 0x331   : > { %4208 = vst [vmem:[%s7003_s30 + $0x80] sm:$0xff] %v4144_v9  ;;  %v4145_v13 = vadd.f32 %v4081_v30, %v3948_v20  ;;  %v3950_v33 = vadd.f32 %v3949_v27, %v3757_v4  ;;  %v3759_v0 = vadd.f32 %v3758_v19, %v6851_v21  ;;  %v4088_v20 = vld [vmem:[%s5513_s13 + $0xc0] sm:$0xff] }
 0x332   : > { %v3762_v53 = vpop.f32.mrf.mxu0  ;;  %v3955_v45 = vpop.f32.mrf.mxu1 }
 0x333   : > { %4209 = vst [vmem:[%s7003_s30 + $0x88] sm:$0xff] %v4145_v13  ;;  %v4146_v6 = vadd.f32 %v4082_v56, %v3950_v33  ;;  %v3952_v42 = vadd.f32 %v3951_v37, %v3759_v0  ;;  %v3763_v2 = vadd.f32 %v3762_v53, %v6856_v46  ;;  %v4089_v13 = vld [vmem:[%s5513_s13 + $0xc8] sm:$0xff]  ;;  %v4090_v53 = vld [vmem:[%s5513_s13 + $0xd0] sm:$0xff] }
 0x334   : > { %v3764_v51 = vpop.f32.mrf.mxu0  ;;  %v3957_v3 = vpop.f32.mrf.mxu1 }
 0x335   : > { %4210 = vst [vmem:[%s7003_s30 + $0x90] sm:$0xff] %v4146_v6  ;;  %v4147_v24 = vadd.f32 %v4083_v31, %v3952_v42  ;;  %v3956_v28 = vadd.f32 %v3955_v45, %v3763_v2  ;;  %v3765_v21 = vadd.f32 %v3764_v51, %v6859_v38 }
 0x336   : > { %v3766_v39 = vpop.f32.mrf.mxu0  ;;  %v3959_v8 = vpop.f32.mrf.mxu1 }
 0x337   : > { %4211 = vst [vmem:[%s7003_s30 + $0x98] sm:$0xff] %v4147_v24  ;;  %v4148_v35 = vadd.f32 %v4084_v52, %v3956_v28  ;;  %v3958_v48 = vadd.f32 %v3957_v3, %v3765_v21  ;;  %v3767_v46 = vadd.f32 %v3766_v39, %v6866_v16  ;;  %v4091_v52 = vld [vmem:[%s5513_s13 + $0xd8] sm:$0xff]  ;;  %v4092_v3 = vld [vmem:[%s5513_s13 + $0xe0] sm:$0xff] }
 0x338   : > { %v3768_v44 = vpop.f32.mrf.mxu0  ;;  %v3961_v32 = vpop.f32.mrf.mxu1 }
 0x339   : > { %4212 = vst [vmem:[%s7003_s30 + $0xa0] sm:$0xff] %v4148_v35  ;;  %v4149_v62 = vadd.f32 %v4085_v12, %v3958_v48  ;;  %v3960_v40 = vadd.f32 %v3959_v8, %v3767_v46  ;;  %v3769_v38 = vadd.f32 %v3768_v44, %v6873_v59  ;;  %v4093_v46 = vld [vmem:[%s5513_s13 + $0xe8] sm:$0xff] }
 0x33a   : > { %v3772_v61 = vpop.f32.mrf.mxu0  ;;  %v3965_v9 = vpop.f32.mrf.mxu1 }
 0x33b   : > { %4213 = vst [vmem:[%s7003_s30 + $0xa8] sm:$0xff] %v4149_v62  ;;  %v4150_v30 = vadd.f32 %v4086_v10, %v3960_v40  ;;  %v3962_v49 = vadd.f32 %v3961_v32, %v3769_v38  ;;  %v3773_v16 = vadd.f32 %v3772_v61, %v6876_v26  ;;  %v4094_v40 = vld [vmem:[%s5513_s13 + $0xf0] sm:$0xff] }
 0x33c   : > { %v3774_v4 = vpop.f32.mrf.mxu0  ;;  %v3967_v19 = vpop.f32.mrf.mxu1 }
 0x33d   : > { %4214 = vst [vmem:[%s7003_s30 + $0xb0] sm:$0xff] %v4150_v30  ;;  %v4151_v27 = vadd.f32 %v4087_v1, %v3962_v49  ;;  %v3966_v56 = vadd.f32 %v3965_v9, %v3773_v16  ;;  %v3775_v59 = vadd.f32 %v3774_v4, %v6879_v43  ;;  %v4095_v30 = vld [vmem:[%s5513_s13 + $0xf8] sm:$0xff]  ;;  %v4096_v4 = vld [vmem:[%s5513_s13 + $0x100] sm:$0xff] }
 0x33e   : > { %v3776_v33 = vpop.f32.mrf.mxu0  ;;  %v3969_v31 = vpop.f32.mrf.mxu1 }
 0x33f   : > { %4215 = vst [vmem:[%s7003_s30 + $0xb8] sm:$0xff] %v4151_v27  ;;  %v4152_v0 = vadd.f32 %v4088_v20, %v3966_v56  ;;  %v3968_v37 = vadd.f32 %v3967_v19, %v3775_v59  ;;  %v3777_v26 = vadd.f32 %v3776_v33, %v6882_v54 }
 0x340   : > { %v3778_v6 = vpop.f32.mrf.mxu0  ;;  %v3971_v45 = vpop.f32.mrf.mxu1 }
 0x341   : > { %4216 = vst [vmem:[%s7003_s30 + $0xc0] sm:$0xff] %v4152_v0  ;;  %v4153_v42 = vadd.f32 %v4089_v13, %v3968_v37  ;;  %v3970_v2 = vadd.f32 %v3969_v31, %v3777_v26  ;;  %v3779_v43 = vadd.f32 %v3778_v6, %v6885_v7  ;;  %v4097_v13 = vld [vmem:[%s5513_s13 + $0x108] sm:$0xff]  ;;  %v4098_v31 = vld [vmem:[%s5513_s13 + $0x110] sm:$0xff] }
 0x342   : > { %v3782_v51 = vpop.f32.mrf.mxu0  ;;  %v3975_v21 = vpop.f32.mrf.mxu1 }
 0x343   : > { %4217 = vst [vmem:[%s7003_s30 + $0xc8] sm:$0xff] %v4153_v42  ;;  %v4154_v24 = vadd.f32 %v4090_v53, %v3970_v2  ;;  %v3972_v28 = vadd.f32 %v3971_v45, %v3779_v43  ;;  %v3783_v54 = vadd.f32 %v3782_v51, %v6888_v63  ;;  %v4099_v43 = vld [vmem:[%s5513_s13 + $0x118] sm:$0xff] }
 0x344   : > { %v3784_v12 = vpop.f32.mrf.mxu0  ;;  %v3977_v48 = vpop.f32.mrf.mxu1 }
 0x345   : > { %4218 = vst [vmem:[%s7003_s30 + $0xd0] sm:$0xff] %v4154_v24  ;;  %v4155_v39 = vadd.f32 %v4091_v52, %v3972_v28  ;;  %v3976_v35 = vadd.f32 %v3975_v21, %v3783_v54  ;;  %v3785_v7 = vadd.f32 %v3784_v12, %v6891_v60  ;;  %v4100_v28 = vld [vmem:[%s5513_s13 + $0x120] sm:$0xff] }
 0x346   : > { %v3786_v8 = vpop.f32.mrf.mxu0  ;;  %v3979_v62 = vpop.f32.mrf.mxu1 }
 0x347   : > { %4219 = vst [vmem:[%s7003_s30 + $0xd8] sm:$0xff] %v4155_v39  ;;  %v4156_v10 = vadd.f32 %v4092_v3, %v3976_v35  ;;  %v3978_v44 = vadd.f32 %v3977_v48, %v3785_v7  ;;  %v3787_v63 = vadd.f32 %v3786_v8, %v6894_v34  ;;  %v4101_v39 = vld [vmem:[%s5513_s13 + $0x128] sm:$0xff]  ;;  %v4102_v8 = vld [vmem:[%s5513_s13 + $0x130] sm:$0xff] }
 0x348   : > { %v3788_v38 = vpop.f32.mrf.mxu0  ;;  %v3981_v61 = vpop.f32.mrf.mxu1 }
 0x349   : > { %4220 = vst [vmem:[%s7003_s30 + $0xe0] sm:$0xff] %v4156_v10  ;;  %v4157_v32 = vadd.f32 %v4093_v46, %v3978_v44  ;;  %v3980_v1 = vadd.f32 %v3979_v62, %v3787_v63  ;;  %v3789_v60 = vadd.f32 %v3788_v38, %v6897_v25 }
 0x34a   : > { %v3792_v49 = vpop.f32.mrf.mxu0  ;;  %v3985_v20 = vpop.f32.mrf.mxu1 }
 0x34b   : > { %4221 = vst [vmem:[%s7003_s30 + $0xe8] sm:$0xff] %v4157_v32  ;;  %v4158_v16 = vadd.f32 %v4094_v40, %v3980_v1  ;;  %v3982_v9 = vadd.f32 %v3981_v61, %v3789_v60  ;;  %v3793_v34 = vadd.f32 %v3792_v49, %v6900_v47  ;;  %v4103_v40 = vld [vmem:[%s5513_s13 + $0x138] sm:$0xff]  ;;  %v4104_v61 = vld [vmem:[%s5513_s13 + $0x140] sm:$0xff] }
 0x34c   : > { %v3794_v27 = vpop.f32.mrf.mxu0  ;;  %v3987_v19 = vpop.f32.mrf.mxu1 }
 0x34d   : > { %4222 = vst [vmem:[%s7003_s30 + $0xf0] sm:$0xff] %v4158_v16  ;;  %v4159_v56 = vadd.f32 %v4095_v30, %v3982_v9  ;;  %v3986_v59 = vadd.f32 %v3985_v20, %v3793_v34  ;;  %v3795_v25 = vadd.f32 %v3794_v27, %v6903_v41  ;;  %v4105_v34 = vld [vmem:[%s5513_s13 + $0x148] sm:$0xff] }
 0x34e   : > { %v3796_v33 = vpop.f32.mrf.mxu0  ;;  %v3989_v26 = vpop.f32.mrf.mxu1 }
 0x34f   : > { %4223 = vst [vmem:[%s7003_s30 + $0xf8] sm:$0xff] %v4159_v56  ;;  %v4160_v0 = vadd.f32 %v4096_v4, %v3986_v59  ;;  %v3988_v37 = vadd.f32 %v3987_v19, %v3795_v25  ;;  %v3797_v47 = vadd.f32 %v3796_v33, %v6906_v15  ;;  %v4106_v59 = vld [vmem:[%s5513_s13 + $0x150] sm:$0xff] }
 0x350   : > { %v3798_v53 = vpop.f32.mrf.mxu0  ;;  %v3991_v2 = vpop.f32.mrf.mxu1 }
 0x351   : > { %4224 = vst [vmem:[%s7003_s30 + $0x100] sm:$0xff] %v4160_v0  ;;  %v4161_v6 = vadd.f32 %v4097_v13, %v3988_v37  ;;  %v3990_v42 = vadd.f32 %v3989_v26, %v3797_v47  ;;  %v3799_v41 = vadd.f32 %v3798_v53, %v6909_v5  ;;  %v4107_v0 = vld [vmem:[%s5513_s13 + $0x158] sm:$0xff]  ;;  %v4108_v53 = vld [vmem:[%s5513_s13 + $0x160] sm:$0xff] }
 0x352   : > { %v3802_v45 = vpop.f32.mrf.mxu0  ;;  %v3995_v24 = vpop.f32.mrf.mxu1 }
 0x353   : > { %4225 = vst [vmem:[%s7003_s30 + $0x108] sm:$0xff] %v4161_v6  ;;  %v4162_v52 = vadd.f32 %v4098_v31, %v3990_v42  ;;  %v3992_v51 = vadd.f32 %v3991_v2, %v3799_v41  ;;  %v3803_v15 = vadd.f32 %v3802_v45, %v6912_v58 }
 0x354   : > { %v3804_v54 = vpop.f32.mrf.mxu0  ;;  %v3997_v12 = vpop.f32.mrf.mxu1 }
 0x355   : > { %4226 = vst [vmem:[%s7003_s30 + $0x110] sm:$0xff] %v4162_v52  ;;  %v4163_v21 = vadd.f32 %v4099_v43, %v3992_v51  ;;  %v3996_v3 = vadd.f32 %v3995_v24, %v3803_v15  ;;  %v3805_v5 = vadd.f32 %v3804_v54, %v6915_v22  ;;  %v4109_v43 = vld [vmem:[%s5513_s13 + $0x168] sm:$0xff]  ;;  %v4110_v24 = vld [vmem:[%s5513_s13 + $0x170] sm:$0xff] }
 0x356   : > { %v3806_v35 = vpop.f32.mrf.mxu0  ;;  %v3999_v46 = vpop.f32.mrf.mxu1 }
 0x357   : > { %4227 = vst [vmem:[%s7003_s30 + $0x118] sm:$0xff] %v4163_v21  ;;  %v4164_v7 = vadd.f32 %v4100_v28, %v3996_v3  ;;  %v3998_v48 = vadd.f32 %v3997_v12, %v3805_v5  ;;  %v3807_v58 = vadd.f32 %v3806_v35, %v6918_v17  ;;  %v7396_v3 = vld [vmem:[#allocation25_spill] sm:$0xff] }
 0x358   : > { %v3808_v10 = vpop.f32.mrf.mxu0  ;;  %v4001_v62 = vpop.f32.mrf.mxu1  ;;  %v4111_v12 = vld [vmem:[%s5513_s13 + $0x178] sm:$0xff] }
 0x359   : > { %4228 = vst [vmem:[%s7003_s30 + $0x120] sm:$0xff] %v4164_v7  ;;  %v4165_v44 = vadd.f32 %v4101_v39, %v3998_v48  ;;  %v4000_v63 = vadd.f32 %v3999_v46, %v3807_v58  ;;  %v3809_v22 = vadd.f32 %v3808_v10, %v6921_v11  ;;  %v7397_v48 = vld [vmem:[#allocation22_spill] sm:$0xff] }
 0x35a   : > { %v3812_v38 = vpop.f32.mrf.mxu0  ;;  %v4005_v60 = vpop.f32.mrf.mxu1  ;;  %v4112_v46 = vld [vmem:[%s5513_s13 + $0x180] sm:$0xff] }
 0x35b   : > { %4229 = vst [vmem:[%s7003_s30 + $0x128] sm:$0xff] %v4165_v44  ;;  %v4166_v32 = vadd.f32 %v4102_v8, %v4000_v63  ;;  %v4002_v1 = vadd.f32 %v4001_v62, %v3809_v22  ;;  %v3813_v17 = vadd.f32 %v3812_v38, %v6924_v36  ;;  %v7398_v63 = vld [vmem:[#allocation18_spill] sm:$0xff] }
 0x35c   : > { %v3814_v30 = vpop.f32.mrf.mxu0  ;;  %v4007_v9 = vpop.f32.mrf.mxu1 }
 0x35d   : > { %4230 = vst [vmem:[%s7003_s30 + $0x130] sm:$0xff] %v4166_v32  ;;  %v4167_v49 = vadd.f32 %v4103_v40, %v4002_v1  ;;  %v4006_v16 = vadd.f32 %v4005_v60, %v3813_v17  ;;  %v3815_v11 = vadd.f32 %v3814_v30, %v6927_v55  ;;  %v4113_v40 = vld [vmem:[%s5513_s13 + $0x188] sm:$0xff]  ;;  %v7399_v17 = vld [vmem:[#allocation24_spill] sm:$0xff] }
 0x35e   : > { %v3816_v20 = vpop.f32.mrf.mxu0  ;;  %v4009_v56 = vpop.f32.mrf.mxu1  ;;  %v4114_v30 = vld [vmem:[%s5513_s13 + $0x190] sm:$0xff] }
 0x35f   : > { %4231 = vst [vmem:[%s7003_s30 + $0x138] sm:$0xff] %v4167_v49  ;;  %v4168_v4 = vadd.f32 %v4104_v61, %v4006_v16  ;;  %v4008_v27 = vadd.f32 %v4007_v9, %v3815_v11  ;;  %v3817_v36 = vadd.f32 %v3816_v20, %v6930_v29  ;;  %v7400_v9 = vld [vmem:[#allocation21_spill] sm:$0xff] }
 0x360   : > { %v3818_v25 = vpop.f32.mrf.mxu0  ;;  %v4011_v33 = vpop.f32.mrf.mxu1 }
 0x361   : > { %4232 = vst [vmem:[%s7003_s30 + $0x140] sm:$0xff] %v4168_v4  ;;  %v4169_v19 = vadd.f32 %v4105_v34, %v4008_v27  ;;  %v4010_v13 = vadd.f32 %v4009_v56, %v3817_v36  ;;  %v3819_v55 = vadd.f32 %v3818_v25, %v6933_v57  ;;  %v4115_v4 = vld [vmem:[%s5513_s13 + $0x198] sm:$0xff] }
 0x362   : > { %v3822_v37 = vpop.f32.mrf.mxu0  ;;  %v4015_v31 = vpop.f32.mrf.mxu1 }
 0x363   : > { %4233 = vst [vmem:[%s7003_s30 + $0x148] sm:$0xff] %v4169_v19  ;;  %v4170_v47 = vadd.f32 %v4106_v59, %v4010_v13  ;;  %v4012_v26 = vadd.f32 %v4011_v33, %v3819_v55  ;;  %v3823_v29 = vadd.f32 %v3822_v37, %v6936_v18  ;;  %v7401_v59 = vld [vmem:[#allocation28_spill] sm:$0xff]  ;;  %v4116_v13 = vld [vmem:[%s5513_s13 + $0x1a0] sm:$0xff] }
 0x364   : > { %v3824_v6 = vpop.f32.mrf.mxu0  ;;  %v4017_v2 = vpop.f32.mrf.mxu1  ;;  %v7402_v37 = vld [vmem:[#allocation26_spill] sm:$0xff] }
 0x365   : > { %4234 = vst [vmem:[%s7003_s30 + $0x150] sm:$0xff] %v4170_v47  ;;  %v4171_v42 = vadd.f32 %v4107_v0, %v4012_v26  ;;  %v4016_v41 = vadd.f32 %v4015_v31, %v3823_v29  ;;  %v3825_v57 = vadd.f32 %v3824_v6, %v6939_v50  ;;  %v4117_v29 = vld [vmem:[%s5513_s13 + $0x1a8] sm:$0xff] }
 0x366   : > { %v3826_v45 = vpop.f32.mrf.mxu0  ;;  %v4019_v15 = vpop.f32.mrf.mxu1 }
 0x367   : > { %4235 = vst [vmem:[%s7003_s30 + $0x158] sm:$0xff] %v4171_v42  ;;  %v4172_v52 = vadd.f32 %v4108_v53, %v4016_v41  ;;  %v4018_v51 = vadd.f32 %v4017_v2, %v3825_v57  ;;  %v3827_v18 = vadd.f32 %v3826_v45, %v6942_v14  ;;  %v7403_v42 = vld [vmem:[#allocation27_spill] sm:$0xff]  ;;  %v4118_v2 = vld [vmem:[%s5513_s13 + $0x1b0] sm:$0xff] }
 0x368   : > { %v3828_v28 = vpop.f32.mrf.mxu0  ;;  %v4021_v5 = vpop.f32.mrf.mxu1 }
 0x369   : > { %4236 = vst [vmem:[%s7003_s30 + $0x160] sm:$0xff] %v4172_v52  ;;  %v4173_v54 = vadd.f32 %v4109_v43, %v4018_v51  ;;  %v4020_v21 = vadd.f32 %v4019_v15, %v3827_v18  ;;  %v3829_v50 = vadd.f32 %v3828_v28, %v7396_v3  ;;  %v7404_v51 = vld [vmem:[#allocation30_spill] sm:$0xff]  ;;  %v7405_v3 = vld [vmem:[#allocation32_spill] sm:$0xff] }
 0x36a   : > { %v3832_v39 = vpop.f32.mrf.mxu0  ;;  %v4025_v58 = vpop.f32.mrf.mxu1 }
 0x36b   : > { %4237 = vst [vmem:[%s7003_s30 + $0x168] sm:$0xff] %v4173_v54  ;;  %v4174_v35 = vadd.f32 %v4110_v24, %v4020_v21  ;;  %v4022_v7 = vadd.f32 %v4021_v5, %v3829_v50  ;;  %v3833_v14 = vadd.f32 %v3832_v39, %v7397_v48  ;;  %v4119_v24 = vld [vmem:[%s5513_s13 + $0x1b8] sm:$0xff]  ;;  %v7406_v48 = vld [vmem:[#allocation31_spill] sm:$0xff] }
 0x36c   : > { %v3834_v8 = vpop.f32.mrf.mxu0  ;;  %v4027_v62 = vpop.f32.mrf.mxu1 }
 0x36d   : > { %4238 = vst [vmem:[%s7003_s30 + $0x170] sm:$0xff] %v4174_v35  ;;  %v4175_v10 = vadd.f32 %v4111_v12, %v4022_v7  ;;  %v4026_v44 = vadd.f32 %v4025_v58, %v3833_v14  ;;  %v3835_v22 = vadd.f32 %v3834_v8, %v7398_v63  ;;  %v4120_v12 = vld [vmem:[%s5513_s13 + $0x1c0] sm:$0xff]  ;;  %v7407_v63 = vld [vmem:[#allocation29_spill] sm:$0xff] }
 0x36e   : > { %v3836_v38 = vpop.f32.mrf.mxu0  ;;  %v4029_v61 = vpop.f32.mrf.mxu1 }
 0x36f   : > { %4239 = vst [vmem:[%s7003_s30 + $0x178] sm:$0xff] %v4175_v10  ;;  %v4176_v32 = vadd.f32 %v4112_v46, %v4026_v44  ;;  %v4028_v1 = vadd.f32 %v4027_v62, %v3835_v22  ;;  %v3837_v60 = vadd.f32 %v3836_v38, %v7399_v17  ;;  %v4121_v46 = vld [vmem:[%s5513_s13 + $0x1c8] sm:$0xff]  ;;  %v7408_v17 = vld [vmem:[#allocation33_spill] sm:$0xff] }
 0x370   : > { %v3838_v49 = vpop.f32.mrf.mxu0  ;;  %v4031_v20 = vpop.f32.mrf.mxu1 }
 0x371   : > { %4240 = vst [vmem:[%s7003_s30 + $0x180] sm:$0xff] %v4176_v32  ;;  %v4177_v16 = vadd.f32 %v4113_v40, %v4028_v1  ;;  %v4030_v11 = vadd.f32 %v4029_v61, %v3837_v60  ;;  %v3839_v34 = vadd.f32 %v3838_v49, %v7400_v9  ;;  %v4122_v40 = vld [vmem:[%s5513_s13 + $0x1d0] sm:$0xff] }
 0x372   : > { %v3842_v27 = vpop.f32.mrf.mxu0  ;;  %v4035_v19 = vpop.f32.mrf.mxu1  ;;  %v7409_v9 = vld [vmem:[#allocation20_spill] sm:$0xff] }
 0x373   : > { %4241 = vst [vmem:[%s7003_s30 + $0x188] sm:$0xff] %v4177_v16  ;;  %v4178_v36 = vadd.f32 %v4114_v30, %v4030_v11  ;;  %v4032_v56 = vadd.f32 %v4031_v20, %v3839_v34  ;;  %v3843_v25 = vadd.f32 %v3842_v27, %v7401_v59  ;;  %v4123_v30 = vld [vmem:[%s5513_s13 + $0x1d8] sm:$0xff]  ;;  %v7410_v59 = vld [vmem:[#allocation23_spill] sm:$0xff] }
 0x374   : > { %v3844_v55 = vpop.f32.mrf.mxu0  ;;  %v4037_v26 = vpop.f32.mrf.mxu1 }
 0x375   : > { %4242 = vst [vmem:[%s7003_s30 + $0x190] sm:$0xff] %v4178_v36  ;;  %v4179_v33 = vadd.f32 %v4115_v4, %v4032_v56  ;;  %v4036_v0 = vadd.f32 %v4035_v19, %v3843_v25  ;;  %v3845_v47 = vadd.f32 %v3844_v55, %v7402_v37  ;;  %v4124_v4 = vld [vmem:[%s5513_s13 + $0x1e0] sm:$0xff] }
 0x376   : > { %v3846_v31 = vpop.f32.mrf.mxu0  ;;  %v4039_v57 = vpop.f32.mrf.mxu1  ;;  %v7411_v37 = vld [vmem:[#allocation34_spill] sm:$0xff] }
 0x377   : > { %4243 = vst [vmem:[%s7003_s30 + $0x198] sm:$0xff] %v4179_v33  ;;  %v4180_v53 = vadd.f32 %v4116_v13, %v4036_v0  ;;  %v4038_v6 = vadd.f32 %v4037_v26, %v3845_v47  ;;  %v3847_v41 = vadd.f32 %v3846_v31, %v7403_v42  ;;  %v4125_v13 = vld [vmem:[%s5513_s13 + $0x1e8] sm:$0xff] }
 0x378   : > { %v3848_v43 = vpop.f32.mrf.mxu0  ;;  %v4041_v15 = vpop.f32.mrf.mxu1 }
 0x379   : > { %4244 = vst [vmem:[%s7003_s30 + $0x1a0] sm:$0xff] %v4180_v53  ;;  %v4181_v45 = vadd.f32 %v4117_v29, %v4038_v6  ;;  %v4040_v52 = vadd.f32 %v4039_v57, %v3847_v41  ;;  %v3849_v18 = vadd.f32 %v3848_v43, %v7404_v51  ;;  %v4126_v29 = vld [vmem:[%s5513_s13 + $0x1f0] sm:$0xff]  ;;  %v4127_v57 = vld [vmem:[%s5513_s13 + $0x1f8] sm:$0xff] }
 0x37a   : > { %v3852_v28 = vpop.f32.mrf.mxu0  ;;  %v4045_v5 = vpop.f32.mrf.mxu1 }
 0x37b   : > { %4245 = vst [vmem:[%s7003_s30 + $0x1a8] sm:$0xff] %v4181_v45  ;;  %v4182_v54 = vadd.f32 %v4118_v2, %v4040_v52  ;;  %v4042_v21 = vadd.f32 %v4041_v15, %v3849_v18  ;;  %v3853_v50 = vadd.f32 %v3852_v28, %v7405_v3 }
 0x37c   : > { %v3854_v39 = vpop.f32.mrf.mxu0  ;;  %v4047_v58 = vpop.f32.mrf.mxu1 }
 0x37d   : > { %4246 = vst [vmem:[%s7003_s30 + $0x1b0] sm:$0xff] %v4182_v54  ;;  %v4183_v35 = vadd.f32 %v4119_v24, %v4042_v21  ;;  %v4046_v7 = vadd.f32 %v4045_v5, %v3853_v50  ;;  %v3855_v14 = vadd.f32 %v3854_v39, %v7406_v48 }
 0x37e   : > { %v3856_v8 = vpop.f32.mrf.mxu0  ;;  %v4049_v62 = vpop.f32.mrf.mxu1 }
 0x37f   : > { %4247 = vst [vmem:[%s7003_s30 + $0x1b8] sm:$0xff] %v4183_v35  ;;  %v4184_v10 = vadd.f32 %v4120_v12, %v4046_v7  ;;  %v4048_v44 = vadd.f32 %v4047_v58, %v3855_v14  ;;  %v3857_v22 = vadd.f32 %v3856_v8, %v7407_v63 }
 0x380   : > { %v3858_v38 = vpop.f32.mrf.mxu0  ;;  %v4051_v61 = vpop.f32.mrf.mxu1 }
 0x381   : > { %4248 = vst [vmem:[%s7003_s30 + $0x1c0] sm:$0xff] %v4184_v10  ;;  %v4185_v32 = vadd.f32 %v4121_v46, %v4048_v44  ;;  %v4050_v1 = vadd.f32 %v4049_v62, %v3857_v22  ;;  %v3859_v60 = vadd.f32 %v3858_v38, %v7408_v17 }
 0x382   : > { %v3862_v49 = vpop.f32.mrf.mxu0  ;;  %v4055_v20 = vpop.f32.mrf.mxu1 }
 0x383   : > { %4249 = vst [vmem:[%s7003_s30 + $0x1c8] sm:$0xff] %v4185_v32  ;;  %v4186_v16 = vadd.f32 %v4122_v40, %v4050_v1  ;;  %v4052_v11 = vadd.f32 %v4051_v61, %v3859_v60  ;;  %v3863_v34 = vadd.f32 %v3862_v49, %v7409_v9 }
 0x384   : > { %v3864_v27 = vpop.f32.mrf.mxu0  ;;  %v4057_v19 = vpop.f32.mrf.mxu1 }
 0x385   : > { %4250 = vst [vmem:[%s7003_s30 + $0x1d0] sm:$0xff] %v4186_v16  ;;  %v4187_v36 = vadd.f32 %v4123_v30, %v4052_v11  ;;  %v4056_v56 = vadd.f32 %v4055_v20, %v3863_v34  ;;  %v3865_v25 = vadd.f32 %v3864_v27, %v7410_v59 }
 0x386   : > { %v3866_v55 = vpop.f32.mrf.mxu0  ;;  %v4059_v26 = vpop.f32.mrf.mxu1 }
 0x387   : > { %4251 = vst [vmem:[%s7003_s30 + $0x1d8] sm:$0xff] %v4187_v36  ;;  %v4188_v33 = vadd.f32 %v4124_v4, %v4056_v56  ;;  %v4058_v0 = vadd.f32 %v4057_v19, %v3865_v25  ;;  %v3867_v47 = vadd.f32 %v3866_v55, %v7411_v37 }
 0x388   : > { %v3868_v31 = vpop.f32.mrf.mxu0  ;;  %v4061_v41 = vpop.f32.mrf.mxu1 }
 0x389   : > { %4252 = vst [vmem:[%s7003_s30 + $0x1e0] sm:$0xff] %v4188_v33  ;;  %v4189_v53 = vadd.f32 %v4125_v13, %v4058_v0  ;;  %v4060_v6 = vadd.f32 %v4059_v26, %v3867_v47  ;;  %v3869_v42 = vadd.f32 %v3868_v31, %v6993_v23 }
 0x38b   : > { %4253 = vst [vmem:[%s7003_s30 + $0x1e8] sm:$0xff] %v4189_v53  ;;  %v4190_v2 = vadd.f32 %v4126_v29, %v4060_v6  ;;  %v4062_v43 = vadd.f32 %v4061_v41, %v3869_v42 }
 0x38d   : > { %4254 = vst [vmem:[%s7003_s30 + $0x1f0] sm:$0xff] %v4190_v2  ;;  %v4191_v23 = vadd.f32 %v4127_v57, %v4062_v43 }
 0x38f   : > { %4255 = vst [vmem:[%s7003_s30 + $0x1f8] sm:$0xff] %v4191_v23 }
 0x390   : > { %5193 = shalt.err (!%p5190_p10)
}
 0x391   : > { %s5194_s26 = scalar_lea.hbm %s7194_s14, 8192  ;;  %s5198_s27 = scalar_lea.hbm %s7247_s6, 16384 }
 0x392   : > { %p5195_p13 = scmp.ne.s32.totalorder %s7194_s14, %s5194_s26  ;;  %p5199_p9 = scmp.lt.s32.totalorder %s7194_s14, %s7247_s6 }
 0x393   : > { %p5200_p0 = scmp.lt.s32.totalorder %s5198_s27, %s5194_s26 }
 0x394   : > { %p5196_p7 = pnand %p5195_p13, %p7412_p11 }
 0x395   : > { %p5201_p3 = por %p5200_p0, %p5199_p9 }
 0x396   : > { %p5197_p2 = pneg %p5196_p7 }
 0x398   : > { %p5202_p1 = pnand %p5201_p3, %p5197_p2 }
 0x39a   : > { %5205 = shalt.err (!%p5202_p1)
}
 0x39b   : > { %s5270_s10 = smov 256   ;;  %s5271_s7 = smov 16  }
 0x39c   : > { %4730 = dma.vmem_to_hbm [thread:$0]  (%p7412_p11), %s7196_s20, 8192, %s7194_s14, %s4257_s25, %s5270_s10, %s5270_s10, %s5271_s7  }
 0x39d PF: > { %s4286_s9 = sand.u32 1, %s5244_s21   ;;  %p7413_p4 = scmp.ne.s32.totalorder %s7263_s28, 0 }
 0x39e   : > { %p7414_p6 = scmp.ge.s32.totalorder %s5256_s24, 2  ;;  %s4287_s8 = scalar_lea.sflag [#allocation4], %s4286_s9 }
 0x3a0   : > { %p4750_p8 = pnand %p7414_p6, %p7413_p4 }
 0x3a2   : > { %p4751_p12 = pneg %p4750_p8 }
 0x3a4   : > { %5239 = dma.done.wait (%p4751_p12), %s4287_s8, 8192  }
 0x3a5   : > { %5241 = vsyncadd (%p4751_p12), %s4287_s8, 4294959104  ;;  %s7415_s24 = sld [smem:[#allocation17_spill]]  ;;  %s7416_s21 = smov %s5248_s22 }
 0x3a6   : > { %s7417_s22 = smov %s5252_s23  ;;  %s7418_s23 = smov %s5380_s17 }
 0x3ab   : > { %p21_p5 = scmp.ge.s32.totalorder %s7415_s24, 4  }
 0x3ad   :  { %23 = sbr.rel (!%p21_p5) target bundleno = 7 (0x7), region = 112 }
 0x3b2   :  { %4292 = vsyncpa [#allocation3], 1 }
 0x3b3   :  { %4294 = vsyncpa [#allocation3 + $0x1], 1 }
 0x3b4   :  { %4295 = vsyncpa [#allocation6], 1 }
 0x3b5   :  { %4296 = vsyncpa [#allocation9], 1 }
 0x3b6   :  { %4297 = vsyncpa [#allocation4], 1 }
 0x3b7   :  { %4299 = vsyncpa [#allocation4 + $0x1], 1 }

</bundles_post_ra>
